<compile_context>
chip_gen: v7x
topology: tpu7x:2x2x1
jax: 0.10.0
libtpu: 0.0.40
codegen_flags: <defaults>
</compile_context>

<pallas_src>
import math

import numpy as np
import jax
import jax.numpy as jnp
from jax.experimental import pallas as pl
from jax.experimental.pallas import tpu as pltpu

DIM = 64
IMAGE_SIZE = 64
KSZ = 5
STRIDE = 2
PAD = 2


# ----------------------------------------------------------------------------
# Mask construction (numpy, deterministic) -- replicates get_mask / conv2d(ones)
# ----------------------------------------------------------------------------
def _axis_counts(dim, k, p, s):
    lin = (dim + 2 * p - k) // s + 1
    lout = (lin - 1) * s - 2 * p + k
    res = np.zeros(lout, dtype=np.float64)
    for j in range(lin):
        for kk in range(k):
            pos = j * s + kk - p
            if 0 <= pos < lout:
                res[pos] += 1.0
    off = (dim + 2 * p + 1) % s
    if off != 0:
        res = np.concatenate([res, np.ones(off, dtype=np.float64)])
    return res


def get_mask_np(dim_x, dim_y, kernel, padding=(0, 0), stride=(1, 1)):
    kx, ky = kernel
    px, py = padding
    sx, sy = stride
    rx = _axis_counts(dim_x, kx, px, sx)
    ry = _axis_counts(dim_y, ky, py, sy)
    factor = ((kx - 1) // sx + 1) * ((ky - 1) // sy + 1)
    return (factor / (rx[:, None] * ry[None, :])).astype(np.float64)


def conv2d_ones_np(m, k=KSZ, stride=STRIDE, pad=PAD):
    H, W = m.shape
    Ho = (H + 2 * pad - k) // stride + 1
    Wo = (W + 2 * pad - k) // stride + 1
    mp = np.pad(m, ((pad, pad), (pad, pad)))
    out = np.zeros((Ho, Wo), dtype=np.float64)
    for i in range(Ho):
        for j in range(Wo):
            out[i, j] = mp[i * stride:i * stride + k, j * stride:j * stride + k].sum()
    return out


def build_masks():
    masks_np = {}
    pre = get_mask_np(IMAGE_SIZE, IMAGE_SIZE, (5, 5), (2, 2), (2, 2))
    for i in range(1, 5):
        post = 1.0 / conv2d_ones_np(pre)
        masks_np[f"pre{i}"] = pre
        masks_np[f"post{i}"] = post
        if i < 4:
            pre = get_mask_np(post.shape[0], post.shape[1], (5, 5), (2, 2), (2, 2))
    return masks_np


# ----------------------------------------------------------------------------
# Pallas kernels
# ----------------------------------------------------------------------------
def conv_block_kernel(a_ref, w_ref, b_ref, m_ref, o_ref):
    """One (mchunk, 25*Cin) x (25*Cin, Cout) matmul + bias + fused-mask + ReLU.

    a_ref : (1, mchunk, K)  bf16 im2col rows (all 25 taps folded on lanes)
    w_ref : (K, Cout)       bf16 packed weights (resident across the grid)
    b_ref : (1, Cout)       f32 bias
    m_ref : (mchunk, 1)     f32 fused mask (post_i * pre_{i+1})
    o_ref : (1, mchunk, Cout) bf16
    """
    y = jnp.dot(a_ref[0, :, :], w_ref[...], preferred_element_type=jnp.float32)
    y = (y + b_ref[...]) * m_ref[...]
    o_ref[0, :, :] = jnp.maximum(y, 0.0).astype(o_ref.dtype)


def conv_linear_kernel(a_ref, w_ref, b_ref, m_ref, wl_ref, bl_ref, o_ref):
    """conv4 + ReLU + fused Linear(8192 -> 1) for one batch element.

    a_ref : (1, 16, 6400) bf16   w_ref : (6400, 512) bf16
    b_ref : (1, 512) f32         m_ref : (16, 1) f32 (post4)
    wl_ref: (16, 512) f32 (linear weight permuted to (h*w, c) layout)
    bl_ref: (1, 1) f32           o_ref : (1, 1, 128) f32 (scalar, lane-broadcast)
    """
    y = jnp.dot(a_ref[0, :, :], w_ref[...], preferred_element_type=jnp.float32)
    y = jnp.maximum((y + b_ref[...]) * m_ref[...], 0.0)
    s = jnp.sum(y * wl_ref[...], axis=1, keepdims=True)        # (16, 1)
    s = jnp.sum(s, axis=0, keepdims=True) + bl_ref[...]        # (1, 1)
    o_ref[0, :, :] = jnp.broadcast_to(s, (1, o_ref.shape[2]))


# ----------------------------------------------------------------------------
# JAX-side tap packing (bf16 glue, NHWC, no transposes)
# ----------------------------------------------------------------------------
def build_im2col(x):
    """x: (B, H, W, C) bf16, pre-mask already applied/fused.
    Returns (B, Ho*Wo, 25*C) bf16 with taps ordered (kh, kw, c), c fastest."""
    B, H, W, C = x.shape
    Ho, Wo = H // 2, W // 2
    xp = jnp.pad(x, ((0, 0), (PAD, PAD), (PAD, PAD), (0, 0)))
    parts = [xp[:, kh:kh + 2 * Ho:2, kw:kw + 2 * Wo:2, :]
             for kh in range(KSZ) for kw in range(KSZ)]
    a = jnp.concatenate(parts, axis=-1)
    return a.reshape(B, Ho * Wo, KSZ * KSZ * C)


def pack_conv_weight(w):
    """w: (Cout, Cin, 5, 5) f32 (PyTorch layout, already /= pre_mask.mean()).
    Returns (25*Cin, Cout) bf16, ordering matching build_im2col."""
    cout, cin = w.shape[0], w.shape[1]
    t = jnp.transpose(w, (2, 3, 1, 0))            # (kh, kw, cin, cout)
    return t.reshape(KSZ * KSZ * cin, cout).astype(jnp.bfloat16)


# ----------------------------------------------------------------------------
# Layer wrappers
# ----------------------------------------------------------------------------
def conv_layer(x, layer):
    B, H, W, Cin = x.shape
    Ho, Wo = H // 2, W // 2
    M = Ho * Wo
    K = KSZ * KSZ * Cin
    Cout = layer["bias"].shape[-1]
    mchunk = layer["mchunk"]
    nm = M // mchunk
    a = build_im2col(x)

    out = pl.pallas_call(
        conv_block_kernel,
        out_shape=jax.ShapeDtypeStruct((B, M, Cout), jnp.bfloat16),
        grid_spec=pltpu.PrefetchScalarGridSpec(
            num_scalar_prefetch=0,
            grid=(B, nm),                                   # weight block constant -> resident
            in_specs=[
                pl.BlockSpec((1, mchunk, K), lambda b, m: (b, m, 0)),
                pl.BlockSpec((K, Cout), lambda b, m: (0, 0)),
                pl.BlockSpec((1, Cout), lambda b, m: (0, 0)),
                pl.BlockSpec((mchunk, 1), lambda b, m: (m, 0)),
            ],
            out_specs=pl.BlockSpec((1, mchunk, Cout), lambda b, m: (b, m, 0)),
        ),
        compiler_params=pltpu.CompilerParams(
            dimension_semantics=("parallel", "parallel"),
            vmem_limit_bytes=32 * 1024 * 1024,
        ),
    )(a, layer["w_packed"], layer["bias"], layer["mask_rows"])
    return out.reshape(B, Ho, Wo, Cout)


def conv4_linear(x, layer, wl_mat, bl):
    B, H, W, Cin = x.shape
    Ho, Wo = H // 2, W // 2                                 # 4, 4
    M = Ho * Wo                                             # 16
    K = KSZ * KSZ * Cin                                     # 6400
    Cout = layer["bias"].shape[-1]                          # 512
    a = build_im2col(x)

    out = pl.pallas_call(
        conv_linear_kernel,
        out_shape=jax.ShapeDtypeStruct((B, 1, 128), jnp.float32),
        grid_spec=pltpu.PrefetchScalarGridSpec(
            num_scalar_prefetch=0,
            grid=(B,),
            in_specs=[
                pl.BlockSpec((1, M, K), lambda b: (b, 0, 0)),
                pl.BlockSpec((K, Cout), lambda b: (0, 0)),
                pl.BlockSpec((1, Cout), lambda b: (0, 0)),
                pl.BlockSpec((M, 1), lambda b: (0, 0)),
                pl.BlockSpec((M, Cout), lambda b: (0, 0)),
                pl.BlockSpec((1, 1), lambda b: (0, 0)),
            ],
            out_specs=pl.BlockSpec((1, 1, 128), lambda b: (b, 0, 0)),
        ),
        compiler_params=pltpu.CompilerParams(
            dimension_semantics=("parallel",),
            vmem_limit_bytes=32 * 1024 * 1024,
        ),
    )(a, layer["w_packed"], layer["bias"], layer["mask_rows"], wl_mat, bl)
    return out[:, 0, 0]


def discriminator_forward(x, params, pre1):
    h = x.reshape(-1, IMAGE_SIZE, IMAGE_SIZE, 1)            # NCHW (C==1) -> NHWC: pure reshape
    h = (h * pre1[None, :, :, None]).astype(jnp.bfloat16)   # only explicit pre-mask; rest fused
    for i in range(1, 4):
        h = conv_layer(h, params[f"conv{i}"])               # (B, Ho, Wo, Cout) bf16 NHWC
    out = conv4_linear(h, params["conv4"], params["wl_mat"], params["bl"])
    return out.reshape(-1)


# ----------------------------------------------------------------------------
# Deterministic parameter setup
# ----------------------------------------------------------------------------
def build_params(masks_np):
    key = jax.random.PRNGKey(0)
    ks = jax.random.split(key, 10)
    chans = [(1, DIM), (DIM, 2 * DIM), (2 * DIM, 4 * DIM), (4 * DIM, 8 * DIM)]
    spatial_in = [64, 32, 16, 8]
    params = {}
    for idx, (cin, cout) in enumerate(chans, start=1):
        fan_in = cin * KSZ * KSZ
        bound = 1.0 / math.sqrt(fan_in)
        w = jax.random.uniform(ks[2 * (idx - 1)], (cout, cin, KSZ, KSZ),
                               jnp.float32, -bound, bound)
        b = jax.random.uniform(ks[2 * (idx - 1) + 1], (cout,),
                               jnp.float32, -bound, bound)
        # weight /= mask_pre.mean()  (as in __init__)
        w = w / jnp.float32(masks_np[f"pre{idx}"].mean())

        post = masks_np[f"post{idx}"]
        fused = post * masks_np[f"pre{idx + 1}"] if idx < 4 else post
        # relu(y*post)*pre_next == relu(y*post*pre_next) only because masks > 0.
        assert (fused > 0).all()

        Ho = spatial_in[idx - 1] // 2
        M = Ho * Ho
        mchunk = M if idx == 4 else max(16, M // 4)         # ~4 M-chunks -> ~8 grid steps/layer
        assert M % mchunk == 0 and mchunk % 16 == 0, (M, mchunk)  # bf16 sublane alignment

        params[f"conv{idx}"] = dict(
            w_packed=pack_conv_weight(w),
            bias=jnp.asarray(b, jnp.float32).reshape(1, cout),
            mask_rows=jnp.asarray(fused.reshape(-1, 1), jnp.float32),
            mchunk=mchunk,
        )

    fan_in = 8 * 4 * 4 * DIM
    bound = 1.0 / math.sqrt(fan_in)
    wl = jax.random.uniform(ks[8], (1, fan_in), jnp.float32, -bound, bound)
    bl = jax.random.uniform(ks[9], (1,), jnp.float32, -bound, bound)
    # PyTorch flattens NCHW (c, h, w); our conv4 tile is (m=h*w, c) -> permute wl to (m, c).
    params["wl_mat"] = wl.reshape(8 * DIM, 4, 4).transpose(1, 2, 0).reshape(4 * 4, 8 * DIM)
    params["bl"] = bl.reshape(1, 1)
    return params


if __name__ == "__main__":
    masks_np = build_masks()
    pre1 = jnp.asarray(masks_np["pre1"], jnp.float32)
    params = build_params(masks_np)

    batch = 2
    x = jax.random.normal(jax.random.PRNGKey(0),
                          (batch, 1, IMAGE_SIZE, IMAGE_SIZE), dtype=jnp.float32)

    fwd = jax.jit(lambda xx: discriminator_forward(xx, params, pre1))
    out = fwd(x)
    jax.block_until_ready(out)
    assert out.shape == (batch,), out.shape
    print("KERNEL_OK")
</pallas_src>

<mosaic_0001>
module attributes {stable_mosaic.version = 11 : i64} {
  func.func @conv_block_kernel(%arg0: i32, %arg1: i32, %arg2: memref<1x256x25xbf16, #tpu.memory_space<vmem>>, %arg3: memref<25x64xbf16, #tpu.memory_space<vmem>>, %arg4: memref<1x64xf32, #tpu.memory_space<vmem>>, %arg5: memref<256x1xf32, #tpu.memory_space<vmem>>, %arg6: memref<1x256x64xbf16, #tpu.memory_space<vmem>>) attributes {dimension_semantics = [#tpu.dimension_semantics<parallel>, #tpu.dimension_semantics<parallel>], iteration_bounds = array<i64: 2, 4>, scalar_prefetch = 0 : i64, scratch_operands = 0 : i64, tpu.core_type = #tpu.core_type<tc>, window_params = [{transform_indices = @transform_0, window_bounds = array<i64: 1, 256, 25>}, {pipeline_mode = #tpu.pipeline_mode<synchronous>, transform_indices = @transform_1, window_bounds = array<i64: 25, 64>}, {pipeline_mode = #tpu.pipeline_mode<synchronous>, transform_indices = @transform_2, window_bounds = array<i64: 1, 64>}, {transform_indices = @transform_3, window_bounds = array<i64: 256, 1>}, {transform_indices = @transform_4, window_bounds = array<i64: 1, 256, 64>}]} {
    %c0 = arith.constant 0 : index
    %c0_0 = arith.constant 0 : index
    %c0_1 = arith.constant 0 : index
    %0 = vector.load %arg2[%c0, %c0_0, %c0_1] : memref<1x256x25xbf16, #tpu.memory_space<vmem>>, vector<1x256x25xbf16>
    %1 = vector.shape_cast %0 : vector<1x256x25xbf16> to vector<256x25xbf16>
    %c0_2 = arith.constant 0 : index
    %c0_3 = arith.constant 0 : index
    %2 = vector.load %arg3[%c0_2, %c0_3] : memref<25x64xbf16, #tpu.memory_space<vmem>>, vector<25x64xbf16>
    %cst = arith.constant dense<0.000000e+00> : vector<256x64xf32>
    %3 = tpu.matmul %1, %2, %cst {dimension_numbers = #tpu.dot_dimension_numbers<[1], [0], [0], [1], [0, 0, 1, 1], [], []>} : vector<256x25xbf16>, vector<25x64xbf16>, vector<256x64xf32> -> vector<256x64xf32>
    %c0_4 = arith.constant 0 : index
    %c0_5 = arith.constant 0 : index
    %4 = vector.load %arg4[%c0_4, %c0_5] : memref<1x64xf32, #tpu.memory_space<vmem>>, vector<1x64xf32>
    %5 = vector.broadcast %4 : vector<1x64xf32> to vector<256x64xf32>
    %6 = arith.addf %3, %5 : vector<256x64xf32>
    %c0_6 = arith.constant 0 : index
    %c0_7 = arith.constant 0 : index
    %7 = vector.load %arg5[%c0_6, %c0_7] : memref<256x1xf32, #tpu.memory_space<vmem>>, vector<256x1xf32>
    %8 = vector.broadcast %7 : vector<256x1xf32> to vector<256x64xf32>
    %9 = arith.mulf %6, %8 : vector<256x64xf32>
    %cst_8 = arith.constant 0.000000e+00 : f32
    %10 = vector.broadcast %cst_8 : f32 to vector<256x64xf32>
    %11 = arith.maximumf %9, %10 : vector<256x64xf32>
    %12 = arith.truncf %11 : vector<256x64xf32> to vector<256x64xbf16>
    %c0_9 = arith.constant 0 : index
    %c0_10 = arith.constant 0 : index
    %c0_11 = arith.constant 0 : index
    %13 = vector.load %arg6[%c0_9, %c0_10, %c0_11] : memref<1x256x64xbf16, #tpu.memory_space<vmem>>, vector<1x256x64xbf16>
    %14 = vector.shape_cast %13 : vector<1x256x64xbf16> to vector<256x64xbf16>
    %15 = vector.shape_cast %12 : vector<256x64xbf16> to vector<1x256x64xbf16>
    tpu.vector_store %arg6[%c0_9, %c0_10, %c0_11], %15 {strides = array<i32>} : memref<1x256x64xbf16, #tpu.memory_space<vmem>>, vector<1x256x64xbf16>,
    return
  }
  func.func @transform_0(%arg0: i32, %arg1: i32) -> (i32, i32, i32) {
    %c0_i32 = arith.constant 0 : i32
    %c0_i32_0 = arith.constant 0 : i32
    return %arg0, %arg1, %c0_i32 : i32, i32, i32
  }
  func.func @transform_1(%arg0: i32, %arg1: i32) -> (i32, i32) {
    %c0_i32 = arith.constant 0 : i32
    %c0_i32_0 = arith.constant 0 : i32
    %c0_i32_1 = arith.constant 0 : i32
    return %c0_i32, %c0_i32_0 : i32, i32
  }
  func.func @transform_2(%arg0: i32, %arg1: i32) -> (i32, i32) {
    %c0_i32 = arith.constant 0 : i32
    %c0_i32_0 = arith.constant 0 : i32
    %c0_i32_1 = arith.constant 0 : i32
    return %c0_i32, %c0_i32_0 : i32, i32
  }
  func.func @transform_3(%arg0: i32, %arg1: i32) -> (i32, i32) {
    %c0_i32 = arith.constant 0 : i32
    %c0_i32_0 = arith.constant 0 : i32
    return %arg1, %c0_i32 : i32, i32
  }
  func.func @transform_4(%arg0: i32, %arg1: i32) -> (i32, i32, i32) {
    %c0_i32 = arith.constant 0 : i32
    %c0_i32_0 = arith.constant 0 : i32
    return %arg0, %arg1, %c0_i32 : i32, i32, i32
  }
}

module attributes {stable_mosaic.version = 11 : i64} {
  func.func @conv_block_kernel(%arg0: i32, %arg1: i32, %arg2: memref<1x64x1600xbf16, #tpu.memory_space<vmem>>, %arg3: memref<1600x128xbf16, #tpu.memory_space<vmem>>, %arg4: memref<1x128xf32, #tpu.memory_space<vmem>>, %arg5: memref<64x1xf32, #tpu.memory_space<vmem>>, %arg6: memref<1x64x128xbf16, #tpu.memory_space<vmem>>) attributes {dimension_semantics = [#tpu.dimension_semantics<parallel>, #tpu.dimension_semantics<parallel>], iteration_bounds = array<i64: 2, 4>, scalar_prefetch = 0 : i64, scratch_operands = 0 : i64, tpu.core_type = #tpu.core_type<tc>, window_params = [{transform_indices = @transform_0, window_bounds = array<i64: 1, 64, 1600>}, {pipeline_mode = #tpu.pipeline_mode<synchronous>, transform_indices = @transform_1, window_bounds = array<i64: 1600, 128>}, {pipeline_mode = #tpu.pipeline_mode<synchronous>, transform_indices = @transform_2, window_bounds = array<i64: 1, 128>}, {transform_indices = @transform_3, window_bounds = array<i64: 64, 1>}, {transform_indices = @transform_4, window_bounds = array<i64: 1, 64, 128>}]} {
    %c0 = arith.constant 0 : index
    %c0_0 = arith.constant 0 : index
    %c0_1 = arith.constant 0 : index
    %0 = vector.load %arg2[%c0, %c0_0, %c0_1] : memref<1x64x1600xbf16, #tpu.memory_space<vmem>>, vector<1x64x1600xbf16>
    %1 = vector.shape_cast %0 : vector<1x64x1600xbf16> to vector<64x1600xbf16>
    %c0_2 = arith.constant 0 : index
    %c0_3 = arith.constant 0 : index
    %2 = vector.load %arg3[%c0_2, %c0_3] : memref<1600x128xbf16, #tpu.memory_space<vmem>>, vector<1600x128xbf16>
    %cst = arith.constant dense<0.000000e+00> : vector<64x128xf32>
    %3 = tpu.matmul %1, %2, %cst {dimension_numbers = #tpu.dot_dimension_numbers<[1], [0], [0], [1], [0, 0, 1, 1], [], []>} : vector<64x1600xbf16>, vector<1600x128xbf16>, vector<64x128xf32> -> vector<64x128xf32>
    %c0_4 = arith.constant 0 : index
    %c0_5 = arith.constant 0 : index
    %4 = vector.load %arg4[%c0_4, %c0_5] : memref<1x128xf32, #tpu.memory_space<vmem>>, vector<1x128xf32>
    %5 = vector.broadcast %4 : vector<1x128xf32> to vector<64x128xf32>
    %6 = arith.addf %3, %5 : vector<64x128xf32>
    %c0_6 = arith.constant 0 : index
    %c0_7 = arith.constant 0 : index
    %7 = vector.load %arg5[%c0_6, %c0_7] : memref<64x1xf32, #tpu.memory_space<vmem>>, vector<64x1xf32>
    %8 = vector.broadcast %7 : vector<64x1xf32> to vector<64x128xf32>
    %9 = arith.mulf %6, %8 : vector<64x128xf32>
    %cst_8 = arith.constant 0.000000e+00 : f32
    %10 = vector.broadcast %cst_8 : f32 to vector<64x128xf32>
    %11 = arith.maximumf %9, %10 : vector<64x128xf32>
    %12 = arith.truncf %11 : vector<64x128xf32> to vector<64x128xbf16>
    %c0_9 = arith.constant 0 : index
    %c0_10 = arith.constant 0 : index
    %c0_11 = arith.constant 0 : index
    %13 = vector.load %arg6[%c0_9, %c0_10, %c0_11] : memref<1x64x128xbf16, #tpu.memory_space<vmem>>, vector<1x64x128xbf16>
    %14 = vector.shape_cast %13 : vector<1x64x128xbf16> to vector<64x128xbf16>
    %15 = vector.shape_cast %12 : vector<64x128xbf16> to vector<1x64x128xbf16>
    tpu.vector_store %arg6[%c0_9, %c0_10, %c0_11], %15 {strides = array<i32>} : memref<1x64x128xbf16, #tpu.memory_space<vmem>>, vector<1x64x128xbf16>,
    return
  }
  func.func @transform_0(%arg0: i32, %arg1: i32) -> (i32, i32, i32) {
    %c0_i32 = arith.constant 0 : i32
    %c0_i32_0 = arith.constant 0 : i32
    return %arg0, %arg1, %c0_i32 : i32, i32, i32
  }
  func.func @transform_1(%arg0: i32, %arg1: i32) -> (i32, i32) {
    %c0_i32 = arith.constant 0 : i32
    %c0_i32_0 = arith.constant 0 : i32
    %c0_i32_1 = arith.constant 0 : i32
    return %c0_i32, %c0_i32_0 : i32, i32
  }
  func.func @transform_2(%arg0: i32, %arg1: i32) -> (i32, i32) {
    %c0_i32 = arith.constant 0 : i32
    %c0_i32_0 = arith.constant 0 : i32
    %c0_i32_1 = arith.constant 0 : i32
    return %c0_i32, %c0_i32_0 : i32, i32
  }
  func.func @transform_3(%arg0: i32, %arg1: i32) -> (i32, i32) {
    %c0_i32 = arith.constant 0 : i32
    %c0_i32_0 = arith.constant 0 : i32
    return %arg1, %c0_i32 : i32, i32
  }
  func.func @transform_4(%arg0: i32, %arg1: i32) -> (i32, i32, i32) {
    %c0_i32 = arith.constant 0 : i32
    %c0_i32_0 = arith.constant 0 : i32
    return %arg0, %arg1, %c0_i32 : i32, i32, i32
  }
}

module attributes {stable_mosaic.version = 11 : i64} {
  func.func @conv_block_kernel(%arg0: i32, %arg1: i32, %arg2: memref<1x16x3200xbf16, #tpu.memory_space<vmem>>, %arg3: memref<3200x256xbf16, #tpu.memory_space<vmem>>, %arg4: memref<1x256xf32, #tpu.memory_space<vmem>>, %arg5: memref<16x1xf32, #tpu.memory_space<vmem>>, %arg6: memref<1x16x256xbf16, #tpu.memory_space<vmem>>) attributes {dimension_semantics = [#tpu.dimension_semantics<parallel>, #tpu.dimension_semantics<parallel>], iteration_bounds = array<i64: 2, 4>, scalar_prefetch = 0 : i64, scratch_operands = 0 : i64, tpu.core_type = #tpu.core_type<tc>, window_params = [{transform_indices = @transform_0, window_bounds = array<i64: 1, 16, 3200>}, {pipeline_mode = #tpu.pipeline_mode<synchronous>, transform_indices = @transform_1, window_bounds = array<i64: 3200, 256>}, {pipeline_mode = #tpu.pipeline_mode<synchronous>, transform_indices = @transform_2, window_bounds = array<i64: 1, 256>}, {transform_indices = @transform_3, window_bounds = array<i64: 16, 1>}, {transform_indices = @transform_4, window_bounds = array<i64: 1, 16, 256>}]} {
    %c0 = arith.constant 0 : index
    %c0_0 = arith.constant 0 : index
    %c0_1 = arith.constant 0 : index
    %0 = vector.load %arg2[%c0, %c0_0, %c0_1] : memref<1x16x3200xbf16, #tpu.memory_space<vmem>>, vector<1x16x3200xbf16>
    %1 = vector.shape_cast %0 : vector<1x16x3200xbf16> to vector<16x3200xbf16>
    %c0_2 = arith.constant 0 : index
    %c0_3 = arith.constant 0 : index
    %2 = vector.load %arg3[%c0_2, %c0_3] : memref<3200x256xbf16, #tpu.memory_space<vmem>>, vector<3200x256xbf16>
    %cst = arith.constant dense<0.000000e+00> : vector<16x256xf32>
    %3 = tpu.matmul %1, %2, %cst {dimension_numbers = #tpu.dot_dimension_numbers<[1], [0], [0], [1], [0, 0, 1, 1], [], []>} : vector<16x3200xbf16>, vector<3200x256xbf16>, vector<16x256xf32> -> vector<16x256xf32>
    %c0_4 = arith.constant 0 : index
    %c0_5 = arith.constant 0 : index
    %4 = vector.load %arg4[%c0_4, %c0_5] : memref<1x256xf32, #tpu.memory_space<vmem>>, vector<1x256xf32>
    %5 = vector.broadcast %4 : vector<1x256xf32> to vector<16x256xf32>
    %6 = arith.addf %3, %5 : vector<16x256xf32>
    %c0_6 = arith.constant 0 : index
    %c0_7 = arith.constant 0 : index
    %7 = vector.load %arg5[%c0_6, %c0_7] : memref<16x1xf32, #tpu.memory_space<vmem>>, vector<16x1xf32>
    %8 = vector.broadcast %7 : vector<16x1xf32> to vector<16x256xf32>
    %9 = arith.mulf %6, %8 : vector<16x256xf32>
    %cst_8 = arith.constant 0.000000e+00 : f32
    %10 = vector.broadcast %cst_8 : f32 to vector<16x256xf32>
    %11 = arith.maximumf %9, %10 : vector<16x256xf32>
    %12 = arith.truncf %11 : vector<16x256xf32> to vector<16x256xbf16>
    %c0_9 = arith.constant 0 : index
    %c0_10 = arith.constant 0 : index
    %c0_11 = arith.constant 0 : index
    %13 = vector.load %arg6[%c0_9, %c0_10, %c0_11] : memref<1x16x256xbf16, #tpu.memory_space<vmem>>, vector<1x16x256xbf16>
    %14 = vector.shape_cast %13 : vector<1x16x256xbf16> to vector<16x256xbf16>
    %15 = vector.shape_cast %12 : vector<16x256xbf16> to vector<1x16x256xbf16>
    tpu.vector_store %arg6[%c0_9, %c0_10, %c0_11], %15 {strides = array<i32>} : memref<1x16x256xbf16, #tpu.memory_space<vmem>>, vector<1x16x256xbf16>,
    return
  }
  func.func @transform_0(%arg0: i32, %arg1: i32) -> (i32, i32, i32) {
    %c0_i32 = arith.constant 0 : i32
    %c0_i32_0 = arith.constant 0 : i32
    return %arg0, %arg1, %c0_i32 : i32, i32, i32
  }
  func.func @transform_1(%arg0: i32, %arg1: i32) -> (i32, i32) {
    %c0_i32 = arith.constant 0 : i32
    %c0_i32_0 = arith.constant 0 : i32
    %c0_i32_1 = arith.constant 0 : i32
    return %c0_i32, %c0_i32_0 : i32, i32
  }
  func.func @transform_2(%arg0: i32, %arg1: i32) -> (i32, i32) {
    %c0_i32 = arith.constant 0 : i32
    %c0_i32_0 = arith.constant 0 : i32
    %c0_i32_1 = arith.constant 0 : i32
    return %c0_i32, %c0_i32_0 : i32, i32
  }
  func.func @transform_3(%arg0: i32, %arg1: i32) -> (i32, i32) {
    %c0_i32 = arith.constant 0 : i32
    %c0_i32_0 = arith.constant 0 : i32
    return %arg1, %c0_i32 : i32, i32
  }
  func.func @transform_4(%arg0: i32, %arg1: i32) -> (i32, i32, i32) {
    %c0_i32 = arith.constant 0 : i32
    %c0_i32_0 = arith.constant 0 : i32
    return %arg0, %arg1, %c0_i32 : i32, i32, i32
  }
}

module attributes {stable_mosaic.version = 11 : i64} {
  func.func @conv_linear_kernel(%arg0: i32, %arg1: memref<1x16x6400xbf16, #tpu.memory_space<vmem>>, %arg2: memref<6400x512xbf16, #tpu.memory_space<vmem>>, %arg3: memref<1x512xf32, #tpu.memory_space<vmem>>, %arg4: memref<16x1xf32, #tpu.memory_space<vmem>>, %arg5: memref<16x512xf32, #tpu.memory_space<vmem>>, %arg6: memref<1x1xf32, #tpu.memory_space<vmem>>, %arg7: memref<1x1x128xf32, #tpu.memory_space<vmem>>) attributes {dimension_semantics = [#tpu.dimension_semantics<parallel>], iteration_bounds = array<i64: 2>, scalar_prefetch = 0 : i64, scratch_operands = 0 : i64, tpu.core_type = #tpu.core_type<tc>, window_params = [{transform_indices = @transform_0, window_bounds = array<i64: 1, 16, 6400>}, {pipeline_mode = #tpu.pipeline_mode<synchronous>, transform_indices = @transform_1, window_bounds = array<i64: 6400, 512>}, {pipeline_mode = #tpu.pipeline_mode<synchronous>, transform_indices = @transform_2, window_bounds = array<i64: 1, 512>}, {pipeline_mode = #tpu.pipeline_mode<synchronous>, transform_indices = @transform_3, window_bounds = array<i64: 16, 1>}, {pipeline_mode = #tpu.pipeline_mode<synchronous>, transform_indices = @transform_4, window_bounds = array<i64: 16, 512>}, {pipeline_mode = #tpu.pipeline_mode<synchronous>, transform_indices = @transform_5, window_bounds = array<i64: 1, 1>}, {transform_indices = @transform_6, window_bounds = array<i64: 1, 1, 128>}]} {
    %c0 = arith.constant 0 : index
    %c0_0 = arith.constant 0 : index
    %c0_1 = arith.constant 0 : index
    %0 = vector.load %arg1[%c0, %c0_0, %c0_1] : memref<1x16x6400xbf16, #tpu.memory_space<vmem>>, vector<1x16x6400xbf16>
    %1 = vector.shape_cast %0 : vector<1x16x6400xbf16> to vector<16x6400xbf16>
    %c0_2 = arith.constant 0 : index
    %c0_3 = arith.constant 0 : index
    %2 = vector.load %arg2[%c0_2, %c0_3] : memref<6400x512xbf16, #tpu.memory_space<vmem>>, vector<6400x512xbf16>
    %cst = arith.constant dense<0.000000e+00> : vector<16x512xf32>
    %3 = tpu.matmul %1, %2, %cst {dimension_numbers = #tpu.dot_dimension_numbers<[1], [0], [0], [1], [0, 0, 1, 1], [], []>} : vector<16x6400xbf16>, vector<6400x512xbf16>, vector<16x512xf32> -> vector<16x512xf32>
    %c0_4 = arith.constant 0 : index
    %c0_5 = arith.constant 0 : index
    %4 = vector.load %arg3[%c0_4, %c0_5] : memref<1x512xf32, #tpu.memory_space<vmem>>, vector<1x512xf32>
    %5 = vector.broadcast %4 : vector<1x512xf32> to vector<16x512xf32>
    %6 = arith.addf %3, %5 : vector<16x512xf32>
    %c0_6 = arith.constant 0 : index
    %c0_7 = arith.constant 0 : index
    %7 = vector.load %arg4[%c0_6, %c0_7] : memref<16x1xf32, #tpu.memory_space<vmem>>, vector<16x1xf32>
    %8 = vector.broadcast %7 : vector<16x1xf32> to vector<16x512xf32>
    %9 = arith.mulf %6, %8 : vector<16x512xf32>
    %cst_8 = arith.constant 0.000000e+00 : f32
    %10 = vector.broadcast %cst_8 : f32 to vector<16x512xf32>
    %11 = arith.maximumf %9, %10 : vector<16x512xf32>
    %c0_9 = arith.constant 0 : index
    %c0_10 = arith.constant 0 : index
    %12 = vector.load %arg5[%c0_9, %c0_10] : memref<16x512xf32, #tpu.memory_space<vmem>>, vector<16x512xf32>
    %13 = arith.mulf %11, %12 : vector<16x512xf32>
    %cst_11 = arith.constant dense<0.000000e+00> : vector<16xf32>
    %14 = vector.multi_reduction <add>, %13, %cst_11 [1] : vector<16x512xf32> to vector<16xf32>
    %15 = vector.shape_cast %14 : vector<16xf32> to vector<16x1xf32>
    %cst_12 = arith.constant dense<0.000000e+00> : vector<1xf32>
    %16 = vector.multi_reduction <add>, %15, %cst_12 [0] : vector<16x1xf32> to vector<1xf32>
    %17 = vector.shape_cast %16 : vector<1xf32> to vector<1x1xf32>
    %c0_13 = arith.constant 0 : index
    %c0_14 = arith.constant 0 : index
    %18 = vector.load %arg6[%c0_13, %c0_14] : memref<1x1xf32, #tpu.memory_space<vmem>>, vector<1x1xf32>
    %19 = arith.addf %17, %18 : vector<1x1xf32>
    %20 = vector.shape_cast %19 : vector<1x1xf32> to vector<1x1xf32>
    %21 = vector.broadcast %20 : vector<1x1xf32> to vector<1x128xf32>
    %c0_15 = arith.constant 0 : index
    %c0_16 = arith.constant 0 : index
    %c0_17 = arith.constant 0 : index
    %22 = vector.load %arg7[%c0_15, %c0_16, %c0_17] : memref<1x1x128xf32, #tpu.memory_space<vmem>>, vector<1x1x128xf32>
    %23 = vector.shape_cast %22 : vector<1x1x128xf32> to vector<1x128xf32>
    %24 = vector.shape_cast %21 : vector<1x128xf32> to vector<1x1x128xf32>
    tpu.vector_store %arg7[%c0_15, %c0_16, %c0_17], %24 {strides = array<i32>} : memref<1x1x128xf32, #tpu.memory_space<vmem>>, vector<1x1x128xf32>,
    return
  }
  func.func @transform_0(%arg0: i32) -> (i32, i32, i32) {
    %c0_i32 = arith.constant 0 : i32
    %c0_i32_0 = arith.constant 0 : i32
    %c0_i32_1 = arith.constant 0 : i32
    return %arg0, %c0_i32, %c0_i32_0 : i32, i32, i32
  }
  func.func @transform_1(%arg0: i32) -> (i32, i32) {
    %c0_i32 = arith.constant 0 : i32
    %c0_i32_0 = arith.constant 0 : i32
    %c0_i32_1 = arith.constant 0 : i32
    return %c0_i32, %c0_i32_0 : i32, i32
  }
  func.func @transform_2(%arg0: i32) -> (i32, i32) {
    %c0_i32 = arith.constant 0 : i32
    %c0_i32_0 = arith.constant 0 : i32
    %c0_i32_1 = arith.constant 0 : i32
    return %c0_i32, %c0_i32_0 : i32, i32
  }
  func.func @transform_3(%arg0: i32) -> (i32, i32) {
    %c0_i32 = arith.constant 0 : i32
    %c0_i32_0 = arith.constant 0 : i32
    %c0_i32_1 = arith.constant 0 : i32
    return %c0_i32, %c0_i32_0 : i32, i32
  }
  func.func @transform_4(%arg0: i32) -> (i32, i32) {
    %c0_i32 = arith.constant 0 : i32
    %c0_i32_0 = arith.constant 0 : i32
    %c0_i32_1 = arith.constant 0 : i32
    return %c0_i32, %c0_i32_0 : i32, i32
  }
  func.func @transform_5(%arg0: i32) -> (i32, i32) {
    %c0_i32 = arith.constant 0 : i32
    %c0_i32_0 = arith.constant 0 : i32
    %c0_i32_1 = arith.constant 0 : i32
    return %c0_i32, %c0_i32_0 : i32, i32
  }
  func.func @transform_6(%arg0: i32) -> (i32, i32, i32) {
    %c0_i32 = arith.constant 0 : i32
    %c0_i32_0 = arith.constant 0 : i32
    %c0_i32_1 = arith.constant 0 : i32
    return %arg0, %c0_i32, %c0_i32_0 : i32, i32, i32
  }
}

</mosaic_0001>

<bundles_post_ra>
// kernel: _lambda_.4
= control target key start
LH: loop header
LB: loop body
LE: loop exit
PB: predicated region body
PF: predicated region fallthrough
CT: control target
= control target key end

     0   :  { %s1431_s15 = smov 0   ;;  %s1433_s16 = smov 0   ;;  %s1736_s0 = inlined_call_operand.vmem [shape: bf16[2,1024,25], index: 0, kind: input, shape index: {}]   ;;  %s1737_s1 = inlined_call_operand.vmem [shape: bf16[25,64], index: 1, kind: input, shape index: {}]   ;;  %s1738_s2 = inlined_call_operand.vmem [shape: f32[1,64], index: 2, kind: input, shape index: {}]   ;;  %s1739_s3 = inlined_call_operand.vmem [shape: f32[1024,1], index: 3, kind: input, shape index: {}]   ;;  %s1740_s4 = inlined_call_operand.vmem [shape: bf16[2,1024,64], index: 4, kind: output, shape index: {}]  }
   0x1   :  { %s1435_s17 = smov 0   ;;  %s1437_s18 = smov 0  }
   0x2   :  { %s1439_s19 = smov 0  }
   0x3 LB: > { %s23_s20 = sadd.s32 1, %s1394_s17  ;;  %s26_s21 = sadd.s32 1, %s1398_s18  ;;  %s1402_s19 = sphi %s1439_s19, %s14_s19   ;;  %s1398_s18 = sphi %s1437_s18, %s1744_s18   ;;  %s1394_s17 = sphi %s1435_s17, %s1743_s17   ;;  %s1390_s16 = sphi %s1433_s16, %s1742_s16   ;;  %s1386_s15 = sphi %s1431_s15, %s1741_s15  }
   0x4   : > { %p24_p0 = scmp.ge.s32.totalorder %s23_s20, 4  ;;  %p1134_p1 = scmp.ge.s32.totalorder %s1402_s19, 1 }
   0x5   : > { %p194_p2 = scmp.lt.s32.totalorder %s1402_s19, 9 }
   0x6   : > { %s1746_s20 = smov (%p24_p0, %s23_s20), 0  ;;  %s1748_s21 = smov (!%p24_p0, %s26_s21), %s1398_s18 }
   0x7   : > { %p195_p3 = pnand %p1134_p1, %p194_p2  ;;  %p28_p4 = scmp.ge.s32.totalorder %s1748_s21, 2 }
   0x8   : > { %v1346_v0 = vld [vmem:[%s1737_s1] sm:$0xff] (!%p195_p3)   ;;  %v1404_v1 = vmov (!%p195_p3), 0   ;;  %v1347_v2 = vld [vmem:[%s1737_s1 + $0x8] sm:$0x1f] (!%p195_p3)   ;;  %vm443_vm0 = vcmask (!%p195_p3), 1043456   ;;  %vm444_vm1 = vcmask (!%p195_p3), 1044480  }
   0x9   : > { %s1750_s21 = smov (%p28_p4, %s1748_s21), 0  ;;  %198 = sbr.rel (%p195_p3) target bundleno = 274 (0x112), region = 36 }
   0xa   : > { %1345 = vset.pattern.permute.xlu1 (!%p195_p3), %v1404_v1  ;;  %1344 = vset.pattern.permute.xlu0 (!%p195_p3), %v1404_v1  ;;  %s1135_s26 = sshll.u32 (!%p195_p3), %s1386_s15, 5  ;;  %p234_p5 = scmp.lt.s32.totalorder (!%p195_p3), %s1390_s16, 1  ;;  %v1405_v3 = vmov (!%p195_p3), 65535   ;;  %vm394_vm2 = vcmask (!%p195_p3), 203776   ;;  %vm995_vm3 = vcmask (!%p195_p3), 519168  }
   0xb   : > { %1262 = vmatprep.subr.bf16.mxu0 (!%p195_p3), %v1346_v0  ;;  %1298 = vmatprep.subr.bf16.mxu1 (!%p195_p3), %v1346_v0  ;;  %v445_v4 = vsel (!%p195_p3), %vm443_vm0, 4294967295, %v1405_v3  ;;  %p236_p6 = scmp.lt.s32.totalorder (!%p195_p3), %s1135_s26, 127 }
   0xc   : > { %1263 = vmatpush3.bf16.msra.mxu0 (!%p195_p3), %v1346_v0  ;;  %1300 = vmatpush3.bf16.msra.mxu1 (!%p195_p3), %v1346_v0  ;;  %v446_v5 = vsel (!%p195_p3), %vm444_vm1, %v445_v4, 0 }
   0xd   : > { %v448_v6 = vand.u32 (!%p195_p3), %v1347_v2, %v446_v5 }
   0xf   : > { %1264 = vmatprep.subr.bf16.mxu0 (!%p195_p3), %v448_v6  ;;  %1299 = vmatprep.subr.bf16.mxu1 (!%p195_p3), %v448_v6 }
  0x10   : > { %s1752_s16 = smov (!%p234_p5, %s1390_s16), 1  ;;  %s1754_s26 = smov (!%p236_p6, %s1135_s26), 127  ;;  %1265 = vmatpush3.bf16.msra.mxu0 %v448_v6  ;;  %1301 = vmatpush3.bf16.msra.mxu1 %v448_v6 }
  0x11   : > { %s1136_s27 = sshll.u32 %s1752_s16, 7  ;;  %s1139_s28 = sshll.u32 %s1754_s26, 3 }
  0x12   : > { %s1474_s29 = sadd.s32 %s1136_s27, %s1754_s26  ;;  %s1479_s6 = scalar_lea.vmem %s1739_s3, %s1139_s28 }
  0x13   : > { %s1137_s7 = sshll.u32 %s1474_s29, 2  ;;  %v613_v7 = vld [vmem:[%s1479_s6 + $0x10] sm:$0xff]  ;;  %v611_v8 = vld [vmem:[%s1479_s6] sm:$0xff]  ;;  %v614_v9 = vld [vmem:[%s1479_s6 + $0x18] sm:$0xff] }
  0x14   : > { %s1489_s10 = scalar_lea.vmem %s1736_s0, %s1137_s7  ;;  %655 = vperm.xlu1 %1345, %v613_v7   ;;  %645 = vperm.xlu0 %1344, %v611_v8   ;;  %v612_v12 = vld [vmem:[%s1479_s6 + $0x8] sm:$0xff]  ;;  %v615_v16 = vld [vmem:[%s1479_s6 + $0x20] sm:$0xff]  ;;  %v618_v19 = vld [vmem:[%s1479_s6 + $0x38] sm:$0xff]  ;;  %s1605_s15 = scalar_lea.vmem %s1740_s4, %s1137_s7 }
  0x15   : > { %v1348_v10 = vld [vmem:[%s1489_s10] sm:$0xff]   ;;  %v1350_v13 = vld [vmem:[%s1489_s10 + $0x8] sm:$0xff]   ;;  %v1352_v17 = vld [vmem:[%s1489_s10 + $0x10] sm:$0xff]  }
  0x16   : > { %v1349_v11 = vld [vmem:[%s1489_s10 + $0x40] sm:$0xff]   ;;  %1266 = vmatprep.mubr.msk.bf16.mxu0 %vm394_vm2, %v1348_v10  ;;  %v1351_v14 = vld [vmem:[%s1489_s10 + $0x48] sm:$0xff]   ;;  %v1353_v18 = vld [vmem:[%s1489_s10 + $0x50] sm:$0xff]  }
  0x17   : > { %1282 = vmatprep.mubr.msk.bf16.mxu1 %vm394_vm2, %v1349_v11  ;;  %v616_v15 = vld [vmem:[%s1479_s6 + $0x28] sm:$0xff]  ;;  %1267 = vmatmul.mubr.msk.bf16.vlgmr.msra.gmra.mrb[0].mxu0 %vm394_vm2, %v1350_v13  ;;  %v617_v20 = vld [vmem:[%s1479_s6 + $0x30] sm:$0xff]  ;;  %v1354_v21 = vld [vmem:[%s1489_s10 + $0x18] sm:$0xff]  }
  0x18   : > { %660 = vperm.xlu1 %1345, %v614_v9   ;;  %650 = vperm.xlu0 %1344, %v612_v12   ;;  %v1355_v22 = vld [vmem:[%s1489_s10 + $0x58] sm:$0xff]   ;;  %v1356_v23 = vld [vmem:[%s1489_s10 + $0x20] sm:$0xff]   ;;  %v620_v24 = vld [vmem:[%s1479_s6 + $0x48] sm:$0xff] }
  0x19   : > { %1283 = vmatmul.mubr.msk.bf16.vlgmr.msra.gmra.mrb[0].mxu1 %vm394_vm2, %v1351_v14  ;;  %1270 = vmatprep.mubr.msk.bf16.mxu0 %vm394_vm2, %v1352_v17  ;;  %v1357_v25 = vld [vmem:[%s1489_s10 + $0x60] sm:$0xff]   ;;  %v622_v27 = vld [vmem:[%s1479_s6 + $0x58] sm:$0xff]  ;;  %v621_v28 = vld [vmem:[%s1479_s6 + $0x50] sm:$0xff] }
  0x1a   : > { %1286 = vmatprep.mubr.msk.bf16.mxu1 %vm394_vm2, %v1353_v18  ;;  %v619_v26 = vld [vmem:[%s1479_s6 + $0x40] sm:$0xff]  ;;  %v1358_v29 = vld [vmem:[%s1489_s10 + $0x28] sm:$0xff]   ;;  %v1360_v31 = vld [vmem:[%s1489_s10 + $0x30] sm:$0xff]  }
  0x1b   : > { %v1359_v30 = vld [vmem:[%s1489_s10 + $0x68] sm:$0xff]   ;;  %v1361_v32 = vld [vmem:[%s1489_s10 + $0x70] sm:$0xff]   ;;  %v623_v34 = vld [vmem:[%s1479_s6 + $0x60] sm:$0xff] }
  0x1c   : > { %670 = vperm.xlu1 %1345, %v616_v15   ;;  %665 = vperm.xlu0 %1344, %v615_v16   ;;  %v624_v33 = vld [vmem:[%s1479_s6 + $0x68] sm:$0xff]  ;;  %v626_v35 = vld [vmem:[%s1479_s6 + $0x78] sm:$0xff]  ;;  %v625_v36 = vld [vmem:[%s1479_s6 + $0x70] sm:$0xff] }
  0x1d   : > { %v1362_v37 = vld [vmem:[%s1489_s10 + $0x38] sm:$0xff]   ;;  %v628_v39 = vld [vmem:[%s1479_s6 + $0x88] sm:$0xff]  ;;  %v627_v40 = vld [vmem:[%s1479_s6 + $0x80] sm:$0xff] }
  0x1e   : > { %v1363_v38 = vld [vmem:[%s1489_s10 + $0x78] sm:$0xff]   ;;  %v629_v42 = vld [vmem:[%s1479_s6 + $0x90] sm:$0xff]  ;;  %v632_v43 = vld [vmem:[%s1479_s6 + $0xa8] sm:$0xff] }
  0x1f   : > { %1271 = vmatmul.mubr.msk.bf16.gmra.mrb[4].mxu0 %vm394_vm2, %v1354_v21  ;;  %v630_v41 = vld [vmem:[%s1479_s6 + $0x98] sm:$0xff]  ;;  %v631_v44 = vld [vmem:[%s1479_s6 + $0xa0] sm:$0xff]  ;;  %v633_v46 = vld [vmem:[%s1479_s6 + $0xb0] sm:$0xff] }
  0x20   : > { %680 = vperm.xlu1 %1345, %v618_v19   ;;  %675 = vperm.xlu0 %1344, %v617_v20   ;;  %v634_v45 = vld [vmem:[%s1479_s6 + $0xb8] sm:$0xff]  ;;  %v636_v47 = vld [vmem:[%s1479_s6 + $0xc8] sm:$0xff]  ;;  %v635_v48 = vld [vmem:[%s1479_s6 + $0xc0] sm:$0xff] }
  0x21   : > { %1287 = vmatmul.mubr.msk.bf16.gmra.mrb[4].mxu1 %vm394_vm2, %v1355_v22  ;;  %1274 = vmatprep.mubr.msk.bf16.mxu0 %vm394_vm2, %v1356_v23  ;;  %v638_v49 = vld [vmem:[%s1479_s6 + $0xd8] sm:$0xff]  ;;  %v637_v50 = vld [vmem:[%s1479_s6 + $0xd0] sm:$0xff]  ;;  %v640_v51 = vld [vmem:[%s1479_s6 + $0xe8] sm:$0xff] }
  0x22   : > { %1290 = vmatprep.mubr.msk.bf16.mxu1 %vm394_vm2, %v1357_v25  ;;  %v639_v52 = vld [vmem:[%s1479_s6 + $0xe0] sm:$0xff]  ;;  %v642_v53 = vld [vmem:[%s1479_s6 + $0xf8] sm:$0xff]  ;;  %v641_v54 = vld [vmem:[%s1479_s6 + $0xf0] sm:$0xff] }
  0x23   : > { %v1586_v14 = vld [vmem:[%s1738_s2] ss:$0 sm:$0xff] }
  0x24   : > { %690 = vperm.xlu1 %1345, %v620_v24   ;;  %685 = vperm.xlu0 %1344, %v619_v26  }
  0x27   : > { %1275 = vmatmul.mubr.msk.bf16.gmra.mrb[8].mxu0 %vm394_vm2, %v1358_v29 }
  0x28   : > { %700 = vperm.xlu1 %1345, %v622_v27   ;;  %695 = vperm.xlu0 %1344, %v621_v28  }
  0x29   : > { %1291 = vmatmul.mubr.msk.bf16.gmra.mrb[8].mxu1 %vm394_vm2, %v1359_v30  ;;  %1278 = vmatprep.mubr.msk.bf16.mxu0 %vm394_vm2, %v1360_v31 }
  0x2a   : > { %1294 = vmatprep.mubr.msk.bf16.mxu1 %vm394_vm2, %v1361_v32 }
  0x2c   : > { %710 = vperm.xlu1 %1345, %v624_v33   ;;  %705 = vperm.xlu0 %1344, %v623_v34  }
  0x2f   : > { %1279 = vmatmul.mubr.msk.bf16.gmra.mrb[12].mxu0 %vm394_vm2, %v1362_v37 }
  0x30   : > { %720 = vperm.xlu1 %1345, %v626_v35   ;;  %715 = vperm.xlu0 %1344, %v625_v36  }
  0x31   : > { %1295 = vmatmul.mubr.msk.bf16.gmra.mrb[12].mxu1 %vm394_vm2, %v1363_v38 }
  0x34   : > { %730 = vperm.xlu1 %1345, %v628_v39   ;;  %725 = vperm.xlu0 %1344, %v627_v40  }
  0x38   : > { %740 = vperm.xlu1 %1345, %v630_v41   ;;  %735 = vperm.xlu0 %1344, %v629_v42  }
  0x3c   : > { %750 = vperm.xlu1 %1345, %v632_v43   ;;  %745 = vperm.xlu0 %1344, %v631_v44  }
  0x40   : > { %760 = vperm.xlu1 %1345, %v634_v45   ;;  %755 = vperm.xlu0 %1344, %v633_v46  }
  0x44   : > { %770 = vperm.xlu1 %1345, %v636_v47   ;;  %765 = vperm.xlu0 %1344, %v635_v48  }
  0x48   : > { %780 = vperm.xlu1 %1345, %v638_v49   ;;  %775 = vperm.xlu0 %1344, %v637_v50  }
  0x4c   : > { %790 = vperm.xlu1 %1345, %v640_v51   ;;  %785 = vperm.xlu0 %1344, %v639_v52  }
  0x50   : > { %800 = vperm.xlu1 %1345, %v642_v53   ;;  %795 = vperm.xlu0 %1344, %v641_v54  }
  0x93   : > { %v646_v55 = vpop.permute.xlu0 %645  ;;  %v656_v56 = vpop.permute.xlu1 %655 }
  0x97   : > { %v651_v57 = vpop.permute.xlu0 %650  ;;  %v661_v58 = vpop.permute.xlu1 %660 }
  0x9b   : > { %v1553_v59 = vpop.permute.xlu0 %665  ;;  %v1555_v60 = vpop.permute.xlu1 %670 }
  0x9f   : > { %v1557_v61 = vpop.permute.xlu0 %675  ;;  %v1559_v62 = vpop.permute.xlu1 %680 }
  0xa3   : > { %v1561_v63 = vpop.permute.xlu0 %685  ;;  %v1563_v0 = vpop.permute.xlu1 %690 }
  0xa7   : > { %v1565_v1 = vpop.permute.xlu0 %695  ;;  %v1567_v2 = vpop.permute.xlu1 %700 }
  0xab   : > { %v1569_v3 = vpop.permute.xlu0 %705  ;;  %v1571_v4 = vpop.permute.xlu1 %710 }
  0xaf   : > { %v1573_v5 = vpop.permute.xlu0 %715  ;;  %v1575_v6 = vpop.permute.xlu1 %720 }
  0xb3   : > { %v726_v7 = vpop.permute.xlu0 %725  ;;  %v731_v8 = vpop.permute.xlu1 %730 }
  0xb7   : > { %v736_v9 = vpop.permute.xlu0 %735  ;;  %v741_v10 = vpop.permute.xlu1 %740 }
  0xbb   : > { %v1577_v11 = vpop.permute.xlu0 %745  ;;  %v1579_v12 = vpop.permute.xlu1 %750 }
  0xbf   : > { %v1581_v13 = vpop.permute.xlu0 %755  ;;  %v1588_v15 = vpop.permute.xlu1 %760 }
  0xc3   : > { %v1590_v16 = vpop.permute.xlu0 %765  ;;  %v1607_v43 = vpop.permute.xlu1 %770 }
  0xc7   : > { %v1609_v48 = vpop.permute.xlu0 %775 }
  0xea   : > { %v1268_v17 = vpop.f32.mrb[0].mxu0 }
  0xeb   : > { %v493_v18 = vadd.f32 %v1268_v17, %v1586_v14  ;;  %v484_v20 = vpop.f32.mrb[1].mxu0 }
  0xec   : > { %v1284_v19 = vpop.f32.mrb[0].mxu1  ;;  %v485_v22 = vadd.f32 %v1586_v14, %v484_v20  ;;  %v1269_v24 = vpop.f32.mrb[2].mxu0 }
  0xed   : > { %v557_v21 = vadd.f32 %v1284_v19, %v1586_v14  ;;  %v548_v23 = vpop.f32.mrb[1].mxu1  ;;  %v805_v25 = vmul.f32 %v656_v56, %v493_v18  ;;  %v496_v27 = vadd.f32 %v1269_v24, %v1586_v14  ;;  %v487_v29 = vpop.f32.mrb[3].mxu0 }
  0xee   : > { %v549_v26 = vadd.f32 %v1586_v14, %v548_v23  ;;  %v1285_v28 = vpop.f32.mrb[2].mxu1  ;;  %v803_v31 = vmul.f32 %v646_v55, %v485_v22  ;;  %v488_v33 = vadd.f32 %v1586_v14, %v487_v29 }
  0xef   : > { %v821_v30 = vmul.f32 %v736_v9, %v557_v21  ;;  %v560_v32 = vadd.f32 %v1285_v28, %v1586_v14  ;;  %v551_v34 = vpop.f32.mrb[3].mxu1  ;;  %v837_v35 = vmax.f32 %v805_v25, 0.0  ;;  %v806_v37 = vmul.f32 %v661_v58, %v496_v27 }
  0xf0   : > { %v819_v36 = vmul.f32 %v726_v7, %v549_v26  ;;  %v552_v38 = vadd.f32 %v1586_v14, %v551_v34  ;;  %v835_v40 = vmax.f32 %v803_v31, 0.0  ;;  %v804_v42 = vmul.f32 %v651_v57, %v488_v33 }
  0xf1   : > { %v853_v39 = vmax.f32 %v821_v30, 0.0  ;;  %v822_v41 = vmul.f32 %v741_v10, %v560_v32  ;;  %v1214_v44 = vpack.c.bf16 %v837_v35, %v837_v35  ;;  %v838_v46 = vmax.f32 %v806_v37, 0.0 }
  0xf2   : > { %v851_v45 = vmax.f32 %v819_v36, 0.0  ;;  %v820_v47 = vmul.f32 %v731_v8, %v552_v38  ;;  %v1212_v50 = vpack.c.bf16 %v835_v40, %v835_v40  ;;  %v836_v52 = vmax.f32 %v804_v42, 0.0  ;;  %v1272_v53 = vpop.f32.mrb[4].mxu0  ;;  %v781_v36 = vpop.permute.xlu1 %780 }
  0xf3   : > { %v1230_v49 = vpack.c.bf16 %v853_v39, %v853_v39  ;;  %v854_v51 = vmax.f32 %v822_v41, 0.0  ;;  %998 = vst.msk [vmem:[%s1605_s15 + $0x8] sm:$0xf] %vm995_vm3, %v1214_v44  ;;  %v1215_v55 = vpack.c.bf16 %v838_v46, %v838_v46  ;;  %v509_v57 = vadd.f32 %v1272_v53, %v1586_v14  ;;  %v500_v7 = vpop.f32.mrb[5].mxu0 }
  0xf4   : > { %v1228_v54 = vpack.c.bf16 %v851_v45, %v851_v45  ;;  %v852_v56 = vmax.f32 %v820_v47, 0.0  ;;  %v1288_v58 = vpop.f32.mrb[4].mxu1  ;;  %996 = vst.msk [vmem:[%s1605_s15] sm:$0xf] %vm995_vm3, %v1212_v50  ;;  %v1213_v9 = vpack.c.bf16 %v836_v52, %v836_v52  ;;  %v501_v17 = vadd.f32 %v1586_v14, %v500_v7  ;;  %v1273_v19 = vpop.f32.mrb[6].mxu0 }
  0xf5   : > { %1014 = vst.msk [vmem:[%s1605_s15 + $0x48] sm:$0xf] %vm995_vm3, %v1230_v49  ;;  %v1231_v8 = vpack.c.bf16 %v854_v51, %v854_v51  ;;  %v573_v10 = vadd.f32 %v1288_v58, %v1586_v14  ;;  %v564_v18 = vpop.f32.mrb[5].mxu1  ;;  %999 = vst.msk [vmem:[%s1605_s15 + $0xc] sm:$0xf] %vm995_vm3, %v1215_v55  ;;  %v809_v21 = vmul.f32 %v1557_v61, %v509_v57  ;;  %v503_v25 = vpop.f32.mrb[7].mxu0 }
  0xf6   : > { %1012 = vst.msk [vmem:[%s1605_s15 + $0x40] sm:$0xf] %vm995_vm3, %v1228_v54  ;;  %v1229_v20 = vpack.c.bf16 %v852_v56, %v852_v56  ;;  %v565_v22 = vadd.f32 %v1586_v14, %v564_v18  ;;  %v512_v23 = vadd.f32 %v1273_v19, %v1586_v14  ;;  %v1289_v24 = vpop.f32.mrb[6].mxu1  ;;  %997 = vst.msk [vmem:[%s1605_s15 + $0x4] sm:$0xf] %vm995_vm3, %v1213_v9 }
  0xf7   : > { %1015 = vst.msk [vmem:[%s1605_s15 + $0x4c] sm:$0xf] %vm995_vm3, %v1231_v8  ;;  %v825_v26 = vmul.f32 %v1581_v13, %v573_v10  ;;  %v807_v27 = vmul.f32 %v1553_v59, %v501_v17  ;;  %v576_v28 = vadd.f32 %v1289_v24, %v1586_v14  ;;  %v504_v29 = vadd.f32 %v1586_v14, %v503_v25  ;;  %v567_v30 = vpop.f32.mrb[7].mxu1 }
  0xf8   : > { %1013 = vst.msk [vmem:[%s1605_s15 + $0x44] sm:$0xf] %vm995_vm3, %v1229_v20  ;;  %v841_v61 = vmax.f32 %v809_v21, 0.0  ;;  %v823_v31 = vmul.f32 %v1577_v11, %v565_v22  ;;  %v810_v32 = vmul.f32 %v1559_v62, %v512_v23  ;;  %v568_v33 = vadd.f32 %v1586_v14, %v567_v30  ;;  %v1643_v11 = vpop.permute.xlu0 %785 }
  0xf9   : > { %v857_v34 = vmax.f32 %v825_v26, 0.0  ;;  %v839_v35 = vmax.f32 %v807_v27, 0.0  ;;  %v826_v13 = vmul.f32 %v1588_v15, %v576_v28  ;;  %v808_v59 = vmul.f32 %v1555_v60, %v504_v29  ;;  %v791_v26 = vpop.permute.xlu1 %790 }
  0xfa   : > { %v1218_v37 = vpack.c.bf16 %v841_v61, %v841_v61  ;;  %v855_v38 = vmax.f32 %v823_v31, 0.0  ;;  %v842_v39 = vmax.f32 %v810_v32, 0.0  ;;  %v824_v40 = vmul.f32 %v1579_v12, %v568_v33  ;;  %v1276_v45 = vpop.f32.mrb[8].mxu0 }
  0xfb   : > { %v1234_v62 = vpack.c.bf16 %v857_v34, %v857_v34  ;;  %v1216_v41 = vpack.c.bf16 %v839_v35, %v839_v35  ;;  %v858_v42 = vmax.f32 %v826_v13, 0.0  ;;  %v840_v44 = vmax.f32 %v808_v59, 0.0  ;;  %v516_v50 = vpop.f32.mrb[9].mxu0 }
  0xfc   : > { %1002 = vst.msk [vmem:[%s1605_s15 + $0x18] sm:$0xf] %vm995_vm3, %v1218_v37  ;;  %v1232_v60 = vpack.c.bf16 %v855_v38, %v855_v38  ;;  %v1219_v15 = vpack.c.bf16 %v842_v39, %v842_v39  ;;  %v856_v46 = vmax.f32 %v824_v40, 0.0  ;;  %v525_v47 = vadd.f32 %v1276_v45, %v1586_v14  ;;  %v1292_v49 = vpop.f32.mrb[8].mxu1  ;;  %v1277_v55 = vpop.f32.mrb[10].mxu0 }
  0xfd   : > { %1018 = vst.msk [vmem:[%s1605_s15 + $0x58] sm:$0xf] %vm995_vm3, %v1234_v62  ;;  %1000 = vst.msk [vmem:[%s1605_s15 + $0x10] sm:$0xf] %vm995_vm3, %v1216_v41  ;;  %v1235_v12 = vpack.c.bf16 %v858_v42, %v858_v42  ;;  %v1217_v51 = vpack.c.bf16 %v840_v44, %v840_v44  ;;  %v589_v52 = vadd.f32 %v1292_v49, %v1586_v14  ;;  %v580_v54 = vpop.f32.mrb[9].mxu1  ;;  %v519_v9 = vpop.f32.mrb[11].mxu0 }
  0xfe   : > { %v517_v53 = vadd.f32 %v1586_v14, %v516_v50  ;;  %1016 = vst.msk [vmem:[%s1605_s15 + $0x50] sm:$0xf] %vm995_vm3, %v1232_v60  ;;  %1003 = vst.msk [vmem:[%s1605_s15 + $0x1c] sm:$0xf] %vm995_vm3, %v1219_v15  ;;  %v1233_v56 = vpack.c.bf16 %v856_v46, %v856_v46  ;;  %v813_v57 = vmul.f32 %v1565_v1, %v525_v47  ;;  %v1293_v8 = vpop.f32.mrb[10].mxu1  ;;  %v796_v61 = vpop.permute.xlu0 %795 }
  0xff   : > { %v581_v58 = vadd.f32 %v1586_v14, %v580_v54  ;;  %v528_v7 = vadd.f32 %v1277_v55, %v1586_v14  ;;  %1019 = vst.msk [vmem:[%s1605_s15 + $0x5c] sm:$0xf] %vm995_vm3, %v1235_v12  ;;  %1001 = vst.msk [vmem:[%s1605_s15 + $0x14] sm:$0xf] %vm995_vm3, %v1217_v51  ;;  %v829_v10 = vmul.f32 %v1609_v48, %v589_v52  ;;  %v583_v20 = vpop.f32.mrb[11].mxu1  ;;  %v801_v51 = vpop.permute.xlu1 %800 }
 0x100   : > { %v811_v17 = vmul.f32 %v1561_v63, %v517_v53  ;;  %v592_v18 = vadd.f32 %v1293_v8, %v1586_v14  ;;  %v520_v19 = vadd.f32 %v1586_v14, %v519_v9  ;;  %1017 = vst.msk [vmem:[%s1605_s15 + $0x54] sm:$0xf] %vm995_vm3, %v1233_v56  ;;  %v845_v1 = vmax.f32 %v813_v57, 0.0 }
 0x101   : > { %v827_v21 = vmul.f32 %v1590_v16, %v581_v58  ;;  %v814_v22 = vmul.f32 %v1567_v2, %v528_v7  ;;  %v584_v23 = vadd.f32 %v1586_v14, %v583_v20  ;;  %v861_v24 = vmax.f32 %v829_v10, 0.0 }
 0x102   : > { %v843_v25 = vmax.f32 %v811_v17, 0.0  ;;  %v830_v48 = vmul.f32 %v781_v36, %v592_v18  ;;  %v812_v63 = vmul.f32 %v1563_v0, %v520_v19  ;;  %v1222_v27 = vpack.c.bf16 %v845_v1, %v845_v1  ;;  %v1280_v33 = vpop.f32.mrb[12].mxu0 }
 0x103   : > { %v859_v28 = vmax.f32 %v827_v21, 0.0  ;;  %v846_v29 = vmax.f32 %v814_v22, 0.0  ;;  %v828_v30 = vmul.f32 %v1607_v43, %v584_v23  ;;  %v1238_v16 = vpack.c.bf16 %v861_v24, %v861_v24  ;;  %v532_v36 = vpop.f32.mrb[13].mxu0 }
 0x104   : > { %v1220_v31 = vpack.c.bf16 %v843_v25, %v843_v25  ;;  %v862_v2 = vmax.f32 %v830_v48, 0.0  ;;  %v844_v32 = vmax.f32 %v812_v63, 0.0  ;;  %1006 = vst.msk [vmem:[%s1605_s15 + $0x28] sm:$0xf] %vm995_vm3, %v1222_v27  ;;  %v541_v13 = vadd.f32 %v1280_v33, %v1586_v14  ;;  %v1296_v59 = vpop.f32.mrb[12].mxu1  ;;  %v1281_v62 = vpop.f32.mrb[14].mxu0 }
 0x105   : > { %v1236_v34 = vpack.c.bf16 %v859_v28, %v859_v28  ;;  %v1223_v0 = vpack.c.bf16 %v846_v29, %v846_v29  ;;  %v860_v35 = vmax.f32 %v828_v30, 0.0  ;;  %1022 = vst.msk [vmem:[%s1605_s15 + $0x68] sm:$0xf] %vm995_vm3, %v1238_v16  ;;  %v605_v38 = vadd.f32 %v1296_v59, %v1586_v14  ;;  %v596_v40 = vpop.f32.mrb[13].mxu1  ;;  %v535_v15 = vpop.f32.mrb[15].mxu0 }
 0x106   : > { %1004 = vst.msk [vmem:[%s1605_s15 + $0x20] sm:$0xf] %vm995_vm3, %v1220_v31  ;;  %v1239_v43 = vpack.c.bf16 %v862_v2, %v862_v2  ;;  %v1221_v37 = vpack.c.bf16 %v844_v32, %v844_v32  ;;  %v533_v39 = vadd.f32 %v1586_v14, %v532_v36  ;;  %v817_v42 = vmul.f32 %v1573_v5, %v541_v13  ;;  %v1297_v60 = vpop.f32.mrb[14].mxu1 }
 0x107   : > { %1020 = vst.msk [vmem:[%s1605_s15 + $0x60] sm:$0xf] %vm995_vm3, %v1236_v34  ;;  %1007 = vst.msk [vmem:[%s1605_s15 + $0x2c] sm:$0xf] %vm995_vm3, %v1223_v0  ;;  %v1237_v41 = vpack.c.bf16 %v860_v35, %v860_v35  ;;  %v597_v44 = vadd.f32 %v1586_v14, %v596_v40  ;;  %v544_v45 = vadd.f32 %v1281_v62, %v1586_v14  ;;  %v599_v12 = vpop.f32.mrb[15].mxu1 }
 0x108   : > { %1023 = vst.msk [vmem:[%s1605_s15 + $0x6c] sm:$0xf] %vm995_vm3, %v1239_v43  ;;  %1005 = vst.msk [vmem:[%s1605_s15 + $0x24] sm:$0xf] %vm995_vm3, %v1221_v37  ;;  %v833_v46 = vmul.f32 %v796_v61, %v605_v38  ;;  %v815_v47 = vmul.f32 %v1569_v3, %v533_v39  ;;  %v608_v49 = vadd.f32 %v1297_v60, %v1586_v14  ;;  %v849_v5 = vmax.f32 %v817_v42, 0.0 }
 0x109   : > { %v536_v50 = vadd.f32 %v1586_v14, %v535_v15  ;;  %1021 = vst.msk [vmem:[%s1605_s15 + $0x64] sm:$0xf] %vm995_vm3, %v1237_v41  ;;  %v831_v52 = vmul.f32 %v1643_v11, %v597_v44  ;;  %v818_v53 = vmul.f32 %v1575_v6, %v544_v45  ;;  %v600_v54 = vadd.f32 %v1586_v14, %v599_v12 }
 0x10a   : > { %v865_v55 = vmax.f32 %v833_v46, 0.0  ;;  %v847_v56 = vmax.f32 %v815_v47, 0.0  ;;  %v834_v3 = vmul.f32 %v801_v51, %v608_v49  ;;  %v1226_v58 = vpack.c.bf16 %v849_v5, %v849_v5 }
 0x10b   : > { %v816_v57 = vmul.f32 %v1571_v4, %v536_v50  ;;  %v863_v7 = vmax.f32 %v831_v52, 0.0  ;;  %v850_v8 = vmax.f32 %v818_v53, 0.0  ;;  %v832_v9 = vmul.f32 %v791_v26, %v600_v54 }
 0x10c   : > { %v1242_v10 = vpack.c.bf16 %v865_v55, %v865_v55  ;;  %v1224_v11 = vpack.c.bf16 %v847_v56, %v847_v56  ;;  %v866_v6 = vmax.f32 %v834_v3, 0.0  ;;  %1010 = vst.msk [vmem:[%s1605_s15 + $0x38] sm:$0xf] %vm995_vm3, %v1226_v58 }
 0x10d   : > { %v848_v14 = vmax.f32 %v816_v57, 0.0  ;;  %v1240_v17 = vpack.c.bf16 %v863_v7, %v863_v7  ;;  %v1227_v18 = vpack.c.bf16 %v850_v8, %v850_v8  ;;  %v864_v19 = vmax.f32 %v832_v9, 0.0 }
 0x10e   : > { %1026 = vst.msk [vmem:[%s1605_s15 + $0x78] sm:$0xf] %vm995_vm3, %v1242_v10  ;;  %1008 = vst.msk [vmem:[%s1605_s15 + $0x30] sm:$0xf] %vm995_vm3, %v1224_v11  ;;  %v1243_v4 = vpack.c.bf16 %v866_v6, %v866_v6 }
 0x10f   : > { %v1225_v20 = vpack.c.bf16 %v848_v14, %v848_v14  ;;  %1024 = vst.msk [vmem:[%s1605_s15 + $0x70] sm:$0xf] %vm995_vm3, %v1240_v17  ;;  %1011 = vst.msk [vmem:[%s1605_s15 + $0x3c] sm:$0xf] %vm995_vm3, %v1227_v18  ;;  %v1241_v1 = vpack.c.bf16 %v864_v19, %v864_v19 }
 0x110   : > { %1027 = vst.msk [vmem:[%s1605_s15 + $0x7c] sm:$0xf] %vm995_vm3, %v1243_v4 }
 0x111   : > { %1009 = vst.msk [vmem:[%s1605_s15 + $0x34] sm:$0xf] %vm995_vm3, %v1225_v20  ;;  %1025 = vst.msk [vmem:[%s1605_s15 + $0x74] sm:$0xf] %vm995_vm3, %v1241_v1 }
 0x112 PF: > { %s14_s19 = sadd.s32 1, %s1402_s19   ;;  %s1741_s15 = smov %s1394_s17 }
 0x113   : > { %p11_p7 = scmp.ge.s32.totalorder %s14_s19, 10   ;;  %s1742_s16 = smov %s1398_s18 }
 0x114   : > { %s1743_s17 = smov %s1746_s20  ;;  %s1744_s18 = smov %s1750_s21 }
 0x115   :  { %13 = sbr.rel (!%p11_p7) target bundleno = 3 (0x3), region = 69 }

// kernel: _lambda_.5
= control target key start
LH: loop header
LB: loop body
LE: loop exit
PB: predicated region body
PF: predicated region fallthrough
CT: control target
= control target key end

     0   :  { %s2832_s15 = smov 0   ;;  %s2834_s16 = smov 0   ;;  %s3309_s0 = inlined_call_operand.vmem [shape: bf16[2,256,1600], index: 0, kind: input, shape index: {}]   ;;  %s3310_s1 = inlined_call_operand.vmem [shape: bf16[1600,128], index: 1, kind: input, shape index: {}]   ;;  %s3311_s2 = inlined_call_operand.vmem [shape: f32[1,128], index: 2, kind: input, shape index: {}]   ;;  %s3312_s3 = inlined_call_operand.vmem [shape: f32[256,1], index: 3, kind: input, shape index: {}]   ;;  %s3313_s4 = inlined_call_operand.vmem [shape: bf16[2,256,128], index: 4, kind: output, shape index: {}]  }
   0x1   :  { %s2836_s17 = smov 0   ;;  %s2838_s18 = smov 0  }
   0x2   :  { %s2840_s19 = smov 0  }
   0x3 LB: > { %s23_s20 = sadd.s32 1, %s2796_s17  ;;  %s26_s21 = sadd.s32 1, %s2800_s18  ;;  %s2804_s19 = sphi %s2840_s19, %s14_s19   ;;  %s2800_s18 = sphi %s2838_s18, %s3317_s18   ;;  %s2796_s17 = sphi %s2836_s17, %s3316_s17   ;;  %s2792_s16 = sphi %s2834_s16, %s3315_s16   ;;  %s2788_s15 = sphi %s2832_s15, %s3314_s15  }
   0x4   : > { %p24_p0 = scmp.ge.s32.totalorder %s23_s20, 4  ;;  %p2067_p1 = scmp.ge.s32.totalorder %s2804_s19, 1 }
   0x5   : > { %p195_p2 = scmp.lt.s32.totalorder %s2804_s19, 9 }
   0x6   : > { %s3319_s20 = smov (%p24_p0, %s23_s20), 0  ;;  %s3321_s21 = smov (!%p24_p0, %s26_s21), %s2800_s18 }
   0x7   : > { %p196_p3 = pnand %p2067_p1, %p195_p2  ;;  %p28_p4 = scmp.ge.s32.totalorder %s3321_s21, 2 }
   0x8   : > { %v2590_v0 = vld [vmem:[%s3310_s1 + $0x40] sm:$0xff] (!%p196_p3)   ;;  %v2594_v4 = vld [vmem:[%s3310_s1 + $0x48] sm:$0xff] (!%p196_p3)   ;;  %s2068_s12 = sshll.u32 (!%p196_p3), %s2788_s15, 3  ;;  %v2598_v8 = vld [vmem:[%s3310_s1 + $0x50] sm:$0xff] (!%p196_p3)   ;;  %p236_p5 = scmp.lt.s32.totalorder (!%p196_p3), %s2792_s16, 1  ;;  %v2806_v28 = vmov (!%p196_p3), 0  }
   0x9   : > { %s3323_s21 = smov (%p28_p4, %s3321_s21), 0  ;;  %199 = sbr.rel (%p196_p3) target bundleno = 364 (0x16c), region = 36 }
   0xa   : > { %v2591_v1 = vld [vmem:[%s3310_s1 + $0xc0] sm:$0xff] (!%p196_p3)   ;;  %2273 = vmatprep.subr.bf16.mxu0 (!%p196_p3), %v2590_v0  ;;  %v2595_v5 = vld [vmem:[%s3310_s1 + $0xc8] sm:$0xff] (!%p196_p3)   ;;  %v2599_v9 = vld [vmem:[%s3310_s1 + $0xd0] sm:$0xff] (!%p196_p3)   ;;  %p238_p6 = scmp.lt.s32.totalorder (!%p196_p3), %s2068_s12, 31  ;;  %2589 = vset.pattern.permute.xlu1 (!%p196_p3), %v2806_v28  ;;  %vm1386_vm0 = vcmask (!%p196_p3), 523264  }
   0xb   : > { %v2592_v2 = vld [vmem:[%s3310_s1] sm:$0xff] (!%p196_p3)   ;;  %2313 = vmatprep.subr.bf16.mxu1 (!%p196_p3), %v2591_v1  ;;  %v2596_v6 = vld [vmem:[%s3310_s1 + $0x8] sm:$0xff] (!%p196_p3)   ;;  %v2600_v10 = vld [vmem:[%s3310_s1 + $0x10] sm:$0xff] (!%p196_p3)   ;;  %2588 = vset.pattern.permute.xlu0 (!%p196_p3), %v2806_v28 }
   0xc   : > { %v2593_v3 = vld [vmem:[%s3310_s1 + $0x80] sm:$0xff] (!%p196_p3)   ;;  %2274 = vmatpush3.bf16.msra.mxu0 (!%p196_p3), %v2592_v2  ;;  %v2597_v7 = vld [vmem:[%s3310_s1 + $0x88] sm:$0xff] (!%p196_p3)   ;;  %v2601_v11 = vld [vmem:[%s3310_s1 + $0x90] sm:$0xff] (!%p196_p3)  }
   0xd   : > { %2314 = vmatpush3.bf16.msra.mxu1 (!%p196_p3), %v2593_v3  ;;  %2275 = vmatprep.subr.bf16.mxu0 (!%p196_p3), %v2594_v4  ;;  %v2602_v12 = vld [vmem:[%s3310_s1 + $0x58] sm:$0xff] (!%p196_p3)   ;;  %v2606_v16 = vld [vmem:[%s3310_s1 + $0x60] sm:$0xff] (!%p196_p3)   ;;  %v2610_v20 = vld [vmem:[%s3310_s1 + $0x68] sm:$0xff] (!%p196_p3)  }
   0xe   : > { %2315 = vmatprep.subr.bf16.mxu1 (!%p196_p3), %v2595_v5  ;;  %v2603_v13 = vld [vmem:[%s3310_s1 + $0xd8] sm:$0xff] (!%p196_p3)   ;;  %v2607_v17 = vld [vmem:[%s3310_s1 + $0xe0] sm:$0xff] (!%p196_p3)   ;;  %v2611_v21 = vld [vmem:[%s3310_s1 + $0xe8] sm:$0xff] (!%p196_p3)  }
   0xf   : > { %v2604_v14 = vld [vmem:[%s3310_s1 + $0x18] sm:$0xff] (!%p196_p3)   ;;  %v2608_v18 = vld [vmem:[%s3310_s1 + $0x20] sm:$0xff] (!%p196_p3)   ;;  %v2612_v22 = vld [vmem:[%s3310_s1 + $0x28] sm:$0xff] (!%p196_p3)  }
  0x10   : > { %2276 = vmatpush3.bf16.msra.mxu0 %v2596_v6  ;;  %s3325_s16 = smov (!%p236_p5, %s2792_s16), 1  ;;  %s3327_s12 = smov (!%p238_p6, %s2068_s12), 31  ;;  %v2605_v15 = vld [vmem:[%s3310_s1 + $0x98] sm:$0xff]   ;;  %v2609_v19 = vld [vmem:[%s3310_s1 + $0xa0] sm:$0xff]   ;;  %v2613_v23 = vld [vmem:[%s3310_s1 + $0xa8] sm:$0xff]  }
  0x11   : > { %2316 = vmatpush3.bf16.msra.mxu1 %v2597_v7  ;;  %2277 = vmatprep.subr.bf16.mxu0 %v2598_v8  ;;  %s2546_s14 = smul.u32 416, %s3325_s16  ;;  %v2614_v24 = vld [vmem:[%s3310_s1 + $0x70] sm:$0xff]   ;;  %v2618_v29 = vld [vmem:[%s3310_s1 + $0x78] sm:$0xff]   ;;  %v2628_v37 = vld [vmem:[%s3310_s1 + $0x140] sm:$0xff]   ;;  %s2071_s26 = sshll.u32 %s3327_s12, 3 }
  0x12   : > { %2317 = vmatprep.subr.bf16.mxu1 %v2599_v9  ;;  %s2545_s24 = smul.u32 13, %s3327_s12  ;;  %v2615_v25 = vld [vmem:[%s3310_s1 + $0xf0] sm:$0xff]   ;;  %v2619_v30 = vld [vmem:[%s3310_s1 + $0xf8] sm:$0xff]   ;;  %v2629_v38 = vld [vmem:[%s3310_s1 + $0x1c0] sm:$0xff]   ;;  %s3228_s30 = scalar_lea.vmem %s3312_s3, %s2071_s26 }
  0x13   : > { %v2616_v26 = vld [vmem:[%s3310_s1 + $0x30] sm:$0xff]   ;;  %v2620_v31 = vld [vmem:[%s3310_s1 + $0x38] sm:$0xff]   ;;  %v2630_v39 = vld [vmem:[%s3310_s1 + $0x100] sm:$0xff]  }
  0x14   : > { %2278 = vmatpush3.bf16.msra.mxu0 %v2600_v10  ;;  %s242_s6 = sadd.s32 %s2546_s14, %s2545_s24  ;;  %v2617_v27 = vld [vmem:[%s3310_s1 + $0xb0] sm:$0xff]   ;;  %v2621_v32 = vld [vmem:[%s3310_s1 + $0xb8] sm:$0xff]   ;;  %v2631_v40 = vld [vmem:[%s3310_s1 + $0x180] sm:$0xff]  }
  0x15   : > { %2318 = vmatpush3.bf16.msra.mxu1 %v2601_v11  ;;  %2279 = vmatprep.subr.bf16.mxu0 %v2602_v12  ;;  %s2069_s22 = sshll.u32 %s242_s6, 2  ;;  %v2632_v41 = vld [vmem:[%s3310_s1 + $0x148] sm:$0xff]   ;;  %v2642_v49 = vld [vmem:[%s3310_s1 + $0x150] sm:$0xff]   ;;  %v2646_v53 = vld [vmem:[%s3310_s1 + $0x158] sm:$0xff]  }
  0x16   : > { %2319 = vmatprep.subr.bf16.mxu1 %v2603_v13  ;;  %s2968_s5 = scalar_lea.vmem %s3309_s0, %s2069_s22  ;;  %v2633_v42 = vld [vmem:[%s3310_s1 + $0x1c8] sm:$0xff]   ;;  %v2643_v50 = vld [vmem:[%s3310_s1 + $0x1d0] sm:$0xff]   ;;  %v2647_v54 = vld [vmem:[%s3310_s1 + $0x1d8] sm:$0xff]  }
  0x17   : > { %v2622_v33 = vld [vmem:[%s2968_s5] ss:$52 sps:$4 sm:$0xff]   ;;  %v2624_v34 = vld [vmem:[%s2968_s5 + $0x4] ss:$52 sps:$4 sm:$0xff]   ;;  %v2625_v35 = vld [vmem:[%s2968_s5 + $0x8] ss:$52 sps:$4 sm:$0xff]  }
  0x18   : > { %2280 = vmatpush3.bf16.msra.mxu0 %v2604_v14  ;;  %v2627_v36 = vld [vmem:[%s2968_s5 + $0xc] ss:$52 sps:$4 sm:$0xff]   ;;  %1431 = vmatprep.mubr.bf16.mxu0 %v2624_v34  ;;  %v2638_v46 = vld [vmem:[%s2968_s5 + $0x74] ss:$52 sps:$4 sm:$0xff]   ;;  %v2641_v48 = vld [vmem:[%s2968_s5 + $0x70] ss:$52 sps:$4 sm:$0xff]  }
  0x19   : > { %2320 = vmatpush3.bf16.msra.mxu1 %v2605_v15  ;;  %2281 = vmatprep.subr.bf16.mxu0 %v2606_v16  ;;  %v2634_v43 = vld [vmem:[%s3310_s1 + $0x108] sm:$0xff]   ;;  %v2644_v51 = vld [vmem:[%s3310_s1 + $0x110] sm:$0xff]   ;;  %v2648_v55 = vld [vmem:[%s3310_s1 + $0x118] sm:$0xff]  }
  0x1a   : > { %2321 = vmatprep.subr.bf16.mxu1 %v2607_v17  ;;  %1496 = vmatprep.mubr.bf16.mxu1 %v2627_v36  ;;  %v2635_v44 = vld [vmem:[%s3310_s1 + $0x188] sm:$0xff]   ;;  %v2645_v52 = vld [vmem:[%s3310_s1 + $0x190] sm:$0xff]   ;;  %v2649_v56 = vld [vmem:[%s3310_s1 + $0x198] sm:$0xff]  }
  0x1b   : > { %v2636_v45 = vld [vmem:[%s2968_s5 + $0x6c] ss:$52 sps:$4 sm:$0xff]   ;;  %v2640_v47 = vld [vmem:[%s2968_s5 + $0x68] ss:$52 sps:$4 sm:$0xff]   ;;  %v2654_v59 = vld [vmem:[%s2968_s5 + $0xd0] ss:$52 sps:$4 sm:$0xff]  }
  0x1c   : > { %2282 = vmatpush3.bf16.msra.mxu0 %v2608_v18  ;;  %v2650_v57 = vld [vmem:[%s2968_s5 + $0xd4] ss:$52 sps:$4 sm:$0xff]   ;;  %v2652_v58 = vld [vmem:[%s2968_s5 + $0xdc] ss:$52 sps:$4 sm:$0xff]   ;;  %v2655_v60 = vld [vmem:[%s2968_s5 + $0xd8] ss:$52 sps:$4 sm:$0xff]  }
  0x1d   : > { %2322 = vmatpush3.bf16.msra.mxu1 %v2609_v19  ;;  %2283 = vmatprep.subr.bf16.mxu0 %v2610_v20  ;;  %v2656_v61 = vld [vmem:[%s3310_s1 + $0x160] sm:$0xff]   ;;  %v2660_v1 = vld [vmem:[%s3310_s1 + $0x168] sm:$0xff]   ;;  %v2664_v5 = vld [vmem:[%s2968_s5 + $0x13c] ss:$52 sps:$4 sm:$0xff]  }
  0x1e   : > { %2323 = vmatprep.subr.bf16.mxu1 %v2611_v21  ;;  %v2657_v62 = vld [vmem:[%s3310_s1 + $0x1e0] sm:$0xff]   ;;  %v2661_v2 = vld [vmem:[%s3310_s1 + $0x1e8] sm:$0xff]   ;;  %v2670_v9 = vld [vmem:[%s3310_s1 + $0x170] sm:$0xff]  }
  0x1f   : > { %v2658_v63 = vld [vmem:[%s3310_s1 + $0x120] sm:$0xff]   ;;  %v2662_v3 = vld [vmem:[%s3310_s1 + $0x128] sm:$0xff]   ;;  %v2671_v10 = vld [vmem:[%s3310_s1 + $0x1f0] sm:$0xff]  }
  0x20   : > { %2284 = vmatpush3.bf16.msra.mxu0 %v2612_v22  ;;  %v2659_v0 = vld [vmem:[%s3310_s1 + $0x1a0] sm:$0xff]   ;;  %v2663_v4 = vld [vmem:[%s3310_s1 + $0x1a8] sm:$0xff]   ;;  %v2672_v11 = vld [vmem:[%s3310_s1 + $0x130] sm:$0xff]  }
  0x21   : > { %2324 = vmatpush3.bf16.msra.mxu1 %v2613_v23  ;;  %2285 = vmatprep.subr.bf16.mxu0 %v2614_v24  ;;  %v2666_v6 = vld [vmem:[%s2968_s5 + $0x144] ss:$52 sps:$4 sm:$0xff]   ;;  %v2669_v8 = vld [vmem:[%s2968_s5 + $0x140] ss:$52 sps:$4 sm:$0xff]   ;;  %v2683_v20 = vld [vmem:[%s2968_s5 + $0x1c] ss:$52 sps:$4 sm:$0xff]  }
  0x22   : > { %2325 = vmatprep.subr.bf16.mxu1 %v2615_v25  ;;  %v2668_v7 = vld [vmem:[%s2968_s5 + $0x138] ss:$52 sps:$4 sm:$0xff]   ;;  %v2673_v12 = vld [vmem:[%s3310_s1 + $0x1b0] sm:$0xff]   ;;  %v2684_v21 = vld [vmem:[%s3310_s1 + $0x240] sm:$0xff]  }
  0x23   : > { %v2674_v13 = vld [vmem:[%s3310_s1 + $0x178] sm:$0xff]   ;;  %v2678_v17 = vld [vmem:[%s2968_s5 + $0x10] ss:$52 sps:$4 sm:$0xff]   ;;  %v2680_v18 = vld [vmem:[%s2968_s5 + $0x14] ss:$52 sps:$4 sm:$0xff]  }
  0x24   : > { %2286 = vmatpush3.bf16.msra.mxu0 %v2616_v26  ;;  %v2675_v14 = vld [vmem:[%s3310_s1 + $0x1f8] sm:$0xff]   ;;  %v2685_v22 = vld [vmem:[%s3310_s1 + $0x2c0] sm:$0xff]   ;;  %v2688_v25 = vld [vmem:[%s3310_s1 + $0x248] sm:$0xff]  }
  0x25   : > { %2326 = vmatpush3.bf16.msra.mxu1 %v2617_v27  ;;  %2287 = vmatprep.subr.bf16.mxu0 %v2618_v29  ;;  %v2676_v15 = vld [vmem:[%s3310_s1 + $0x138] sm:$0xff]   ;;  %v2686_v23 = vld [vmem:[%s3310_s1 + $0x200] sm:$0xff]   ;;  %v2689_v26 = vld [vmem:[%s3310_s1 + $0x2c8] sm:$0xff]  }
  0x26   : > { %2327 = vmatprep.subr.bf16.mxu1 %v2619_v30  ;;  %v2677_v16 = vld [vmem:[%s3310_s1 + $0x1b8] sm:$0xff]   ;;  %v2687_v24 = vld [vmem:[%s3310_s1 + $0x280] sm:$0xff]   ;;  %v2690_v27 = vld [vmem:[%s3310_s1 + $0x208] sm:$0xff]  }
  0x27   : > { %v2681_v19 = vld [vmem:[%s2968_s5 + $0x18] ss:$52 sps:$4 sm:$0xff]   ;;  %v2692_v29 = vld [vmem:[%s2968_s5 + $0x7c] ss:$52 sps:$4 sm:$0xff]  }
  0x28   : > { %2288 = vmatpush3.bf16.msra.mxu0 %v2620_v31  ;;  %v2691_v28 = vld [vmem:[%s3310_s1 + $0x288] sm:$0xff]   ;;  %v2694_v30 = vld [vmem:[%s2968_s5 + $0x84] ss:$52 sps:$4 sm:$0xff]   ;;  %v2699_v34 = vld [vmem:[%s3310_s1 + $0x2d0] sm:$0xff]  }
  0x29   : > { %2328 = vmatpush3.bf16.msra.mxu1 %v2621_v32  ;;  %2353 = vmatprep.subr.bf16.mxu0 %v2628_v37  ;;  %v2696_v31 = vld [vmem:[%s2968_s5 + $0x78] ss:$52 sps:$4 sm:$0xff]   ;;  %v2697_v32 = vld [vmem:[%s2968_s5 + $0x80] ss:$52 sps:$4 sm:$0xff]  }
  0x2a   : > { %2393 = vmatprep.subr.bf16.mxu1 %v2629_v38  ;;  %v2701_v36 = vld [vmem:[%s3310_s1 + $0x290] sm:$0xff]   ;;  %v2702_v37 = vld [vmem:[%s3310_s1 + $0x258] sm:$0xff]  }
  0x2b   : > { %1432 = vmatmul.mubr.bf16.vlgmr.msra.gmra.mrb[0].mxu0 %v2622_v33  ;;  %v2698_v33 = vld [vmem:[%s3310_s1 + $0x250] sm:$0xff]   ;;  %v2703_v38 = vld [vmem:[%s3310_s1 + $0x2d8] sm:$0xff]  }
  0x2c   : > { %1497 = vmatmul.mubr.bf16.vlgmr.msra.gmra.mrb[0].mxu1 %v2625_v35  ;;  %2354 = vmatpush3.bf16.msra.mxu0 %v2630_v39  ;;  %v2700_v35 = vld [vmem:[%s3310_s1 + $0x210] sm:$0xff]   ;;  %v2704_v39 = vld [vmem:[%s3310_s1 + $0x218] sm:$0xff]  }
  0x2d   : > { %2394 = vmatpush3.bf16.msra.mxu1 %v2631_v40  ;;  %2355 = vmatprep.subr.bf16.mxu0 %v2632_v41  ;;  %v2705_v40 = vld [vmem:[%s3310_s1 + $0x298] sm:$0xff]  }
  0x2e   : > { %2395 = vmatprep.subr.bf16.mxu1 %v2633_v42  ;;  %1439 = vmatprep.mubr.bf16.mxu0 %v2636_v45  ;;  %v2706_v41 = vld [vmem:[%s2968_s5 + $0xe4] ss:$52 sps:$4 sm:$0xff]   ;;  %v2708_v42 = vld [vmem:[%s2968_s5 + $0xec] ss:$52 sps:$4 sm:$0xff]  }
  0x2f   : > { %1504 = vmatprep.mubr.bf16.mxu1 %v2638_v46  ;;  %v2712_v45 = vld [vmem:[%s3310_s1 + $0x260] sm:$0xff]  }
  0x30   : > { %2356 = vmatpush3.bf16.msra.mxu0 %v2634_v43  ;;  %v2710_v43 = vld [vmem:[%s2968_s5 + $0xe0] ss:$52 sps:$4 sm:$0xff]  }
  0x31   : > { %2396 = vmatpush3.bf16.msra.mxu1 %v2635_v44  ;;  %2357 = vmatprep.subr.bf16.mxu0 %v2642_v49  ;;  %v2711_v44 = vld [vmem:[%s2968_s5 + $0xe8] ss:$52 sps:$4 sm:$0xff]   ;;  %v2713_v46 = vld [vmem:[%s3310_s1 + $0x2e0] sm:$0xff]  }
  0x32   : > { %2397 = vmatprep.subr.bf16.mxu1 %v2643_v50  ;;  %v2716_v49 = vld [vmem:[%s3310_s1 + $0x268] sm:$0xff]  }
  0x33   : > { %1440 = vmatmul.mubr.bf16.gmra.mrb[4].mxu0 %v2640_v47  ;;  %v2714_v47 = vld [vmem:[%s3310_s1 + $0x220] sm:$0xff]   ;;  %v2717_v50 = vld [vmem:[%s3310_s1 + $0x2e8] sm:$0xff]  }
  0x34   : > { %1505 = vmatmul.mubr.bf16.gmra.mrb[4].mxu1 %v2641_v48  ;;  %2358 = vmatpush3.bf16.msra.mxu0 %v2644_v51  ;;  %v2715_v48 = vld [vmem:[%s3310_s1 + $0x2a0] sm:$0xff]   ;;  %v2718_v51 = vld [vmem:[%s3310_s1 + $0x228] sm:$0xff]  }
  0x35   : > { %2398 = vmatpush3.bf16.msra.mxu1 %v2645_v52  ;;  %2359 = vmatprep.subr.bf16.mxu0 %v2646_v53  ;;  %v2719_v52 = vld [vmem:[%s3310_s1 + $0x2a8] sm:$0xff]  }
  0x36   : > { %2399 = vmatprep.subr.bf16.mxu1 %v2647_v54  ;;  %1447 = vmatprep.mubr.bf16.mxu0 %v2650_v57  ;;  %v2720_v53 = vld [vmem:[%s2968_s5 + $0x14c] ss:$52 sps:$4 sm:$0xff]   ;;  %v2722_v54 = vld [vmem:[%s2968_s5 + $0x154] ss:$52 sps:$4 sm:$0xff]  }
  0x37   : > { %1512 = vmatprep.mubr.bf16.mxu1 %v2652_v58  ;;  %v2726_v57 = vld [vmem:[%s3310_s1 + $0x270] sm:$0xff]  }
  0x38   : > { %2360 = vmatpush3.bf16.msra.mxu0 %v2648_v55  ;;  %v2724_v55 = vld [vmem:[%s2968_s5 + $0x148] ss:$52 sps:$4 sm:$0xff]   ;;  %v2727_v58 = vld [vmem:[%s3310_s1 + $0x2f0] sm:$0xff]  }
  0x39   : > { %2400 = vmatpush3.bf16.msra.mxu1 %v2649_v56  ;;  %2361 = vmatprep.subr.bf16.mxu0 %v2656_v61  ;;  %v2725_v56 = vld [vmem:[%s2968_s5 + $0x150] ss:$52 sps:$4 sm:$0xff]   ;;  %v2730_v61 = vld [vmem:[%s3310_s1 + $0x278] sm:$0xff]  }
  0x3a   : > { %2401 = vmatprep.subr.bf16.mxu1 %v2657_v62  ;;  %v2731_v62 = vld [vmem:[%s3310_s1 + $0x2f8] sm:$0xff]  }
  0x3b   : > { %1448 = vmatmul.mubr.bf16.gmra.mrb[8].mxu0 %v2654_v59  ;;  %v2728_v59 = vld [vmem:[%s3310_s1 + $0x230] sm:$0xff]  }
  0x3c   : > { %1513 = vmatmul.mubr.bf16.gmra.mrb[8].mxu1 %v2655_v60  ;;  %2362 = vmatpush3.bf16.msra.mxu0 %v2658_v63  ;;  %v2729_v60 = vld [vmem:[%s3310_s1 + $0x2b0] sm:$0xff]   ;;  %v2732_v63 = vld [vmem:[%s3310_s1 + $0x238] sm:$0xff]  }
  0x3d   : > { %2402 = vmatpush3.bf16.msra.mxu1 %v2659_v0  ;;  %2363 = vmatprep.subr.bf16.mxu0 %v2660_v1  ;;  %v2733_v0 = vld [vmem:[%s3310_s1 + $0x2b8] sm:$0xff]   ;;  %v2734_v1 = vld [vmem:[%s2968_s5 + $0x20] ss:$52 sps:$4 sm:$0xff]  }
  0x3e   : > { %2403 = vmatprep.subr.bf16.mxu1 %v2661_v2  ;;  %1455 = vmatprep.mubr.bf16.mxu0 %v2664_v5  ;;  %v2736_v2 = vld [vmem:[%s2968_s5 + $0x24] ss:$52 sps:$4 sm:$0xff]  }
  0x3f   : > { %1520 = vmatprep.mubr.bf16.mxu1 %v2666_v6  ;;  %v2740_v5 = vld [vmem:[%s3310_s1 + $0x300] sm:$0xff]  }
  0x40   : > { %2364 = vmatpush3.bf16.msra.mxu0 %v2662_v3  ;;  %v2737_v3 = vld [vmem:[%s2968_s5 + $0x28] ss:$52 sps:$4 sm:$0xff]   ;;  %v2741_v6 = vld [vmem:[%s2968_s5 + $0x8c] ss:$52 sps:$4 sm:$0xff]  }
  0x41   : > { %2404 = vmatpush3.bf16.msra.mxu1 %v2663_v4  ;;  %2365 = vmatprep.subr.bf16.mxu0 %v2670_v9  ;;  %v2739_v4 = vld [vmem:[%s2968_s5 + $0x2c] ss:$52 sps:$4 sm:$0xff]   ;;  %v2745_v9 = vld [vmem:[%s2968_s5 + $0x88] ss:$52 sps:$4 sm:$0xff]  }
  0x42   : > { %2405 = vmatprep.subr.bf16.mxu1 %v2671_v10  ;;  %v2746_v10 = vld [vmem:[%s2968_s5 + $0x90] ss:$52 sps:$4 sm:$0xff]  }
  0x43   : > { %1456 = vmatmul.mubr.bf16.gmra.mrb[12].mxu0 %v2668_v7  ;;  %v2743_v7 = vld [vmem:[%s2968_s5 + $0x94] ss:$52 sps:$4 sm:$0xff]  }
  0x44   : > { %1521 = vmatmul.mubr.bf16.gmra.mrb[12].mxu1 %v2669_v8  ;;  %2366 = vmatpush3.bf16.msra.mxu0 %v2672_v11  ;;  %v2747_v8 = vld [vmem:[%s3310_s1 + $0x308] sm:$0xff]  }
  0x45   : > { %2406 = vmatpush3.bf16.msra.mxu1 %v2673_v12  ;;  %2367 = vmatprep.subr.bf16.mxu0 %v2674_v13  ;;  %v2748_v11 = vld [vmem:[%s2968_s5 + $0xf4] ss:$52 sps:$4 sm:$0xff]   ;;  %v2750_v12 = vld [vmem:[%s2968_s5 + $0xfc] ss:$52 sps:$4 sm:$0xff]  }
  0x46   : > { %2407 = vmatprep.subr.bf16.mxu1 %v2675_v14  ;;  %1561 = vmatprep.mubr.bf16.mxu0 %v2680_v18  ;;  %v2754_v13 = vld [vmem:[%s3310_s1 + $0x310] sm:$0xff]   ;;  %v2761_v14 = vld [vmem:[%s3310_s1 + $0x318] sm:$0xff]  }
  0x47   : > { %1626 = vmatprep.mubr.bf16.mxu1 %v2683_v20  ;;  %v2757_v18 = vld [vmem:[%s2968_s5 + $0x164] ss:$52 sps:$4 sm:$0xff]  }
  0x48   : > { %2368 = vmatpush3.bf16.msra.mxu0 %v2676_v15  ;;  %v2752_v15 = vld [vmem:[%s2968_s5 + $0xf0] ss:$52 sps:$4 sm:$0xff]  }
  0x49   : > { %2408 = vmatpush3.bf16.msra.mxu1 %v2677_v16  ;;  %2433 = vmatprep.subr.bf16.mxu0 %v2684_v21  ;;  %v2753_v16 = vld [vmem:[%s2968_s5 + $0xf8] ss:$52 sps:$4 sm:$0xff]   ;;  %v1854_v20 = vld [vmem:[%s3228_s30] sm:$0xff] }
  0x4a   : > { %2473 = vmatprep.subr.bf16.mxu1 %v2685_v22  ;;  %1864 = vperm.xlu0 %2588, %v1854_v20   ;;  %v1857_v21 = vld [vmem:[%s3228_s30 + $0x18] sm:$0xff] }
  0x4b   : > { %1562 = vmatmul.mubr.bf16.vlgmr.msra.gmra.mrb[16].mxu0 %v2678_v17  ;;  %v2755_v17 = vld [vmem:[%s2968_s5 + $0x15c] ss:$52 sps:$4 sm:$0xff]   ;;  %v2759_v22 = vld [vmem:[%s2968_s5 + $0x158] ss:$52 sps:$4 sm:$0xff]  }
  0x4c   : > { %1627 = vmatmul.mubr.bf16.vlgmr.msra.gmra.mrb[16].mxu1 %v2681_v19  ;;  %2434 = vmatpush3.bf16.msra.mxu0 %v2686_v23  ;;  %v1856_v19 = vld [vmem:[%s3228_s30 + $0x10] sm:$0xff]  ;;  %v1855_v23 = vld [vmem:[%s3228_s30 + $0x8] sm:$0xff] }
  0x4d   : > { %2474 = vmatpush3.bf16.msra.mxu1 %v2687_v24  ;;  %2435 = vmatprep.subr.bf16.mxu0 %v2688_v25  ;;  %v2760_v24 = vld [vmem:[%s2968_s5 + $0x160] ss:$52 sps:$4 sm:$0xff]   ;;  %v2762_v25 = vld [vmem:[%s2968_s5 + $0x30] ss:$52 sps:$4 sm:$0xff]  }
  0x4e   : > { %2475 = vmatprep.subr.bf16.mxu1 %v2689_v26  ;;  %1569 = vmatprep.mubr.bf16.mxu0 %v2692_v29  ;;  %v2763_v26 = vld [vmem:[%s2968_s5 + $0x100] ss:$52 sps:$4 sm:$0xff]   ;;  %v1861_v29 = vld [vmem:[%s3228_s30 + $0x38] sm:$0xff] }
  0x4f   : > { %1634 = vmatprep.mubr.bf16.mxu1 %v2694_v30  ;;  %1874 = vperm.xlu1 %2589, %v1856_v19   ;;  %v2764_v30 = vld [vmem:[%s2968_s5 + $0x98] ss:$52 sps:$4 sm:$0xff]  }
  0x50   : > { %2436 = vmatpush3.bf16.msra.mxu0 %v2690_v27  ;;  %1869 = vperm.xlu0 %2588, %v1855_v23   ;;  %v1859_v27 = vld [vmem:[%s3228_s30 + $0x28] sm:$0xff] }
  0x51   : > { %2476 = vmatpush3.bf16.msra.mxu1 %v2691_v28  ;;  %2437 = vmatprep.subr.bf16.mxu0 %v2698_v33  ;;  %v1858_v28 = vld [vmem:[%s3228_s30 + $0x20] sm:$0xff] }
  0x52   : > { %2477 = vmatprep.subr.bf16.mxu1 %v2699_v34 }
  0x53   : > { %1570 = vmatmul.mubr.bf16.gmra.mrb[20].mxu0 %v2696_v31  ;;  %1879 = vperm.xlu1 %2589, %v1857_v21   ;;  %v1860_v31 = vld [vmem:[%s3228_s30 + $0x30] sm:$0xff] }
  0x54   : > { %1635 = vmatmul.mubr.bf16.gmra.mrb[20].mxu1 %v2697_v32  ;;  %2438 = vmatpush3.bf16.msra.mxu0 %v2700_v35  ;;  %v2765_v32 = vld [vmem:[%s2968_s5 + $0x168] ss:$52 sps:$4 sm:$0xff]   ;;  %v2075_v35 = vld [vmem:[%s3311_s2] ss:$0 sm:$0xff]  ;;  %s2073_s5 = sshll.u32 %s3325_s16, 5 }
  0x55   : > { %2478 = vmatpush3.bf16.msra.mxu1 %v2701_v36  ;;  %2439 = vmatprep.subr.bf16.mxu0 %v2702_v37  ;;  %s258_s8 = sadd.s32 %s2073_s5, %s3327_s12 }
  0x56   : > { %2479 = vmatprep.subr.bf16.mxu1 %v2703_v38  ;;  %1577 = vmatprep.mubr.bf16.mxu0 %v2706_v41  ;;  %s2074_s16 = sshll.u32 %s258_s8, 2 }
  0x57   : > { %1642 = vmatprep.mubr.bf16.mxu1 %v2708_v42  ;;  %1889 = vperm.xlu1 %2589, %v1859_v27   ;;  %s260_s10 = scalar_lea.vmem %s3313_s4, %s2074_s16 }
  0x58   : > { %2440 = vmatpush3.bf16.msra.mxu0 %v2704_v39  ;;  %1884 = vperm.xlu0 %2588, %v1858_v28  }
  0x59   : > { %2480 = vmatpush3.bf16.msra.mxu1 %v2705_v40  ;;  %2441 = vmatprep.subr.bf16.mxu0 %v2712_v45 }
  0x5a   : > { %2481 = vmatprep.subr.bf16.mxu1 %v2713_v46 }
  0x5b   : > { %1578 = vmatmul.mubr.bf16.gmra.mrb[24].mxu0 %v2710_v43  ;;  %1899 = vperm.xlu1 %2589, %v1861_v29  }
  0x5c   : > { %1643 = vmatmul.mubr.bf16.gmra.mrb[24].mxu1 %v2711_v44  ;;  %2442 = vmatpush3.bf16.msra.mxu0 %v2714_v47 }
  0x5d   : > { %2482 = vmatpush3.bf16.msra.mxu1 %v2715_v48  ;;  %2443 = vmatprep.subr.bf16.mxu0 %v2716_v49 }
  0x5e   : > { %2483 = vmatprep.subr.bf16.mxu1 %v2717_v50  ;;  %1585 = vmatprep.mubr.bf16.mxu0 %v2720_v53 }
  0x5f   : > { %1650 = vmatprep.mubr.bf16.mxu1 %v2722_v54  ;;  %1894 = vperm.xlu0 %2588, %v1860_v31  }
  0x60   : > { %2444 = vmatpush3.bf16.msra.mxu0 %v2718_v51 }
  0x61   : > { %2484 = vmatpush3.bf16.msra.mxu1 %v2719_v52  ;;  %2445 = vmatprep.subr.bf16.mxu0 %v2726_v57 }
  0x62   : > { %2485 = vmatprep.subr.bf16.mxu1 %v2727_v58 }
  0x63   : > { %1586 = vmatmul.mubr.bf16.gmra.mrb[28].mxu0 %v2724_v55 }
  0x64   : > { %1651 = vmatmul.mubr.bf16.gmra.mrb[28].mxu1 %v2725_v56  ;;  %2446 = vmatpush3.bf16.msra.mxu0 %v2728_v59 }
  0x65   : > { %2486 = vmatpush3.bf16.msra.mxu1 %v2729_v60  ;;  %2447 = vmatprep.subr.bf16.mxu0 %v2730_v61 }
  0x66   : > { %2487 = vmatprep.subr.bf16.mxu1 %v2731_v62  ;;  %1691 = vmatprep.mubr.bf16.mxu0 %v2736_v2 }
  0x67   : > { %1756 = vmatprep.mubr.bf16.mxu1 %v2739_v4 }
  0x68   : > { %2448 = vmatpush3.bf16.msra.mxu0 %v2732_v63 }
  0x69   : > { %2488 = vmatpush3.bf16.msra.mxu1 %v2733_v0  ;;  %2521 = vmatprep.subr.bf16.mxu0 %v2740_v5 }
  0x6a   : > { %2537 = vmatprep.subr.bf16.mxu1 %v2740_v5 }
  0x6b   : > { %1692 = vmatmul.mubr.bf16.vlgmr.msra.gmra.mrb[32].mxu0 %v2734_v1 }
  0x6c   : > { %1757 = vmatmul.mubr.bf16.vlgmr.msra.gmra.mrb[32].mxu1 %v2737_v3  ;;  %2522 = vmatpush3.bf16.msra.mxu0 %v2740_v5 }
  0x6d   : > { %2541 = vmatpush3.bf16.msra.mxu1 %v2740_v5  ;;  %1699 = vmatprep.mubr.bf16.mxu0 %v2741_v6 }
  0x6e   : > { %1764 = vmatprep.mubr.bf16.mxu1 %v2743_v7  ;;  %2523 = vmatprep.subr.bf16.mxu0 %v2747_v8 }
  0x6f   : > { %2538 = vmatprep.subr.bf16.mxu1 %v2747_v8 }
  0x70   : > { %2524 = vmatpush3.bf16.msra.mxu0 %v2747_v8 }
  0x71   : > { %2542 = vmatpush3.bf16.msra.mxu1 %v2747_v8  ;;  %2525 = vmatprep.subr.bf16.mxu0 %v2754_v13 }
  0x72   : > { %2539 = vmatprep.subr.bf16.mxu1 %v2754_v13 }
  0x73   : > { %1700 = vmatmul.mubr.bf16.gmra.mrb[36].mxu0 %v2745_v9 }
  0x74   : > { %1765 = vmatmul.mubr.bf16.gmra.mrb[36].mxu1 %v2746_v10  ;;  %1707 = vmatprep.mubr.bf16.mxu0 %v2748_v11 }
  0x75   : > { %1772 = vmatprep.mubr.bf16.mxu1 %v2750_v12  ;;  %2526 = vmatpush3.bf16.msra.mxu0 %v2754_v13 }
  0x76   : > { %2543 = vmatpush3.bf16.msra.mxu1 %v2754_v13  ;;  %2527 = vmatprep.subr.bf16.mxu0 %v2761_v14 }
  0x77   : > { %2540 = vmatprep.subr.bf16.mxu1 %v2761_v14 }
  0x79   : > { %2528 = vmatpush3.bf16.msra.mxu0 %v2761_v14 }
  0x7a   : > { %2544 = vmatpush3.bf16.msra.mxu1 %v2761_v14 }
  0x7b   : > { %1708 = vmatmul.mubr.bf16.gmra.mrb[40].mxu0 %v2752_v15 }
  0x7c   : > { %1773 = vmatmul.mubr.bf16.gmra.mrb[40].mxu1 %v2753_v16  ;;  %1715 = vmatprep.mubr.bf16.mxu0 %v2755_v17 }
  0x7d   : > { %1780 = vmatprep.mubr.bf16.mxu1 %v2757_v18 }
  0x83   : > { %1716 = vmatmul.mubr.bf16.gmra.mrb[44].mxu0 %v2759_v22 }
  0x84   : > { %1781 = vmatmul.mubr.bf16.gmra.mrb[44].mxu1 %v2760_v24  ;;  %2529 = vmatprep.mubr.msk.bf16.mxu0 %vm1386_vm0, %v2762_v25 }
  0x85   : > { %2533 = vmatprep.mubr.msk.bf16.mxu1 %vm1386_vm0, %v2763_v26 }
  0x8b   : > { %2530 = vmatmul.mubr.msk.bf16.vlgmr.msra.gmra.mrb[48].mxu0 %vm1386_vm0, %v2764_v30 }
  0x8c   : > { %2534 = vmatmul.mubr.msk.bf16.vlgmr.msra.gmra.mrb[48].mxu1 %vm1386_vm0, %v2765_v32 }
  0xfe   : > { %v2289_v33 = vpop.f32.mrb[0].mxu0 }
  0xff   : > { %v2329_v34 = vpop.f32.mrb[0].mxu1  ;;  %v2290_v36 = vpop.f32.mrb[1].mxu0 }
 0x100   : > { %v2291_v37 = vadd.f32 %v2290_v36, %v2289_v33  ;;  %v2330_v38 = vpop.f32.mrb[1].mxu1  ;;  %v2292_v39 = vpop.f32.mrb[2].mxu0 }
 0x101   : > { %v2331_v40 = vadd.f32 %v2330_v38, %v2329_v34  ;;  %v2332_v41 = vpop.f32.mrb[2].mxu1  ;;  %v2293_v42 = vpop.f32.mrb[3].mxu0 }
 0x102   : > { %v1434_v43 = vadd.f32 %v2291_v37, %v2075_v35  ;;  %v2294_v44 = vadd.f32 %v2293_v42, %v2292_v39  ;;  %v2333_v45 = vpop.f32.mrb[3].mxu1 }
 0x103   : > { %v2334_v46 = vadd.f32 %v2333_v45, %v2332_v41 }
 0x104   : > { %v1499_v47 = vadd.f32 %v2331_v40, %v1434_v43  ;;  %v1437_v48 = vadd.f32 %v2294_v44, %v2075_v35 }
 0x106   : > { %v1502_v49 = vadd.f32 %v2334_v46, %v1437_v48  ;;  %v2295_v50 = vpop.f32.mrb[4].mxu0 }
 0x107   : > { %v2335_v51 = vpop.f32.mrb[4].mxu1  ;;  %v2296_v52 = vpop.f32.mrb[5].mxu0 }
 0x108   : > { %v2297_v53 = vadd.f32 %v2296_v52, %v2295_v50  ;;  %v2336_v54 = vpop.f32.mrb[5].mxu1  ;;  %v2298_v55 = vpop.f32.mrb[6].mxu0 }
 0x109   : > { %v2337_v56 = vadd.f32 %v2336_v54, %v2335_v51  ;;  %v2338_v57 = vpop.f32.mrb[6].mxu1  ;;  %v2299_v58 = vpop.f32.mrb[7].mxu0 }
 0x10a   : > { %v1442_v59 = vadd.f32 %v2297_v53, %v2075_v35  ;;  %v2300_v60 = vadd.f32 %v2299_v58, %v2298_v55  ;;  %v2339_v61 = vpop.f32.mrb[7].mxu1 }
 0x10b   : > { %v2340_v62 = vadd.f32 %v2339_v61, %v2338_v57 }
 0x10c   : > { %v1507_v63 = vadd.f32 %v2337_v56, %v1442_v59  ;;  %v1445_v0 = vadd.f32 %v2300_v60, %v2075_v35 }
 0x10e   : > { %v3253_v1 = vadd.f32 %v2340_v62, %v1445_v0  ;;  %v2301_v2 = vpop.f32.mrb[8].mxu0 }
 0x10f   : > { %v2341_v3 = vpop.f32.mrb[8].mxu1  ;;  %v2302_v4 = vpop.f32.mrb[9].mxu0 }
 0x110   : > { %v2303_v5 = vadd.f32 %v2302_v4, %v2301_v2  ;;  %v2342_v6 = vpop.f32.mrb[9].mxu1  ;;  %v2304_v7 = vpop.f32.mrb[10].mxu0 }
 0x111   : > { %v2343_v8 = vadd.f32 %v2342_v6, %v2341_v3  ;;  %v2344_v9 = vpop.f32.mrb[10].mxu1  ;;  %v2305_v10 = vpop.f32.mrb[11].mxu0 }
 0x112   : > { %v1450_v11 = vadd.f32 %v2303_v5, %v2075_v35  ;;  %v2306_v12 = vadd.f32 %v2305_v10, %v2304_v7  ;;  %v2345_v13 = vpop.f32.mrb[11].mxu1 }
 0x113   : > { %v2346_v14 = vadd.f32 %v2345_v13, %v2344_v9 }
 0x114   : > { %v1515_v15 = vadd.f32 %v2343_v8, %v1450_v11  ;;  %v1453_v16 = vadd.f32 %v2306_v12, %v2075_v35 }
 0x116   : > { %v3255_v17 = vadd.f32 %v2346_v14, %v1453_v16  ;;  %v2307_v18 = vpop.f32.mrb[12].mxu0 }
 0x117   : > { %v2347_v19 = vpop.f32.mrb[12].mxu1  ;;  %v2308_v20 = vpop.f32.mrb[13].mxu0 }
 0x118   : > { %v2348_v21 = vpop.f32.mrb[13].mxu1  ;;  %v2309_v22 = vadd.f32 %v2308_v20, %v2307_v18  ;;  %v2310_v24 = vpop.f32.mrb[14].mxu0 }
 0x119   : > { %v2349_v23 = vadd.f32 %v2348_v21, %v2347_v19  ;;  %v2350_v25 = vpop.f32.mrb[14].mxu1  ;;  %v2311_v26 = vpop.f32.mrb[15].mxu0 }
 0x11a   : > { %v2351_v27 = vpop.f32.mrb[15].mxu1  ;;  %v1458_v28 = vadd.f32 %v2309_v22, %v2075_v35  ;;  %v2312_v29 = vadd.f32 %v2311_v26, %v2310_v24 }
 0x11b   : > { %v2352_v30 = vadd.f32 %v2351_v27, %v2350_v25 }
 0x11c   : > { %v1523_v31 = vadd.f32 %v2349_v23, %v1458_v28  ;;  %v1461_v32 = vadd.f32 %v2312_v29, %v2075_v35 }
 0x11e   : > { %v3257_v33 = vadd.f32 %v2352_v30, %v1461_v32  ;;  %v2369_v34 = vpop.f32.mrb[16].mxu0 }
 0x11f   : > { %v2370_v36 = vpop.f32.mrb[17].mxu0  ;;  %v2409_v37 = vpop.f32.mrb[16].mxu1 }
 0x120   : > { %v2371_v38 = vadd.f32 %v2370_v36, %v2369_v34  ;;  %v2372_v39 = vpop.f32.mrb[18].mxu0  ;;  %v2410_v40 = vpop.f32.mrb[17].mxu1 }
 0x121   : > { %v2373_v41 = vpop.f32.mrb[19].mxu0  ;;  %v2411_v43 = vadd.f32 %v2410_v40, %v2409_v37  ;;  %v2412_v44 = vpop.f32.mrb[18].mxu1 }
 0x122   : > { %v1564_v42 = vadd.f32 %v2371_v38, %v1499_v47  ;;  %v2374_v45 = vadd.f32 %v2373_v41, %v2372_v39  ;;  %v2413_v46 = vpop.f32.mrb[19].mxu1 }
 0x123   : > { %v2414_v51 = vadd.f32 %v2413_v46, %v2412_v44 }
 0x124   : > { %v1629_v48 = vadd.f32 %v2411_v43, %v1564_v42  ;;  %v1567_v50 = vadd.f32 %v2374_v45, %v1502_v49 }
 0x126   : > { %v1632_v52 = vadd.f32 %v2414_v51, %v1567_v50  ;;  %v2375_v53 = vpop.f32.mrb[20].mxu0 }
 0x127   : > { %v2415_v35 = vpop.f32.mrb[20].mxu1  ;;  %v2376_v54 = vpop.f32.mrb[21].mxu0 }
 0x128   : > { %v2377_v55 = vadd.f32 %v2376_v54, %v2375_v53  ;;  %v2416_v56 = vpop.f32.mrb[21].mxu1  ;;  %v2378_v57 = vpop.f32.mrb[22].mxu0 }
 0x129   : > { %v2417_v58 = vadd.f32 %v2416_v56, %v2415_v35  ;;  %v2418_v59 = vpop.f32.mrb[22].mxu1  ;;  %v2379_v60 = vpop.f32.mrb[23].mxu0 }
 0x12a   : > { %v1572_v61 = vadd.f32 %v2377_v55, %v1507_v63  ;;  %v2380_v62 = vadd.f32 %v2379_v60, %v2378_v57  ;;  %v2419_v47 = vpop.f32.mrb[23].mxu1 }
 0x12b   : > { %v2420_v0 = vadd.f32 %v2419_v47, %v2418_v59 }
 0x12c   : > { %v1637_v2 = vadd.f32 %v2417_v58, %v1572_v61  ;;  %v1575_v3 = vadd.f32 %v2380_v62, %v3253_v1 }
 0x12e   : > { %v3260_v4 = vadd.f32 %v2420_v0, %v1575_v3  ;;  %v2381_v49 = vpop.f32.mrb[24].mxu0 }
 0x12f   : > { %v2421_v5 = vpop.f32.mrb[24].mxu1  ;;  %v2382_v6 = vpop.f32.mrb[25].mxu0 }
 0x130   : > { %v2422_v7 = vpop.f32.mrb[25].mxu1  ;;  %v2383_v8 = vadd.f32 %v2382_v6, %v2381_v49  ;;  %v2384_v10 = vpop.f32.mrb[26].mxu0 }
 0x131   : > { %v2423_v9 = vadd.f32 %v2422_v7, %v2421_v5  ;;  %v2424_v11 = vpop.f32.mrb[26].mxu1  ;;  %v2385_v12 = vpop.f32.mrb[27].mxu0 }
 0x132   : > { %v2425_v13 = vpop.f32.mrb[27].mxu1  ;;  %v1580_v14 = vadd.f32 %v2383_v8, %v1515_v15  ;;  %v2386_v63 = vadd.f32 %v2385_v12, %v2384_v10  ;;  %v1875_v6 = vpop.permute.xlu1 %1874 }
 0x133   : > { %v2426_v16 = vadd.f32 %v2425_v13, %v2424_v11 }
 0x134   : > { %v3262_v18 = vadd.f32 %v2423_v9, %v1580_v14  ;;  %v1583_v19 = vadd.f32 %v2386_v63, %v3255_v17 }
 0x136   : > { %v3265_v1 = vadd.f32 %v2426_v16, %v1583_v19  ;;  %v2387_v20 = vpop.f32.mrb[28].mxu0 }
 0x137   : > { %v2427_v21 = vpop.f32.mrb[28].mxu1  ;;  %v2388_v22 = vpop.f32.mrb[29].mxu0 }
 0x138   : > { %v2389_v23 = vadd.f32 %v2388_v22, %v2387_v20  ;;  %v2428_v24 = vpop.f32.mrb[29].mxu1  ;;  %v2390_v25 = vpop.f32.mrb[30].mxu0 }
 0x139   : > { %v2429_v26 = vadd.f32 %v2428_v24, %v2427_v21  ;;  %v2430_v27 = vpop.f32.mrb[30].mxu1  ;;  %v2391_v28 = vpop.f32.mrb[31].mxu0 }
 0x13a   : > { %v1588_v29 = vadd.f32 %v2389_v23, %v1523_v31  ;;  %v2392_v30 = vadd.f32 %v2391_v28, %v2390_v25  ;;  %v2431_v15 = vpop.f32.mrb[31].mxu1  ;;  %v1880_v24 = vpop.permute.xlu1 %1879 }
 0x13b   : > { %v2432_v32 = vadd.f32 %v2431_v15, %v2430_v27 }
 0x13c   : > { %v3267_v34 = vadd.f32 %v2429_v26, %v1588_v29  ;;  %v1591_v36 = vadd.f32 %v2392_v30, %v3257_v33  ;;  %v3274_v33 = vpop.permute.xlu0 %1864 }
 0x13e   : > { %v3270_v17 = vadd.f32 %v2432_v32, %v1591_v36  ;;  %v2449_v37 = vpop.f32.mrb[32].mxu0 }
 0x13f   : > { %v2489_v38 = vpop.f32.mrb[32].mxu1  ;;  %v2450_v39 = vpop.f32.mrb[33].mxu0 }
 0x140   : > { %v2451_v40 = vadd.f32 %v2450_v39, %v2449_v37  ;;  %v2490_v41 = vpop.f32.mrb[33].mxu1  ;;  %v2452_v42 = vpop.f32.mrb[34].mxu0 }
 0x141   : > { %v2491_v43 = vadd.f32 %v2490_v41, %v2489_v38  ;;  %v2492_v44 = vpop.f32.mrb[34].mxu1  ;;  %v2453_v45 = vpop.f32.mrb[35].mxu0 }
 0x142   : > { %v1694_v46 = vadd.f32 %v2451_v40, %v1629_v48  ;;  %v2454_v31 = vadd.f32 %v2453_v45, %v2452_v42  ;;  %v2493_v50 = vpop.f32.mrb[35].mxu1  ;;  %v3279_v8 = vpop.permute.xlu0 %1869 }
 0x143   : > { %v2494_v51 = vadd.f32 %v2493_v50, %v2492_v44 }
 0x144   : > { %v1697_v53 = vadd.f32 %v2454_v31, %v1632_v52  ;;  %v3272_v35 = vadd.f32 %v2491_v43, %v1694_v46  ;;  %v1890_v43 = vpop.permute.xlu1 %1889 }
 0x146   : > { %v2455_v54 = vpop.f32.mrb[36].mxu0  ;;  %v3276_v55 = vadd.f32 %v2494_v51, %v1697_v53  ;;  %v1885_v25 = vpop.permute.xlu0 %1884 }
 0x147   : > { %v2495_v56 = vpop.f32.mrb[36].mxu1  ;;  %v2456_v57 = vpop.f32.mrb[37].mxu0 }
 0x148   : > { %v2457_v58 = vadd.f32 %v2456_v57, %v2455_v54  ;;  %v2496_v59 = vpop.f32.mrb[37].mxu1  ;;  %v2458_v60 = vpop.f32.mrb[38].mxu0 }
 0x149   : > { %v2497_v61 = vadd.f32 %v2496_v59, %v2495_v56  ;;  %v2498_v62 = vpop.f32.mrb[38].mxu1  ;;  %v2459_v47 = vpop.f32.mrb[39].mxu0 }
 0x14a   : > { %v1702_v48 = vadd.f32 %v2457_v58, %v1637_v2  ;;  %v2460_v0 = vadd.f32 %v2459_v47, %v2458_v60  ;;  %v2499_v3 = vpop.f32.mrb[39].mxu1  ;;  %v1895_v44 = vpop.permute.xlu0 %1894 }
 0x14b   : > { %v2500_v49 = vadd.f32 %v2499_v3, %v2498_v62  ;;  %v1900_v3 = vpop.permute.xlu1 %1899 }
 0x14c   : > { %v1705_v52 = vadd.f32 %v2460_v0, %v3260_v4  ;;  %v1767_v5 = vadd.f32 %v2497_v61, %v1702_v48 }
 0x14e   : > { %v2461_v7 = vpop.f32.mrb[40].mxu0  ;;  %v1770_v9 = vadd.f32 %v2500_v49, %v1705_v52 }
 0x14f   : > { %v2501_v10 = vpop.f32.mrb[40].mxu1  ;;  %v2462_v11 = vpop.f32.mrb[41].mxu0 }
 0x150   : > { %v2463_v12 = vadd.f32 %v2462_v11, %v2461_v7  ;;  %v2502_v13 = vpop.f32.mrb[41].mxu1  ;;  %v2464_v14 = vpop.f32.mrb[42].mxu0 }
 0x151   : > { %v2503_v63 = vadd.f32 %v2502_v13, %v2501_v10  ;;  %v2504_v16 = vpop.f32.mrb[42].mxu1  ;;  %v2465_v19 = vpop.f32.mrb[43].mxu0 }
 0x152   : > { %v1710_v2 = vadd.f32 %v2463_v12, %v3262_v18  ;;  %v2466_v20 = vadd.f32 %v2465_v19, %v2464_v14  ;;  %v2505_v21 = vpop.f32.mrb[43].mxu1 }
 0x153   : > { %v2506_v22 = vadd.f32 %v2505_v21, %v2504_v16 }
 0x154   : > { %v1713_v4 = vadd.f32 %v2466_v20, %v3265_v1  ;;  %v1775_v23 = vadd.f32 %v2503_v63, %v1710_v2 }
 0x156   : > { %v2467_v26 = vpop.f32.mrb[44].mxu0  ;;  %v1778_v27 = vadd.f32 %v2506_v22, %v1713_v4 }
 0x157   : > { %v2507_v28 = vpop.f32.mrb[44].mxu1  ;;  %v2468_v29 = vpop.f32.mrb[45].mxu0 }
 0x158   : > { %v2469_v30 = vadd.f32 %v2468_v29, %v2467_v26  ;;  %v2508_v15 = vpop.f32.mrb[45].mxu1  ;;  %v2470_v32 = vpop.f32.mrb[46].mxu0 }
 0x159   : > { %v2509_v36 = vadd.f32 %v2508_v15, %v2507_v28  ;;  %v2510_v37 = vpop.f32.mrb[46].mxu1  ;;  %v2471_v38 = vpop.f32.mrb[47].mxu0 }
 0x15a   : > { %v1718_v18 = vadd.f32 %v2469_v30, %v3267_v34  ;;  %v2472_v39 = vadd.f32 %v2471_v38, %v2470_v32  ;;  %v2511_v40 = vpop.f32.mrb[47].mxu1 }
 0x15b   : > { %v2512_v1 = vadd.f32 %v2511_v40, %v2510_v37 }
 0x15c   : > { %v1721_v41 = vadd.f32 %v2472_v39, %v3270_v17  ;;  %v1783_v42 = vadd.f32 %v2509_v36, %v1718_v18 }
 0x15e   : > { %v2531_v45 = vpop.f32.mrb[48].mxu0  ;;  %v1786_v46 = vadd.f32 %v2512_v1, %v1721_v41 }
 0x15f   : > { %v1832_v31 = vadd.f32 %v2531_v45, %v1767_v5  ;;  %v2535_v50 = vpop.f32.mrb[48].mxu1  ;;  %v1823_v51 = vpop.f32.mrb[49].mxu0 }
 0x160   : > { %v1848_v53 = vadd.f32 %v2535_v50, %v1783_v42  ;;  %v1824_v54 = vadd.f32 %v1823_v51, %v3272_v35  ;;  %v1839_v56 = vpop.f32.mrb[49].mxu1  ;;  %v2532_v34 = vpop.f32.mrb[50].mxu0 }
 0x161   : > { %v1904_v57 = vmul.f32 %v1875_v6, %v1832_v31  ;;  %v1840_v58 = vadd.f32 %v1839_v56, %v1775_v23  ;;  %v1835_v59 = vadd.f32 %v2532_v34, %v1770_v9  ;;  %v2536_v60 = vpop.f32.mrb[50].mxu1  ;;  %v1826_v17 = vpop.f32.mrb[51].mxu0 }
 0x162   : > { %v1908_v61 = vmul.f32 %v1895_v44, %v1848_v53  ;;  %v1902_v62 = vmul.f32 %v3274_v33, %v1824_v54  ;;  %v1851_v47 = vadd.f32 %v2536_v60, %v1786_v46  ;;  %v1827_v48 = vadd.f32 %v1826_v17, %v3276_v55  ;;  %v1842_v0 = vpop.f32.mrb[51].mxu1 }
 0x163   : > { %v1906_v49 = vmul.f32 %v1885_v25, %v1840_v58  ;;  %v1905_v52 = vmul.f32 %v1880_v24, %v1835_v59  ;;  %v1843_v35 = vadd.f32 %v1842_v0, %v1778_v27  ;;  %v1912_v6 = vmax.f32 %v1904_v57, 0.0 }
 0x164   : > { %v1909_v5 = vmul.f32 %v1900_v3, %v1851_v47  ;;  %v1903_v7 = vmul.f32 %v3279_v8, %v1827_v48  ;;  %v1916_v11 = vmax.f32 %v1908_v61, 0.0  ;;  %v1910_v12 = vmax.f32 %v1902_v62, 0.0 }
 0x165   : > { %v1913_v10 = vmax.f32 %v1905_v52, 0.0  ;;  %v1907_v9 = vmul.f32 %v1890_v43, %v1843_v35  ;;  %v1914_v13 = vmax.f32 %v1906_v49, 0.0 }
 0x166   : > { %v1917_v33 = vmax.f32 %v1909_v5, 0.0  ;;  %v1911_v55 = vmax.f32 %v1903_v7, 0.0 }
 0x167   : > { %v2258_v14 = vpack.c.bf16 %v1913_v10, %v1912_v6  ;;  %v1915_v63 = vmax.f32 %v1907_v9, 0.0 }
 0x168   : > { %v2268_v16 = vpack.c.bf16 %v1917_v33, %v1916_v11  ;;  %v2253_v19 = vpack.c.bf16 %v1911_v55, %v1910_v12 }
 0x169   : > { %2270 = vst [vmem:[%s260_s10 + $0x8] sm:$0xff] %v2258_v14   ;;  %v2263_v2 = vpack.c.bf16 %v1915_v63, %v1914_v13 }
 0x16a   : > { %2272 = vst [vmem:[%s260_s10 + $0x18] sm:$0xff] %v2268_v16   ;;  %2254 = vst [vmem:[%s260_s10] sm:$0xff] %v2253_v19  }
 0x16b   : > { %2271 = vst [vmem:[%s260_s10 + $0x10] sm:$0xff] %v2263_v2  }
 0x16c PF: > { %s14_s19 = sadd.s32 1, %s2804_s19   ;;  %s3314_s15 = smov %s2796_s17 }
 0x16d   : > { %p11_p7 = scmp.ge.s32.totalorder %s14_s19, 10   ;;  %s3315_s16 = smov %s2800_s18 }
 0x16e   : > { %s3316_s17 = smov %s3319_s20  ;;  %s3317_s18 = smov %s3323_s21 }
 0x16f   :  { %13 = sbr.rel (!%p11_p7) target bundleno = 3 (0x3), region = 69 }

// kernel: _lambda_.6
= control target key start
LH: loop header
LB: loop body
LE: loop exit
PB: predicated region body
PF: predicated region fallthrough
CT: control target
= control target key end

     0   :  { %s4776_s15 = smov 0   ;;  %s4778_s16 = smov 0   ;;  %s6078_s0 = inlined_call_operand.vmem [shape: bf16[2,64,3200], index: 0, kind: input, shape index: {}]   ;;  %s6079_s1 = inlined_call_operand.vmem [shape: bf16[3200,256], index: 1, kind: input, shape index: {}]   ;;  %s6080_s2 = inlined_call_operand.vmem [shape: f32[1,256], index: 2, kind: input, shape index: {}]   ;;  %s6081_s3 = inlined_call_operand.vmem [shape: f32[64,1], index: 3, kind: input, shape index: {}]   ;;  %s6082_s4 = inlined_call_operand.vmem [shape: bf16[2,64,256], index: 4, kind: output, shape index: {}]  }
   0x1   :  { %s4780_s17 = smov 0   ;;  %s4782_s18 = smov 0  }
   0x2   :  { %s4784_s19 = smov 0  }
   0x3 LB: > { %s23_s20 = sadd.s32 1, %s4740_s17  ;;  %s26_s21 = sadd.s32 1, %s4744_s18  ;;  %s4748_s19 = sphi %s4784_s19, %s14_s19   ;;  %s4744_s18 = sphi %s4782_s18, %s6086_s18   ;;  %s4740_s17 = sphi %s4780_s17, %s6085_s17   ;;  %s4736_s16 = sphi %s4778_s16, %s6084_s16   ;;  %s4732_s15 = sphi %s4776_s15, %s6083_s15  }
   0x4   : > { %p24_p0 = scmp.ge.s32.totalorder %s23_s20, 4  ;;  %p3537_p1 = scmp.ge.s32.totalorder %s4748_s19, 1 }
   0x5   : > { %p195_p2 = scmp.lt.s32.totalorder %s4748_s19, 9 }
   0x6   : > { %s6088_s20 = smov (%p24_p0, %s23_s20), 0  ;;  %s6090_s21 = smov (!%p24_p0, %s26_s21), %s4744_s18 }
   0x7   : > { %p196_p3 = pnand %p3537_p1, %p195_p2  ;;  %p28_p4 = scmp.ge.s32.totalorder %s6090_s21, 2 }
   0x8   : > { %v4073_v0 = vld [vmem:[%s6079_s1 + $0x4] ss:$8 sps:$4 sm:$0xff] (!%p196_p3)   ;;  %v4077_v2 = vld [vmem:[%s6079_s1] ss:$8 sps:$4 sm:$0xff] (!%p196_p3)   ;;  %v4079_v4 = vld [vmem:[%s6079_s1 + $0x14] ss:$8 sps:$4 sm:$0xff] (!%p196_p3)  }
   0x9   : > { %s6092_s21 = smov (%p28_p4, %s6090_s21), 0  ;;  %199 = sbr.rel (%p196_p3) target bundleno = 651 (0x28b), region = 36 }
   0xa   : > { %v4075_v1 = vld [vmem:[%s6079_s1 + $0x604] ss:$8 sps:$4 sm:$0xff] (!%p196_p3)   ;;  %2829 = vmatprep.subr.bf16.mxu1 (!%p196_p3), %v4073_v0  ;;  %v4078_v3 = vld [vmem:[%s6079_s1 + $0x600] ss:$8 sps:$4 sm:$0xff] (!%p196_p3)   ;;  %v4081_v5 = vld [vmem:[%s6079_s1 + $0x614] ss:$8 sps:$4 sm:$0xff] (!%p196_p3)  }
   0xb   : > { %3087 = vmatprep.subr.bf16.mxu0 (!%p196_p3), %v4075_v1  ;;  %2830 = vmatpush1.bf16.msra.mxu1 (!%p196_p3), %v4077_v2  ;;  %v4083_v6 = vld [vmem:[%s6079_s1 + $0x10] ss:$8 sps:$4 sm:$0xff] (!%p196_p3)   ;;  %v4085_v8 = vld [vmem:[%s6079_s1 + $0x24] ss:$8 sps:$4 sm:$0xff] (!%p196_p3)   ;;  %v4089_v10 = vld [vmem:[%s6079_s1 + $0x20] ss:$8 sps:$4 sm:$0xff] (!%p196_p3)  }
   0xc   : > { %3088 = vmatpush1.bf16.msra.mxu0 (!%p196_p3), %v4078_v3  ;;  %2831 = vmatprep.subr.bf16.mxu1 (!%p196_p3), %v4079_v4  ;;  %v4084_v7 = vld [vmem:[%s6079_s1 + $0x610] ss:$8 sps:$4 sm:$0xff] (!%p196_p3)   ;;  %v4087_v9 = vld [vmem:[%s6079_s1 + $0x624] ss:$8 sps:$4 sm:$0xff] (!%p196_p3)   ;;  %v4090_v11 = vld [vmem:[%s6079_s1 + $0x620] ss:$8 sps:$4 sm:$0xff] (!%p196_p3)  }
   0xd   : > { %3089 = vmatprep.subr.bf16.mxu0 (!%p196_p3), %v4081_v5  ;;  %v4091_v12 = vld [vmem:[%s6079_s1 + $0x34] ss:$8 sps:$4 sm:$0xff] (!%p196_p3)   ;;  %v4095_v14 = vld [vmem:[%s6079_s1 + $0x30] ss:$8 sps:$4 sm:$0xff] (!%p196_p3)   ;;  %v4097_v16 = vld [vmem:[%s6079_s1 + $0x44] ss:$8 sps:$4 sm:$0xff] (!%p196_p3)  }
   0xe   : > { %v4093_v13 = vld [vmem:[%s6079_s1 + $0x634] ss:$8 sps:$4 sm:$0xff] (!%p196_p3)   ;;  %v4096_v15 = vld [vmem:[%s6079_s1 + $0x630] ss:$8 sps:$4 sm:$0xff] (!%p196_p3)   ;;  %v4099_v17 = vld [vmem:[%s6079_s1 + $0x644] ss:$8 sps:$4 sm:$0xff] (!%p196_p3)  }
   0xf   : > { %2832 = vmatpush1.bf16.msra.mxu1 (!%p196_p3), %v4083_v6  ;;  %v4101_v18 = vld [vmem:[%s6079_s1 + $0x40] ss:$8 sps:$4 sm:$0xff] (!%p196_p3)   ;;  %v4103_v20 = vld [vmem:[%s6079_s1 + $0x54] ss:$8 sps:$4 sm:$0xff] (!%p196_p3)   ;;  %v4107_v22 = vld [vmem:[%s6079_s1 + $0x50] ss:$8 sps:$4 sm:$0xff] (!%p196_p3)  }
  0x10   : > { %3090 = vmatpush1.bf16.msra.mxu0 %v4084_v7  ;;  %2833 = vmatprep.subr.bf16.mxu1 %v4085_v8  ;;  %v4102_v19 = vld [vmem:[%s6079_s1 + $0x640] ss:$8 sps:$4 sm:$0xff]   ;;  %v4105_v21 = vld [vmem:[%s6079_s1 + $0x654] ss:$8 sps:$4 sm:$0xff]   ;;  %s3538_s30 = sshll.u32 %s4732_s15, 1  ;;  %p237_p5 = scmp.lt.s32.totalorder %s4736_s16, 1 }
  0x11   : > { %3091 = vmatprep.subr.bf16.mxu0 %v4087_v9  ;;  %v4108_v23 = vld [vmem:[%s6079_s1 + $0x650] ss:$8 sps:$4 sm:$0xff]   ;;  %v4109_v24 = vld [vmem:[%s6079_s1 + $0x64] ss:$8 sps:$4 sm:$0xff]   ;;  %p239_p6 = scmp.lt.s32.totalorder %s3538_s30, 7 }
  0x12   : > { %v4111_v25 = vld [vmem:[%s6079_s1 + $0x664] ss:$8 sps:$4 sm:$0xff]   ;;  %v4113_v26 = vld [vmem:[%s6079_s1 + $0x60] ss:$8 sps:$4 sm:$0xff]   ;;  %v4115_v28 = vld [vmem:[%s6079_s1 + $0x74] ss:$8 sps:$4 sm:$0xff]  }
  0x13   : > { %2834 = vmatpush1.bf16.msra.mxu1 %v4089_v10  ;;  %v4114_v27 = vld [vmem:[%s6079_s1 + $0x660] ss:$8 sps:$4 sm:$0xff]   ;;  %v4117_v29 = vld [vmem:[%s6079_s1 + $0x674] ss:$8 sps:$4 sm:$0xff]   ;;  %s6094_s16 = smov (!%p237_p5, %s4736_s16), 1  ;;  %s6096_s30 = smov (!%p239_p6, %s3538_s30), 7 }
  0x14   : > { %3092 = vmatpush1.bf16.msra.mxu0 %v4090_v11  ;;  %2835 = vmatprep.subr.bf16.mxu1 %v4091_v12  ;;  %v4119_v30 = vld [vmem:[%s6079_s1 + $0x70] ss:$8 sps:$4 sm:$0xff]   ;;  %v4121_v32 = vld [vmem:[%s6079_s1 + $0x84] ss:$8 sps:$4 sm:$0xff]   ;;  %s4030_s8 = smul.u32 200, %s6094_s16  ;;  %s3541_s15 = sshll.u32 %s6096_s30, 3 }
  0x15   : > { %3093 = vmatprep.subr.bf16.mxu0 %v4093_v13  ;;  %v4120_v31 = vld [vmem:[%s6079_s1 + $0x670] ss:$8 sps:$4 sm:$0xff]   ;;  %v4123_v33 = vld [vmem:[%s6079_s1 + $0x684] ss:$8 sps:$4 sm:$0xff]   ;;  %s4029_s9 = smul.u32 25, %s6096_s30  ;;  %s251_s25 = scalar_lea.vmem %s6081_s3, %s3541_s15 }
  0x16   : > { %v4125_v34 = vld [vmem:[%s6079_s1 + $0x80] ss:$8 sps:$4 sm:$0xff]   ;;  %v4127_v36 = vld [vmem:[%s6079_s1 + $0x94] ss:$8 sps:$4 sm:$0xff]   ;;  %v4131_v38 = vld [vmem:[%s6079_s1 + $0x90] ss:$8 sps:$4 sm:$0xff]  }
  0x17   : > { %2836 = vmatpush1.bf16.msra.mxu1 %v4095_v14  ;;  %v4126_v35 = vld [vmem:[%s6079_s1 + $0x680] ss:$8 sps:$4 sm:$0xff]   ;;  %v4129_v37 = vld [vmem:[%s6079_s1 + $0x694] ss:$8 sps:$4 sm:$0xff]   ;;  %s243_s24 = sadd.s32 %s4030_s8, %s4029_s9  ;;  %v4132_v39 = vld [vmem:[%s6079_s1 + $0x690] ss:$8 sps:$4 sm:$0xff]  }
  0x18   : > { %3094 = vmatpush1.bf16.msra.mxu0 %v4096_v15  ;;  %2837 = vmatprep.subr.bf16.mxu1 %v4097_v16  ;;  %v4133_v40 = vld [vmem:[%s6079_s1 + $0xa4] ss:$8 sps:$4 sm:$0xff]   ;;  %s3539_s8 = sshll.u32 %s243_s24, 2  ;;  %v4137_v42 = vld [vmem:[%s6079_s1 + $0xa0] ss:$8 sps:$4 sm:$0xff]   ;;  %s3543_s12 = sshll.u32 %s6096_s30, 1 }
  0x19   : > { %3095 = vmatprep.subr.bf16.mxu0 %v4099_v17  ;;  %v4135_v41 = vld [vmem:[%s6079_s1 + $0x6a4] ss:$8 sps:$4 sm:$0xff]   ;;  %v4138_v43 = vld [vmem:[%s6079_s1 + $0x6a0] ss:$8 sps:$4 sm:$0xff]   ;;  %v4139_v44 = vld [vmem:[%s6079_s1 + $0xb4] ss:$8 sps:$4 sm:$0xff]   ;;  %s4957_s23 = scalar_lea.vmem %s6078_s0, %s3539_s8 }
  0x1a   : > { %v4141_v45 = vld [vmem:[%s6079_s1 + $0x6b4] ss:$8 sps:$4 sm:$0xff]   ;;  %v4143_v46 = vld [vmem:[%s6079_s1 + $0xb0] ss:$8 sps:$4 sm:$0xff]   ;;  %v4171_v48 = vld [vmem:[%s4957_s23 + $0x4] ss:$100 sps:$4 sm:$0xff]  }
  0x1b   : > { %2838 = vmatpush1.bf16.msra.mxu1 %v4101_v18  ;;  %v4144_v47 = vld [vmem:[%s6079_s1 + $0x6b0] ss:$8 sps:$4 sm:$0xff]   ;;  %v4145_v49 = vld [vmem:[%s6079_s1 + $0xc4] ss:$8 sps:$4 sm:$0xff]   ;;  %2861 = vmatprep.mubr.bf16.mxu1 %v4171_v48  ;;  %v4149_v52 = vld [vmem:[%s6079_s1 + $0xc0] ss:$8 sps:$4 sm:$0xff]  }
  0x1c   : > { %3096 = vmatpush1.bf16.msra.mxu0 %v4102_v19  ;;  %2839 = vmatprep.subr.bf16.mxu1 %v4103_v20  ;;  %v4147_v50 = vld [vmem:[%s6079_s1 + $0x6c4] ss:$8 sps:$4 sm:$0xff]   ;;  %v4177_v51 = vld [vmem:[%s4957_s23 + $0x34] ss:$100 sps:$4 sm:$0xff]   ;;  %v4150_v53 = vld [vmem:[%s6079_s1 + $0x6c0] ss:$8 sps:$4 sm:$0xff]  }
  0x1d   : > { %3097 = vmatprep.subr.bf16.mxu0 %v4105_v21  ;;  %v4151_v54 = vld [vmem:[%s6079_s1 + $0xd4] ss:$8 sps:$4 sm:$0xff]   ;;  %3119 = vmatprep.mubr.bf16.mxu0 %v4177_v51  ;;  %v4155_v56 = vld [vmem:[%s6079_s1 + $0xd0] ss:$8 sps:$4 sm:$0xff]   ;;  %v4157_v58 = vld [vmem:[%s6079_s1 + $0xe4] ss:$8 sps:$4 sm:$0xff]  }
  0x1e   : > { %v4153_v55 = vld [vmem:[%s6079_s1 + $0x6d4] ss:$8 sps:$4 sm:$0xff]   ;;  %v4156_v57 = vld [vmem:[%s6079_s1 + $0x6d0] ss:$8 sps:$4 sm:$0xff]   ;;  %v4159_v59 = vld [vmem:[%s6079_s1 + $0x6e4] ss:$8 sps:$4 sm:$0xff]  }
  0x1f   : > { %2840 = vmatpush1.bf16.msra.mxu1 %v4107_v22  ;;  %v4161_v60 = vld [vmem:[%s6079_s1 + $0xe0] ss:$8 sps:$4 sm:$0xff]   ;;  %v4163_v62 = vld [vmem:[%s6079_s1 + $0xf4] ss:$8 sps:$4 sm:$0xff]   ;;  %v4167_v0 = vld [vmem:[%s6079_s1 + $0xf0] ss:$8 sps:$4 sm:$0xff]  }
  0x20   : > { %3098 = vmatpush1.bf16.msra.mxu0 %v4108_v23  ;;  %2841 = vmatprep.subr.bf16.mxu1 %v4109_v24  ;;  %v4162_v61 = vld [vmem:[%s6079_s1 + $0x6e0] ss:$8 sps:$4 sm:$0xff]   ;;  %v4165_v63 = vld [vmem:[%s6079_s1 + $0x6f4] ss:$8 sps:$4 sm:$0xff]   ;;  %v4168_v1 = vld [vmem:[%s6079_s1 + $0x6f0] ss:$8 sps:$4 sm:$0xff]  }
  0x21   : > { %3099 = vmatprep.subr.bf16.mxu0 %v4111_v25  ;;  %v4174_v2 = vld [vmem:[%s6079_s1 + $0x104] ss:$8 sps:$4 sm:$0xff]   ;;  %v4172_v5 = vld [vmem:[%s6079_s1 + $0x100] ss:$8 sps:$4 sm:$0xff]   ;;  %v4175_v6 = vld [vmem:[%s4957_s23 + $0x30] ss:$100 sps:$4 sm:$0xff]  }
  0x22   : > { %v4180_v3 = vld [vmem:[%s6079_s1 + $0x704] ss:$8 sps:$4 sm:$0xff]   ;;  %v4178_v7 = vld [vmem:[%s6079_s1 + $0x700] ss:$8 sps:$4 sm:$0xff]   ;;  %v4183_v8 = vld [vmem:[%s6079_s1 + $0x114] ss:$8 sps:$4 sm:$0xff]  }
  0x23   : > { %2842 = vmatpush1.bf16.msra.mxu1 %v4113_v26  ;;  %v4169_v4 = vld [vmem:[%s4957_s23] ss:$100 sps:$4 sm:$0xff]   ;;  %v4186_v9 = vld [vmem:[%s6079_s1 + $0x714] ss:$8 sps:$4 sm:$0xff]   ;;  %v4181_v10 = vld [vmem:[%s6079_s1 + $0x110] ss:$8 sps:$4 sm:$0xff]  }
  0x24   : > { %3100 = vmatpush1.bf16.msra.mxu0 %v4114_v27  ;;  %2843 = vmatprep.subr.bf16.mxu1 %v4115_v28  ;;  %v4184_v11 = vld [vmem:[%s6079_s1 + $0x710] ss:$8 sps:$4 sm:$0xff]   ;;  %v4189_v12 = vld [vmem:[%s6079_s1 + $0x124] ss:$8 sps:$4 sm:$0xff]   ;;  %v4187_v14 = vld [vmem:[%s6079_s1 + $0x120] ss:$8 sps:$4 sm:$0xff]  }
  0x25   : > { %3101 = vmatprep.subr.bf16.mxu0 %v4117_v29  ;;  %v4192_v13 = vld [vmem:[%s6079_s1 + $0x724] ss:$8 sps:$4 sm:$0xff]   ;;  %v4190_v15 = vld [vmem:[%s6079_s1 + $0x720] ss:$8 sps:$4 sm:$0xff]   ;;  %v4195_v16 = vld [vmem:[%s6079_s1 + $0x134] ss:$8 sps:$4 sm:$0xff]  }
  0x26   : > { %v4198_v17 = vld [vmem:[%s6079_s1 + $0x734] ss:$8 sps:$4 sm:$0xff]   ;;  %v4193_v18 = vld [vmem:[%s6079_s1 + $0x130] ss:$8 sps:$4 sm:$0xff]   ;;  %v4201_v20 = vld [vmem:[%s6079_s1 + $0x144] ss:$8 sps:$4 sm:$0xff]  }
  0x27   : > { %2844 = vmatpush1.bf16.msra.mxu1 %v4119_v30  ;;  %v4196_v19 = vld [vmem:[%s6079_s1 + $0x730] ss:$8 sps:$4 sm:$0xff]   ;;  %v4204_v21 = vld [vmem:[%s6079_s1 + $0x744] ss:$8 sps:$4 sm:$0xff]   ;;  %v4199_v22 = vld [vmem:[%s6079_s1 + $0x140] ss:$8 sps:$4 sm:$0xff]  }
  0x28   : > { %3102 = vmatpush1.bf16.msra.mxu0 %v4120_v31  ;;  %2845 = vmatprep.subr.bf16.mxu1 %v4121_v32  ;;  %v4202_v23 = vld [vmem:[%s6079_s1 + $0x740] ss:$8 sps:$4 sm:$0xff]   ;;  %v4207_v24 = vld [vmem:[%s6079_s1 + $0x154] ss:$8 sps:$4 sm:$0xff]   ;;  %v4205_v26 = vld [vmem:[%s6079_s1 + $0x150] ss:$8 sps:$4 sm:$0xff]  }
  0x29   : > { %3103 = vmatprep.subr.bf16.mxu0 %v4123_v33  ;;  %v4210_v25 = vld [vmem:[%s6079_s1 + $0x754] ss:$8 sps:$4 sm:$0xff]   ;;  %v4208_v27 = vld [vmem:[%s6079_s1 + $0x750] ss:$8 sps:$4 sm:$0xff]   ;;  %v4213_v28 = vld [vmem:[%s6079_s1 + $0x164] ss:$8 sps:$4 sm:$0xff]  }
  0x2a   : > { %v4216_v29 = vld [vmem:[%s6079_s1 + $0x764] ss:$8 sps:$4 sm:$0xff]   ;;  %v4211_v30 = vld [vmem:[%s6079_s1 + $0x160] ss:$8 sps:$4 sm:$0xff]   ;;  %v4219_v32 = vld [vmem:[%s6079_s1 + $0x174] ss:$8 sps:$4 sm:$0xff]  }
  0x2b   : > { %2846 = vmatpush1.bf16.msra.mxu1 %v4125_v34  ;;  %v4214_v31 = vld [vmem:[%s6079_s1 + $0x760] ss:$8 sps:$4 sm:$0xff]   ;;  %v4222_v33 = vld [vmem:[%s6079_s1 + $0x774] ss:$8 sps:$4 sm:$0xff]   ;;  %v4273_v34 = vld [vmem:[%s4957_s23 + $0xc] ss:$100 sps:$4 sm:$0xff]  }
  0x2c   : > { %3104 = vmatpush1.bf16.msra.mxu0 %v4126_v35  ;;  %2847 = vmatprep.subr.bf16.mxu1 %v4127_v36  ;;  %v4217_v35 = vld [vmem:[%s6079_s1 + $0x170] ss:$8 sps:$4 sm:$0xff]   ;;  %v4235_v48 = vld [vmem:[%s6079_s1 + $0x1a0] ss:$8 sps:$4 sm:$0xff]   ;;  %v4246_v51 = vld [vmem:[%s6079_s1 + $0x7b4] ss:$8 sps:$4 sm:$0xff]  }
  0x2d   : > { %3105 = vmatprep.subr.bf16.mxu0 %v4129_v37  ;;  %v4220_v36 = vld [vmem:[%s6079_s1 + $0x770] ss:$8 sps:$4 sm:$0xff]   ;;  %v4279_v37 = vld [vmem:[%s4957_s23 + $0x3c] ss:$100 sps:$4 sm:$0xff]  }
  0x2f   : > { %2848 = vmatpush1.bf16.msra.mxu1 %v4131_v38  ;;  %v4225_v38 = vld [vmem:[%s6079_s1 + $0x184] ss:$8 sps:$4 sm:$0xff]  }
  0x30   : > { %3106 = vmatpush1.bf16.msra.mxu0 %v4132_v39  ;;  %2849 = vmatprep.subr.bf16.mxu1 %v4133_v40  ;;  %v4228_v39 = vld [vmem:[%s6079_s1 + $0x784] ss:$8 sps:$4 sm:$0xff]   ;;  %v4223_v40 = vld [vmem:[%s6079_s1 + $0x180] ss:$8 sps:$4 sm:$0xff]  }
  0x31   : > { %3107 = vmatprep.subr.bf16.mxu0 %v4135_v41  ;;  %v4226_v41 = vld [vmem:[%s6079_s1 + $0x780] ss:$8 sps:$4 sm:$0xff]  }
  0x33   : > { %2850 = vmatpush1.bf16.msra.mxu1 %v4137_v42  ;;  %v4231_v42 = vld [vmem:[%s6079_s1 + $0x194] ss:$8 sps:$4 sm:$0xff]  }
  0x34   : > { %3108 = vmatpush1.bf16.msra.mxu0 %v4138_v43  ;;  %2851 = vmatprep.subr.bf16.mxu1 %v4139_v44  ;;  %v4234_v43 = vld [vmem:[%s6079_s1 + $0x794] ss:$8 sps:$4 sm:$0xff]   ;;  %v4229_v44 = vld [vmem:[%s6079_s1 + $0x190] ss:$8 sps:$4 sm:$0xff]  }
  0x35   : > { %3109 = vmatprep.subr.bf16.mxu0 %v4141_v45  ;;  %v4232_v45 = vld [vmem:[%s6079_s1 + $0x790] ss:$8 sps:$4 sm:$0xff]  }
  0x37   : > { %2852 = vmatpush1.bf16.msra.mxu1 %v4143_v46  ;;  %v4237_v46 = vld [vmem:[%s6079_s1 + $0x1a4] ss:$8 sps:$4 sm:$0xff]  }
  0x38   : > { %3110 = vmatpush1.bf16.msra.mxu0 %v4144_v47  ;;  %2853 = vmatprep.subr.bf16.mxu1 %v4145_v49  ;;  %v4240_v47 = vld [vmem:[%s6079_s1 + $0x7a4] ss:$8 sps:$4 sm:$0xff]   ;;  %v4238_v49 = vld [vmem:[%s6079_s1 + $0x7a0] ss:$8 sps:$4 sm:$0xff]  }
  0x39   : > { %3111 = vmatprep.subr.bf16.mxu0 %v4147_v50  ;;  %v4243_v50 = vld [vmem:[%s6079_s1 + $0x1b4] ss:$8 sps:$4 sm:$0xff]  }
  0x3b   : > { %2854 = vmatpush1.bf16.msra.mxu1 %v4149_v52  ;;  %v4241_v52 = vld [vmem:[%s6079_s1 + $0x1b0] ss:$8 sps:$4 sm:$0xff]  }
  0x3c   : > { %3112 = vmatpush1.bf16.msra.mxu0 %v4150_v53  ;;  %2855 = vmatprep.subr.bf16.mxu1 %v4151_v54  ;;  %v4244_v53 = vld [vmem:[%s6079_s1 + $0x7b0] ss:$8 sps:$4 sm:$0xff]   ;;  %v4249_v54 = vld [vmem:[%s6079_s1 + $0x1c4] ss:$8 sps:$4 sm:$0xff]  }
  0x3d   : > { %3113 = vmatprep.subr.bf16.mxu0 %v4153_v55  ;;  %v4252_v55 = vld [vmem:[%s6079_s1 + $0x7c4] ss:$8 sps:$4 sm:$0xff]  }
  0x3f   : > { %2856 = vmatpush1.bf16.msra.mxu1 %v4155_v56  ;;  %v4247_v56 = vld [vmem:[%s6079_s1 + $0x1c0] ss:$8 sps:$4 sm:$0xff]  }
  0x40   : > { %3114 = vmatpush1.bf16.msra.mxu0 %v4156_v57  ;;  %2857 = vmatprep.subr.bf16.mxu1 %v4157_v58  ;;  %v4250_v57 = vld [vmem:[%s6079_s1 + $0x7c0] ss:$8 sps:$4 sm:$0xff]   ;;  %v4255_v58 = vld [vmem:[%s6079_s1 + $0x1d4] ss:$8 sps:$4 sm:$0xff]  }
  0x41   : > { %3115 = vmatprep.subr.bf16.mxu0 %v4159_v59  ;;  %v4258_v59 = vld [vmem:[%s6079_s1 + $0x7d4] ss:$8 sps:$4 sm:$0xff]  }
  0x43   : > { %2858 = vmatpush1.bf16.msra.mxu1 %v4161_v60  ;;  %v4253_v60 = vld [vmem:[%s6079_s1 + $0x1d0] ss:$8 sps:$4 sm:$0xff]  }
  0x44   : > { %3116 = vmatpush1.bf16.msra.mxu0 %v4162_v61  ;;  %2859 = vmatprep.subr.bf16.mxu1 %v4163_v62  ;;  %v4256_v61 = vld [vmem:[%s6079_s1 + $0x7d0] ss:$8 sps:$4 sm:$0xff]   ;;  %v4261_v62 = vld [vmem:[%s6079_s1 + $0x1e4] ss:$8 sps:$4 sm:$0xff]  }
  0x45   : > { %3117 = vmatprep.subr.bf16.mxu0 %v4165_v63  ;;  %v4264_v63 = vld [vmem:[%s6079_s1 + $0x7e4] ss:$8 sps:$4 sm:$0xff]  }
  0x47   : > { %2860 = vmatpush1.bf16.msra.mxu1 %v4167_v0  ;;  %v4259_v0 = vld [vmem:[%s6079_s1 + $0x1e0] ss:$8 sps:$4 sm:$0xff]  }
  0x48   : > { %3118 = vmatpush1.bf16.msra.mxu0 %v4168_v1  ;;  %2872 = vmatprep.subr.bf16.mxu1 %v4174_v2  ;;  %v4262_v1 = vld [vmem:[%s6079_s1 + $0x7e0] ss:$8 sps:$4 sm:$0xff]   ;;  %v4267_v2 = vld [vmem:[%s6079_s1 + $0x1f4] ss:$8 sps:$4 sm:$0xff]  }
  0x49   : > { %3130 = vmatprep.subr.bf16.mxu0 %v4180_v3  ;;  %v4270_v3 = vld [vmem:[%s6079_s1 + $0x7f4] ss:$8 sps:$4 sm:$0xff]  }
  0x4a   : > { %2862 = vmatmul.mubr.bf16.vlgmr.msra.gmra.mrb[0].mxu1 %v4169_v4  ;;  %v4265_v4 = vld [vmem:[%s6079_s1 + $0x1f0] ss:$8 sps:$4 sm:$0xff]  }
  0x4b   : > { %3120 = vmatmul.mubr.bf16.vlgmr.msra.gmra.mrb[0].mxu0 %v4175_v6  ;;  %2873 = vmatpush1.bf16.msra.mxu1 %v4172_v5  ;;  %v4268_v5 = vld [vmem:[%s6079_s1 + $0x7f0] ss:$8 sps:$4 sm:$0xff]   ;;  %v4276_v6 = vld [vmem:[%s6079_s1 + $0x204] ss:$8 sps:$4 sm:$0xff]  }
  0x4c   : > { %3131 = vmatpush1.bf16.msra.mxu0 %v4178_v7  ;;  %2874 = vmatprep.subr.bf16.mxu1 %v4183_v8  ;;  %v4282_v7 = vld [vmem:[%s6079_s1 + $0x804] ss:$8 sps:$4 sm:$0xff]  }
  0x4d   : > { %3132 = vmatprep.subr.bf16.mxu0 %v4186_v9  ;;  %2904 = vmatprep.mubr.bf16.mxu1 %v4273_v34  ;;  %v4271_v8 = vld [vmem:[%s4957_s23 + $0x8] ss:$100 sps:$4 sm:$0xff]  }
  0x4e   : > { %3162 = vmatprep.mubr.bf16.mxu0 %v4279_v37  ;;  %v4274_v9 = vld [vmem:[%s6079_s1 + $0x200] ss:$8 sps:$4 sm:$0xff]   ;;  %v4315_v34 = vld [vmem:[%s6079_s1 + $0x264] ss:$8 sps:$4 sm:$0xff]  }
  0x4f   : > { %2875 = vmatpush1.bf16.msra.mxu1 %v4181_v10  ;;  %v4277_v10 = vld [vmem:[%s4957_s23 + $0x38] ss:$100 sps:$4 sm:$0xff]   ;;  %v4316_v37 = vld [vmem:[%s6079_s1 + $0x860] ss:$8 sps:$4 sm:$0xff]  }
  0x50   : > { %3133 = vmatpush1.bf16.msra.mxu0 %v4184_v11  ;;  %2876 = vmatprep.subr.bf16.mxu1 %v4189_v12  ;;  %v4280_v11 = vld [vmem:[%s6079_s1 + $0x800] ss:$8 sps:$4 sm:$0xff]   ;;  %v4285_v12 = vld [vmem:[%s6079_s1 + $0x214] ss:$8 sps:$4 sm:$0xff]  }
  0x51   : > { %3134 = vmatprep.subr.bf16.mxu0 %v4192_v13  ;;  %v4288_v13 = vld [vmem:[%s6079_s1 + $0x814] ss:$8 sps:$4 sm:$0xff]  }
  0x53   : > { %2877 = vmatpush1.bf16.msra.mxu1 %v4187_v14  ;;  %v4283_v14 = vld [vmem:[%s6079_s1 + $0x210] ss:$8 sps:$4 sm:$0xff]  }
  0x54   : > { %3135 = vmatpush1.bf16.msra.mxu0 %v4190_v15  ;;  %2878 = vmatprep.subr.bf16.mxu1 %v4195_v16  ;;  %v4286_v15 = vld [vmem:[%s6079_s1 + $0x810] ss:$8 sps:$4 sm:$0xff]   ;;  %v4291_v16 = vld [vmem:[%s6079_s1 + $0x224] ss:$8 sps:$4 sm:$0xff]  }
  0x55   : > { %3136 = vmatprep.subr.bf16.mxu0 %v4198_v17  ;;  %v4294_v17 = vld [vmem:[%s6079_s1 + $0x824] ss:$8 sps:$4 sm:$0xff]  }
  0x57   : > { %2879 = vmatpush1.bf16.msra.mxu1 %v4193_v18  ;;  %v4289_v18 = vld [vmem:[%s6079_s1 + $0x220] ss:$8 sps:$4 sm:$0xff]  }
  0x58   : > { %3137 = vmatpush1.bf16.msra.mxu0 %v4196_v19  ;;  %2880 = vmatprep.subr.bf16.mxu1 %v4201_v20  ;;  %v4375_v19 = vld [vmem:[%s4957_s23 + $0x14] ss:$100 sps:$4 sm:$0xff]   ;;  %v4292_v20 = vld [vmem:[%s6079_s1 + $0x820] ss:$8 sps:$4 sm:$0xff]  }
  0x59   : > { %3138 = vmatprep.subr.bf16.mxu0 %v4204_v21  ;;  %v4297_v21 = vld [vmem:[%s6079_s1 + $0x234] ss:$8 sps:$4 sm:$0xff]  }
  0x5b   : > { %2881 = vmatpush1.bf16.msra.mxu1 %v4199_v22  ;;  %v4300_v22 = vld [vmem:[%s6079_s1 + $0x834] ss:$8 sps:$4 sm:$0xff]  }
  0x5c   : > { %3139 = vmatpush1.bf16.msra.mxu0 %v4202_v23  ;;  %2882 = vmatprep.subr.bf16.mxu1 %v4207_v24  ;;  %v4381_v23 = vld [vmem:[%s4957_s23 + $0x44] ss:$100 sps:$4 sm:$0xff]   ;;  %v4295_v24 = vld [vmem:[%s6079_s1 + $0x230] ss:$8 sps:$4 sm:$0xff]  }
  0x5d   : > { %3140 = vmatprep.subr.bf16.mxu0 %v4210_v25  ;;  %v4298_v25 = vld [vmem:[%s6079_s1 + $0x830] ss:$8 sps:$4 sm:$0xff]  }
  0x5f   : > { %2883 = vmatpush1.bf16.msra.mxu1 %v4205_v26  ;;  %v4303_v26 = vld [vmem:[%s6079_s1 + $0x244] ss:$8 sps:$4 sm:$0xff]  }
  0x60   : > { %3141 = vmatpush1.bf16.msra.mxu0 %v4208_v27  ;;  %2884 = vmatprep.subr.bf16.mxu1 %v4213_v28  ;;  %v4306_v27 = vld [vmem:[%s6079_s1 + $0x844] ss:$8 sps:$4 sm:$0xff]   ;;  %v4301_v28 = vld [vmem:[%s6079_s1 + $0x240] ss:$8 sps:$4 sm:$0xff]  }
  0x61   : > { %3142 = vmatprep.subr.bf16.mxu0 %v4216_v29  ;;  %v4304_v29 = vld [vmem:[%s6079_s1 + $0x840] ss:$8 sps:$4 sm:$0xff]  }
  0x63   : > { %2885 = vmatpush1.bf16.msra.mxu1 %v4211_v30  ;;  %v4309_v30 = vld [vmem:[%s6079_s1 + $0x254] ss:$8 sps:$4 sm:$0xff]  }
  0x64   : > { %3143 = vmatpush1.bf16.msra.mxu0 %v4214_v31  ;;  %2886 = vmatprep.subr.bf16.mxu1 %v4219_v32  ;;  %v4312_v31 = vld [vmem:[%s6079_s1 + $0x854] ss:$8 sps:$4 sm:$0xff]   ;;  %v4307_v32 = vld [vmem:[%s6079_s1 + $0x250] ss:$8 sps:$4 sm:$0xff]  }
  0x65   : > { %3144 = vmatprep.subr.bf16.mxu0 %v4222_v33  ;;  %v4310_v33 = vld [vmem:[%s6079_s1 + $0x850] ss:$8 sps:$4 sm:$0xff]  }
  0x67   : > { %2887 = vmatpush1.bf16.msra.mxu1 %v4217_v35  ;;  %v4318_v35 = vld [vmem:[%s6079_s1 + $0x864] ss:$8 sps:$4 sm:$0xff]  }
  0x68   : > { %3145 = vmatpush1.bf16.msra.mxu0 %v4220_v36  ;;  %2888 = vmatprep.subr.bf16.mxu1 %v4225_v38  ;;  %v4313_v36 = vld [vmem:[%s6079_s1 + $0x260] ss:$8 sps:$4 sm:$0xff]   ;;  %v4321_v38 = vld [vmem:[%s6079_s1 + $0x274] ss:$8 sps:$4 sm:$0xff]  }
  0x69   : > { %3146 = vmatprep.subr.bf16.mxu0 %v4228_v39  ;;  %v4324_v39 = vld [vmem:[%s6079_s1 + $0x874] ss:$8 sps:$4 sm:$0xff]  }
  0x6b   : > { %2889 = vmatpush1.bf16.msra.mxu1 %v4223_v40  ;;  %v4319_v40 = vld [vmem:[%s6079_s1 + $0x270] ss:$8 sps:$4 sm:$0xff]  }
  0x6c   : > { %3147 = vmatpush1.bf16.msra.mxu0 %v4226_v41  ;;  %2890 = vmatprep.subr.bf16.mxu1 %v4231_v42  ;;  %v4322_v41 = vld [vmem:[%s6079_s1 + $0x870] ss:$8 sps:$4 sm:$0xff]   ;;  %v4327_v42 = vld [vmem:[%s6079_s1 + $0x284] ss:$8 sps:$4 sm:$0xff]  }
  0x6d   : > { %3148 = vmatprep.subr.bf16.mxu0 %v4234_v43  ;;  %v4330_v43 = vld [vmem:[%s6079_s1 + $0x884] ss:$8 sps:$4 sm:$0xff]  }
  0x6f   : > { %2891 = vmatpush1.bf16.msra.mxu1 %v4229_v44  ;;  %v4325_v44 = vld [vmem:[%s6079_s1 + $0x280] ss:$8 sps:$4 sm:$0xff]  }
  0x70   : > { %3149 = vmatpush1.bf16.msra.mxu0 %v4232_v45  ;;  %2892 = vmatprep.subr.bf16.mxu1 %v4237_v46  ;;  %v4328_v45 = vld [vmem:[%s6079_s1 + $0x880] ss:$8 sps:$4 sm:$0xff]   ;;  %v4333_v46 = vld [vmem:[%s6079_s1 + $0x294] ss:$8 sps:$4 sm:$0xff]  }
  0x71   : > { %3150 = vmatprep.subr.bf16.mxu0 %v4240_v47  ;;  %v4336_v47 = vld [vmem:[%s6079_s1 + $0x894] ss:$8 sps:$4 sm:$0xff]  }
  0x73   : > { %2893 = vmatpush1.bf16.msra.mxu1 %v4235_v48  ;;  %v4331_v48 = vld [vmem:[%s6079_s1 + $0x290] ss:$8 sps:$4 sm:$0xff]  }
  0x74   : > { %3151 = vmatpush1.bf16.msra.mxu0 %v4238_v49  ;;  %2894 = vmatprep.subr.bf16.mxu1 %v4243_v50  ;;  %v4334_v49 = vld [vmem:[%s6079_s1 + $0x890] ss:$8 sps:$4 sm:$0xff]   ;;  %v4339_v50 = vld [vmem:[%s6079_s1 + $0x2a4] ss:$8 sps:$4 sm:$0xff]  }
  0x75   : > { %3152 = vmatprep.subr.bf16.mxu0 %v4246_v51  ;;  %v4342_v51 = vld [vmem:[%s6079_s1 + $0x8a4] ss:$8 sps:$4 sm:$0xff]  }
  0x77   : > { %2895 = vmatpush1.bf16.msra.mxu1 %v4241_v52  ;;  %v4337_v52 = vld [vmem:[%s6079_s1 + $0x2a0] ss:$8 sps:$4 sm:$0xff]  }
  0x78   : > { %3153 = vmatpush1.bf16.msra.mxu0 %v4244_v53  ;;  %2896 = vmatprep.subr.bf16.mxu1 %v4249_v54  ;;  %v4340_v53 = vld [vmem:[%s6079_s1 + $0x8a0] ss:$8 sps:$4 sm:$0xff]   ;;  %v4345_v54 = vld [vmem:[%s6079_s1 + $0x2b4] ss:$8 sps:$4 sm:$0xff]  }
  0x79   : > { %3154 = vmatprep.subr.bf16.mxu0 %v4252_v55  ;;  %v4348_v55 = vld [vmem:[%s6079_s1 + $0x8b4] ss:$8 sps:$4 sm:$0xff]  }
  0x7b   : > { %2897 = vmatpush1.bf16.msra.mxu1 %v4247_v56  ;;  %v4343_v56 = vld [vmem:[%s6079_s1 + $0x2b0] ss:$8 sps:$4 sm:$0xff]  }
  0x7c   : > { %3155 = vmatpush1.bf16.msra.mxu0 %v4250_v57  ;;  %2898 = vmatprep.subr.bf16.mxu1 %v4255_v58  ;;  %v4346_v57 = vld [vmem:[%s6079_s1 + $0x8b0] ss:$8 sps:$4 sm:$0xff]   ;;  %v4351_v58 = vld [vmem:[%s6079_s1 + $0x2c4] ss:$8 sps:$4 sm:$0xff]  }
  0x7d   : > { %3156 = vmatprep.subr.bf16.mxu0 %v4258_v59  ;;  %v4354_v59 = vld [vmem:[%s6079_s1 + $0x8c4] ss:$8 sps:$4 sm:$0xff]  }
  0x7f   : > { %2899 = vmatpush1.bf16.msra.mxu1 %v4253_v60  ;;  %v4349_v60 = vld [vmem:[%s6079_s1 + $0x2c0] ss:$8 sps:$4 sm:$0xff]  }
  0x80   : > { %3157 = vmatpush1.bf16.msra.mxu0 %v4256_v61  ;;  %2900 = vmatprep.subr.bf16.mxu1 %v4261_v62  ;;  %v4352_v61 = vld [vmem:[%s6079_s1 + $0x8c0] ss:$8 sps:$4 sm:$0xff]   ;;  %v4357_v62 = vld [vmem:[%s6079_s1 + $0x2d4] ss:$8 sps:$4 sm:$0xff]  }
  0x81   : > { %3158 = vmatprep.subr.bf16.mxu0 %v4264_v63  ;;  %v4360_v63 = vld [vmem:[%s6079_s1 + $0x8d4] ss:$8 sps:$4 sm:$0xff]  }
  0x83   : > { %2901 = vmatpush1.bf16.msra.mxu1 %v4259_v0  ;;  %v4355_v0 = vld [vmem:[%s6079_s1 + $0x2d0] ss:$8 sps:$4 sm:$0xff]  }
  0x84   : > { %3159 = vmatpush1.bf16.msra.mxu0 %v4262_v1  ;;  %2902 = vmatprep.subr.bf16.mxu1 %v4267_v2  ;;  %v4358_v1 = vld [vmem:[%s6079_s1 + $0x8d0] ss:$8 sps:$4 sm:$0xff]   ;;  %v4363_v2 = vld [vmem:[%s6079_s1 + $0x2e4] ss:$8 sps:$4 sm:$0xff]  }
  0x85   : > { %3160 = vmatprep.subr.bf16.mxu0 %v4270_v3  ;;  %v4366_v3 = vld [vmem:[%s6079_s1 + $0x8e4] ss:$8 sps:$4 sm:$0xff]  }
  0x87   : > { %2903 = vmatpush1.bf16.msra.mxu1 %v4265_v4  ;;  %v4361_v4 = vld [vmem:[%s6079_s1 + $0x2e0] ss:$8 sps:$4 sm:$0xff]  }
  0x88   : > { %3161 = vmatpush1.bf16.msra.mxu0 %v4268_v5  ;;  %2915 = vmatprep.subr.bf16.mxu1 %v4276_v6  ;;  %v4364_v5 = vld [vmem:[%s6079_s1 + $0x8e0] ss:$8 sps:$4 sm:$0xff]   ;;  %v4369_v6 = vld [vmem:[%s6079_s1 + $0x2f4] ss:$8 sps:$4 sm:$0xff]  }
  0x89   : > { %3173 = vmatprep.subr.bf16.mxu0 %v4282_v7  ;;  %v4372_v7 = vld [vmem:[%s6079_s1 + $0x8f4] ss:$8 sps:$4 sm:$0xff]  }
  0x8a   : > { %2905 = vmatmul.mubr.bf16.vlgmr.msra.gmra.mrb[0].mxu1 %v4271_v8  ;;  %v4367_v8 = vld [vmem:[%s6079_s1 + $0x2f0] ss:$8 sps:$4 sm:$0xff]  }
  0x8b   : > { %3163 = vmatmul.mubr.bf16.vlgmr.msra.gmra.mrb[0].mxu0 %v4277_v10  ;;  %2916 = vmatpush1.bf16.msra.mxu1 %v4274_v9  ;;  %v4370_v9 = vld [vmem:[%s6079_s1 + $0x8f0] ss:$8 sps:$4 sm:$0xff]   ;;  %v4378_v10 = vld [vmem:[%s6079_s1 + $0x304] ss:$8 sps:$4 sm:$0xff]  }
  0x8c   : > { %3174 = vmatpush1.bf16.msra.mxu0 %v4280_v11  ;;  %2917 = vmatprep.subr.bf16.mxu1 %v4285_v12  ;;  %v4384_v11 = vld [vmem:[%s6079_s1 + $0x904] ss:$8 sps:$4 sm:$0xff]   ;;  %v4373_v12 = vld [vmem:[%s4957_s23 + $0x10] ss:$100 sps:$4 sm:$0xff]  }
  0x8d   : > { %3175 = vmatprep.subr.bf16.mxu0 %v4288_v13  ;;  %2947 = vmatprep.mubr.bf16.mxu1 %v4375_v19  ;;  %v4376_v13 = vld [vmem:[%s6079_s1 + $0x300] ss:$8 sps:$4 sm:$0xff]   ;;  %v4483_v19 = vld [vmem:[%s4957_s23 + $0x4c] ss:$100 sps:$4 sm:$0xff]  }
  0x8e   : > { %3205 = vmatprep.mubr.bf16.mxu0 %v4381_v23  ;;  %v4396_v23 = vld [vmem:[%s6079_s1 + $0x924] ss:$8 sps:$4 sm:$0xff]  }
  0x8f   : > { %2918 = vmatpush1.bf16.msra.mxu1 %v4283_v14  ;;  %v4379_v14 = vld [vmem:[%s4957_s23 + $0x40] ss:$100 sps:$4 sm:$0xff]  }
  0x90   : > { %3176 = vmatpush1.bf16.msra.mxu0 %v4286_v15  ;;  %2919 = vmatprep.subr.bf16.mxu1 %v4291_v16  ;;  %v4382_v15 = vld [vmem:[%s6079_s1 + $0x900] ss:$8 sps:$4 sm:$0xff]   ;;  %v4387_v16 = vld [vmem:[%s6079_s1 + $0x314] ss:$8 sps:$4 sm:$0xff]  }
  0x91   : > { %3177 = vmatprep.subr.bf16.mxu0 %v4294_v17  ;;  %v4390_v17 = vld [vmem:[%s6079_s1 + $0x914] ss:$8 sps:$4 sm:$0xff]  }
  0x93   : > { %2920 = vmatpush1.bf16.msra.mxu1 %v4289_v18  ;;  %v4477_v18 = vld [vmem:[%s4957_s23 + $0x1c] ss:$100 sps:$4 sm:$0xff]  }
  0x94   : > { %3178 = vmatpush1.bf16.msra.mxu0 %v4292_v20  ;;  %2921 = vmatprep.subr.bf16.mxu1 %v4297_v21  ;;  %v4385_v20 = vld [vmem:[%s6079_s1 + $0x310] ss:$8 sps:$4 sm:$0xff]  }
  0x95   : > { %3179 = vmatprep.subr.bf16.mxu0 %v4300_v22  ;;  %v4388_v21 = vld [vmem:[%s6079_s1 + $0x910] ss:$8 sps:$4 sm:$0xff]   ;;  %v4393_v22 = vld [vmem:[%s6079_s1 + $0x324] ss:$8 sps:$4 sm:$0xff]  }
  0x97   : > { %2922 = vmatpush1.bf16.msra.mxu1 %v4295_v24  ;;  %v4391_v24 = vld [vmem:[%s6079_s1 + $0x320] ss:$8 sps:$4 sm:$0xff]  }
  0x98   : > { %3180 = vmatpush1.bf16.msra.mxu0 %v4298_v25  ;;  %2923 = vmatprep.subr.bf16.mxu1 %v4303_v26  ;;  %v4394_v25 = vld [vmem:[%s6079_s1 + $0x920] ss:$8 sps:$4 sm:$0xff]   ;;  %v4399_v26 = vld [vmem:[%s6079_s1 + $0x334] ss:$8 sps:$4 sm:$0xff]  }
  0x99   : > { %3181 = vmatprep.subr.bf16.mxu0 %v4306_v27  ;;  %v4402_v27 = vld [vmem:[%s6079_s1 + $0x934] ss:$8 sps:$4 sm:$0xff]  }
  0x9b   : > { %2924 = vmatpush1.bf16.msra.mxu1 %v4301_v28  ;;  %v4397_v28 = vld [vmem:[%s6079_s1 + $0x330] ss:$8 sps:$4 sm:$0xff]  }
  0x9c   : > { %3182 = vmatpush1.bf16.msra.mxu0 %v4304_v29  ;;  %2925 = vmatprep.subr.bf16.mxu1 %v4309_v30  ;;  %v4400_v29 = vld [vmem:[%s6079_s1 + $0x930] ss:$8 sps:$4 sm:$0xff]   ;;  %v4405_v30 = vld [vmem:[%s6079_s1 + $0x344] ss:$8 sps:$4 sm:$0xff]  }
  0x9d   : > { %3183 = vmatprep.subr.bf16.mxu0 %v4312_v31  ;;  %v4408_v31 = vld [vmem:[%s6079_s1 + $0x944] ss:$8 sps:$4 sm:$0xff]  }
  0x9f   : > { %2926 = vmatpush1.bf16.msra.mxu1 %v4307_v32  ;;  %v4403_v32 = vld [vmem:[%s6079_s1 + $0x340] ss:$8 sps:$4 sm:$0xff]  }
  0xa0   : > { %3184 = vmatpush1.bf16.msra.mxu0 %v4310_v33  ;;  %2927 = vmatprep.subr.bf16.mxu1 %v4315_v34  ;;  %v4406_v33 = vld [vmem:[%s6079_s1 + $0x940] ss:$8 sps:$4 sm:$0xff]   ;;  %v4411_v34 = vld [vmem:[%s6079_s1 + $0x354] ss:$8 sps:$4 sm:$0xff]  }
  0xa1   : > { %3185 = vmatprep.subr.bf16.mxu0 %v4318_v35  ;;  %v4414_v35 = vld [vmem:[%s6079_s1 + $0x954] ss:$8 sps:$4 sm:$0xff]  }
  0xa3   : > { %2928 = vmatpush1.bf16.msra.mxu1 %v4313_v36  ;;  %v4409_v36 = vld [vmem:[%s6079_s1 + $0x350] ss:$8 sps:$4 sm:$0xff]  }
  0xa4   : > { %3186 = vmatpush1.bf16.msra.mxu0 %v4316_v37  ;;  %2929 = vmatprep.subr.bf16.mxu1 %v4321_v38  ;;  %v4412_v37 = vld [vmem:[%s6079_s1 + $0x950] ss:$8 sps:$4 sm:$0xff]   ;;  %v4417_v38 = vld [vmem:[%s6079_s1 + $0x364] ss:$8 sps:$4 sm:$0xff]  }
  0xa5   : > { %3187 = vmatprep.subr.bf16.mxu0 %v4324_v39  ;;  %v4420_v39 = vld [vmem:[%s6079_s1 + $0x964] ss:$8 sps:$4 sm:$0xff]  }
  0xa7   : > { %2930 = vmatpush1.bf16.msra.mxu1 %v4319_v40  ;;  %v4415_v40 = vld [vmem:[%s6079_s1 + $0x360] ss:$8 sps:$4 sm:$0xff]  }
  0xa8   : > { %3188 = vmatpush1.bf16.msra.mxu0 %v4322_v41  ;;  %2931 = vmatprep.subr.bf16.mxu1 %v4327_v42  ;;  %v4418_v41 = vld [vmem:[%s6079_s1 + $0x960] ss:$8 sps:$4 sm:$0xff]   ;;  %v4423_v42 = vld [vmem:[%s6079_s1 + $0x374] ss:$8 sps:$4 sm:$0xff]  }
  0xa9   : > { %3189 = vmatprep.subr.bf16.mxu0 %v4330_v43  ;;  %v4426_v43 = vld [vmem:[%s6079_s1 + $0x974] ss:$8 sps:$4 sm:$0xff]  }
  0xab   : > { %2932 = vmatpush1.bf16.msra.mxu1 %v4325_v44  ;;  %v4421_v44 = vld [vmem:[%s6079_s1 + $0x370] ss:$8 sps:$4 sm:$0xff]  }
  0xac   : > { %3190 = vmatpush1.bf16.msra.mxu0 %v4328_v45  ;;  %2933 = vmatprep.subr.bf16.mxu1 %v4333_v46  ;;  %v4424_v45 = vld [vmem:[%s6079_s1 + $0x970] ss:$8 sps:$4 sm:$0xff]   ;;  %v4429_v46 = vld [vmem:[%s6079_s1 + $0x384] ss:$8 sps:$4 sm:$0xff]  }
  0xad   : > { %3191 = vmatprep.subr.bf16.mxu0 %v4336_v47  ;;  %v4432_v47 = vld [vmem:[%s6079_s1 + $0x984] ss:$8 sps:$4 sm:$0xff]  }
  0xaf   : > { %2934 = vmatpush1.bf16.msra.mxu1 %v4331_v48  ;;  %v4427_v48 = vld [vmem:[%s6079_s1 + $0x380] ss:$8 sps:$4 sm:$0xff]  }
  0xb0   : > { %3192 = vmatpush1.bf16.msra.mxu0 %v4334_v49  ;;  %2935 = vmatprep.subr.bf16.mxu1 %v4339_v50  ;;  %v4430_v49 = vld [vmem:[%s6079_s1 + $0x980] ss:$8 sps:$4 sm:$0xff]   ;;  %v4435_v50 = vld [vmem:[%s6079_s1 + $0x394] ss:$8 sps:$4 sm:$0xff]  }
  0xb1   : > { %3193 = vmatprep.subr.bf16.mxu0 %v4342_v51  ;;  %v4438_v51 = vld [vmem:[%s6079_s1 + $0x994] ss:$8 sps:$4 sm:$0xff]  }
  0xb3   : > { %2936 = vmatpush1.bf16.msra.mxu1 %v4337_v52  ;;  %v4433_v52 = vld [vmem:[%s6079_s1 + $0x390] ss:$8 sps:$4 sm:$0xff]  }
  0xb4   : > { %3194 = vmatpush1.bf16.msra.mxu0 %v4340_v53  ;;  %2937 = vmatprep.subr.bf16.mxu1 %v4345_v54  ;;  %v4436_v53 = vld [vmem:[%s6079_s1 + $0x990] ss:$8 sps:$4 sm:$0xff]   ;;  %v4441_v54 = vld [vmem:[%s6079_s1 + $0x3a4] ss:$8 sps:$4 sm:$0xff]  }
  0xb5   : > { %3195 = vmatprep.subr.bf16.mxu0 %v4348_v55  ;;  %v4444_v55 = vld [vmem:[%s6079_s1 + $0x9a4] ss:$8 sps:$4 sm:$0xff]  }
  0xb7   : > { %2938 = vmatpush1.bf16.msra.mxu1 %v4343_v56  ;;  %v4439_v56 = vld [vmem:[%s6079_s1 + $0x3a0] ss:$8 sps:$4 sm:$0xff]  }
  0xb8   : > { %3196 = vmatpush1.bf16.msra.mxu0 %v4346_v57  ;;  %2939 = vmatprep.subr.bf16.mxu1 %v4351_v58  ;;  %v4442_v57 = vld [vmem:[%s6079_s1 + $0x9a0] ss:$8 sps:$4 sm:$0xff]   ;;  %v4447_v58 = vld [vmem:[%s6079_s1 + $0x3b4] ss:$8 sps:$4 sm:$0xff]  }
  0xb9   : > { %3197 = vmatprep.subr.bf16.mxu0 %v4354_v59  ;;  %v4450_v59 = vld [vmem:[%s6079_s1 + $0x9b4] ss:$8 sps:$4 sm:$0xff]  }
  0xbb   : > { %2940 = vmatpush1.bf16.msra.mxu1 %v4349_v60  ;;  %v4445_v60 = vld [vmem:[%s6079_s1 + $0x3b0] ss:$8 sps:$4 sm:$0xff]  }
  0xbc   : > { %3198 = vmatpush1.bf16.msra.mxu0 %v4352_v61  ;;  %2941 = vmatprep.subr.bf16.mxu1 %v4357_v62  ;;  %v4448_v61 = vld [vmem:[%s6079_s1 + $0x9b0] ss:$8 sps:$4 sm:$0xff]   ;;  %v4453_v62 = vld [vmem:[%s6079_s1 + $0x3c4] ss:$8 sps:$4 sm:$0xff]  }
  0xbd   : > { %3199 = vmatprep.subr.bf16.mxu0 %v4360_v63  ;;  %v4456_v63 = vld [vmem:[%s6079_s1 + $0x9c4] ss:$8 sps:$4 sm:$0xff]  }
  0xbf   : > { %2942 = vmatpush1.bf16.msra.mxu1 %v4355_v0  ;;  %v4451_v0 = vld [vmem:[%s6079_s1 + $0x3c0] ss:$8 sps:$4 sm:$0xff]  }
  0xc0   : > { %3200 = vmatpush1.bf16.msra.mxu0 %v4358_v1  ;;  %2943 = vmatprep.subr.bf16.mxu1 %v4363_v2  ;;  %v4454_v1 = vld [vmem:[%s6079_s1 + $0x9c0] ss:$8 sps:$4 sm:$0xff]   ;;  %v4459_v2 = vld [vmem:[%s6079_s1 + $0x3d4] ss:$8 sps:$4 sm:$0xff]  }
  0xc1   : > { %3201 = vmatprep.subr.bf16.mxu0 %v4366_v3  ;;  %v4462_v3 = vld [vmem:[%s6079_s1 + $0x9d4] ss:$8 sps:$4 sm:$0xff]  }
  0xc3   : > { %2944 = vmatpush1.bf16.msra.mxu1 %v4361_v4  ;;  %v4457_v4 = vld [vmem:[%s6079_s1 + $0x3d0] ss:$8 sps:$4 sm:$0xff]  }
  0xc4   : > { %3202 = vmatpush1.bf16.msra.mxu0 %v4364_v5  ;;  %2945 = vmatprep.subr.bf16.mxu1 %v4369_v6  ;;  %v4460_v5 = vld [vmem:[%s6079_s1 + $0x9d0] ss:$8 sps:$4 sm:$0xff]   ;;  %v4465_v6 = vld [vmem:[%s6079_s1 + $0x3e4] ss:$8 sps:$4 sm:$0xff]  }
  0xc5   : > { %3203 = vmatprep.subr.bf16.mxu0 %v4372_v7  ;;  %v4468_v7 = vld [vmem:[%s6079_s1 + $0x9e4] ss:$8 sps:$4 sm:$0xff]  }
  0xc7   : > { %2946 = vmatpush1.bf16.msra.mxu1 %v4367_v8  ;;  %v4463_v8 = vld [vmem:[%s6079_s1 + $0x3e0] ss:$8 sps:$4 sm:$0xff]  }
  0xc8   : > { %3204 = vmatpush1.bf16.msra.mxu0 %v4370_v9  ;;  %2958 = vmatprep.subr.bf16.mxu1 %v4378_v10  ;;  %v4466_v9 = vld [vmem:[%s6079_s1 + $0x9e0] ss:$8 sps:$4 sm:$0xff]   ;;  %v4471_v10 = vld [vmem:[%s6079_s1 + $0x3f4] ss:$8 sps:$4 sm:$0xff]  }
  0xc9   : > { %3216 = vmatprep.subr.bf16.mxu0 %v4384_v11  ;;  %v4474_v11 = vld [vmem:[%s6079_s1 + $0x9f4] ss:$8 sps:$4 sm:$0xff]  }
  0xca   : > { %2948 = vmatmul.mubr.bf16.vlgmr.msra.gmra.mrb[0].mxu1 %v4373_v12  ;;  %v4469_v12 = vld [vmem:[%s6079_s1 + $0x3f0] ss:$8 sps:$4 sm:$0xff]  }
  0xcb   : > { %3206 = vmatmul.mubr.bf16.vlgmr.msra.gmra.mrb[0].mxu0 %v4379_v14  ;;  %2959 = vmatpush1.bf16.msra.mxu1 %v4376_v13  ;;  %v4472_v13 = vld [vmem:[%s6079_s1 + $0x9f0] ss:$8 sps:$4 sm:$0xff]   ;;  %v4480_v14 = vld [vmem:[%s6079_s1 + $0x404] ss:$8 sps:$4 sm:$0xff]  }
  0xcc   : > { %3217 = vmatpush1.bf16.msra.mxu0 %v4382_v15  ;;  %2960 = vmatprep.subr.bf16.mxu1 %v4387_v16  ;;  %v4486_v15 = vld [vmem:[%s6079_s1 + $0xa04] ss:$8 sps:$4 sm:$0xff]   ;;  %v4475_v16 = vld [vmem:[%s4957_s23 + $0x18] ss:$100 sps:$4 sm:$0xff]  }
  0xcd   : > { %3218 = vmatprep.subr.bf16.mxu0 %v4390_v17  ;;  %2990 = vmatprep.mubr.bf16.mxu1 %v4477_v18  ;;  %v4478_v17 = vld [vmem:[%s6079_s1 + $0x400] ss:$8 sps:$4 sm:$0xff]  }
  0xce   : > { %3248 = vmatprep.mubr.bf16.mxu0 %v4483_v19  ;;  %v4481_v18 = vld [vmem:[%s4957_s23 + $0x48] ss:$100 sps:$4 sm:$0xff]  }
  0xcf   : > { %2961 = vmatpush1.bf16.msra.mxu1 %v4385_v20  ;;  %v4484_v19 = vld [vmem:[%s6079_s1 + $0xa00] ss:$8 sps:$4 sm:$0xff]   ;;  %v4489_v20 = vld [vmem:[%s6079_s1 + $0x414] ss:$8 sps:$4 sm:$0xff]  }
  0xd0   : > { %3219 = vmatpush1.bf16.msra.mxu0 %v4388_v21  ;;  %2962 = vmatprep.subr.bf16.mxu1 %v4393_v22  ;;  %v4492_v21 = vld [vmem:[%s6079_s1 + $0xa14] ss:$8 sps:$4 sm:$0xff]   ;;  %v4579_v22 = vld [vmem:[%s4957_s23 + $0x24] ss:$100 sps:$4 sm:$0xff]  }
  0xd1   : > { %3220 = vmatprep.subr.bf16.mxu0 %v4396_v23  ;;  %v4585_v23 = vld [vmem:[%s4957_s23 + $0x54] ss:$100 sps:$4 sm:$0xff]  }
  0xd3   : > { %2963 = vmatpush1.bf16.msra.mxu1 %v4391_v24  ;;  %v4487_v24 = vld [vmem:[%s6079_s1 + $0x410] ss:$8 sps:$4 sm:$0xff]  }
  0xd4   : > { %3221 = vmatpush1.bf16.msra.mxu0 %v4394_v25  ;;  %2964 = vmatprep.subr.bf16.mxu1 %v4399_v26  ;;  %v4490_v25 = vld [vmem:[%s6079_s1 + $0xa10] ss:$8 sps:$4 sm:$0xff]   ;;  %v4495_v26 = vld [vmem:[%s6079_s1 + $0x424] ss:$8 sps:$4 sm:$0xff]  }
  0xd5   : > { %3222 = vmatprep.subr.bf16.mxu0 %v4402_v27  ;;  %v4498_v27 = vld [vmem:[%s6079_s1 + $0xa24] ss:$8 sps:$4 sm:$0xff]  }
  0xd7   : > { %2965 = vmatpush1.bf16.msra.mxu1 %v4397_v28  ;;  %v4493_v28 = vld [vmem:[%s6079_s1 + $0x420] ss:$8 sps:$4 sm:$0xff]  }
  0xd8   : > { %3223 = vmatpush1.bf16.msra.mxu0 %v4400_v29  ;;  %2966 = vmatprep.subr.bf16.mxu1 %v4405_v30  ;;  %v4496_v29 = vld [vmem:[%s6079_s1 + $0xa20] ss:$8 sps:$4 sm:$0xff]   ;;  %v4501_v30 = vld [vmem:[%s6079_s1 + $0x434] ss:$8 sps:$4 sm:$0xff]  }
  0xd9   : > { %3224 = vmatprep.subr.bf16.mxu0 %v4408_v31  ;;  %v4504_v31 = vld [vmem:[%s6079_s1 + $0xa34] ss:$8 sps:$4 sm:$0xff]  }
  0xdb   : > { %2967 = vmatpush1.bf16.msra.mxu1 %v4403_v32  ;;  %v4499_v32 = vld [vmem:[%s6079_s1 + $0x430] ss:$8 sps:$4 sm:$0xff]  }
  0xdc   : > { %3225 = vmatpush1.bf16.msra.mxu0 %v4406_v33  ;;  %2968 = vmatprep.subr.bf16.mxu1 %v4411_v34  ;;  %v4502_v33 = vld [vmem:[%s6079_s1 + $0xa30] ss:$8 sps:$4 sm:$0xff]   ;;  %v4507_v34 = vld [vmem:[%s6079_s1 + $0x444] ss:$8 sps:$4 sm:$0xff]  }
  0xdd   : > { %3226 = vmatprep.subr.bf16.mxu0 %v4414_v35  ;;  %v4510_v35 = vld [vmem:[%s6079_s1 + $0xa44] ss:$8 sps:$4 sm:$0xff]  }
  0xdf   : > { %2969 = vmatpush1.bf16.msra.mxu1 %v4409_v36  ;;  %v4505_v36 = vld [vmem:[%s6079_s1 + $0x440] ss:$8 sps:$4 sm:$0xff]  }
  0xe0   : > { %3227 = vmatpush1.bf16.msra.mxu0 %v4412_v37  ;;  %2970 = vmatprep.subr.bf16.mxu1 %v4417_v38  ;;  %v4508_v37 = vld [vmem:[%s6079_s1 + $0xa40] ss:$8 sps:$4 sm:$0xff]   ;;  %v4513_v38 = vld [vmem:[%s6079_s1 + $0x454] ss:$8 sps:$4 sm:$0xff]  }
  0xe1   : > { %3228 = vmatprep.subr.bf16.mxu0 %v4420_v39  ;;  %v4516_v39 = vld [vmem:[%s6079_s1 + $0xa54] ss:$8 sps:$4 sm:$0xff]  }
  0xe3   : > { %2971 = vmatpush1.bf16.msra.mxu1 %v4415_v40  ;;  %v4511_v40 = vld [vmem:[%s6079_s1 + $0x450] ss:$8 sps:$4 sm:$0xff]  }
  0xe4   : > { %3229 = vmatpush1.bf16.msra.mxu0 %v4418_v41  ;;  %2972 = vmatprep.subr.bf16.mxu1 %v4423_v42  ;;  %v4514_v41 = vld [vmem:[%s6079_s1 + $0xa50] ss:$8 sps:$4 sm:$0xff]   ;;  %v4519_v42 = vld [vmem:[%s6079_s1 + $0x464] ss:$8 sps:$4 sm:$0xff]  }
  0xe5   : > { %3230 = vmatprep.subr.bf16.mxu0 %v4426_v43  ;;  %v4522_v43 = vld [vmem:[%s6079_s1 + $0xa64] ss:$8 sps:$4 sm:$0xff]  }
  0xe7   : > { %2973 = vmatpush1.bf16.msra.mxu1 %v4421_v44  ;;  %v4517_v44 = vld [vmem:[%s6079_s1 + $0x460] ss:$8 sps:$4 sm:$0xff]  }
  0xe8   : > { %3231 = vmatpush1.bf16.msra.mxu0 %v4424_v45  ;;  %2974 = vmatprep.subr.bf16.mxu1 %v4429_v46  ;;  %v4520_v45 = vld [vmem:[%s6079_s1 + $0xa60] ss:$8 sps:$4 sm:$0xff]   ;;  %v4525_v46 = vld [vmem:[%s6079_s1 + $0x474] ss:$8 sps:$4 sm:$0xff]  }
  0xe9   : > { %3232 = vmatprep.subr.bf16.mxu0 %v4432_v47  ;;  %v4528_v47 = vld [vmem:[%s6079_s1 + $0xa74] ss:$8 sps:$4 sm:$0xff]  }
  0xeb   : > { %2975 = vmatpush1.bf16.msra.mxu1 %v4427_v48  ;;  %v4523_v48 = vld [vmem:[%s6079_s1 + $0x470] ss:$8 sps:$4 sm:$0xff]  }
  0xec   : > { %3233 = vmatpush1.bf16.msra.mxu0 %v4430_v49  ;;  %2976 = vmatprep.subr.bf16.mxu1 %v4435_v50  ;;  %v4526_v49 = vld [vmem:[%s6079_s1 + $0xa70] ss:$8 sps:$4 sm:$0xff]   ;;  %v4531_v50 = vld [vmem:[%s6079_s1 + $0x484] ss:$8 sps:$4 sm:$0xff]  }
  0xed   : > { %3234 = vmatprep.subr.bf16.mxu0 %v4438_v51  ;;  %v4534_v51 = vld [vmem:[%s6079_s1 + $0xa84] ss:$8 sps:$4 sm:$0xff]  }
  0xef   : > { %2977 = vmatpush1.bf16.msra.mxu1 %v4433_v52  ;;  %v4529_v52 = vld [vmem:[%s6079_s1 + $0x480] ss:$8 sps:$4 sm:$0xff]  }
  0xf0   : > { %3235 = vmatpush1.bf16.msra.mxu0 %v4436_v53  ;;  %2978 = vmatprep.subr.bf16.mxu1 %v4441_v54  ;;  %v4532_v53 = vld [vmem:[%s6079_s1 + $0xa80] ss:$8 sps:$4 sm:$0xff]   ;;  %v4537_v54 = vld [vmem:[%s6079_s1 + $0x494] ss:$8 sps:$4 sm:$0xff]  }
  0xf1   : > { %3236 = vmatprep.subr.bf16.mxu0 %v4444_v55  ;;  %v4540_v55 = vld [vmem:[%s6079_s1 + $0xa94] ss:$8 sps:$4 sm:$0xff]  }
  0xf3   : > { %2979 = vmatpush1.bf16.msra.mxu1 %v4439_v56  ;;  %v4750_v56 = vmov 0  }
  0xf4   : > { %3237 = vmatpush1.bf16.msra.mxu0 %v4442_v57  ;;  %2980 = vmatprep.subr.bf16.mxu1 %v4447_v58  ;;  %v4535_v57 = vld [vmem:[%s6079_s1 + $0x490] ss:$8 sps:$4 sm:$0xff]  }
  0xf5   : > { %3238 = vmatprep.subr.bf16.mxu0 %v4450_v59  ;;  %4072 = vset.pattern.permute.xlu0 %v4750_v56  ;;  %v4538_v58 = vld [vmem:[%s6079_s1 + $0xa90] ss:$8 sps:$4 sm:$0xff]   ;;  %v4543_v59 = vld [vmem:[%s6079_s1 + $0x4a4] ss:$8 sps:$4 sm:$0xff]  }
  0xf7   : > { %2981 = vmatpush1.bf16.msra.mxu1 %v4445_v60  ;;  %v4546_v60 = vld [vmem:[%s6079_s1 + $0xaa4] ss:$8 sps:$4 sm:$0xff]  }
  0xf8   : > { %3239 = vmatpush1.bf16.msra.mxu0 %v4448_v61  ;;  %2982 = vmatprep.subr.bf16.mxu1 %v4453_v62  ;;  %v3388_v61 = vld [vmem:[%s251_s25] sm:$0xff]  ;;  %v3389_v62 = vld [vmem:[%s251_s25 + $0x8] sm:$0xff] }
  0xf9   : > { %3240 = vmatprep.subr.bf16.mxu0 %v4456_v63  ;;  %3392 = vperm.xlu0 %4072, %v3388_v61   ;;  %v4541_v63 = vld [vmem:[%s6079_s1 + $0x4a0] ss:$8 sps:$4 sm:$0xff]  }
  0xfa   : > { %v4634_v61 = vld [vmem:[%s6079_s1 + $0xb80] ss:$8 sps:$4 sm:$0xff]  }
  0xfb   : > { %2983 = vmatpush1.bf16.msra.mxu1 %v4451_v0  ;;  %v4544_v0 = vld [vmem:[%s6079_s1 + $0xaa0] ss:$8 sps:$4 sm:$0xff]  }
  0xfc   : > { %3241 = vmatpush1.bf16.msra.mxu0 %v4454_v1  ;;  %2984 = vmatprep.subr.bf16.mxu1 %v4459_v2  ;;  %v4549_v1 = vld [vmem:[%s6079_s1 + $0x4b4] ss:$8 sps:$4 sm:$0xff]  }
  0xfd   : > { %3242 = vmatprep.subr.bf16.mxu0 %v4462_v3  ;;  %v4552_v2 = vld [vmem:[%s6079_s1 + $0xab4] ss:$8 sps:$4 sm:$0xff]   ;;  %3397 = vperm.xlu0 %4072, %v3389_v62   ;;  %v4547_v3 = vld [vmem:[%s6079_s1 + $0x4b0] ss:$8 sps:$4 sm:$0xff]  }
  0xfe   : > { %v4639_v62 = vld [vmem:[%s6079_s1 + $0x594] ss:$8 sps:$4 sm:$0xff]  }
  0xff   : > { %2985 = vmatpush1.bf16.msra.mxu1 %v4457_v4  ;;  %v4550_v4 = vld [vmem:[%s6079_s1 + $0xab0] ss:$8 sps:$4 sm:$0xff]  }
 0x100   : > { %3243 = vmatpush1.bf16.msra.mxu0 %v4460_v5  ;;  %2986 = vmatprep.subr.bf16.mxu1 %v4465_v6  ;;  %v4555_v5 = vld [vmem:[%s6079_s1 + $0x4c4] ss:$8 sps:$4 sm:$0xff]  }
 0x101   : > { %3244 = vmatprep.subr.bf16.mxu0 %v4468_v7  ;;  %v4558_v6 = vld [vmem:[%s6079_s1 + $0xac4] ss:$8 sps:$4 sm:$0xff]   ;;  %v4553_v7 = vld [vmem:[%s6079_s1 + $0x4c0] ss:$8 sps:$4 sm:$0xff]  }
 0x103   : > { %2987 = vmatpush1.bf16.msra.mxu1 %v4463_v8  ;;  %v4556_v8 = vld [vmem:[%s6079_s1 + $0xac0] ss:$8 sps:$4 sm:$0xff]  }
 0x104   : > { %3245 = vmatpush1.bf16.msra.mxu0 %v4466_v9  ;;  %2988 = vmatprep.subr.bf16.mxu1 %v4471_v10  ;;  %v4561_v9 = vld [vmem:[%s6079_s1 + $0x4d4] ss:$8 sps:$4 sm:$0xff]  }
 0x105   : > { %3246 = vmatprep.subr.bf16.mxu0 %v4474_v11  ;;  %v4564_v10 = vld [vmem:[%s6079_s1 + $0xad4] ss:$8 sps:$4 sm:$0xff]   ;;  %v4559_v11 = vld [vmem:[%s6079_s1 + $0x4d0] ss:$8 sps:$4 sm:$0xff]  }
 0x107   : > { %2989 = vmatpush1.bf16.msra.mxu1 %v4469_v12  ;;  %v4562_v12 = vld [vmem:[%s6079_s1 + $0xad0] ss:$8 sps:$4 sm:$0xff]  }
 0x108   : > { %3247 = vmatpush1.bf16.msra.mxu0 %v4472_v13  ;;  %3001 = vmatprep.subr.bf16.mxu1 %v4480_v14  ;;  %v4567_v13 = vld [vmem:[%s6079_s1 + $0x4e4] ss:$8 sps:$4 sm:$0xff]  }
 0x109   : > { %3259 = vmatprep.subr.bf16.mxu0 %v4486_v15  ;;  %v4570_v14 = vld [vmem:[%s6079_s1 + $0xae4] ss:$8 sps:$4 sm:$0xff]   ;;  %v4565_v15 = vld [vmem:[%s6079_s1 + $0x4e0] ss:$8 sps:$4 sm:$0xff]  }
 0x10a   : > { %2991 = vmatmul.mubr.bf16.vlgmr.msra.gmra.mrb[0].mxu1 %v4475_v16  ;;  %v4568_v16 = vld [vmem:[%s6079_s1 + $0xae0] ss:$8 sps:$4 sm:$0xff]  }
 0x10b   : > { %3249 = vmatmul.mubr.bf16.vlgmr.msra.gmra.mrb[0].mxu0 %v4481_v18  ;;  %3002 = vmatpush1.bf16.msra.mxu1 %v4478_v17  ;;  %v4573_v17 = vld [vmem:[%s6079_s1 + $0x4f4] ss:$8 sps:$4 sm:$0xff]  }
 0x10c   : > { %3260 = vmatpush1.bf16.msra.mxu0 %v4484_v19  ;;  %3003 = vmatprep.subr.bf16.mxu1 %v4489_v20  ;;  %v4576_v18 = vld [vmem:[%s6079_s1 + $0xaf4] ss:$8 sps:$4 sm:$0xff]   ;;  %v4571_v19 = vld [vmem:[%s6079_s1 + $0x4f0] ss:$8 sps:$4 sm:$0xff]  }
 0x10d   : > { %3261 = vmatprep.subr.bf16.mxu0 %v4492_v21  ;;  %3033 = vmatprep.mubr.bf16.mxu1 %v4579_v22  ;;  %v4574_v20 = vld [vmem:[%s6079_s1 + $0xaf0] ss:$8 sps:$4 sm:$0xff]   ;;  %v4582_v21 = vld [vmem:[%s6079_s1 + $0x504] ss:$8 sps:$4 sm:$0xff]  }
 0x10e   : > { %3291 = vmatprep.mubr.bf16.mxu0 %v4585_v23  ;;  %v4588_v22 = vld [vmem:[%s6079_s1 + $0xb04] ss:$8 sps:$4 sm:$0xff]  }
 0x10f   : > { %3004 = vmatpush1.bf16.msra.mxu1 %v4487_v24  ;;  %v4577_v23 = vld [vmem:[%s4957_s23 + $0x20] ss:$100 sps:$4 sm:$0xff]   ;;  %v4583_v24 = vld [vmem:[%s4957_s23 + $0x50] ss:$100 sps:$4 sm:$0xff]  }
 0x110   : > { %3262 = vmatpush1.bf16.msra.mxu0 %v4490_v25  ;;  %3005 = vmatprep.subr.bf16.mxu1 %v4495_v26  ;;  %v4580_v25 = vld [vmem:[%s6079_s1 + $0x500] ss:$8 sps:$4 sm:$0xff]  }
 0x111   : > { %3263 = vmatprep.subr.bf16.mxu0 %v4498_v27  ;;  %v4586_v26 = vld [vmem:[%s6079_s1 + $0xb00] ss:$8 sps:$4 sm:$0xff]   ;;  %v4591_v27 = vld [vmem:[%s6079_s1 + $0x514] ss:$8 sps:$4 sm:$0xff]  }
 0x113   : > { %3006 = vmatpush1.bf16.msra.mxu1 %v4493_v28  ;;  %v4594_v28 = vld [vmem:[%s6079_s1 + $0xb14] ss:$8 sps:$4 sm:$0xff]  }
 0x114   : > { %3264 = vmatpush1.bf16.msra.mxu0 %v4496_v29  ;;  %3007 = vmatprep.subr.bf16.mxu1 %v4501_v30  ;;  %v4681_v29 = vld [vmem:[%s4957_s23 + $0x2c] ss:$100 sps:$4 sm:$0xff]   ;;  %v4684_v30 = vld [vmem:[%s4957_s23 + $0x5c] ss:$100 sps:$4 sm:$0xff]  }
 0x115   : > { %3265 = vmatprep.subr.bf16.mxu0 %v4504_v31  ;;  %v4589_v31 = vld [vmem:[%s6079_s1 + $0x510] ss:$8 sps:$4 sm:$0xff]  }
 0x117   : > { %3008 = vmatpush1.bf16.msra.mxu1 %v4499_v32  ;;  %v4592_v32 = vld [vmem:[%s6079_s1 + $0xb10] ss:$8 sps:$4 sm:$0xff]  }
 0x118   : > { %3266 = vmatpush1.bf16.msra.mxu0 %v4502_v33  ;;  %3009 = vmatprep.subr.bf16.mxu1 %v4507_v34  ;;  %v4597_v33 = vld [vmem:[%s6079_s1 + $0x524] ss:$8 sps:$4 sm:$0xff]  }
 0x119   : > { %3267 = vmatprep.subr.bf16.mxu0 %v4510_v35  ;;  %v4600_v34 = vld [vmem:[%s6079_s1 + $0xb24] ss:$8 sps:$4 sm:$0xff]   ;;  %v4595_v35 = vld [vmem:[%s6079_s1 + $0x520] ss:$8 sps:$4 sm:$0xff]  }
 0x11b   : > { %3010 = vmatpush1.bf16.msra.mxu1 %v4505_v36  ;;  %v4598_v36 = vld [vmem:[%s6079_s1 + $0xb20] ss:$8 sps:$4 sm:$0xff]  }
 0x11c   : > { %3268 = vmatpush1.bf16.msra.mxu0 %v4508_v37  ;;  %3011 = vmatprep.subr.bf16.mxu1 %v4513_v38  ;;  %v4603_v37 = vld [vmem:[%s6079_s1 + $0x534] ss:$8 sps:$4 sm:$0xff]  }
 0x11d   : > { %3269 = vmatprep.subr.bf16.mxu0 %v4516_v39  ;;  %v4606_v38 = vld [vmem:[%s6079_s1 + $0xb34] ss:$8 sps:$4 sm:$0xff]   ;;  %v4601_v39 = vld [vmem:[%s6079_s1 + $0x530] ss:$8 sps:$4 sm:$0xff]  }
 0x11f   : > { %3012 = vmatpush1.bf16.msra.mxu1 %v4511_v40  ;;  %v4604_v40 = vld [vmem:[%s6079_s1 + $0xb30] ss:$8 sps:$4 sm:$0xff]  }
 0x120   : > { %3270 = vmatpush1.bf16.msra.mxu0 %v4514_v41  ;;  %3013 = vmatprep.subr.bf16.mxu1 %v4519_v42  ;;  %v4609_v41 = vld [vmem:[%s6079_s1 + $0x544] ss:$8 sps:$4 sm:$0xff]  }
 0x121   : > { %3271 = vmatprep.subr.bf16.mxu0 %v4522_v43  ;;  %v4612_v42 = vld [vmem:[%s6079_s1 + $0xb44] ss:$8 sps:$4 sm:$0xff]   ;;  %v4607_v43 = vld [vmem:[%s6079_s1 + $0x540] ss:$8 sps:$4 sm:$0xff]  }
 0x123   : > { %3014 = vmatpush1.bf16.msra.mxu1 %v4517_v44  ;;  %v4610_v44 = vld [vmem:[%s6079_s1 + $0xb40] ss:$8 sps:$4 sm:$0xff]  }
 0x124   : > { %3272 = vmatpush1.bf16.msra.mxu0 %v4520_v45  ;;  %3015 = vmatprep.subr.bf16.mxu1 %v4525_v46  ;;  %v4615_v45 = vld [vmem:[%s6079_s1 + $0x554] ss:$8 sps:$4 sm:$0xff]  }
 0x125   : > { %3273 = vmatprep.subr.bf16.mxu0 %v4528_v47  ;;  %v4618_v46 = vld [vmem:[%s6079_s1 + $0xb54] ss:$8 sps:$4 sm:$0xff]   ;;  %v4613_v47 = vld [vmem:[%s6079_s1 + $0x550] ss:$8 sps:$4 sm:$0xff]  }
 0x127   : > { %3016 = vmatpush1.bf16.msra.mxu1 %v4523_v48  ;;  %v4616_v48 = vld [vmem:[%s6079_s1 + $0xb50] ss:$8 sps:$4 sm:$0xff]  }
 0x128   : > { %3274 = vmatpush1.bf16.msra.mxu0 %v4526_v49  ;;  %3017 = vmatprep.subr.bf16.mxu1 %v4531_v50  ;;  %v4621_v49 = vld [vmem:[%s6079_s1 + $0x564] ss:$8 sps:$4 sm:$0xff]  }
 0x129   : > { %3275 = vmatprep.subr.bf16.mxu0 %v4534_v51  ;;  %v4624_v50 = vld [vmem:[%s6079_s1 + $0xb64] ss:$8 sps:$4 sm:$0xff]   ;;  %v4619_v51 = vld [vmem:[%s6079_s1 + $0x560] ss:$8 sps:$4 sm:$0xff]  }
 0x12b   : > { %3018 = vmatpush1.bf16.msra.mxu1 %v4529_v52  ;;  %v4622_v52 = vld [vmem:[%s6079_s1 + $0xb60] ss:$8 sps:$4 sm:$0xff]  }
 0x12c   : > { %3276 = vmatpush1.bf16.msra.mxu0 %v4532_v53  ;;  %3019 = vmatprep.subr.bf16.mxu1 %v4537_v54  ;;  %v4627_v53 = vld [vmem:[%s6079_s1 + $0x574] ss:$8 sps:$4 sm:$0xff]  }
 0x12d   : > { %3277 = vmatprep.subr.bf16.mxu0 %v4540_v55  ;;  %v4630_v54 = vld [vmem:[%s6079_s1 + $0xb74] ss:$8 sps:$4 sm:$0xff]   ;;  %v4625_v55 = vld [vmem:[%s6079_s1 + $0x570] ss:$8 sps:$4 sm:$0xff]  }
 0x12f   : > { %3020 = vmatpush1.bf16.msra.mxu1 %v4535_v57  ;;  %v4628_v57 = vld [vmem:[%s6079_s1 + $0xb70] ss:$8 sps:$4 sm:$0xff]  }
 0x130   : > { %3278 = vmatpush1.bf16.msra.mxu0 %v4538_v58  ;;  %3021 = vmatprep.subr.bf16.mxu1 %v4543_v59  ;;  %v4633_v58 = vld [vmem:[%s6079_s1 + $0x584] ss:$8 sps:$4 sm:$0xff]  }
 0x131   : > { %3279 = vmatprep.subr.bf16.mxu0 %v4546_v60  ;;  %v4636_v59 = vld [vmem:[%s6079_s1 + $0xb84] ss:$8 sps:$4 sm:$0xff]   ;;  %v4631_v60 = vld [vmem:[%s6079_s1 + $0x580] ss:$8 sps:$4 sm:$0xff]  }
 0x133   : > { %3022 = vmatpush1.bf16.msra.mxu1 %v4541_v63  ;;  %v4642_v63 = vld [vmem:[%s6079_s1 + $0xb94] ss:$8 sps:$4 sm:$0xff]  }
 0x134   : > { %3280 = vmatpush1.bf16.msra.mxu0 %v4544_v0  ;;  %3023 = vmatprep.subr.bf16.mxu1 %v4549_v1  ;;  %v4637_v0 = vld [vmem:[%s6079_s1 + $0x590] ss:$8 sps:$4 sm:$0xff]  }
 0x135   : > { %3281 = vmatprep.subr.bf16.mxu0 %v4552_v2  ;;  %v4640_v1 = vld [vmem:[%s6079_s1 + $0xb90] ss:$8 sps:$4 sm:$0xff]   ;;  %v4645_v2 = vld [vmem:[%s6079_s1 + $0x5a4] ss:$8 sps:$4 sm:$0xff]  }
 0x137   : > { %3024 = vmatpush1.bf16.msra.mxu1 %v4547_v3  ;;  %v4648_v3 = vld [vmem:[%s6079_s1 + $0xba4] ss:$8 sps:$4 sm:$0xff]  }
 0x138   : > { %3282 = vmatpush1.bf16.msra.mxu0 %v4550_v4  ;;  %3025 = vmatprep.subr.bf16.mxu1 %v4555_v5  ;;  %v4643_v4 = vld [vmem:[%s6079_s1 + $0x5a0] ss:$8 sps:$4 sm:$0xff]  }
 0x139   : > { %3283 = vmatprep.subr.bf16.mxu0 %v4558_v6  ;;  %v4646_v5 = vld [vmem:[%s6079_s1 + $0xba0] ss:$8 sps:$4 sm:$0xff]   ;;  %v4651_v6 = vld [vmem:[%s6079_s1 + $0x5b4] ss:$8 sps:$4 sm:$0xff]  }
 0x13b   : > { %3026 = vmatpush1.bf16.msra.mxu1 %v4553_v7  ;;  %v4654_v7 = vld [vmem:[%s6079_s1 + $0xbb4] ss:$8 sps:$4 sm:$0xff]  }
 0x13c   : > { %3284 = vmatpush1.bf16.msra.mxu0 %v4556_v8  ;;  %3027 = vmatprep.subr.bf16.mxu1 %v4561_v9  ;;  %v4649_v8 = vld [vmem:[%s6079_s1 + $0x5b0] ss:$8 sps:$4 sm:$0xff]  }
 0x13d   : > { %3285 = vmatprep.subr.bf16.mxu0 %v4564_v10  ;;  %v4652_v9 = vld [vmem:[%s6079_s1 + $0xbb0] ss:$8 sps:$4 sm:$0xff]   ;;  %v4657_v10 = vld [vmem:[%s6079_s1 + $0x5c4] ss:$8 sps:$4 sm:$0xff]  }
 0x13f   : > { %3028 = vmatpush1.bf16.msra.mxu1 %v4559_v11  ;;  %v4660_v11 = vld [vmem:[%s6079_s1 + $0xbc4] ss:$8 sps:$4 sm:$0xff]  }
 0x140   : > { %3286 = vmatpush1.bf16.msra.mxu0 %v4562_v12  ;;  %3029 = vmatprep.subr.bf16.mxu1 %v4567_v13  ;;  %v4655_v12 = vld [vmem:[%s6079_s1 + $0x5c0] ss:$8 sps:$4 sm:$0xff]  }
 0x141   : > { %3287 = vmatprep.subr.bf16.mxu0 %v4570_v14  ;;  %v4658_v13 = vld [vmem:[%s6079_s1 + $0xbc0] ss:$8 sps:$4 sm:$0xff]   ;;  %v4663_v14 = vld [vmem:[%s6079_s1 + $0x5d4] ss:$8 sps:$4 sm:$0xff]  }
 0x143   : > { %3030 = vmatpush1.bf16.msra.mxu1 %v4565_v15  ;;  %v4666_v15 = vld [vmem:[%s6079_s1 + $0xbd4] ss:$8 sps:$4 sm:$0xff]  }
 0x144   : > { %3288 = vmatpush1.bf16.msra.mxu0 %v4568_v16  ;;  %3031 = vmatprep.subr.bf16.mxu1 %v4573_v17  ;;  %v4661_v16 = vld [vmem:[%s6079_s1 + $0x5d0] ss:$8 sps:$4 sm:$0xff]  }
 0x145   : > { %3289 = vmatprep.subr.bf16.mxu0 %v4576_v18  ;;  %v4664_v17 = vld [vmem:[%s6079_s1 + $0xbd0] ss:$8 sps:$4 sm:$0xff]   ;;  %v4669_v18 = vld [vmem:[%s6079_s1 + $0x5e4] ss:$8 sps:$4 sm:$0xff]  }
 0x147   : > { %3032 = vmatpush1.bf16.msra.mxu1 %v4571_v19  ;;  %v4672_v19 = vld [vmem:[%s6079_s1 + $0xbe4] ss:$8 sps:$4 sm:$0xff]  }
 0x148   : > { %3290 = vmatpush1.bf16.msra.mxu0 %v4574_v20  ;;  %3044 = vmatprep.subr.bf16.mxu1 %v4582_v21  ;;  %v4667_v20 = vld [vmem:[%s6079_s1 + $0x5e0] ss:$8 sps:$4 sm:$0xff]  }
 0x149   : > { %3302 = vmatprep.subr.bf16.mxu0 %v4588_v22  ;;  %v4670_v21 = vld [vmem:[%s6079_s1 + $0xbe0] ss:$8 sps:$4 sm:$0xff]   ;;  %v4675_v22 = vld [vmem:[%s6079_s1 + $0x5f4] ss:$8 sps:$4 sm:$0xff]  }
 0x14a   : > { %3034 = vmatmul.mubr.bf16.vlgmr.msra.gmra.mrb[0].mxu1 %v4577_v23  ;;  %v4678_v23 = vld [vmem:[%s6079_s1 + $0xbf4] ss:$8 sps:$4 sm:$0xff]  }
 0x14b   : > { %3292 = vmatmul.mubr.bf16.vlgmr.msra.gmra.mrb[0].mxu0 %v4583_v24  ;;  %3045 = vmatpush1.bf16.msra.mxu1 %v4580_v25  ;;  %v4673_v24 = vld [vmem:[%s6079_s1 + $0x5f0] ss:$8 sps:$4 sm:$0xff]  }
 0x14c   : > { %3303 = vmatpush1.bf16.msra.mxu0 %v4586_v26  ;;  %3046 = vmatprep.subr.bf16.mxu1 %v4591_v27  ;;  %v4676_v25 = vld [vmem:[%s6079_s1 + $0xbf0] ss:$8 sps:$4 sm:$0xff]   ;;  %v4687_v26 = vld [vmem:[%s6079_s1 + $0xc04] ss:$8 sps:$4 sm:$0xff]  }
 0x14d   : > { %3304 = vmatprep.subr.bf16.mxu0 %v4594_v28  ;;  %3076 = vmatprep.mubr.bf16.mxu1 %v4681_v29  ;;  %v4679_v27 = vld [vmem:[%s4957_s23 + $0x28] ss:$100 sps:$4 sm:$0xff]   ;;  %v4682_v28 = vld [vmem:[%s4957_s23 + $0x58] ss:$100 sps:$4 sm:$0xff]  }
 0x14e   : > { %3334 = vmatprep.mubr.bf16.mxu0 %v4684_v30  ;;  %v4685_v29 = vld [vmem:[%s6079_s1 + $0xc00] ss:$8 sps:$4 sm:$0xff]   ;;  %v4690_v30 = vld [vmem:[%s6079_s1 + $0xc14] ss:$8 sps:$4 sm:$0xff]  }
 0x14f   : > { %3047 = vmatpush1.bf16.msra.mxu1 %v4589_v31  ;;  %v4688_v31 = vld [vmem:[%s6079_s1 + $0xc10] ss:$8 sps:$4 sm:$0xff]  }
 0x150   : > { %3305 = vmatpush1.bf16.msra.mxu0 %v4592_v32  ;;  %3048 = vmatprep.subr.bf16.mxu1 %v4597_v33  ;;  %v4693_v32 = vld [vmem:[%s6079_s1 + $0xc24] ss:$8 sps:$4 sm:$0xff]   ;;  %v4691_v33 = vld [vmem:[%s6079_s1 + $0xc20] ss:$8 sps:$4 sm:$0xff]  }
 0x151   : > { %3306 = vmatprep.subr.bf16.mxu0 %v4600_v34  ;;  %v4696_v34 = vld [vmem:[%s6079_s1 + $0xc34] ss:$8 sps:$4 sm:$0xff]  }
 0x153   : > { %3049 = vmatpush1.bf16.msra.mxu1 %v4595_v35  ;;  %v4699_v35 = vld [vmem:[%s6079_s1 + $0xc44] ss:$8 sps:$4 sm:$0xff]  }
 0x154   : > { %3307 = vmatpush1.bf16.msra.mxu0 %v4598_v36  ;;  %3050 = vmatprep.subr.bf16.mxu1 %v4603_v37  ;;  %v4697_v36 = vld [vmem:[%s6079_s1 + $0xc40] ss:$8 sps:$4 sm:$0xff]   ;;  %v4702_v37 = vld [vmem:[%s6079_s1 + $0xc54] ss:$8 sps:$4 sm:$0xff]  }
 0x155   : > { %3308 = vmatprep.subr.bf16.mxu0 %v4606_v38  ;;  %v4700_v38 = vld [vmem:[%s6079_s1 + $0xc50] ss:$8 sps:$4 sm:$0xff]  }
 0x157   : > { %3051 = vmatpush1.bf16.msra.mxu1 %v4601_v39  ;;  %v4705_v39 = vld [vmem:[%s6079_s1 + $0xc64] ss:$8 sps:$4 sm:$0xff]  }
 0x158   : > { %3309 = vmatpush1.bf16.msra.mxu0 %v4604_v40  ;;  %3052 = vmatprep.subr.bf16.mxu1 %v4609_v41  ;;  %v4703_v40 = vld [vmem:[%s6079_s1 + $0xc60] ss:$8 sps:$4 sm:$0xff]   ;;  %v4708_v41 = vld [vmem:[%s6079_s1 + $0xc74] ss:$8 sps:$4 sm:$0xff]  }
 0x159   : > { %3310 = vmatprep.subr.bf16.mxu0 %v4612_v42  ;;  %v4706_v42 = vld [vmem:[%s6079_s1 + $0xc70] ss:$8 sps:$4 sm:$0xff]  }
 0x15b   : > { %3053 = vmatpush1.bf16.msra.mxu1 %v4607_v43  ;;  %v4709_v43 = vld [vmem:[%s4957_s23 + $0x60] ss:$100 sps:$4 sm:$0xff]   ;;  %s3544_s23 = sshll.u32 %s6094_s16, 4 }
 0x15c   : > { %3311 = vmatpush1.bf16.msra.mxu0 %v4610_v44  ;;  %3054 = vmatprep.subr.bf16.mxu1 %v4615_v45  ;;  %s260_s13 = sadd.s32 %s3544_s23, %s3543_s12 }
 0x15d   : > { %3312 = vmatprep.subr.bf16.mxu0 %v4618_v46  ;;  %s3545_s14 = sshll.u32 %s260_s13, 2 }
 0x15e   : > { %s262_s22 = scalar_lea.vmem %s6082_s4, %s3545_s14 }
 0x15f   : > { %3055 = vmatpush1.bf16.msra.mxu1 %v4613_v47 }
 0x160   : > { %3313 = vmatpush1.bf16.msra.mxu0 %v4616_v48  ;;  %3056 = vmatprep.subr.bf16.mxu1 %v4621_v49  ;;  %v693_v48 = vlaneseq }
 0x161   : > { %3314 = vmatprep.subr.bf16.mxu0 %v4624_v50 }
 0x162   : > { %v694_v49 = vshrl.u32 %v693_v48, 7 }
 0x163   : > { %3057 = vmatpush1.bf16.msra.mxu1 %v4619_v51  ;;  %v691_v51 = vld [vmem:[%s6080_s2] sm:$0x3] }
 0x164   : > { %3315 = vmatpush1.bf16.msra.mxu0 %v4622_v52  ;;  %3058 = vmatprep.subr.bf16.mxu1 %v4627_v53  ;;  %v695_v50 = vsub.s32 0, %v694_v49  ;;  %v699_v52 = vsub.s32 1, %v694_v49 }
 0x165   : > { %3316 = vmatprep.subr.bf16.mxu0 %v4630_v54 }
 0x166   : > { %v696_v53 = vrot.slane %v691_v51, %v695_v50  ;;  %v700_v54 = vrot.slane %v691_v51, %v699_v52 }
 0x167   : > { %3059 = vmatpush1.bf16.msra.mxu1 %v4625_v55 }
 0x168   : > { %3317 = vmatpush1.bf16.msra.mxu0 %v4628_v57  ;;  %3060 = vmatprep.subr.bf16.mxu1 %v4633_v58 }
 0x169   : > { %3318 = vmatprep.subr.bf16.mxu0 %v4636_v59 }
 0x16b   : > { %3061 = vmatpush1.bf16.msra.mxu1 %v4631_v60 }
 0x16c   : > { %3319 = vmatpush1.bf16.msra.mxu0 %v4634_v61  ;;  %3062 = vmatprep.subr.bf16.mxu1 %v4639_v62 }
 0x16d   : > { %3320 = vmatprep.subr.bf16.mxu0 %v4642_v63 }
 0x16f   : > { %3063 = vmatpush1.bf16.msra.mxu1 %v4637_v0 }
 0x170   : > { %3321 = vmatpush1.bf16.msra.mxu0 %v4640_v1  ;;  %3064 = vmatprep.subr.bf16.mxu1 %v4645_v2 }
 0x171   : > { %3322 = vmatprep.subr.bf16.mxu0 %v4648_v3 }
 0x173   : > { %3065 = vmatpush1.bf16.msra.mxu1 %v4643_v4 }
 0x174   : > { %3323 = vmatpush1.bf16.msra.mxu0 %v4646_v5  ;;  %3066 = vmatprep.subr.bf16.mxu1 %v4651_v6 }
 0x175   : > { %3324 = vmatprep.subr.bf16.mxu0 %v4654_v7 }
 0x177   : > { %3067 = vmatpush1.bf16.msra.mxu1 %v4649_v8 }
 0x178   : > { %3325 = vmatpush1.bf16.msra.mxu0 %v4652_v9  ;;  %3068 = vmatprep.subr.bf16.mxu1 %v4657_v10  ;;  %v3393_v55 = vpop.permute.xlu0 %3392 }
 0x179   : > { %3326 = vmatprep.subr.bf16.mxu0 %v4660_v11 }
 0x17b   : > { %3069 = vmatpush1.bf16.msra.mxu1 %v4655_v12 }
 0x17c   : > { %3327 = vmatpush1.bf16.msra.mxu0 %v4658_v13  ;;  %3070 = vmatprep.subr.bf16.mxu1 %v4663_v14  ;;  %v3398_v5 = vpop.permute.xlu0 %3397 }
 0x17d   : > { %3328 = vmatprep.subr.bf16.mxu0 %v4666_v15 }
 0x17f   : > { %3071 = vmatpush1.bf16.msra.mxu1 %v4661_v16 }
 0x180   : > { %3329 = vmatpush1.bf16.msra.mxu0 %v4664_v17  ;;  %3072 = vmatprep.subr.bf16.mxu1 %v4669_v18 }
 0x181   : > { %3330 = vmatprep.subr.bf16.mxu0 %v4672_v19 }
 0x183   : > { %3073 = vmatpush1.bf16.msra.mxu1 %v4667_v20 }
 0x184   : > { %3331 = vmatpush1.bf16.msra.mxu0 %v4670_v21  ;;  %3074 = vmatprep.subr.bf16.mxu1 %v4675_v22 }
 0x185   : > { %3332 = vmatprep.subr.bf16.mxu0 %v4678_v23 }
 0x187   : > { %3075 = vmatpush1.bf16.msra.mxu1 %v4673_v24 }
 0x188   : > { %3333 = vmatpush1.bf16.msra.mxu0 %v4676_v25 }
 0x189   : > { %3345 = vmatprep.subr.bf16.mxu0 %v4687_v26 }
 0x18a   : > { %3077 = vmatmul.mubr.bf16.vlgmr.msra.gmra.mrb[0].mxu1 %v4679_v27 }
 0x18b   : > { %3335 = vmatmul.mubr.bf16.vlgmr.msra.gmra.mrb[0].mxu0 %v4682_v28 }
 0x18c   : > { %3346 = vmatpush1.bf16.msra.mxu0 %v4685_v29  ;;  %3377 = vmatprep.mubr.bf16.mxu0 %v4750_v56  ;;  %v4694_v56 = vld [vmem:[%s6079_s1 + $0xc30] ss:$8 sps:$4 sm:$0xff]  }
 0x18d   : > { %3347 = vmatprep.subr.bf16.mxu0 %v4690_v30 }
 0x190   : > { %3348 = vmatpush1.bf16.msra.mxu0 %v4688_v31 }
 0x191   : > { %3349 = vmatprep.subr.bf16.mxu0 %v4693_v32 }
 0x194   : > { %3350 = vmatpush1.bf16.msra.mxu0 %v4691_v33 }
 0x195   : > { %3351 = vmatprep.subr.bf16.mxu0 %v4696_v34 }
 0x198   : > { %3352 = vmatpush1.bf16.msra.mxu0 %v4694_v56 }
 0x199   : > { %3353 = vmatprep.subr.bf16.mxu0 %v4699_v35 }
 0x19c   : > { %3354 = vmatpush1.bf16.msra.mxu0 %v4697_v36 }
 0x19d   : > { %3355 = vmatprep.subr.bf16.mxu0 %v4702_v37 }
 0x1a0   : > { %3356 = vmatpush1.bf16.msra.mxu0 %v4700_v38 }
 0x1a1   : > { %3357 = vmatprep.subr.bf16.mxu0 %v4705_v39 }
 0x1a4   : > { %3358 = vmatpush1.bf16.msra.mxu0 %v4703_v40 }
 0x1a5   : > { %3359 = vmatprep.subr.bf16.mxu0 %v4708_v41 }
 0x1a8   : > { %3360 = vmatpush1.bf16.msra.mxu0 %v4706_v42 }
 0x1ab   : > { %3378 = vmatmul.mubr.bf16.vlgmr.msra.gmra.mrb[0].mxu0 %v4709_v43 }
 0x25d   : > { %v3078_v44 = vpop.f32.mrb[0].mxu1 }
 0x25e   : > { %v3080_v45 = vpop.f32.mrb[1].mxu1  ;;  %v3977_v57 = vadd.f32 %v3078_v44, %v696_v53 }
 0x25f   : > { %v3082_v46 = vpop.f32.mrb[2].mxu1  ;;  %v3979_v58 = vadd.f32 %v3080_v45, %v700_v54 }
 0x260   : > { %v3084_v47 = vpop.f32.mrb[3].mxu1  ;;  %v3981_v60 = vadd.f32 %v3082_v46, %v696_v53 }
 0x261   : > { %v3983_v63 = vadd.f32 %v3084_v47, %v700_v54 }
 0x27e   : > { %v3379_v59 = vpop.f32.mrb[0].mxu0 }
 0x27f   : > { %v3978_v61 = vadd.f32 %v3977_v57, %v3379_v59  ;;  %v3381_v62 = vpop.f32.mrb[1].mxu0 }
 0x280   : > { %v3980_v0 = vadd.f32 %v3979_v58, %v3381_v62  ;;  %v3383_v1 = vpop.f32.mrb[2].mxu0 }
 0x281   : > { %v3400_v2 = vmul.f32 %v3978_v61, %v3393_v55  ;;  %v3982_v3 = vadd.f32 %v3981_v60, %v3383_v1  ;;  %v3385_v4 = vpop.f32.mrb[3].mxu0 }
 0x282   : > { %v3401_v6 = vmul.f32 %v3980_v0, %v3393_v55  ;;  %v3984_v7 = vadd.f32 %v3983_v63, %v3385_v4 }
 0x283   : > { %v3404_v8 = vmax.f32 %v3400_v2, 0.0  ;;  %v3402_v9 = vmul.f32 %v3982_v3, %v3398_v5 }
 0x284   : > { %v3405_v10 = vmax.f32 %v3401_v6, 0.0  ;;  %v3403_v11 = vmul.f32 %v3984_v7, %v3398_v5 }
 0x285   : > { %v3406_v12 = vmax.f32 %v3402_v9, 0.0 }
 0x286   : > { %v3975_v13 = vpack.c.bf16 %v3405_v10, %v3404_v8  ;;  %v3407_v14 = vmax.f32 %v3403_v11, 0.0 }
 0x288   : > { %3420 = vst [vmem:[%s262_s22] sm:$0xff] %v3975_v13  ;;  %v3976_v15 = vpack.c.bf16 %v3407_v14, %v3406_v12 }
 0x28a   : > { %3421 = vst [vmem:[%s262_s22 + $0x8] sm:$0xff] %v3976_v15 }
 0x28b PF: > { %s14_s19 = sadd.s32 1, %s4748_s19   ;;  %s6083_s15 = smov %s4740_s17 }
 0x28c   : > { %p11_p7 = scmp.ge.s32.totalorder %s14_s19, 10   ;;  %s6084_s16 = smov %s4744_s18 }
 0x28d   : > { %s6085_s17 = smov %s6088_s20  ;;  %s6086_s18 = smov %s6092_s21 }
 0x28e   :  { %13 = sbr.rel (!%p11_p7) target bundleno = 3 (0x3), region = 69 }

// kernel: _lambda_.7
= control target key start
LH: loop header
LB: loop body
LE: loop exit
PB: predicated region body
PF: predicated region fallthrough
CT: control target
= control target key end

     0   :  { %s16833_s23 = smov 0   ;;  %s21753_s0 = inlined_call_operand.vmem [shape: bf16[2,16,6400], index: 0, kind: input, shape index: {}]   ;;  %s21754_s1 = inlined_call_operand.vmem [shape: bf16[6400,512], index: 1, kind: input, shape index: {}]   ;;  %s21755_s2 = inlined_call_operand.vmem [shape: f32[1,512], index: 2, kind: input, shape index: {}]   ;;  %s21756_s3 = inlined_call_operand.vmem [shape: f32[16,1], index: 3, kind: input, shape index: {}]   ;;  %s21757_s4 = inlined_call_operand.vmem [shape: f32[16,512], index: 4, kind: input, shape index: {}]   ;;  %s21758_s5 = inlined_call_operand.<no memory space> [shape: f32[1,1], index: 5, kind: input, shape index: {}]   ;;  %s21759_s6 = inlined_call_operand.vmem [shape: f32[2,1,128], index: 6, kind: output, shape index: {}]  }
   0x1   :  { %v11_v0 = vstv %s21758_s5 }
   0x2   :  { %12 = vst [vmem:[#allocation2] sm:$0x1] %v11_v0 }
   0x3 LB: > { %s12442_s24 = sadd.s32 4294967295, %s16792_s23   ;;  %p12446_p0 = scmp.ge.s32.totalorder %s16792_s23, 1  ;;  %s16792_s23 = sphi %s16833_s23, %s18_s23  }
   0x4   : > { %p214_p1 = scmp.lt.s32.totalorder %s16792_s23, 3 }
   0x6   : > { %p215_p2 = pnand %p12446_p0, %p214_p1 }
   0x7   : > { %v14311_v1 = vld [vmem:[%s21754_s1 + $0x4] ss:$16 sps:$4 sm:$0xff] (!%p215_p2)   ;;  %v14313_v2 = vld [vmem:[%s21754_s1 + $0xc] ss:$16 sps:$4 sm:$0xff] (!%p215_p2)   ;;  %v14315_v3 = vld [vmem:[%s21754_s1] ss:$16 sps:$4 sm:$0xff] (!%p215_p2)  }
   0x8   : > { %218 = sbr.rel (%p215_p2) target bundleno = 2128 (0x850), region = 44  ;;  %10172 = vmatprep.subr.bf16.mxu0 (!%p215_p2), %v14311_v1  ;;  %v14316_v4 = vld [vmem:[%s21754_s1 + $0x8] ss:$16 sps:$4 sm:$0xff] (!%p215_p2)   ;;  %11247 = vmatprep.subr.bf16.mxu1 (!%p215_p2), %v14313_v2  ;;  %v14317_v5 = vld [vmem:[%s21754_s1 + $0x24] ss:$16 sps:$4 sm:$0xff] (!%p215_p2)   ;;  %p242_p3 = scmp.lt.s32.totalorder (!%p215_p2), %s12442_s24, 1 }
   0x9   : > { %10173 = vmatpush1.bf16.msra.mxu0 (!%p215_p2), %v14315_v3  ;;  %11248 = vmatpush1.bf16.msra.mxu1 (!%p215_p2), %v14316_v4  ;;  %v14319_v6 = vld [vmem:[%s21754_s1 + $0x2c] ss:$16 sps:$4 sm:$0xff] (!%p215_p2)   ;;  %v14321_v7 = vld [vmem:[%s21754_s1 + $0x20] ss:$16 sps:$4 sm:$0xff] (!%p215_p2)   ;;  %v14322_v8 = vld [vmem:[%s21754_s1 + $0x28] ss:$16 sps:$4 sm:$0xff] (!%p215_p2)  }
   0xa   : > { %10174 = vmatprep.subr.bf16.mxu0 (!%p215_p2), %v14317_v5  ;;  %11249 = vmatprep.subr.bf16.mxu1 (!%p215_p2), %v14319_v6  ;;  %v14323_v9 = vld [vmem:[%s21754_s1 + $0x44] ss:$16 sps:$4 sm:$0xff] (!%p215_p2)   ;;  %v14325_v10 = vld [vmem:[%s21754_s1 + $0x4c] ss:$16 sps:$4 sm:$0xff] (!%p215_p2)   ;;  %v14327_v11 = vld [vmem:[%s21754_s1 + $0x40] ss:$16 sps:$4 sm:$0xff] (!%p215_p2)  }
   0xb   : > { %v14328_v12 = vld [vmem:[%s21754_s1 + $0x48] ss:$16 sps:$4 sm:$0xff] (!%p215_p2)   ;;  %v14329_v13 = vld [vmem:[%s21754_s1 + $0x64] ss:$16 sps:$4 sm:$0xff] (!%p215_p2)   ;;  %v14331_v14 = vld [vmem:[%s21754_s1 + $0x6c] ss:$16 sps:$4 sm:$0xff] (!%p215_p2)  }
   0xc   : > { %v14333_v15 = vld [vmem:[%s21754_s1 + $0x60] ss:$16 sps:$4 sm:$0xff] (!%p215_p2)   ;;  %v14334_v16 = vld [vmem:[%s21754_s1 + $0x68] ss:$16 sps:$4 sm:$0xff] (!%p215_p2)   ;;  %v14335_v17 = vld [vmem:[%s21754_s1 + $0x84] ss:$16 sps:$4 sm:$0xff] (!%p215_p2)  }
   0xd   : > { %10175 = vmatpush1.bf16.msra.mxu0 (!%p215_p2), %v14321_v7  ;;  %11250 = vmatpush1.bf16.msra.mxu1 (!%p215_p2), %v14322_v8  ;;  %v14337_v18 = vld [vmem:[%s21754_s1 + $0x8c] ss:$16 sps:$4 sm:$0xff] (!%p215_p2)   ;;  %v14339_v19 = vld [vmem:[%s21754_s1 + $0x80] ss:$16 sps:$4 sm:$0xff] (!%p215_p2)   ;;  %v14340_v20 = vld [vmem:[%s21754_s1 + $0x88] ss:$16 sps:$4 sm:$0xff] (!%p215_p2)  }
   0xe   : > { %10176 = vmatprep.subr.bf16.mxu0 (!%p215_p2), %v14323_v9  ;;  %11251 = vmatprep.subr.bf16.mxu1 (!%p215_p2), %v14325_v10  ;;  %v14341_v21 = vld [vmem:[%s21754_s1 + $0xa4] ss:$16 sps:$4 sm:$0xff] (!%p215_p2)   ;;  %v14343_v22 = vld [vmem:[%s21754_s1 + $0xac] ss:$16 sps:$4 sm:$0xff] (!%p215_p2)   ;;  %v14345_v23 = vld [vmem:[%s21754_s1 + $0xa0] ss:$16 sps:$4 sm:$0xff] (!%p215_p2)  }
   0xf   : > { %v14346_v24 = vld [vmem:[%s21754_s1 + $0xa8] ss:$16 sps:$4 sm:$0xff]   ;;  %v14347_v25 = vld [vmem:[%s21754_s1 + $0xc4] ss:$16 sps:$4 sm:$0xff]   ;;  %v14349_v26 = vld [vmem:[%s21754_s1 + $0xcc] ss:$16 sps:$4 sm:$0xff]  }
  0x10   : > { %v14351_v27 = vld [vmem:[%s21754_s1 + $0xc0] ss:$16 sps:$4 sm:$0xff]   ;;  %v14352_v28 = vld [vmem:[%s21754_s1 + $0xc8] ss:$16 sps:$4 sm:$0xff]   ;;  %v14353_v29 = vld [vmem:[%s21754_s1 + $0xe4] ss:$16 sps:$4 sm:$0xff]  }
  0x11   : > { %10177 = vmatpush1.bf16.msra.mxu0 %v14327_v11  ;;  %11252 = vmatpush1.bf16.msra.mxu1 %v14328_v12  ;;  %v14355_v30 = vld [vmem:[%s21754_s1 + $0xec] ss:$16 sps:$4 sm:$0xff]   ;;  %v14357_v31 = vld [vmem:[%s21754_s1 + $0xe0] ss:$16 sps:$4 sm:$0xff]   ;;  %v14358_v32 = vld [vmem:[%s21754_s1 + $0xe8] ss:$16 sps:$4 sm:$0xff]  }
  0x12   : > { %10178 = vmatprep.subr.bf16.mxu0 %v14329_v13  ;;  %11253 = vmatprep.subr.bf16.mxu1 %v14331_v14  ;;  %v14359_v33 = vld [vmem:[%s21754_s1 + $0x104] ss:$16 sps:$4 sm:$0xff]   ;;  %v14361_v34 = vld [vmem:[%s21754_s1 + $0x10c] ss:$16 sps:$4 sm:$0xff]   ;;  %v14363_v35 = vld [vmem:[%s21754_s1 + $0x100] ss:$16 sps:$4 sm:$0xff]  }
  0x13   : > { %v14364_v36 = vld [vmem:[%s21754_s1 + $0x108] ss:$16 sps:$4 sm:$0xff]   ;;  %v14365_v37 = vld [vmem:[%s21754_s1 + $0x124] ss:$16 sps:$4 sm:$0xff]   ;;  %s21761_s24 = smov (!%p242_p3, %s12442_s24), 1 }
  0x14   : > { %v14367_v38 = vld [vmem:[%s21754_s1 + $0x12c] ss:$16 sps:$4 sm:$0xff]   ;;  %v14369_v39 = vld [vmem:[%s21754_s1 + $0x120] ss:$16 sps:$4 sm:$0xff]   ;;  %v14370_v40 = vld [vmem:[%s21754_s1 + $0x128] ss:$16 sps:$4 sm:$0xff]   ;;  %s249_s11 = scalar_lea.vmem %s21759_s6, %s21761_s24 }
  0x15   : > { %10179 = vmatpush1.bf16.msra.mxu0 %v14333_v15  ;;  %11254 = vmatpush1.bf16.msra.mxu1 %v14334_v16  ;;  %v14371_v41 = vld [vmem:[%s21754_s1 + $0x144] ss:$16 sps:$4 sm:$0xff]   ;;  %s14300_s13 = smul.u32 400, %s21761_s24  ;;  %v14373_v42 = vld [vmem:[%s21754_s1 + $0x14c] ss:$16 sps:$4 sm:$0xff]  }
  0x16   : > { %10180 = vmatprep.subr.bf16.mxu0 %v14335_v17  ;;  %11255 = vmatprep.subr.bf16.mxu1 %v14337_v18  ;;  %v14375_v43 = vld [vmem:[%s21754_s1 + $0x140] ss:$16 sps:$4 sm:$0xff]   ;;  %v14376_v44 = vld [vmem:[%s21754_s1 + $0x148] ss:$16 sps:$4 sm:$0xff]   ;;  %v14377_v45 = vld [vmem:[%s21754_s1 + $0x164] ss:$16 sps:$4 sm:$0xff]  }
  0x17   : > { %s16986_s26 = scalar_lea.vmem %s21753_s0, %s14300_s13  ;;  %v14379_v46 = vld [vmem:[%s21754_s1 + $0x16c] ss:$16 sps:$4 sm:$0xff]   ;;  %v14381_v47 = vld [vmem:[%s21754_s1 + $0x160] ss:$16 sps:$4 sm:$0xff]   ;;  %v14382_v48 = vld [vmem:[%s21754_s1 + $0x168] ss:$16 sps:$4 sm:$0xff]  }
  0x18   : > { %v14409_v49 = vld [vmem:[%s16986_s26 + $0x4] ss:$200 sps:$4 sm:$0xff]   ;;  %v14387_v52 = vld [vmem:[%s21754_s1 + $0x180] ss:$16 sps:$4 sm:$0xff]   ;;  %v14388_v53 = vld [vmem:[%s21754_s1 + $0x188] ss:$16 sps:$4 sm:$0xff]  }
  0x19   : > { %10181 = vmatpush1.bf16.msra.mxu0 %v14339_v19  ;;  %11256 = vmatpush1.bf16.msra.mxu1 %v14340_v20  ;;  %v14383_v50 = vld [vmem:[%s21754_s1 + $0x184] ss:$16 sps:$4 sm:$0xff]   ;;  %v14385_v51 = vld [vmem:[%s21754_s1 + $0x18c] ss:$16 sps:$4 sm:$0xff]   ;;  %v14393_v56 = vld [vmem:[%s21754_s1 + $0x1a0] ss:$16 sps:$4 sm:$0xff]  }
  0x1a   : > { %10182 = vmatprep.subr.bf16.mxu0 %v14341_v21  ;;  %11257 = vmatprep.subr.bf16.mxu1 %v14343_v22  ;;  %v14389_v54 = vld [vmem:[%s21754_s1 + $0x1a4] ss:$16 sps:$4 sm:$0xff]   ;;  %v14391_v55 = vld [vmem:[%s21754_s1 + $0x1ac] ss:$16 sps:$4 sm:$0xff]   ;;  %v14394_v57 = vld [vmem:[%s21754_s1 + $0x1a8] ss:$16 sps:$4 sm:$0xff]  }
  0x1b   : > { %10204 = vmatprep.mubr.bf16.mxu0 %v14409_v49  ;;  %11279 = vmatprep.mubr.bf16.mxu1 %v14409_v49  ;;  %v14395_v58 = vld [vmem:[%s21754_s1 + $0x1c4] ss:$16 sps:$4 sm:$0xff]   ;;  %v14397_v59 = vld [vmem:[%s21754_s1 + $0x1cc] ss:$16 sps:$4 sm:$0xff]   ;;  %v14399_v60 = vld [vmem:[%s21754_s1 + $0x1c0] ss:$16 sps:$4 sm:$0xff]  }
  0x1c   : > { %v14400_v61 = vld [vmem:[%s21754_s1 + $0x1c8] ss:$16 sps:$4 sm:$0xff]   ;;  %v14401_v62 = vld [vmem:[%s21754_s1 + $0x1e4] ss:$16 sps:$4 sm:$0xff]   ;;  %v14403_v63 = vld [vmem:[%s21754_s1 + $0x1ec] ss:$16 sps:$4 sm:$0xff]  }
  0x1d   : > { %10183 = vmatpush1.bf16.msra.mxu0 %v14345_v23  ;;  %11258 = vmatpush1.bf16.msra.mxu1 %v14346_v24  ;;  %v14405_v0 = vld [vmem:[%s21754_s1 + $0x1e0] ss:$16 sps:$4 sm:$0xff]   ;;  %v14406_v1 = vld [vmem:[%s21754_s1 + $0x1e8] ss:$16 sps:$4 sm:$0xff]   ;;  %v14412_v2 = vld [vmem:[%s21754_s1 + $0x204] ss:$16 sps:$4 sm:$0xff]  }
  0x1e   : > { %10184 = vmatprep.subr.bf16.mxu0 %v14347_v25  ;;  %11259 = vmatprep.subr.bf16.mxu1 %v14349_v26  ;;  %v14415_v3 = vld [vmem:[%s21754_s1 + $0x20c] ss:$16 sps:$4 sm:$0xff]   ;;  %v14407_v4 = vld [vmem:[%s16986_s26] ss:$200 sps:$4 sm:$0xff]   ;;  %v14418_v7 = vld [vmem:[%s21754_s1 + $0x224] ss:$16 sps:$4 sm:$0xff]  }
  0x1f   : > { %v14410_v5 = vld [vmem:[%s21754_s1 + $0x200] ss:$16 sps:$4 sm:$0xff]   ;;  %v14413_v6 = vld [vmem:[%s21754_s1 + $0x208] ss:$16 sps:$4 sm:$0xff]   ;;  %v14421_v8 = vld [vmem:[%s21754_s1 + $0x22c] ss:$16 sps:$4 sm:$0xff]  }
  0x20   : > { %v14416_v9 = vld [vmem:[%s21754_s1 + $0x220] ss:$16 sps:$4 sm:$0xff]   ;;  %v14419_v10 = vld [vmem:[%s21754_s1 + $0x228] ss:$16 sps:$4 sm:$0xff]   ;;  %v14424_v11 = vld [vmem:[%s21754_s1 + $0x244] ss:$16 sps:$4 sm:$0xff]  }
  0x21   : > { %10185 = vmatpush1.bf16.msra.mxu0 %v14351_v27  ;;  %11260 = vmatpush1.bf16.msra.mxu1 %v14352_v28  ;;  %v14427_v12 = vld [vmem:[%s21754_s1 + $0x24c] ss:$16 sps:$4 sm:$0xff]   ;;  %v14422_v13 = vld [vmem:[%s21754_s1 + $0x240] ss:$16 sps:$4 sm:$0xff]   ;;  %v14425_v14 = vld [vmem:[%s21754_s1 + $0x248] ss:$16 sps:$4 sm:$0xff]  }
  0x22   : > { %10186 = vmatprep.subr.bf16.mxu0 %v14353_v29  ;;  %11261 = vmatprep.subr.bf16.mxu1 %v14355_v30  ;;  %v14430_v15 = vld [vmem:[%s21754_s1 + $0x264] ss:$16 sps:$4 sm:$0xff]   ;;  %v14433_v16 = vld [vmem:[%s21754_s1 + $0x26c] ss:$16 sps:$4 sm:$0xff]   ;;  %v14428_v17 = vld [vmem:[%s21754_s1 + $0x260] ss:$16 sps:$4 sm:$0xff]  }
  0x23   : > { %v14431_v18 = vld [vmem:[%s21754_s1 + $0x268] ss:$16 sps:$4 sm:$0xff]   ;;  %v14436_v19 = vld [vmem:[%s21754_s1 + $0x284] ss:$16 sps:$4 sm:$0xff]   ;;  %v14439_v20 = vld [vmem:[%s21754_s1 + $0x28c] ss:$16 sps:$4 sm:$0xff]  }
  0x24   : > { %v14434_v21 = vld [vmem:[%s21754_s1 + $0x280] ss:$16 sps:$4 sm:$0xff]   ;;  %v14437_v22 = vld [vmem:[%s21754_s1 + $0x288] ss:$16 sps:$4 sm:$0xff]   ;;  %v14442_v23 = vld [vmem:[%s21754_s1 + $0x2a4] ss:$16 sps:$4 sm:$0xff]  }
  0x25   : > { %10187 = vmatpush1.bf16.msra.mxu0 %v14357_v31  ;;  %11262 = vmatpush1.bf16.msra.mxu1 %v14358_v32  ;;  %v14445_v24 = vld [vmem:[%s21754_s1 + $0x2ac] ss:$16 sps:$4 sm:$0xff]   ;;  %v14440_v25 = vld [vmem:[%s21754_s1 + $0x2a0] ss:$16 sps:$4 sm:$0xff]   ;;  %v14443_v26 = vld [vmem:[%s21754_s1 + $0x2a8] ss:$16 sps:$4 sm:$0xff]  }
  0x26   : > { %10188 = vmatprep.subr.bf16.mxu0 %v14359_v33  ;;  %11263 = vmatprep.subr.bf16.mxu1 %v14361_v34  ;;  %v14448_v27 = vld [vmem:[%s21754_s1 + $0x2c4] ss:$16 sps:$4 sm:$0xff]   ;;  %v14451_v28 = vld [vmem:[%s21754_s1 + $0x2cc] ss:$16 sps:$4 sm:$0xff]   ;;  %v14446_v29 = vld [vmem:[%s21754_s1 + $0x2c0] ss:$16 sps:$4 sm:$0xff]  }
  0x27   : > { %v14449_v30 = vld [vmem:[%s21754_s1 + $0x2c8] ss:$16 sps:$4 sm:$0xff]   ;;  %v14508_v31 = vld [vmem:[%s16986_s26 + $0xc] ss:$200 sps:$4 sm:$0xff]   ;;  %v14452_v34 = vld [vmem:[%s21754_s1 + $0x2e0] ss:$16 sps:$4 sm:$0xff]  }
  0x28   : > { %v14454_v32 = vld [vmem:[%s21754_s1 + $0x2e4] ss:$16 sps:$4 sm:$0xff]   ;;  %v14457_v33 = vld [vmem:[%s21754_s1 + $0x2ec] ss:$16 sps:$4 sm:$0xff]  }
  0x29   : > { %10189 = vmatpush1.bf16.msra.mxu0 %v14363_v35  ;;  %11264 = vmatpush1.bf16.msra.mxu1 %v14364_v36  ;;  %v14455_v35 = vld [vmem:[%s21754_s1 + $0x2e8] ss:$16 sps:$4 sm:$0xff]   ;;  %v14460_v36 = vld [vmem:[%s21754_s1 + $0x304] ss:$16 sps:$4 sm:$0xff]   ;;  %v14481_v49 = vld [vmem:[%s21754_s1 + $0x36c] ss:$16 sps:$4 sm:$0xff]  }
  0x2a   : > { %10190 = vmatprep.subr.bf16.mxu0 %v14365_v37  ;;  %11265 = vmatprep.subr.bf16.mxu1 %v14367_v38  ;;  %v14463_v37 = vld [vmem:[%s21754_s1 + $0x30c] ss:$16 sps:$4 sm:$0xff]   ;;  %v14458_v38 = vld [vmem:[%s21754_s1 + $0x300] ss:$16 sps:$4 sm:$0xff]  }
  0x2d   : > { %10191 = vmatpush1.bf16.msra.mxu0 %v14369_v39  ;;  %11266 = vmatpush1.bf16.msra.mxu1 %v14370_v40  ;;  %v14461_v39 = vld [vmem:[%s21754_s1 + $0x308] ss:$16 sps:$4 sm:$0xff]   ;;  %v14466_v40 = vld [vmem:[%s21754_s1 + $0x324] ss:$16 sps:$4 sm:$0xff]  }
  0x2e   : > { %10192 = vmatprep.subr.bf16.mxu0 %v14371_v41  ;;  %11267 = vmatprep.subr.bf16.mxu1 %v14373_v42  ;;  %v14469_v41 = vld [vmem:[%s21754_s1 + $0x32c] ss:$16 sps:$4 sm:$0xff]   ;;  %v14464_v42 = vld [vmem:[%s21754_s1 + $0x320] ss:$16 sps:$4 sm:$0xff]  }
  0x31   : > { %10193 = vmatpush1.bf16.msra.mxu0 %v14375_v43  ;;  %11268 = vmatpush1.bf16.msra.mxu1 %v14376_v44  ;;  %v14467_v43 = vld [vmem:[%s21754_s1 + $0x328] ss:$16 sps:$4 sm:$0xff]   ;;  %v14472_v44 = vld [vmem:[%s21754_s1 + $0x344] ss:$16 sps:$4 sm:$0xff]  }
  0x32   : > { %10194 = vmatprep.subr.bf16.mxu0 %v14377_v45  ;;  %11269 = vmatprep.subr.bf16.mxu1 %v14379_v46  ;;  %v14475_v45 = vld [vmem:[%s21754_s1 + $0x34c] ss:$16 sps:$4 sm:$0xff]   ;;  %v14470_v46 = vld [vmem:[%s21754_s1 + $0x340] ss:$16 sps:$4 sm:$0xff]  }
  0x35   : > { %10195 = vmatpush1.bf16.msra.mxu0 %v14381_v47  ;;  %11270 = vmatpush1.bf16.msra.mxu1 %v14382_v48  ;;  %v14473_v47 = vld [vmem:[%s21754_s1 + $0x348] ss:$16 sps:$4 sm:$0xff]   ;;  %v14478_v48 = vld [vmem:[%s21754_s1 + $0x364] ss:$16 sps:$4 sm:$0xff]  }
  0x36   : > { %10196 = vmatprep.subr.bf16.mxu0 %v14383_v50  ;;  %11271 = vmatprep.subr.bf16.mxu1 %v14385_v51  ;;  %v14476_v50 = vld [vmem:[%s21754_s1 + $0x360] ss:$16 sps:$4 sm:$0xff]   ;;  %v14479_v51 = vld [vmem:[%s21754_s1 + $0x368] ss:$16 sps:$4 sm:$0xff]  }
  0x39   : > { %10197 = vmatpush1.bf16.msra.mxu0 %v14387_v52  ;;  %11272 = vmatpush1.bf16.msra.mxu1 %v14388_v53  ;;  %v14484_v52 = vld [vmem:[%s21754_s1 + $0x384] ss:$16 sps:$4 sm:$0xff]   ;;  %v14487_v53 = vld [vmem:[%s21754_s1 + $0x38c] ss:$16 sps:$4 sm:$0xff]  }
  0x3a   : > { %10198 = vmatprep.subr.bf16.mxu0 %v14389_v54  ;;  %11273 = vmatprep.subr.bf16.mxu1 %v14391_v55  ;;  %v14482_v54 = vld [vmem:[%s21754_s1 + $0x380] ss:$16 sps:$4 sm:$0xff]   ;;  %v14485_v55 = vld [vmem:[%s21754_s1 + $0x388] ss:$16 sps:$4 sm:$0xff]  }
  0x3d   : > { %10199 = vmatpush1.bf16.msra.mxu0 %v14393_v56  ;;  %11274 = vmatpush1.bf16.msra.mxu1 %v14394_v57  ;;  %v14490_v56 = vld [vmem:[%s21754_s1 + $0x3a4] ss:$16 sps:$4 sm:$0xff]   ;;  %v14493_v57 = vld [vmem:[%s21754_s1 + $0x3ac] ss:$16 sps:$4 sm:$0xff]  }
  0x3e   : > { %10200 = vmatprep.subr.bf16.mxu0 %v14395_v58  ;;  %11275 = vmatprep.subr.bf16.mxu1 %v14397_v59  ;;  %v14488_v58 = vld [vmem:[%s21754_s1 + $0x3a0] ss:$16 sps:$4 sm:$0xff]   ;;  %v14491_v59 = vld [vmem:[%s21754_s1 + $0x3a8] ss:$16 sps:$4 sm:$0xff]  }
  0x41   : > { %10201 = vmatpush1.bf16.msra.mxu0 %v14399_v60  ;;  %11276 = vmatpush1.bf16.msra.mxu1 %v14400_v61  ;;  %v14496_v60 = vld [vmem:[%s21754_s1 + $0x3c4] ss:$16 sps:$4 sm:$0xff]   ;;  %v14499_v61 = vld [vmem:[%s21754_s1 + $0x3cc] ss:$16 sps:$4 sm:$0xff]  }
  0x42   : > { %10202 = vmatprep.subr.bf16.mxu0 %v14401_v62  ;;  %11277 = vmatprep.subr.bf16.mxu1 %v14403_v63  ;;  %v14494_v62 = vld [vmem:[%s21754_s1 + $0x3c0] ss:$16 sps:$4 sm:$0xff]   ;;  %v14497_v63 = vld [vmem:[%s21754_s1 + $0x3c8] ss:$16 sps:$4 sm:$0xff]  }
  0x45   : > { %10203 = vmatpush1.bf16.msra.mxu0 %v14405_v0  ;;  %11278 = vmatpush1.bf16.msra.mxu1 %v14406_v1  ;;  %v14502_v0 = vld [vmem:[%s21754_s1 + $0x3e4] ss:$16 sps:$4 sm:$0xff]   ;;  %v14505_v1 = vld [vmem:[%s21754_s1 + $0x3ec] ss:$16 sps:$4 sm:$0xff]  }
  0x46   : > { %10215 = vmatprep.subr.bf16.mxu0 %v14412_v2  ;;  %11290 = vmatprep.subr.bf16.mxu1 %v14415_v3  ;;  %v14500_v2 = vld [vmem:[%s21754_s1 + $0x3e0] ss:$16 sps:$4 sm:$0xff]   ;;  %v14503_v3 = vld [vmem:[%s21754_s1 + $0x3e8] ss:$16 sps:$4 sm:$0xff]  }
  0x48   : > { %10205 = vmatmul.mubr.bf16.vlgmr.msra.gmra.mrb[0].mxu0 %v14407_v4  ;;  %11280 = vmatmul.mubr.bf16.vlgmr.msra.gmra.mrb[0].mxu1 %v14407_v4  ;;  %v14511_v4 = vld [vmem:[%s21754_s1 + $0x404] ss:$16 sps:$4 sm:$0xff]  }
  0x49   : > { %10216 = vmatpush1.bf16.msra.mxu0 %v14410_v5  ;;  %11291 = vmatpush1.bf16.msra.mxu1 %v14413_v6  ;;  %v14514_v5 = vld [vmem:[%s21754_s1 + $0x40c] ss:$16 sps:$4 sm:$0xff]   ;;  %v14506_v6 = vld [vmem:[%s16986_s26 + $0x8] ss:$200 sps:$4 sm:$0xff]  }
  0x4a   : > { %10217 = vmatprep.subr.bf16.mxu0 %v14418_v7  ;;  %11292 = vmatprep.subr.bf16.mxu1 %v14421_v8  ;;  %v14509_v7 = vld [vmem:[%s21754_s1 + $0x400] ss:$16 sps:$4 sm:$0xff]   ;;  %v14512_v8 = vld [vmem:[%s21754_s1 + $0x408] ss:$16 sps:$4 sm:$0xff]  }
  0x4b   : > { %10247 = vmatprep.mubr.bf16.mxu0 %v14508_v31  ;;  %11322 = vmatprep.mubr.bf16.mxu1 %v14508_v31  ;;  %v14550_v31 = vld [vmem:[%s21754_s1 + $0x4cc] ss:$16 sps:$4 sm:$0xff]  }
  0x4d   : > { %10218 = vmatpush1.bf16.msra.mxu0 %v14416_v9  ;;  %11293 = vmatpush1.bf16.msra.mxu1 %v14419_v10  ;;  %v14517_v9 = vld [vmem:[%s21754_s1 + $0x424] ss:$16 sps:$4 sm:$0xff]   ;;  %v14520_v10 = vld [vmem:[%s21754_s1 + $0x42c] ss:$16 sps:$4 sm:$0xff]  }
  0x4e   : > { %10219 = vmatprep.subr.bf16.mxu0 %v14424_v11  ;;  %11294 = vmatprep.subr.bf16.mxu1 %v14427_v12  ;;  %v14515_v11 = vld [vmem:[%s21754_s1 + $0x420] ss:$16 sps:$4 sm:$0xff]   ;;  %v14518_v12 = vld [vmem:[%s21754_s1 + $0x428] ss:$16 sps:$4 sm:$0xff]  }
  0x51   : > { %10220 = vmatpush1.bf16.msra.mxu0 %v14422_v13  ;;  %11295 = vmatpush1.bf16.msra.mxu1 %v14425_v14  ;;  %v14607_v13 = vld [vmem:[%s16986_s26 + $0x14] ss:$200 sps:$4 sm:$0xff]  }
  0x52   : > { %10221 = vmatprep.subr.bf16.mxu0 %v14430_v15  ;;  %11296 = vmatprep.subr.bf16.mxu1 %v14433_v16  ;;  %v14523_v14 = vld [vmem:[%s21754_s1 + $0x444] ss:$16 sps:$4 sm:$0xff]   ;;  %v14526_v15 = vld [vmem:[%s21754_s1 + $0x44c] ss:$16 sps:$4 sm:$0xff]   ;;  %v14521_v16 = vld [vmem:[%s21754_s1 + $0x440] ss:$16 sps:$4 sm:$0xff]  }
  0x55   : > { %10222 = vmatpush1.bf16.msra.mxu0 %v14428_v17  ;;  %11297 = vmatpush1.bf16.msra.mxu1 %v14431_v18  ;;  %v14524_v17 = vld [vmem:[%s21754_s1 + $0x448] ss:$16 sps:$4 sm:$0xff]   ;;  %v14529_v18 = vld [vmem:[%s21754_s1 + $0x464] ss:$16 sps:$4 sm:$0xff]  }
  0x56   : > { %10223 = vmatprep.subr.bf16.mxu0 %v14436_v19  ;;  %11298 = vmatprep.subr.bf16.mxu1 %v14439_v20  ;;  %v14532_v19 = vld [vmem:[%s21754_s1 + $0x46c] ss:$16 sps:$4 sm:$0xff]   ;;  %v14527_v20 = vld [vmem:[%s21754_s1 + $0x460] ss:$16 sps:$4 sm:$0xff]  }
  0x59   : > { %10224 = vmatpush1.bf16.msra.mxu0 %v14434_v21  ;;  %11299 = vmatpush1.bf16.msra.mxu1 %v14437_v22  ;;  %v14530_v21 = vld [vmem:[%s21754_s1 + $0x468] ss:$16 sps:$4 sm:$0xff]   ;;  %v14535_v22 = vld [vmem:[%s21754_s1 + $0x484] ss:$16 sps:$4 sm:$0xff]  }
  0x5a   : > { %10225 = vmatprep.subr.bf16.mxu0 %v14442_v23  ;;  %11300 = vmatprep.subr.bf16.mxu1 %v14445_v24  ;;  %v14538_v23 = vld [vmem:[%s21754_s1 + $0x48c] ss:$16 sps:$4 sm:$0xff]   ;;  %v14533_v24 = vld [vmem:[%s21754_s1 + $0x480] ss:$16 sps:$4 sm:$0xff]  }
  0x5d   : > { %10226 = vmatpush1.bf16.msra.mxu0 %v14440_v25  ;;  %11301 = vmatpush1.bf16.msra.mxu1 %v14443_v26  ;;  %v14536_v25 = vld [vmem:[%s21754_s1 + $0x488] ss:$16 sps:$4 sm:$0xff]   ;;  %v14541_v26 = vld [vmem:[%s21754_s1 + $0x4a4] ss:$16 sps:$4 sm:$0xff]  }
  0x5e   : > { %10227 = vmatprep.subr.bf16.mxu0 %v14448_v27  ;;  %11302 = vmatprep.subr.bf16.mxu1 %v14451_v28  ;;  %v14544_v27 = vld [vmem:[%s21754_s1 + $0x4ac] ss:$16 sps:$4 sm:$0xff]   ;;  %v14539_v28 = vld [vmem:[%s21754_s1 + $0x4a0] ss:$16 sps:$4 sm:$0xff]  }
  0x61   : > { %10228 = vmatpush1.bf16.msra.mxu0 %v14446_v29  ;;  %11303 = vmatpush1.bf16.msra.mxu1 %v14449_v30  ;;  %v14542_v29 = vld [vmem:[%s21754_s1 + $0x4a8] ss:$16 sps:$4 sm:$0xff]   ;;  %v14547_v30 = vld [vmem:[%s21754_s1 + $0x4c4] ss:$16 sps:$4 sm:$0xff]  }
  0x62   : > { %10229 = vmatprep.subr.bf16.mxu0 %v14454_v32  ;;  %11304 = vmatprep.subr.bf16.mxu1 %v14457_v33  ;;  %v14545_v32 = vld [vmem:[%s21754_s1 + $0x4c0] ss:$16 sps:$4 sm:$0xff]   ;;  %v14548_v33 = vld [vmem:[%s21754_s1 + $0x4c8] ss:$16 sps:$4 sm:$0xff]  }
  0x65   : > { %10230 = vmatpush1.bf16.msra.mxu0 %v14452_v34  ;;  %11305 = vmatpush1.bf16.msra.mxu1 %v14455_v35  ;;  %v14553_v34 = vld [vmem:[%s21754_s1 + $0x4e4] ss:$16 sps:$4 sm:$0xff]   ;;  %v14556_v35 = vld [vmem:[%s21754_s1 + $0x4ec] ss:$16 sps:$4 sm:$0xff]  }
  0x66   : > { %10231 = vmatprep.subr.bf16.mxu0 %v14460_v36  ;;  %11306 = vmatprep.subr.bf16.mxu1 %v14463_v37  ;;  %v14551_v36 = vld [vmem:[%s21754_s1 + $0x4e0] ss:$16 sps:$4 sm:$0xff]   ;;  %v14554_v37 = vld [vmem:[%s21754_s1 + $0x4e8] ss:$16 sps:$4 sm:$0xff]  }
  0x69   : > { %10232 = vmatpush1.bf16.msra.mxu0 %v14458_v38  ;;  %11307 = vmatpush1.bf16.msra.mxu1 %v14461_v39  ;;  %v14559_v38 = vld [vmem:[%s21754_s1 + $0x504] ss:$16 sps:$4 sm:$0xff]   ;;  %v14562_v39 = vld [vmem:[%s21754_s1 + $0x50c] ss:$16 sps:$4 sm:$0xff]  }
  0x6a   : > { %10233 = vmatprep.subr.bf16.mxu0 %v14466_v40  ;;  %11308 = vmatprep.subr.bf16.mxu1 %v14469_v41  ;;  %v14557_v40 = vld [vmem:[%s21754_s1 + $0x500] ss:$16 sps:$4 sm:$0xff]   ;;  %v14560_v41 = vld [vmem:[%s21754_s1 + $0x508] ss:$16 sps:$4 sm:$0xff]  }
  0x6d   : > { %10234 = vmatpush1.bf16.msra.mxu0 %v14464_v42  ;;  %11309 = vmatpush1.bf16.msra.mxu1 %v14467_v43  ;;  %v14565_v42 = vld [vmem:[%s21754_s1 + $0x524] ss:$16 sps:$4 sm:$0xff]   ;;  %v14568_v43 = vld [vmem:[%s21754_s1 + $0x52c] ss:$16 sps:$4 sm:$0xff]  }
  0x6e   : > { %10235 = vmatprep.subr.bf16.mxu0 %v14472_v44  ;;  %11310 = vmatprep.subr.bf16.mxu1 %v14475_v45  ;;  %v14563_v44 = vld [vmem:[%s21754_s1 + $0x520] ss:$16 sps:$4 sm:$0xff]   ;;  %v14566_v45 = vld [vmem:[%s21754_s1 + $0x528] ss:$16 sps:$4 sm:$0xff]  }
  0x71   : > { %10236 = vmatpush1.bf16.msra.mxu0 %v14470_v46  ;;  %11311 = vmatpush1.bf16.msra.mxu1 %v14473_v47  ;;  %v14571_v46 = vld [vmem:[%s21754_s1 + $0x544] ss:$16 sps:$4 sm:$0xff]   ;;  %v14574_v47 = vld [vmem:[%s21754_s1 + $0x54c] ss:$16 sps:$4 sm:$0xff]  }
  0x72   : > { %10237 = vmatprep.subr.bf16.mxu0 %v14478_v48  ;;  %11312 = vmatprep.subr.bf16.mxu1 %v14481_v49  ;;  %v14569_v48 = vld [vmem:[%s21754_s1 + $0x540] ss:$16 sps:$4 sm:$0xff]   ;;  %v14572_v49 = vld [vmem:[%s21754_s1 + $0x548] ss:$16 sps:$4 sm:$0xff]  }
  0x75   : > { %10238 = vmatpush1.bf16.msra.mxu0 %v14476_v50  ;;  %11313 = vmatpush1.bf16.msra.mxu1 %v14479_v51  ;;  %v14577_v50 = vld [vmem:[%s21754_s1 + $0x564] ss:$16 sps:$4 sm:$0xff]   ;;  %v14580_v51 = vld [vmem:[%s21754_s1 + $0x56c] ss:$16 sps:$4 sm:$0xff]  }
  0x76   : > { %10239 = vmatprep.subr.bf16.mxu0 %v14484_v52  ;;  %11314 = vmatprep.subr.bf16.mxu1 %v14487_v53  ;;  %v14575_v52 = vld [vmem:[%s21754_s1 + $0x560] ss:$16 sps:$4 sm:$0xff]   ;;  %v14578_v53 = vld [vmem:[%s21754_s1 + $0x568] ss:$16 sps:$4 sm:$0xff]  }
  0x79   : > { %10240 = vmatpush1.bf16.msra.mxu0 %v14482_v54  ;;  %11315 = vmatpush1.bf16.msra.mxu1 %v14485_v55  ;;  %v14583_v54 = vld [vmem:[%s21754_s1 + $0x584] ss:$16 sps:$4 sm:$0xff]   ;;  %v14586_v55 = vld [vmem:[%s21754_s1 + $0x58c] ss:$16 sps:$4 sm:$0xff]  }
  0x7a   : > { %10241 = vmatprep.subr.bf16.mxu0 %v14490_v56  ;;  %11316 = vmatprep.subr.bf16.mxu1 %v14493_v57  ;;  %v14581_v56 = vld [vmem:[%s21754_s1 + $0x580] ss:$16 sps:$4 sm:$0xff]   ;;  %v14584_v57 = vld [vmem:[%s21754_s1 + $0x588] ss:$16 sps:$4 sm:$0xff]  }
  0x7d   : > { %10242 = vmatpush1.bf16.msra.mxu0 %v14488_v58  ;;  %11317 = vmatpush1.bf16.msra.mxu1 %v14491_v59  ;;  %v14589_v58 = vld [vmem:[%s21754_s1 + $0x5a4] ss:$16 sps:$4 sm:$0xff]   ;;  %v14592_v59 = vld [vmem:[%s21754_s1 + $0x5ac] ss:$16 sps:$4 sm:$0xff]  }
  0x7e   : > { %10243 = vmatprep.subr.bf16.mxu0 %v14496_v60  ;;  %11318 = vmatprep.subr.bf16.mxu1 %v14499_v61  ;;  %v14587_v60 = vld [vmem:[%s21754_s1 + $0x5a0] ss:$16 sps:$4 sm:$0xff]   ;;  %v14590_v61 = vld [vmem:[%s21754_s1 + $0x5a8] ss:$16 sps:$4 sm:$0xff]  }
  0x81   : > { %10244 = vmatpush1.bf16.msra.mxu0 %v14494_v62  ;;  %11319 = vmatpush1.bf16.msra.mxu1 %v14497_v63  ;;  %v14595_v62 = vld [vmem:[%s21754_s1 + $0x5c4] ss:$16 sps:$4 sm:$0xff]   ;;  %v14598_v63 = vld [vmem:[%s21754_s1 + $0x5cc] ss:$16 sps:$4 sm:$0xff]  }
  0x82   : > { %10245 = vmatprep.subr.bf16.mxu0 %v14502_v0  ;;  %11320 = vmatprep.subr.bf16.mxu1 %v14505_v1  ;;  %v14593_v0 = vld [vmem:[%s21754_s1 + $0x5c0] ss:$16 sps:$4 sm:$0xff]   ;;  %v14596_v1 = vld [vmem:[%s21754_s1 + $0x5c8] ss:$16 sps:$4 sm:$0xff]  }
  0x85   : > { %10246 = vmatpush1.bf16.msra.mxu0 %v14500_v2  ;;  %11321 = vmatpush1.bf16.msra.mxu1 %v14503_v3  ;;  %v14601_v2 = vld [vmem:[%s21754_s1 + $0x5e4] ss:$16 sps:$4 sm:$0xff]   ;;  %v14604_v3 = vld [vmem:[%s21754_s1 + $0x5ec] ss:$16 sps:$4 sm:$0xff]  }
  0x86   : > { %10258 = vmatprep.subr.bf16.mxu0 %v14511_v4  ;;  %11333 = vmatprep.subr.bf16.mxu1 %v14514_v5  ;;  %v14599_v4 = vld [vmem:[%s21754_s1 + $0x5e0] ss:$16 sps:$4 sm:$0xff]   ;;  %v14602_v5 = vld [vmem:[%s21754_s1 + $0x5e8] ss:$16 sps:$4 sm:$0xff]  }
  0x88   : > { %10248 = vmatmul.mubr.bf16.vlgmr.msra.gmra.mrb[0].mxu0 %v14506_v6  ;;  %11323 = vmatmul.mubr.bf16.vlgmr.msra.gmra.mrb[0].mxu1 %v14506_v6  ;;  %v14610_v6 = vld [vmem:[%s21754_s1 + $0x604] ss:$16 sps:$4 sm:$0xff]  }
  0x89   : > { %10259 = vmatpush1.bf16.msra.mxu0 %v14509_v7  ;;  %11334 = vmatpush1.bf16.msra.mxu1 %v14512_v8  ;;  %v14613_v7 = vld [vmem:[%s21754_s1 + $0x60c] ss:$16 sps:$4 sm:$0xff]   ;;  %v14605_v8 = vld [vmem:[%s16986_s26 + $0x10] ss:$200 sps:$4 sm:$0xff]  }
  0x8a   : > { %10260 = vmatprep.subr.bf16.mxu0 %v14517_v9  ;;  %11335 = vmatprep.subr.bf16.mxu1 %v14520_v10  ;;  %v14608_v9 = vld [vmem:[%s21754_s1 + $0x600] ss:$16 sps:$4 sm:$0xff]   ;;  %v14611_v10 = vld [vmem:[%s21754_s1 + $0x608] ss:$16 sps:$4 sm:$0xff]  }
  0x8b   : > { %10290 = vmatprep.mubr.bf16.mxu0 %v14607_v13  ;;  %11365 = vmatprep.mubr.bf16.mxu1 %v14607_v13  ;;  %v14706_v13 = vld [vmem:[%s16986_s26 + $0x1c] ss:$200 sps:$4 sm:$0xff]  }
  0x8d   : > { %10261 = vmatpush1.bf16.msra.mxu0 %v14515_v11  ;;  %11336 = vmatpush1.bf16.msra.mxu1 %v14518_v12  ;;  %v14616_v11 = vld [vmem:[%s21754_s1 + $0x624] ss:$16 sps:$4 sm:$0xff]   ;;  %v14619_v12 = vld [vmem:[%s21754_s1 + $0x62c] ss:$16 sps:$4 sm:$0xff]  }
  0x8e   : > { %10262 = vmatprep.subr.bf16.mxu0 %v14523_v14  ;;  %11337 = vmatprep.subr.bf16.mxu1 %v14526_v15  ;;  %v14614_v14 = vld [vmem:[%s21754_s1 + $0x620] ss:$16 sps:$4 sm:$0xff]   ;;  %v14617_v15 = vld [vmem:[%s21754_s1 + $0x628] ss:$16 sps:$4 sm:$0xff]  }
  0x91   : > { %10263 = vmatpush1.bf16.msra.mxu0 %v14521_v16  ;;  %11338 = vmatpush1.bf16.msra.mxu1 %v14524_v17  ;;  %v14622_v16 = vld [vmem:[%s21754_s1 + $0x644] ss:$16 sps:$4 sm:$0xff]   ;;  %v14625_v17 = vld [vmem:[%s21754_s1 + $0x64c] ss:$16 sps:$4 sm:$0xff]  }
  0x92   : > { %10264 = vmatprep.subr.bf16.mxu0 %v14529_v18  ;;  %11339 = vmatprep.subr.bf16.mxu1 %v14532_v19  ;;  %v14620_v18 = vld [vmem:[%s21754_s1 + $0x640] ss:$16 sps:$4 sm:$0xff]   ;;  %v14623_v19 = vld [vmem:[%s21754_s1 + $0x648] ss:$16 sps:$4 sm:$0xff]  }
  0x95   : > { %10265 = vmatpush1.bf16.msra.mxu0 %v14527_v20  ;;  %11340 = vmatpush1.bf16.msra.mxu1 %v14530_v21  ;;  %v14628_v20 = vld [vmem:[%s21754_s1 + $0x664] ss:$16 sps:$4 sm:$0xff]   ;;  %v14631_v21 = vld [vmem:[%s21754_s1 + $0x66c] ss:$16 sps:$4 sm:$0xff]  }
  0x96   : > { %10266 = vmatprep.subr.bf16.mxu0 %v14535_v22  ;;  %11341 = vmatprep.subr.bf16.mxu1 %v14538_v23  ;;  %v14626_v22 = vld [vmem:[%s21754_s1 + $0x660] ss:$16 sps:$4 sm:$0xff]   ;;  %v14629_v23 = vld [vmem:[%s21754_s1 + $0x668] ss:$16 sps:$4 sm:$0xff]  }
  0x99   : > { %10267 = vmatpush1.bf16.msra.mxu0 %v14533_v24  ;;  %11342 = vmatpush1.bf16.msra.mxu1 %v14536_v25  ;;  %v14634_v24 = vld [vmem:[%s21754_s1 + $0x684] ss:$16 sps:$4 sm:$0xff]   ;;  %v14637_v25 = vld [vmem:[%s21754_s1 + $0x68c] ss:$16 sps:$4 sm:$0xff]  }
  0x9a   : > { %10268 = vmatprep.subr.bf16.mxu0 %v14541_v26  ;;  %11343 = vmatprep.subr.bf16.mxu1 %v14544_v27  ;;  %v14632_v26 = vld [vmem:[%s21754_s1 + $0x680] ss:$16 sps:$4 sm:$0xff]   ;;  %v14635_v27 = vld [vmem:[%s21754_s1 + $0x688] ss:$16 sps:$4 sm:$0xff]  }
  0x9d   : > { %10269 = vmatpush1.bf16.msra.mxu0 %v14539_v28  ;;  %11344 = vmatpush1.bf16.msra.mxu1 %v14542_v29  ;;  %v14640_v28 = vld [vmem:[%s21754_s1 + $0x6a4] ss:$16 sps:$4 sm:$0xff]   ;;  %v14643_v29 = vld [vmem:[%s21754_s1 + $0x6ac] ss:$16 sps:$4 sm:$0xff]  }
  0x9e   : > { %10270 = vmatprep.subr.bf16.mxu0 %v14547_v30  ;;  %11345 = vmatprep.subr.bf16.mxu1 %v14550_v31  ;;  %v14638_v30 = vld [vmem:[%s21754_s1 + $0x6a0] ss:$16 sps:$4 sm:$0xff]   ;;  %v14641_v31 = vld [vmem:[%s21754_s1 + $0x6a8] ss:$16 sps:$4 sm:$0xff]  }
  0xa1   : > { %10271 = vmatpush1.bf16.msra.mxu0 %v14545_v32  ;;  %11346 = vmatpush1.bf16.msra.mxu1 %v14548_v33  ;;  %v14646_v32 = vld [vmem:[%s21754_s1 + $0x6c4] ss:$16 sps:$4 sm:$0xff]   ;;  %v14649_v33 = vld [vmem:[%s21754_s1 + $0x6cc] ss:$16 sps:$4 sm:$0xff]  }
  0xa2   : > { %10272 = vmatprep.subr.bf16.mxu0 %v14553_v34  ;;  %11347 = vmatprep.subr.bf16.mxu1 %v14556_v35  ;;  %v14644_v34 = vld [vmem:[%s21754_s1 + $0x6c0] ss:$16 sps:$4 sm:$0xff]   ;;  %v14647_v35 = vld [vmem:[%s21754_s1 + $0x6c8] ss:$16 sps:$4 sm:$0xff]  }
  0xa5   : > { %10273 = vmatpush1.bf16.msra.mxu0 %v14551_v36  ;;  %11348 = vmatpush1.bf16.msra.mxu1 %v14554_v37  ;;  %v14652_v36 = vld [vmem:[%s21754_s1 + $0x6e4] ss:$16 sps:$4 sm:$0xff]   ;;  %v14655_v37 = vld [vmem:[%s21754_s1 + $0x6ec] ss:$16 sps:$4 sm:$0xff]  }
  0xa6   : > { %10274 = vmatprep.subr.bf16.mxu0 %v14559_v38  ;;  %11349 = vmatprep.subr.bf16.mxu1 %v14562_v39  ;;  %v14650_v38 = vld [vmem:[%s21754_s1 + $0x6e0] ss:$16 sps:$4 sm:$0xff]   ;;  %v14653_v39 = vld [vmem:[%s21754_s1 + $0x6e8] ss:$16 sps:$4 sm:$0xff]  }
  0xa9   : > { %10275 = vmatpush1.bf16.msra.mxu0 %v14557_v40  ;;  %11350 = vmatpush1.bf16.msra.mxu1 %v14560_v41  ;;  %v14658_v40 = vld [vmem:[%s21754_s1 + $0x704] ss:$16 sps:$4 sm:$0xff]   ;;  %v14661_v41 = vld [vmem:[%s21754_s1 + $0x70c] ss:$16 sps:$4 sm:$0xff]  }
  0xaa   : > { %10276 = vmatprep.subr.bf16.mxu0 %v14565_v42  ;;  %11351 = vmatprep.subr.bf16.mxu1 %v14568_v43  ;;  %v14656_v42 = vld [vmem:[%s21754_s1 + $0x700] ss:$16 sps:$4 sm:$0xff]   ;;  %v14659_v43 = vld [vmem:[%s21754_s1 + $0x708] ss:$16 sps:$4 sm:$0xff]  }
  0xad   : > { %10277 = vmatpush1.bf16.msra.mxu0 %v14563_v44  ;;  %11352 = vmatpush1.bf16.msra.mxu1 %v14566_v45  ;;  %v14664_v44 = vld [vmem:[%s21754_s1 + $0x724] ss:$16 sps:$4 sm:$0xff]   ;;  %v14667_v45 = vld [vmem:[%s21754_s1 + $0x72c] ss:$16 sps:$4 sm:$0xff]  }
  0xae   : > { %10278 = vmatprep.subr.bf16.mxu0 %v14571_v46  ;;  %11353 = vmatprep.subr.bf16.mxu1 %v14574_v47  ;;  %v14662_v46 = vld [vmem:[%s21754_s1 + $0x720] ss:$16 sps:$4 sm:$0xff]   ;;  %v14665_v47 = vld [vmem:[%s21754_s1 + $0x728] ss:$16 sps:$4 sm:$0xff]  }
  0xb1   : > { %10279 = vmatpush1.bf16.msra.mxu0 %v14569_v48  ;;  %11354 = vmatpush1.bf16.msra.mxu1 %v14572_v49  ;;  %v14670_v48 = vld [vmem:[%s21754_s1 + $0x744] ss:$16 sps:$4 sm:$0xff]   ;;  %v14673_v49 = vld [vmem:[%s21754_s1 + $0x74c] ss:$16 sps:$4 sm:$0xff]  }
  0xb2   : > { %10280 = vmatprep.subr.bf16.mxu0 %v14577_v50  ;;  %11355 = vmatprep.subr.bf16.mxu1 %v14580_v51  ;;  %v14668_v50 = vld [vmem:[%s21754_s1 + $0x740] ss:$16 sps:$4 sm:$0xff]   ;;  %v14671_v51 = vld [vmem:[%s21754_s1 + $0x748] ss:$16 sps:$4 sm:$0xff]  }
  0xb5   : > { %10281 = vmatpush1.bf16.msra.mxu0 %v14575_v52  ;;  %11356 = vmatpush1.bf16.msra.mxu1 %v14578_v53  ;;  %v14676_v52 = vld [vmem:[%s21754_s1 + $0x764] ss:$16 sps:$4 sm:$0xff]   ;;  %v14679_v53 = vld [vmem:[%s21754_s1 + $0x76c] ss:$16 sps:$4 sm:$0xff]  }
  0xb6   : > { %10282 = vmatprep.subr.bf16.mxu0 %v14583_v54  ;;  %11357 = vmatprep.subr.bf16.mxu1 %v14586_v55  ;;  %v14674_v54 = vld [vmem:[%s21754_s1 + $0x760] ss:$16 sps:$4 sm:$0xff]   ;;  %v14677_v55 = vld [vmem:[%s21754_s1 + $0x768] ss:$16 sps:$4 sm:$0xff]  }
  0xb9   : > { %10283 = vmatpush1.bf16.msra.mxu0 %v14581_v56  ;;  %11358 = vmatpush1.bf16.msra.mxu1 %v14584_v57  ;;  %v14682_v56 = vld [vmem:[%s21754_s1 + $0x784] ss:$16 sps:$4 sm:$0xff]   ;;  %v14685_v57 = vld [vmem:[%s21754_s1 + $0x78c] ss:$16 sps:$4 sm:$0xff]  }
  0xba   : > { %10284 = vmatprep.subr.bf16.mxu0 %v14589_v58  ;;  %11359 = vmatprep.subr.bf16.mxu1 %v14592_v59  ;;  %v14680_v58 = vld [vmem:[%s21754_s1 + $0x780] ss:$16 sps:$4 sm:$0xff]   ;;  %v14683_v59 = vld [vmem:[%s21754_s1 + $0x788] ss:$16 sps:$4 sm:$0xff]  }
  0xbd   : > { %10285 = vmatpush1.bf16.msra.mxu0 %v14587_v60  ;;  %11360 = vmatpush1.bf16.msra.mxu1 %v14590_v61  ;;  %v14688_v60 = vld [vmem:[%s21754_s1 + $0x7a4] ss:$16 sps:$4 sm:$0xff]   ;;  %v14691_v61 = vld [vmem:[%s21754_s1 + $0x7ac] ss:$16 sps:$4 sm:$0xff]  }
  0xbe   : > { %10286 = vmatprep.subr.bf16.mxu0 %v14595_v62  ;;  %11361 = vmatprep.subr.bf16.mxu1 %v14598_v63  ;;  %v14686_v62 = vld [vmem:[%s21754_s1 + $0x7a0] ss:$16 sps:$4 sm:$0xff]   ;;  %v14689_v63 = vld [vmem:[%s21754_s1 + $0x7a8] ss:$16 sps:$4 sm:$0xff]  }
  0xc1   : > { %10287 = vmatpush1.bf16.msra.mxu0 %v14593_v0  ;;  %11362 = vmatpush1.bf16.msra.mxu1 %v14596_v1  ;;  %v14694_v0 = vld [vmem:[%s21754_s1 + $0x7c4] ss:$16 sps:$4 sm:$0xff]   ;;  %v14697_v1 = vld [vmem:[%s21754_s1 + $0x7cc] ss:$16 sps:$4 sm:$0xff]  }
  0xc2   : > { %10288 = vmatprep.subr.bf16.mxu0 %v14601_v2  ;;  %11363 = vmatprep.subr.bf16.mxu1 %v14604_v3  ;;  %v14692_v2 = vld [vmem:[%s21754_s1 + $0x7c0] ss:$16 sps:$4 sm:$0xff]   ;;  %v14695_v3 = vld [vmem:[%s21754_s1 + $0x7c8] ss:$16 sps:$4 sm:$0xff]  }
  0xc5   : > { %10289 = vmatpush1.bf16.msra.mxu0 %v14599_v4  ;;  %11364 = vmatpush1.bf16.msra.mxu1 %v14602_v5  ;;  %v14700_v4 = vld [vmem:[%s21754_s1 + $0x7e4] ss:$16 sps:$4 sm:$0xff]   ;;  %v14703_v5 = vld [vmem:[%s21754_s1 + $0x7ec] ss:$16 sps:$4 sm:$0xff]  }
  0xc6   : > { %10301 = vmatprep.subr.bf16.mxu0 %v14610_v6  ;;  %11376 = vmatprep.subr.bf16.mxu1 %v14613_v7  ;;  %v14698_v6 = vld [vmem:[%s21754_s1 + $0x7e0] ss:$16 sps:$4 sm:$0xff]   ;;  %v14701_v7 = vld [vmem:[%s21754_s1 + $0x7e8] ss:$16 sps:$4 sm:$0xff]  }
  0xc8   : > { %10291 = vmatmul.mubr.bf16.vlgmr.msra.gmra.mrb[0].mxu0 %v14605_v8  ;;  %11366 = vmatmul.mubr.bf16.vlgmr.msra.gmra.mrb[0].mxu1 %v14605_v8  ;;  %v14709_v8 = vld [vmem:[%s21754_s1 + $0x804] ss:$16 sps:$4 sm:$0xff]  }
  0xc9   : > { %10302 = vmatpush1.bf16.msra.mxu0 %v14608_v9  ;;  %11377 = vmatpush1.bf16.msra.mxu1 %v14611_v10  ;;  %v14712_v9 = vld [vmem:[%s21754_s1 + $0x80c] ss:$16 sps:$4 sm:$0xff]   ;;  %v14704_v10 = vld [vmem:[%s16986_s26 + $0x18] ss:$200 sps:$4 sm:$0xff]  }
  0xca   : > { %10303 = vmatprep.subr.bf16.mxu0 %v14616_v11  ;;  %11378 = vmatprep.subr.bf16.mxu1 %v14619_v12  ;;  %v14707_v11 = vld [vmem:[%s21754_s1 + $0x800] ss:$16 sps:$4 sm:$0xff]   ;;  %v14710_v12 = vld [vmem:[%s21754_s1 + $0x808] ss:$16 sps:$4 sm:$0xff]  }
  0xcb   : > { %10333 = vmatprep.mubr.bf16.mxu0 %v14706_v13  ;;  %11408 = vmatprep.mubr.bf16.mxu1 %v14706_v13  ;;  %v14715_v13 = vld [vmem:[%s21754_s1 + $0x824] ss:$16 sps:$4 sm:$0xff]  }
  0xcd   : > { %10304 = vmatpush1.bf16.msra.mxu0 %v14614_v14  ;;  %11379 = vmatpush1.bf16.msra.mxu1 %v14617_v15  ;;  %v14718_v14 = vld [vmem:[%s21754_s1 + $0x82c] ss:$16 sps:$4 sm:$0xff]  }
  0xce   : > { %10305 = vmatprep.subr.bf16.mxu0 %v14622_v16  ;;  %11380 = vmatprep.subr.bf16.mxu1 %v14625_v17  ;;  %v14805_v15 = vld [vmem:[%s16986_s26 + $0x24] ss:$200 sps:$4 sm:$0xff]   ;;  %v14713_v16 = vld [vmem:[%s21754_s1 + $0x820] ss:$16 sps:$4 sm:$0xff]   ;;  %v14716_v17 = vld [vmem:[%s21754_s1 + $0x828] ss:$16 sps:$4 sm:$0xff]  }
  0xd1   : > { %10306 = vmatpush1.bf16.msra.mxu0 %v14620_v18  ;;  %11381 = vmatpush1.bf16.msra.mxu1 %v14623_v19  ;;  %v14721_v18 = vld [vmem:[%s21754_s1 + $0x844] ss:$16 sps:$4 sm:$0xff]   ;;  %v14724_v19 = vld [vmem:[%s21754_s1 + $0x84c] ss:$16 sps:$4 sm:$0xff]  }
  0xd2   : > { %10307 = vmatprep.subr.bf16.mxu0 %v14628_v20  ;;  %11382 = vmatprep.subr.bf16.mxu1 %v14631_v21  ;;  %v14719_v20 = vld [vmem:[%s21754_s1 + $0x840] ss:$16 sps:$4 sm:$0xff]   ;;  %v14722_v21 = vld [vmem:[%s21754_s1 + $0x848] ss:$16 sps:$4 sm:$0xff]  }
  0xd5   : > { %10308 = vmatpush1.bf16.msra.mxu0 %v14626_v22  ;;  %11383 = vmatpush1.bf16.msra.mxu1 %v14629_v23  ;;  %v14727_v22 = vld [vmem:[%s21754_s1 + $0x864] ss:$16 sps:$4 sm:$0xff]   ;;  %v14730_v23 = vld [vmem:[%s21754_s1 + $0x86c] ss:$16 sps:$4 sm:$0xff]  }
  0xd6   : > { %10309 = vmatprep.subr.bf16.mxu0 %v14634_v24  ;;  %11384 = vmatprep.subr.bf16.mxu1 %v14637_v25  ;;  %v14725_v24 = vld [vmem:[%s21754_s1 + $0x860] ss:$16 sps:$4 sm:$0xff]   ;;  %v14728_v25 = vld [vmem:[%s21754_s1 + $0x868] ss:$16 sps:$4 sm:$0xff]  }
  0xd9   : > { %10310 = vmatpush1.bf16.msra.mxu0 %v14632_v26  ;;  %11385 = vmatpush1.bf16.msra.mxu1 %v14635_v27  ;;  %v14733_v26 = vld [vmem:[%s21754_s1 + $0x884] ss:$16 sps:$4 sm:$0xff]   ;;  %v14736_v27 = vld [vmem:[%s21754_s1 + $0x88c] ss:$16 sps:$4 sm:$0xff]  }
  0xda   : > { %10311 = vmatprep.subr.bf16.mxu0 %v14640_v28  ;;  %11386 = vmatprep.subr.bf16.mxu1 %v14643_v29  ;;  %v14731_v28 = vld [vmem:[%s21754_s1 + $0x880] ss:$16 sps:$4 sm:$0xff]   ;;  %v14734_v29 = vld [vmem:[%s21754_s1 + $0x888] ss:$16 sps:$4 sm:$0xff]  }
  0xdd   : > { %10312 = vmatpush1.bf16.msra.mxu0 %v14638_v30  ;;  %11387 = vmatpush1.bf16.msra.mxu1 %v14641_v31  ;;  %v14739_v30 = vld [vmem:[%s21754_s1 + $0x8a4] ss:$16 sps:$4 sm:$0xff]   ;;  %v14742_v31 = vld [vmem:[%s21754_s1 + $0x8ac] ss:$16 sps:$4 sm:$0xff]  }
  0xde   : > { %10313 = vmatprep.subr.bf16.mxu0 %v14646_v32  ;;  %11388 = vmatprep.subr.bf16.mxu1 %v14649_v33  ;;  %v14737_v32 = vld [vmem:[%s21754_s1 + $0x8a0] ss:$16 sps:$4 sm:$0xff]   ;;  %v14740_v33 = vld [vmem:[%s21754_s1 + $0x8a8] ss:$16 sps:$4 sm:$0xff]  }
  0xe1   : > { %10314 = vmatpush1.bf16.msra.mxu0 %v14644_v34  ;;  %11389 = vmatpush1.bf16.msra.mxu1 %v14647_v35  ;;  %v14745_v34 = vld [vmem:[%s21754_s1 + $0x8c4] ss:$16 sps:$4 sm:$0xff]   ;;  %v14748_v35 = vld [vmem:[%s21754_s1 + $0x8cc] ss:$16 sps:$4 sm:$0xff]  }
  0xe2   : > { %10315 = vmatprep.subr.bf16.mxu0 %v14652_v36  ;;  %11390 = vmatprep.subr.bf16.mxu1 %v14655_v37  ;;  %v14743_v36 = vld [vmem:[%s21754_s1 + $0x8c0] ss:$16 sps:$4 sm:$0xff]   ;;  %v14746_v37 = vld [vmem:[%s21754_s1 + $0x8c8] ss:$16 sps:$4 sm:$0xff]  }
  0xe5   : > { %10316 = vmatpush1.bf16.msra.mxu0 %v14650_v38  ;;  %11391 = vmatpush1.bf16.msra.mxu1 %v14653_v39  ;;  %v14751_v38 = vld [vmem:[%s21754_s1 + $0x8e4] ss:$16 sps:$4 sm:$0xff]   ;;  %v14754_v39 = vld [vmem:[%s21754_s1 + $0x8ec] ss:$16 sps:$4 sm:$0xff]  }
  0xe6   : > { %10317 = vmatprep.subr.bf16.mxu0 %v14658_v40  ;;  %11392 = vmatprep.subr.bf16.mxu1 %v14661_v41  ;;  %v14749_v40 = vld [vmem:[%s21754_s1 + $0x8e0] ss:$16 sps:$4 sm:$0xff]   ;;  %v14752_v41 = vld [vmem:[%s21754_s1 + $0x8e8] ss:$16 sps:$4 sm:$0xff]  }
  0xe9   : > { %10318 = vmatpush1.bf16.msra.mxu0 %v14656_v42  ;;  %11393 = vmatpush1.bf16.msra.mxu1 %v14659_v43  ;;  %v14757_v42 = vld [vmem:[%s21754_s1 + $0x904] ss:$16 sps:$4 sm:$0xff]   ;;  %v14760_v43 = vld [vmem:[%s21754_s1 + $0x90c] ss:$16 sps:$4 sm:$0xff]  }
  0xea   : > { %10319 = vmatprep.subr.bf16.mxu0 %v14664_v44  ;;  %11394 = vmatprep.subr.bf16.mxu1 %v14667_v45  ;;  %v14755_v44 = vld [vmem:[%s21754_s1 + $0x900] ss:$16 sps:$4 sm:$0xff]   ;;  %v14758_v45 = vld [vmem:[%s21754_s1 + $0x908] ss:$16 sps:$4 sm:$0xff]  }
  0xed   : > { %10320 = vmatpush1.bf16.msra.mxu0 %v14662_v46  ;;  %11395 = vmatpush1.bf16.msra.mxu1 %v14665_v47  ;;  %v14763_v46 = vld [vmem:[%s21754_s1 + $0x924] ss:$16 sps:$4 sm:$0xff]   ;;  %v14766_v47 = vld [vmem:[%s21754_s1 + $0x92c] ss:$16 sps:$4 sm:$0xff]  }
  0xee   : > { %10321 = vmatprep.subr.bf16.mxu0 %v14670_v48  ;;  %11396 = vmatprep.subr.bf16.mxu1 %v14673_v49  ;;  %v14761_v48 = vld [vmem:[%s21754_s1 + $0x920] ss:$16 sps:$4 sm:$0xff]   ;;  %v14764_v49 = vld [vmem:[%s21754_s1 + $0x928] ss:$16 sps:$4 sm:$0xff]  }
  0xf1   : > { %10322 = vmatpush1.bf16.msra.mxu0 %v14668_v50  ;;  %11397 = vmatpush1.bf16.msra.mxu1 %v14671_v51  ;;  %v14769_v50 = vld [vmem:[%s21754_s1 + $0x944] ss:$16 sps:$4 sm:$0xff]   ;;  %v14772_v51 = vld [vmem:[%s21754_s1 + $0x94c] ss:$16 sps:$4 sm:$0xff]  }
  0xf2   : > { %10323 = vmatprep.subr.bf16.mxu0 %v14676_v52  ;;  %11398 = vmatprep.subr.bf16.mxu1 %v14679_v53  ;;  %v14767_v52 = vld [vmem:[%s21754_s1 + $0x940] ss:$16 sps:$4 sm:$0xff]   ;;  %v14770_v53 = vld [vmem:[%s21754_s1 + $0x948] ss:$16 sps:$4 sm:$0xff]  }
  0xf5   : > { %10324 = vmatpush1.bf16.msra.mxu0 %v14674_v54  ;;  %11399 = vmatpush1.bf16.msra.mxu1 %v14677_v55  ;;  %v14775_v54 = vld [vmem:[%s21754_s1 + $0x964] ss:$16 sps:$4 sm:$0xff]   ;;  %v14778_v55 = vld [vmem:[%s21754_s1 + $0x96c] ss:$16 sps:$4 sm:$0xff]  }
  0xf6   : > { %10325 = vmatprep.subr.bf16.mxu0 %v14682_v56  ;;  %11400 = vmatprep.subr.bf16.mxu1 %v14685_v57  ;;  %v14773_v56 = vld [vmem:[%s21754_s1 + $0x960] ss:$16 sps:$4 sm:$0xff]   ;;  %v14776_v57 = vld [vmem:[%s21754_s1 + $0x968] ss:$16 sps:$4 sm:$0xff]  }
  0xf9   : > { %10326 = vmatpush1.bf16.msra.mxu0 %v14680_v58  ;;  %11401 = vmatpush1.bf16.msra.mxu1 %v14683_v59  ;;  %v14781_v58 = vld [vmem:[%s21754_s1 + $0x984] ss:$16 sps:$4 sm:$0xff]   ;;  %v14784_v59 = vld [vmem:[%s21754_s1 + $0x98c] ss:$16 sps:$4 sm:$0xff]  }
  0xfa   : > { %10327 = vmatprep.subr.bf16.mxu0 %v14688_v60  ;;  %11402 = vmatprep.subr.bf16.mxu1 %v14691_v61  ;;  %v14779_v60 = vld [vmem:[%s21754_s1 + $0x980] ss:$16 sps:$4 sm:$0xff]   ;;  %v14782_v61 = vld [vmem:[%s21754_s1 + $0x988] ss:$16 sps:$4 sm:$0xff]  }
  0xfd   : > { %10328 = vmatpush1.bf16.msra.mxu0 %v14686_v62  ;;  %11403 = vmatpush1.bf16.msra.mxu1 %v14689_v63  ;;  %v14787_v62 = vld [vmem:[%s21754_s1 + $0x9a4] ss:$16 sps:$4 sm:$0xff]   ;;  %v14790_v63 = vld [vmem:[%s21754_s1 + $0x9ac] ss:$16 sps:$4 sm:$0xff]  }
  0xfe   : > { %10329 = vmatprep.subr.bf16.mxu0 %v14694_v0  ;;  %11404 = vmatprep.subr.bf16.mxu1 %v14697_v1  ;;  %v14785_v0 = vld [vmem:[%s21754_s1 + $0x9a0] ss:$16 sps:$4 sm:$0xff]   ;;  %v14788_v1 = vld [vmem:[%s21754_s1 + $0x9a8] ss:$16 sps:$4 sm:$0xff]  }
 0x101   : > { %10330 = vmatpush1.bf16.msra.mxu0 %v14692_v2  ;;  %11405 = vmatpush1.bf16.msra.mxu1 %v14695_v3  ;;  %v14793_v2 = vld [vmem:[%s21754_s1 + $0x9c4] ss:$16 sps:$4 sm:$0xff]   ;;  %v14796_v3 = vld [vmem:[%s21754_s1 + $0x9cc] ss:$16 sps:$4 sm:$0xff]  }
 0x102   : > { %10331 = vmatprep.subr.bf16.mxu0 %v14700_v4  ;;  %11406 = vmatprep.subr.bf16.mxu1 %v14703_v5  ;;  %v14791_v4 = vld [vmem:[%s21754_s1 + $0x9c0] ss:$16 sps:$4 sm:$0xff]   ;;  %v14794_v5 = vld [vmem:[%s21754_s1 + $0x9c8] ss:$16 sps:$4 sm:$0xff]  }
 0x105   : > { %10332 = vmatpush1.bf16.msra.mxu0 %v14698_v6  ;;  %11407 = vmatpush1.bf16.msra.mxu1 %v14701_v7  ;;  %v14799_v6 = vld [vmem:[%s21754_s1 + $0x9e4] ss:$16 sps:$4 sm:$0xff]   ;;  %v14802_v7 = vld [vmem:[%s21754_s1 + $0x9ec] ss:$16 sps:$4 sm:$0xff]  }
 0x106   : > { %10344 = vmatprep.subr.bf16.mxu0 %v14709_v8  ;;  %11419 = vmatprep.subr.bf16.mxu1 %v14712_v9  ;;  %v14797_v8 = vld [vmem:[%s21754_s1 + $0x9e0] ss:$16 sps:$4 sm:$0xff]   ;;  %v14800_v9 = vld [vmem:[%s21754_s1 + $0x9e8] ss:$16 sps:$4 sm:$0xff]  }
 0x108   : > { %10334 = vmatmul.mubr.bf16.vlgmr.msra.gmra.mrb[0].mxu0 %v14704_v10  ;;  %11409 = vmatmul.mubr.bf16.vlgmr.msra.gmra.mrb[0].mxu1 %v14704_v10  ;;  %v14803_v10 = vld [vmem:[%s16986_s26 + $0x20] ss:$200 sps:$4 sm:$0xff]  }
 0x109   : > { %10345 = vmatpush1.bf16.msra.mxu0 %v14707_v11  ;;  %11420 = vmatpush1.bf16.msra.mxu1 %v14710_v12  ;;  %v14808_v11 = vld [vmem:[%s21754_s1 + $0xa04] ss:$16 sps:$4 sm:$0xff]   ;;  %v14811_v12 = vld [vmem:[%s21754_s1 + $0xa0c] ss:$16 sps:$4 sm:$0xff]  }
 0x10a   : > { %10346 = vmatprep.subr.bf16.mxu0 %v14715_v13  ;;  %11421 = vmatprep.subr.bf16.mxu1 %v14718_v14  ;;  %v14806_v13 = vld [vmem:[%s21754_s1 + $0xa00] ss:$16 sps:$4 sm:$0xff]   ;;  %v14809_v14 = vld [vmem:[%s21754_s1 + $0xa08] ss:$16 sps:$4 sm:$0xff]  }
 0x10b   : > { %10376 = vmatprep.mubr.bf16.mxu0 %v14805_v15  ;;  %11451 = vmatprep.mubr.bf16.mxu1 %v14805_v15  ;;  %v14814_v15 = vld [vmem:[%s21754_s1 + $0xa24] ss:$16 sps:$4 sm:$0xff]  }
 0x10d   : > { %10347 = vmatpush1.bf16.msra.mxu0 %v14713_v16  ;;  %11422 = vmatpush1.bf16.msra.mxu1 %v14716_v17  ;;  %v14817_v16 = vld [vmem:[%s21754_s1 + $0xa2c] ss:$16 sps:$4 sm:$0xff]  }
 0x10e   : > { %10348 = vmatprep.subr.bf16.mxu0 %v14721_v18  ;;  %11423 = vmatprep.subr.bf16.mxu1 %v14724_v19  ;;  %v14904_v17 = vld [vmem:[%s16986_s26 + $0x2c] ss:$200 sps:$4 sm:$0xff]   ;;  %v14812_v18 = vld [vmem:[%s21754_s1 + $0xa20] ss:$16 sps:$4 sm:$0xff]   ;;  %v14815_v19 = vld [vmem:[%s21754_s1 + $0xa28] ss:$16 sps:$4 sm:$0xff]  }
 0x111   : > { %10349 = vmatpush1.bf16.msra.mxu0 %v14719_v20  ;;  %11424 = vmatpush1.bf16.msra.mxu1 %v14722_v21  ;;  %v14820_v20 = vld [vmem:[%s21754_s1 + $0xa44] ss:$16 sps:$4 sm:$0xff]   ;;  %v14823_v21 = vld [vmem:[%s21754_s1 + $0xa4c] ss:$16 sps:$4 sm:$0xff]  }
 0x112   : > { %10350 = vmatprep.subr.bf16.mxu0 %v14727_v22  ;;  %11425 = vmatprep.subr.bf16.mxu1 %v14730_v23  ;;  %v14818_v22 = vld [vmem:[%s21754_s1 + $0xa40] ss:$16 sps:$4 sm:$0xff]   ;;  %v14821_v23 = vld [vmem:[%s21754_s1 + $0xa48] ss:$16 sps:$4 sm:$0xff]  }
 0x115   : > { %10351 = vmatpush1.bf16.msra.mxu0 %v14725_v24  ;;  %11426 = vmatpush1.bf16.msra.mxu1 %v14728_v25  ;;  %v14826_v24 = vld [vmem:[%s21754_s1 + $0xa64] ss:$16 sps:$4 sm:$0xff]   ;;  %v14829_v25 = vld [vmem:[%s21754_s1 + $0xa6c] ss:$16 sps:$4 sm:$0xff]  }
 0x116   : > { %10352 = vmatprep.subr.bf16.mxu0 %v14733_v26  ;;  %11427 = vmatprep.subr.bf16.mxu1 %v14736_v27  ;;  %v14824_v26 = vld [vmem:[%s21754_s1 + $0xa60] ss:$16 sps:$4 sm:$0xff]   ;;  %v14827_v27 = vld [vmem:[%s21754_s1 + $0xa68] ss:$16 sps:$4 sm:$0xff]  }
 0x119   : > { %10353 = vmatpush1.bf16.msra.mxu0 %v14731_v28  ;;  %11428 = vmatpush1.bf16.msra.mxu1 %v14734_v29  ;;  %v14832_v28 = vld [vmem:[%s21754_s1 + $0xa84] ss:$16 sps:$4 sm:$0xff]   ;;  %v14835_v29 = vld [vmem:[%s21754_s1 + $0xa8c] ss:$16 sps:$4 sm:$0xff]  }
 0x11a   : > { %10354 = vmatprep.subr.bf16.mxu0 %v14739_v30  ;;  %11429 = vmatprep.subr.bf16.mxu1 %v14742_v31  ;;  %v14830_v30 = vld [vmem:[%s21754_s1 + $0xa80] ss:$16 sps:$4 sm:$0xff]   ;;  %v14833_v31 = vld [vmem:[%s21754_s1 + $0xa88] ss:$16 sps:$4 sm:$0xff]  }
 0x11d   : > { %10355 = vmatpush1.bf16.msra.mxu0 %v14737_v32  ;;  %11430 = vmatpush1.bf16.msra.mxu1 %v14740_v33  ;;  %v14838_v32 = vld [vmem:[%s21754_s1 + $0xaa4] ss:$16 sps:$4 sm:$0xff]   ;;  %v14841_v33 = vld [vmem:[%s21754_s1 + $0xaac] ss:$16 sps:$4 sm:$0xff]  }
 0x11e   : > { %10356 = vmatprep.subr.bf16.mxu0 %v14745_v34  ;;  %11431 = vmatprep.subr.bf16.mxu1 %v14748_v35  ;;  %v14836_v34 = vld [vmem:[%s21754_s1 + $0xaa0] ss:$16 sps:$4 sm:$0xff]   ;;  %v14839_v35 = vld [vmem:[%s21754_s1 + $0xaa8] ss:$16 sps:$4 sm:$0xff]  }
 0x121   : > { %10357 = vmatpush1.bf16.msra.mxu0 %v14743_v36  ;;  %11432 = vmatpush1.bf16.msra.mxu1 %v14746_v37  ;;  %v14844_v36 = vld [vmem:[%s21754_s1 + $0xac4] ss:$16 sps:$4 sm:$0xff]   ;;  %v14847_v37 = vld [vmem:[%s21754_s1 + $0xacc] ss:$16 sps:$4 sm:$0xff]  }
 0x122   : > { %10358 = vmatprep.subr.bf16.mxu0 %v14751_v38  ;;  %11433 = vmatprep.subr.bf16.mxu1 %v14754_v39  ;;  %v14842_v38 = vld [vmem:[%s21754_s1 + $0xac0] ss:$16 sps:$4 sm:$0xff]   ;;  %v14845_v39 = vld [vmem:[%s21754_s1 + $0xac8] ss:$16 sps:$4 sm:$0xff]  }
 0x125   : > { %10359 = vmatpush1.bf16.msra.mxu0 %v14749_v40  ;;  %11434 = vmatpush1.bf16.msra.mxu1 %v14752_v41  ;;  %v14850_v40 = vld [vmem:[%s21754_s1 + $0xae4] ss:$16 sps:$4 sm:$0xff]   ;;  %v14853_v41 = vld [vmem:[%s21754_s1 + $0xaec] ss:$16 sps:$4 sm:$0xff]  }
 0x126   : > { %10360 = vmatprep.subr.bf16.mxu0 %v14757_v42  ;;  %11435 = vmatprep.subr.bf16.mxu1 %v14760_v43  ;;  %v14848_v42 = vld [vmem:[%s21754_s1 + $0xae0] ss:$16 sps:$4 sm:$0xff]   ;;  %v14851_v43 = vld [vmem:[%s21754_s1 + $0xae8] ss:$16 sps:$4 sm:$0xff]  }
 0x129   : > { %10361 = vmatpush1.bf16.msra.mxu0 %v14755_v44  ;;  %11436 = vmatpush1.bf16.msra.mxu1 %v14758_v45  ;;  %v14856_v44 = vld [vmem:[%s21754_s1 + $0xb04] ss:$16 sps:$4 sm:$0xff]   ;;  %v14859_v45 = vld [vmem:[%s21754_s1 + $0xb0c] ss:$16 sps:$4 sm:$0xff]  }
 0x12a   : > { %10362 = vmatprep.subr.bf16.mxu0 %v14763_v46  ;;  %11437 = vmatprep.subr.bf16.mxu1 %v14766_v47  ;;  %v14854_v46 = vld [vmem:[%s21754_s1 + $0xb00] ss:$16 sps:$4 sm:$0xff]   ;;  %v14857_v47 = vld [vmem:[%s21754_s1 + $0xb08] ss:$16 sps:$4 sm:$0xff]  }
 0x12d   : > { %10363 = vmatpush1.bf16.msra.mxu0 %v14761_v48  ;;  %11438 = vmatpush1.bf16.msra.mxu1 %v14764_v49  ;;  %v14862_v48 = vld [vmem:[%s21754_s1 + $0xb24] ss:$16 sps:$4 sm:$0xff]   ;;  %v14865_v49 = vld [vmem:[%s21754_s1 + $0xb2c] ss:$16 sps:$4 sm:$0xff]  }
 0x12e   : > { %10364 = vmatprep.subr.bf16.mxu0 %v14769_v50  ;;  %11439 = vmatprep.subr.bf16.mxu1 %v14772_v51  ;;  %v14860_v50 = vld [vmem:[%s21754_s1 + $0xb20] ss:$16 sps:$4 sm:$0xff]   ;;  %v14863_v51 = vld [vmem:[%s21754_s1 + $0xb28] ss:$16 sps:$4 sm:$0xff]  }
 0x131   : > { %10365 = vmatpush1.bf16.msra.mxu0 %v14767_v52  ;;  %11440 = vmatpush1.bf16.msra.mxu1 %v14770_v53  ;;  %v14868_v52 = vld [vmem:[%s21754_s1 + $0xb44] ss:$16 sps:$4 sm:$0xff]   ;;  %v14871_v53 = vld [vmem:[%s21754_s1 + $0xb4c] ss:$16 sps:$4 sm:$0xff]  }
 0x132   : > { %10366 = vmatprep.subr.bf16.mxu0 %v14775_v54  ;;  %11441 = vmatprep.subr.bf16.mxu1 %v14778_v55  ;;  %v14866_v54 = vld [vmem:[%s21754_s1 + $0xb40] ss:$16 sps:$4 sm:$0xff]   ;;  %v14869_v55 = vld [vmem:[%s21754_s1 + $0xb48] ss:$16 sps:$4 sm:$0xff]  }
 0x135   : > { %10367 = vmatpush1.bf16.msra.mxu0 %v14773_v56  ;;  %11442 = vmatpush1.bf16.msra.mxu1 %v14776_v57  ;;  %v14874_v56 = vld [vmem:[%s21754_s1 + $0xb64] ss:$16 sps:$4 sm:$0xff]   ;;  %v14877_v57 = vld [vmem:[%s21754_s1 + $0xb6c] ss:$16 sps:$4 sm:$0xff]  }
 0x136   : > { %10368 = vmatprep.subr.bf16.mxu0 %v14781_v58  ;;  %11443 = vmatprep.subr.bf16.mxu1 %v14784_v59  ;;  %v14872_v58 = vld [vmem:[%s21754_s1 + $0xb60] ss:$16 sps:$4 sm:$0xff]   ;;  %v14875_v59 = vld [vmem:[%s21754_s1 + $0xb68] ss:$16 sps:$4 sm:$0xff]  }
 0x139   : > { %10369 = vmatpush1.bf16.msra.mxu0 %v14779_v60  ;;  %11444 = vmatpush1.bf16.msra.mxu1 %v14782_v61  ;;  %v14880_v60 = vld [vmem:[%s21754_s1 + $0xb84] ss:$16 sps:$4 sm:$0xff]   ;;  %v14883_v61 = vld [vmem:[%s21754_s1 + $0xb8c] ss:$16 sps:$4 sm:$0xff]  }
 0x13a   : > { %10370 = vmatprep.subr.bf16.mxu0 %v14787_v62  ;;  %11445 = vmatprep.subr.bf16.mxu1 %v14790_v63  ;;  %v14878_v62 = vld [vmem:[%s21754_s1 + $0xb80] ss:$16 sps:$4 sm:$0xff]   ;;  %v14881_v63 = vld [vmem:[%s21754_s1 + $0xb88] ss:$16 sps:$4 sm:$0xff]  }
 0x13d   : > { %10371 = vmatpush1.bf16.msra.mxu0 %v14785_v0  ;;  %11446 = vmatpush1.bf16.msra.mxu1 %v14788_v1  ;;  %v14886_v0 = vld [vmem:[%s21754_s1 + $0xba4] ss:$16 sps:$4 sm:$0xff]   ;;  %v14889_v1 = vld [vmem:[%s21754_s1 + $0xbac] ss:$16 sps:$4 sm:$0xff]  }
 0x13e   : > { %10372 = vmatprep.subr.bf16.mxu0 %v14793_v2  ;;  %11447 = vmatprep.subr.bf16.mxu1 %v14796_v3  ;;  %v14884_v2 = vld [vmem:[%s21754_s1 + $0xba0] ss:$16 sps:$4 sm:$0xff]   ;;  %v14887_v3 = vld [vmem:[%s21754_s1 + $0xba8] ss:$16 sps:$4 sm:$0xff]  }
 0x141   : > { %10373 = vmatpush1.bf16.msra.mxu0 %v14791_v4  ;;  %11448 = vmatpush1.bf16.msra.mxu1 %v14794_v5  ;;  %v14892_v4 = vld [vmem:[%s21754_s1 + $0xbc4] ss:$16 sps:$4 sm:$0xff]   ;;  %v14895_v5 = vld [vmem:[%s21754_s1 + $0xbcc] ss:$16 sps:$4 sm:$0xff]  }
 0x142   : > { %10374 = vmatprep.subr.bf16.mxu0 %v14799_v6  ;;  %11449 = vmatprep.subr.bf16.mxu1 %v14802_v7  ;;  %v14890_v6 = vld [vmem:[%s21754_s1 + $0xbc0] ss:$16 sps:$4 sm:$0xff]   ;;  %v14893_v7 = vld [vmem:[%s21754_s1 + $0xbc8] ss:$16 sps:$4 sm:$0xff]  }
 0x145   : > { %10375 = vmatpush1.bf16.msra.mxu0 %v14797_v8  ;;  %11450 = vmatpush1.bf16.msra.mxu1 %v14800_v9  ;;  %v14898_v8 = vld [vmem:[%s21754_s1 + $0xbe4] ss:$16 sps:$4 sm:$0xff]   ;;  %v14901_v9 = vld [vmem:[%s21754_s1 + $0xbec] ss:$16 sps:$4 sm:$0xff]  }
 0x146   : > { %10387 = vmatprep.subr.bf16.mxu0 %v14808_v11  ;;  %11462 = vmatprep.subr.bf16.mxu1 %v14811_v12  ;;  %v14899_v11 = vld [vmem:[%s21754_s1 + $0xbe8] ss:$16 sps:$4 sm:$0xff]  }
 0x147   : > { %v14902_v12 = vld [vmem:[%s16986_s26 + $0x28] ss:$200 sps:$4 sm:$0xff]  }
 0x148   : > { %10377 = vmatmul.mubr.bf16.vlgmr.msra.gmra.mrb[0].mxu0 %v14803_v10  ;;  %11452 = vmatmul.mubr.bf16.vlgmr.msra.gmra.mrb[0].mxu1 %v14803_v10  ;;  %v14896_v10 = vld [vmem:[%s21754_s1 + $0xbe0] ss:$16 sps:$4 sm:$0xff]  }
 0x149   : > { %10388 = vmatpush1.bf16.msra.mxu0 %v14806_v13  ;;  %11463 = vmatpush1.bf16.msra.mxu1 %v14809_v14  ;;  %v14907_v13 = vld [vmem:[%s21754_s1 + $0xc04] ss:$16 sps:$4 sm:$0xff]   ;;  %v14910_v14 = vld [vmem:[%s21754_s1 + $0xc0c] ss:$16 sps:$4 sm:$0xff]  }
 0x14a   : > { %10389 = vmatprep.subr.bf16.mxu0 %v14814_v15  ;;  %11464 = vmatprep.subr.bf16.mxu1 %v14817_v16  ;;  %v14905_v15 = vld [vmem:[%s21754_s1 + $0xc00] ss:$16 sps:$4 sm:$0xff]   ;;  %v14908_v16 = vld [vmem:[%s21754_s1 + $0xc08] ss:$16 sps:$4 sm:$0xff]  }
 0x14b   : > { %10419 = vmatprep.mubr.bf16.mxu0 %v14904_v17  ;;  %11494 = vmatprep.mubr.bf16.mxu1 %v14904_v17  ;;  %v14913_v17 = vld [vmem:[%s21754_s1 + $0xc24] ss:$16 sps:$4 sm:$0xff]  }
 0x14d   : > { %10390 = vmatpush1.bf16.msra.mxu0 %v14812_v18  ;;  %11465 = vmatpush1.bf16.msra.mxu1 %v14815_v19  ;;  %v14916_v18 = vld [vmem:[%s21754_s1 + $0xc2c] ss:$16 sps:$4 sm:$0xff]  }
 0x14e   : > { %10391 = vmatprep.subr.bf16.mxu0 %v14820_v20  ;;  %11466 = vmatprep.subr.bf16.mxu1 %v14823_v21  ;;  %v15003_v19 = vld [vmem:[%s16986_s26 + $0x34] ss:$200 sps:$4 sm:$0xff]   ;;  %v14911_v20 = vld [vmem:[%s21754_s1 + $0xc20] ss:$16 sps:$4 sm:$0xff]   ;;  %v14914_v21 = vld [vmem:[%s21754_s1 + $0xc28] ss:$16 sps:$4 sm:$0xff]  }
 0x151   : > { %10392 = vmatpush1.bf16.msra.mxu0 %v14818_v22  ;;  %11467 = vmatpush1.bf16.msra.mxu1 %v14821_v23  ;;  %v14919_v22 = vld [vmem:[%s21754_s1 + $0xc44] ss:$16 sps:$4 sm:$0xff]   ;;  %v14922_v23 = vld [vmem:[%s21754_s1 + $0xc4c] ss:$16 sps:$4 sm:$0xff]  }
 0x152   : > { %10393 = vmatprep.subr.bf16.mxu0 %v14826_v24  ;;  %11468 = vmatprep.subr.bf16.mxu1 %v14829_v25  ;;  %v14917_v24 = vld [vmem:[%s21754_s1 + $0xc40] ss:$16 sps:$4 sm:$0xff]   ;;  %v14920_v25 = vld [vmem:[%s21754_s1 + $0xc48] ss:$16 sps:$4 sm:$0xff]  }
 0x155   : > { %10394 = vmatpush1.bf16.msra.mxu0 %v14824_v26  ;;  %11469 = vmatpush1.bf16.msra.mxu1 %v14827_v27  ;;  %v14925_v26 = vld [vmem:[%s21754_s1 + $0xc64] ss:$16 sps:$4 sm:$0xff]   ;;  %v14928_v27 = vld [vmem:[%s21754_s1 + $0xc6c] ss:$16 sps:$4 sm:$0xff]  }
 0x156   : > { %10395 = vmatprep.subr.bf16.mxu0 %v14832_v28  ;;  %11470 = vmatprep.subr.bf16.mxu1 %v14835_v29  ;;  %v14923_v28 = vld [vmem:[%s21754_s1 + $0xc60] ss:$16 sps:$4 sm:$0xff]   ;;  %v14926_v29 = vld [vmem:[%s21754_s1 + $0xc68] ss:$16 sps:$4 sm:$0xff]  }
 0x159   : > { %10396 = vmatpush1.bf16.msra.mxu0 %v14830_v30  ;;  %11471 = vmatpush1.bf16.msra.mxu1 %v14833_v31  ;;  %v14931_v30 = vld [vmem:[%s21754_s1 + $0xc84] ss:$16 sps:$4 sm:$0xff]   ;;  %v14934_v31 = vld [vmem:[%s21754_s1 + $0xc8c] ss:$16 sps:$4 sm:$0xff]  }
 0x15a   : > { %10397 = vmatprep.subr.bf16.mxu0 %v14838_v32  ;;  %11472 = vmatprep.subr.bf16.mxu1 %v14841_v33  ;;  %v14929_v32 = vld [vmem:[%s21754_s1 + $0xc80] ss:$16 sps:$4 sm:$0xff]   ;;  %v14932_v33 = vld [vmem:[%s21754_s1 + $0xc88] ss:$16 sps:$4 sm:$0xff]  }
 0x15d   : > { %10398 = vmatpush1.bf16.msra.mxu0 %v14836_v34  ;;  %11473 = vmatpush1.bf16.msra.mxu1 %v14839_v35  ;;  %v14937_v34 = vld [vmem:[%s21754_s1 + $0xca4] ss:$16 sps:$4 sm:$0xff]   ;;  %v14940_v35 = vld [vmem:[%s21754_s1 + $0xcac] ss:$16 sps:$4 sm:$0xff]  }
 0x15e   : > { %10399 = vmatprep.subr.bf16.mxu0 %v14844_v36  ;;  %11474 = vmatprep.subr.bf16.mxu1 %v14847_v37  ;;  %v14935_v36 = vld [vmem:[%s21754_s1 + $0xca0] ss:$16 sps:$4 sm:$0xff]   ;;  %v14938_v37 = vld [vmem:[%s21754_s1 + $0xca8] ss:$16 sps:$4 sm:$0xff]  }
 0x161   : > { %10400 = vmatpush1.bf16.msra.mxu0 %v14842_v38  ;;  %11475 = vmatpush1.bf16.msra.mxu1 %v14845_v39  ;;  %v14943_v38 = vld [vmem:[%s21754_s1 + $0xcc4] ss:$16 sps:$4 sm:$0xff]   ;;  %v14946_v39 = vld [vmem:[%s21754_s1 + $0xccc] ss:$16 sps:$4 sm:$0xff]  }
 0x162   : > { %10401 = vmatprep.subr.bf16.mxu0 %v14850_v40  ;;  %11476 = vmatprep.subr.bf16.mxu1 %v14853_v41  ;;  %v14941_v40 = vld [vmem:[%s21754_s1 + $0xcc0] ss:$16 sps:$4 sm:$0xff]   ;;  %v14944_v41 = vld [vmem:[%s21754_s1 + $0xcc8] ss:$16 sps:$4 sm:$0xff]  }
 0x165   : > { %10402 = vmatpush1.bf16.msra.mxu0 %v14848_v42  ;;  %11477 = vmatpush1.bf16.msra.mxu1 %v14851_v43  ;;  %v14949_v42 = vld [vmem:[%s21754_s1 + $0xce4] ss:$16 sps:$4 sm:$0xff]   ;;  %v14952_v43 = vld [vmem:[%s21754_s1 + $0xcec] ss:$16 sps:$4 sm:$0xff]  }
 0x166   : > { %10403 = vmatprep.subr.bf16.mxu0 %v14856_v44  ;;  %11478 = vmatprep.subr.bf16.mxu1 %v14859_v45  ;;  %v14947_v44 = vld [vmem:[%s21754_s1 + $0xce0] ss:$16 sps:$4 sm:$0xff]   ;;  %v14950_v45 = vld [vmem:[%s21754_s1 + $0xce8] ss:$16 sps:$4 sm:$0xff]  }
 0x169   : > { %10404 = vmatpush1.bf16.msra.mxu0 %v14854_v46  ;;  %11479 = vmatpush1.bf16.msra.mxu1 %v14857_v47  ;;  %v14955_v46 = vld [vmem:[%s21754_s1 + $0xd04] ss:$16 sps:$4 sm:$0xff]   ;;  %v14958_v47 = vld [vmem:[%s21754_s1 + $0xd0c] ss:$16 sps:$4 sm:$0xff]  }
 0x16a   : > { %10405 = vmatprep.subr.bf16.mxu0 %v14862_v48  ;;  %11480 = vmatprep.subr.bf16.mxu1 %v14865_v49  ;;  %v14953_v48 = vld [vmem:[%s21754_s1 + $0xd00] ss:$16 sps:$4 sm:$0xff]   ;;  %v14956_v49 = vld [vmem:[%s21754_s1 + $0xd08] ss:$16 sps:$4 sm:$0xff]  }
 0x16d   : > { %10406 = vmatpush1.bf16.msra.mxu0 %v14860_v50  ;;  %11481 = vmatpush1.bf16.msra.mxu1 %v14863_v51  ;;  %v14961_v50 = vld [vmem:[%s21754_s1 + $0xd24] ss:$16 sps:$4 sm:$0xff]   ;;  %v14964_v51 = vld [vmem:[%s21754_s1 + $0xd2c] ss:$16 sps:$4 sm:$0xff]  }
 0x16e   : > { %10407 = vmatprep.subr.bf16.mxu0 %v14868_v52  ;;  %11482 = vmatprep.subr.bf16.mxu1 %v14871_v53  ;;  %v14959_v52 = vld [vmem:[%s21754_s1 + $0xd20] ss:$16 sps:$4 sm:$0xff]   ;;  %v14962_v53 = vld [vmem:[%s21754_s1 + $0xd28] ss:$16 sps:$4 sm:$0xff]  }
 0x171   : > { %10408 = vmatpush1.bf16.msra.mxu0 %v14866_v54  ;;  %11483 = vmatpush1.bf16.msra.mxu1 %v14869_v55  ;;  %v14967_v54 = vld [vmem:[%s21754_s1 + $0xd44] ss:$16 sps:$4 sm:$0xff]   ;;  %v14970_v55 = vld [vmem:[%s21754_s1 + $0xd4c] ss:$16 sps:$4 sm:$0xff]  }
 0x172   : > { %10409 = vmatprep.subr.bf16.mxu0 %v14874_v56  ;;  %11484 = vmatprep.subr.bf16.mxu1 %v14877_v57  ;;  %v14965_v56 = vld [vmem:[%s21754_s1 + $0xd40] ss:$16 sps:$4 sm:$0xff]   ;;  %v14968_v57 = vld [vmem:[%s21754_s1 + $0xd48] ss:$16 sps:$4 sm:$0xff]  }
 0x175   : > { %10410 = vmatpush1.bf16.msra.mxu0 %v14872_v58  ;;  %11485 = vmatpush1.bf16.msra.mxu1 %v14875_v59  ;;  %v14973_v58 = vld [vmem:[%s21754_s1 + $0xd64] ss:$16 sps:$4 sm:$0xff]   ;;  %v14976_v59 = vld [vmem:[%s21754_s1 + $0xd6c] ss:$16 sps:$4 sm:$0xff]  }
 0x176   : > { %10411 = vmatprep.subr.bf16.mxu0 %v14880_v60  ;;  %11486 = vmatprep.subr.bf16.mxu1 %v14883_v61  ;;  %v14971_v60 = vld [vmem:[%s21754_s1 + $0xd60] ss:$16 sps:$4 sm:$0xff]   ;;  %v14974_v61 = vld [vmem:[%s21754_s1 + $0xd68] ss:$16 sps:$4 sm:$0xff]  }
 0x179   : > { %10412 = vmatpush1.bf16.msra.mxu0 %v14878_v62  ;;  %11487 = vmatpush1.bf16.msra.mxu1 %v14881_v63  ;;  %v14979_v62 = vld [vmem:[%s21754_s1 + $0xd84] ss:$16 sps:$4 sm:$0xff]   ;;  %v14982_v63 = vld [vmem:[%s21754_s1 + $0xd8c] ss:$16 sps:$4 sm:$0xff]  }
 0x17a   : > { %10413 = vmatprep.subr.bf16.mxu0 %v14886_v0  ;;  %11488 = vmatprep.subr.bf16.mxu1 %v14889_v1  ;;  %v14977_v0 = vld [vmem:[%s21754_s1 + $0xd80] ss:$16 sps:$4 sm:$0xff]   ;;  %v14980_v1 = vld [vmem:[%s21754_s1 + $0xd88] ss:$16 sps:$4 sm:$0xff]  }
 0x17d   : > { %10414 = vmatpush1.bf16.msra.mxu0 %v14884_v2  ;;  %11489 = vmatpush1.bf16.msra.mxu1 %v14887_v3  ;;  %v14985_v2 = vld [vmem:[%s21754_s1 + $0xda4] ss:$16 sps:$4 sm:$0xff]   ;;  %v14988_v3 = vld [vmem:[%s21754_s1 + $0xdac] ss:$16 sps:$4 sm:$0xff]  }
 0x17e   : > { %10415 = vmatprep.subr.bf16.mxu0 %v14892_v4  ;;  %11490 = vmatprep.subr.bf16.mxu1 %v14895_v5  ;;  %v14983_v4 = vld [vmem:[%s21754_s1 + $0xda0] ss:$16 sps:$4 sm:$0xff]   ;;  %v14986_v5 = vld [vmem:[%s21754_s1 + $0xda8] ss:$16 sps:$4 sm:$0xff]  }
 0x181   : > { %10416 = vmatpush1.bf16.msra.mxu0 %v14890_v6  ;;  %11491 = vmatpush1.bf16.msra.mxu1 %v14893_v7  ;;  %v14991_v6 = vld [vmem:[%s21754_s1 + $0xdc4] ss:$16 sps:$4 sm:$0xff]   ;;  %v14994_v7 = vld [vmem:[%s21754_s1 + $0xdcc] ss:$16 sps:$4 sm:$0xff]  }
 0x182   : > { %10417 = vmatprep.subr.bf16.mxu0 %v14898_v8  ;;  %11492 = vmatprep.subr.bf16.mxu1 %v14901_v9  ;;  %v14989_v8 = vld [vmem:[%s21754_s1 + $0xdc0] ss:$16 sps:$4 sm:$0xff]   ;;  %v14992_v9 = vld [vmem:[%s21754_s1 + $0xdc8] ss:$16 sps:$4 sm:$0xff]  }
 0x185   : > { %10418 = vmatpush1.bf16.msra.mxu0 %v14896_v10  ;;  %11493 = vmatpush1.bf16.msra.mxu1 %v14899_v11  ;;  %v14997_v10 = vld [vmem:[%s21754_s1 + $0xde4] ss:$16 sps:$4 sm:$0xff]   ;;  %v15000_v11 = vld [vmem:[%s21754_s1 + $0xdec] ss:$16 sps:$4 sm:$0xff]  }
 0x186   : > { %10430 = vmatprep.subr.bf16.mxu0 %v14907_v13  ;;  %11505 = vmatprep.subr.bf16.mxu1 %v14910_v14  ;;  %v14998_v13 = vld [vmem:[%s21754_s1 + $0xde8] ss:$16 sps:$4 sm:$0xff]  }
 0x187   : > { %v15001_v14 = vld [vmem:[%s16986_s26 + $0x30] ss:$200 sps:$4 sm:$0xff]  }
 0x188   : > { %10420 = vmatmul.mubr.bf16.vlgmr.msra.gmra.mrb[0].mxu0 %v14902_v12  ;;  %11495 = vmatmul.mubr.bf16.vlgmr.msra.gmra.mrb[0].mxu1 %v14902_v12  ;;  %v14995_v12 = vld [vmem:[%s21754_s1 + $0xde0] ss:$16 sps:$4 sm:$0xff]  }
 0x189   : > { %10431 = vmatpush1.bf16.msra.mxu0 %v14905_v15  ;;  %11506 = vmatpush1.bf16.msra.mxu1 %v14908_v16  ;;  %v15006_v15 = vld [vmem:[%s21754_s1 + $0xe04] ss:$16 sps:$4 sm:$0xff]   ;;  %v15009_v16 = vld [vmem:[%s21754_s1 + $0xe0c] ss:$16 sps:$4 sm:$0xff]  }
 0x18a   : > { %10432 = vmatprep.subr.bf16.mxu0 %v14913_v17  ;;  %11507 = vmatprep.subr.bf16.mxu1 %v14916_v18  ;;  %v15004_v17 = vld [vmem:[%s21754_s1 + $0xe00] ss:$16 sps:$4 sm:$0xff]   ;;  %v15007_v18 = vld [vmem:[%s21754_s1 + $0xe08] ss:$16 sps:$4 sm:$0xff]  }
 0x18b   : > { %10462 = vmatprep.mubr.bf16.mxu0 %v15003_v19  ;;  %11537 = vmatprep.mubr.bf16.mxu1 %v15003_v19  ;;  %v15012_v19 = vld [vmem:[%s21754_s1 + $0xe24] ss:$16 sps:$4 sm:$0xff]  }
 0x18d   : > { %10433 = vmatpush1.bf16.msra.mxu0 %v14911_v20  ;;  %11508 = vmatpush1.bf16.msra.mxu1 %v14914_v21  ;;  %v15015_v20 = vld [vmem:[%s21754_s1 + $0xe2c] ss:$16 sps:$4 sm:$0xff]  }
 0x18e   : > { %10434 = vmatprep.subr.bf16.mxu0 %v14919_v22  ;;  %11509 = vmatprep.subr.bf16.mxu1 %v14922_v23  ;;  %v15102_v21 = vld [vmem:[%s16986_s26 + $0x3c] ss:$200 sps:$4 sm:$0xff]   ;;  %v15010_v22 = vld [vmem:[%s21754_s1 + $0xe20] ss:$16 sps:$4 sm:$0xff]   ;;  %v15013_v23 = vld [vmem:[%s21754_s1 + $0xe28] ss:$16 sps:$4 sm:$0xff]  }
 0x191   : > { %10435 = vmatpush1.bf16.msra.mxu0 %v14917_v24  ;;  %11510 = vmatpush1.bf16.msra.mxu1 %v14920_v25  ;;  %v15018_v24 = vld [vmem:[%s21754_s1 + $0xe44] ss:$16 sps:$4 sm:$0xff]   ;;  %v15021_v25 = vld [vmem:[%s21754_s1 + $0xe4c] ss:$16 sps:$4 sm:$0xff]  }
 0x192   : > { %10436 = vmatprep.subr.bf16.mxu0 %v14925_v26  ;;  %11511 = vmatprep.subr.bf16.mxu1 %v14928_v27  ;;  %v15016_v26 = vld [vmem:[%s21754_s1 + $0xe40] ss:$16 sps:$4 sm:$0xff]   ;;  %v15019_v27 = vld [vmem:[%s21754_s1 + $0xe48] ss:$16 sps:$4 sm:$0xff]  }
 0x195   : > { %10437 = vmatpush1.bf16.msra.mxu0 %v14923_v28  ;;  %11512 = vmatpush1.bf16.msra.mxu1 %v14926_v29  ;;  %v15024_v28 = vld [vmem:[%s21754_s1 + $0xe64] ss:$16 sps:$4 sm:$0xff]   ;;  %v15027_v29 = vld [vmem:[%s21754_s1 + $0xe6c] ss:$16 sps:$4 sm:$0xff]  }
 0x196   : > { %10438 = vmatprep.subr.bf16.mxu0 %v14931_v30  ;;  %11513 = vmatprep.subr.bf16.mxu1 %v14934_v31  ;;  %v15022_v30 = vld [vmem:[%s21754_s1 + $0xe60] ss:$16 sps:$4 sm:$0xff]   ;;  %v15025_v31 = vld [vmem:[%s21754_s1 + $0xe68] ss:$16 sps:$4 sm:$0xff]  }
 0x199   : > { %10439 = vmatpush1.bf16.msra.mxu0 %v14929_v32  ;;  %11514 = vmatpush1.bf16.msra.mxu1 %v14932_v33  ;;  %v15030_v32 = vld [vmem:[%s21754_s1 + $0xe84] ss:$16 sps:$4 sm:$0xff]   ;;  %v15033_v33 = vld [vmem:[%s21754_s1 + $0xe8c] ss:$16 sps:$4 sm:$0xff]  }
 0x19a   : > { %10440 = vmatprep.subr.bf16.mxu0 %v14937_v34  ;;  %11515 = vmatprep.subr.bf16.mxu1 %v14940_v35  ;;  %v15028_v34 = vld [vmem:[%s21754_s1 + $0xe80] ss:$16 sps:$4 sm:$0xff]   ;;  %v15031_v35 = vld [vmem:[%s21754_s1 + $0xe88] ss:$16 sps:$4 sm:$0xff]  }
 0x19d   : > { %10441 = vmatpush1.bf16.msra.mxu0 %v14935_v36  ;;  %11516 = vmatpush1.bf16.msra.mxu1 %v14938_v37  ;;  %v15036_v36 = vld [vmem:[%s21754_s1 + $0xea4] ss:$16 sps:$4 sm:$0xff]   ;;  %v15039_v37 = vld [vmem:[%s21754_s1 + $0xeac] ss:$16 sps:$4 sm:$0xff]  }
 0x19e   : > { %10442 = vmatprep.subr.bf16.mxu0 %v14943_v38  ;;  %11517 = vmatprep.subr.bf16.mxu1 %v14946_v39  ;;  %v15034_v38 = vld [vmem:[%s21754_s1 + $0xea0] ss:$16 sps:$4 sm:$0xff]   ;;  %v15037_v39 = vld [vmem:[%s21754_s1 + $0xea8] ss:$16 sps:$4 sm:$0xff]  }
 0x1a1   : > { %10443 = vmatpush1.bf16.msra.mxu0 %v14941_v40  ;;  %11518 = vmatpush1.bf16.msra.mxu1 %v14944_v41  ;;  %v15042_v40 = vld [vmem:[%s21754_s1 + $0xec4] ss:$16 sps:$4 sm:$0xff]   ;;  %v15045_v41 = vld [vmem:[%s21754_s1 + $0xecc] ss:$16 sps:$4 sm:$0xff]  }
 0x1a2   : > { %10444 = vmatprep.subr.bf16.mxu0 %v14949_v42  ;;  %11519 = vmatprep.subr.bf16.mxu1 %v14952_v43  ;;  %v15040_v42 = vld [vmem:[%s21754_s1 + $0xec0] ss:$16 sps:$4 sm:$0xff]   ;;  %v15043_v43 = vld [vmem:[%s21754_s1 + $0xec8] ss:$16 sps:$4 sm:$0xff]  }
 0x1a5   : > { %10445 = vmatpush1.bf16.msra.mxu0 %v14947_v44  ;;  %11520 = vmatpush1.bf16.msra.mxu1 %v14950_v45  ;;  %v15048_v44 = vld [vmem:[%s21754_s1 + $0xee4] ss:$16 sps:$4 sm:$0xff]   ;;  %v15051_v45 = vld [vmem:[%s21754_s1 + $0xeec] ss:$16 sps:$4 sm:$0xff]  }
 0x1a6   : > { %10446 = vmatprep.subr.bf16.mxu0 %v14955_v46  ;;  %11521 = vmatprep.subr.bf16.mxu1 %v14958_v47  ;;  %v15046_v46 = vld [vmem:[%s21754_s1 + $0xee0] ss:$16 sps:$4 sm:$0xff]   ;;  %v15049_v47 = vld [vmem:[%s21754_s1 + $0xee8] ss:$16 sps:$4 sm:$0xff]  }
 0x1a9   : > { %10447 = vmatpush1.bf16.msra.mxu0 %v14953_v48  ;;  %11522 = vmatpush1.bf16.msra.mxu1 %v14956_v49  ;;  %v15054_v48 = vld [vmem:[%s21754_s1 + $0xf04] ss:$16 sps:$4 sm:$0xff]   ;;  %v15057_v49 = vld [vmem:[%s21754_s1 + $0xf0c] ss:$16 sps:$4 sm:$0xff]  }
 0x1aa   : > { %10448 = vmatprep.subr.bf16.mxu0 %v14961_v50  ;;  %11523 = vmatprep.subr.bf16.mxu1 %v14964_v51  ;;  %v15052_v50 = vld [vmem:[%s21754_s1 + $0xf00] ss:$16 sps:$4 sm:$0xff]   ;;  %v15055_v51 = vld [vmem:[%s21754_s1 + $0xf08] ss:$16 sps:$4 sm:$0xff]  }
 0x1ad   : > { %10449 = vmatpush1.bf16.msra.mxu0 %v14959_v52  ;;  %11524 = vmatpush1.bf16.msra.mxu1 %v14962_v53  ;;  %v15060_v52 = vld [vmem:[%s21754_s1 + $0xf24] ss:$16 sps:$4 sm:$0xff]   ;;  %v15063_v53 = vld [vmem:[%s21754_s1 + $0xf2c] ss:$16 sps:$4 sm:$0xff]  }
 0x1ae   : > { %10450 = vmatprep.subr.bf16.mxu0 %v14967_v54  ;;  %11525 = vmatprep.subr.bf16.mxu1 %v14970_v55  ;;  %v15058_v54 = vld [vmem:[%s21754_s1 + $0xf20] ss:$16 sps:$4 sm:$0xff]   ;;  %v15061_v55 = vld [vmem:[%s21754_s1 + $0xf28] ss:$16 sps:$4 sm:$0xff]  }
 0x1b1   : > { %10451 = vmatpush1.bf16.msra.mxu0 %v14965_v56  ;;  %11526 = vmatpush1.bf16.msra.mxu1 %v14968_v57  ;;  %v15066_v56 = vld [vmem:[%s21754_s1 + $0xf44] ss:$16 sps:$4 sm:$0xff]   ;;  %v15069_v57 = vld [vmem:[%s21754_s1 + $0xf4c] ss:$16 sps:$4 sm:$0xff]  }
 0x1b2   : > { %10452 = vmatprep.subr.bf16.mxu0 %v14973_v58  ;;  %11527 = vmatprep.subr.bf16.mxu1 %v14976_v59  ;;  %v15064_v58 = vld [vmem:[%s21754_s1 + $0xf40] ss:$16 sps:$4 sm:$0xff]   ;;  %v15067_v59 = vld [vmem:[%s21754_s1 + $0xf48] ss:$16 sps:$4 sm:$0xff]  }
 0x1b5   : > { %10453 = vmatpush1.bf16.msra.mxu0 %v14971_v60  ;;  %11528 = vmatpush1.bf16.msra.mxu1 %v14974_v61  ;;  %v15072_v60 = vld [vmem:[%s21754_s1 + $0xf64] ss:$16 sps:$4 sm:$0xff]   ;;  %v15075_v61 = vld [vmem:[%s21754_s1 + $0xf6c] ss:$16 sps:$4 sm:$0xff]  }
 0x1b6   : > { %10454 = vmatprep.subr.bf16.mxu0 %v14979_v62  ;;  %11529 = vmatprep.subr.bf16.mxu1 %v14982_v63  ;;  %v15070_v62 = vld [vmem:[%s21754_s1 + $0xf60] ss:$16 sps:$4 sm:$0xff]   ;;  %v15073_v63 = vld [vmem:[%s21754_s1 + $0xf68] ss:$16 sps:$4 sm:$0xff]  }
 0x1b9   : > { %10455 = vmatpush1.bf16.msra.mxu0 %v14977_v0  ;;  %11530 = vmatpush1.bf16.msra.mxu1 %v14980_v1  ;;  %v15078_v0 = vld [vmem:[%s21754_s1 + $0xf84] ss:$16 sps:$4 sm:$0xff]   ;;  %v15081_v1 = vld [vmem:[%s21754_s1 + $0xf8c] ss:$16 sps:$4 sm:$0xff]  }
 0x1ba   : > { %10456 = vmatprep.subr.bf16.mxu0 %v14985_v2  ;;  %11531 = vmatprep.subr.bf16.mxu1 %v14988_v3  ;;  %v15076_v2 = vld [vmem:[%s21754_s1 + $0xf80] ss:$16 sps:$4 sm:$0xff]   ;;  %v15079_v3 = vld [vmem:[%s21754_s1 + $0xf88] ss:$16 sps:$4 sm:$0xff]  }
 0x1bd   : > { %10457 = vmatpush1.bf16.msra.mxu0 %v14983_v4  ;;  %11532 = vmatpush1.bf16.msra.mxu1 %v14986_v5  ;;  %v15084_v4 = vld [vmem:[%s21754_s1 + $0xfa4] ss:$16 sps:$4 sm:$0xff]   ;;  %v15087_v5 = vld [vmem:[%s21754_s1 + $0xfac] ss:$16 sps:$4 sm:$0xff]  }
 0x1be   : > { %10458 = vmatprep.subr.bf16.mxu0 %v14991_v6  ;;  %11533 = vmatprep.subr.bf16.mxu1 %v14994_v7  ;;  %v15082_v6 = vld [vmem:[%s21754_s1 + $0xfa0] ss:$16 sps:$4 sm:$0xff]   ;;  %v15085_v7 = vld [vmem:[%s21754_s1 + $0xfa8] ss:$16 sps:$4 sm:$0xff]  }
 0x1c1   : > { %10459 = vmatpush1.bf16.msra.mxu0 %v14989_v8  ;;  %11534 = vmatpush1.bf16.msra.mxu1 %v14992_v9  ;;  %v15090_v8 = vld [vmem:[%s21754_s1 + $0xfc4] ss:$16 sps:$4 sm:$0xff]   ;;  %v15093_v9 = vld [vmem:[%s21754_s1 + $0xfcc] ss:$16 sps:$4 sm:$0xff]  }
 0x1c2   : > { %10460 = vmatprep.subr.bf16.mxu0 %v14997_v10  ;;  %11535 = vmatprep.subr.bf16.mxu1 %v15000_v11  ;;  %v15088_v10 = vld [vmem:[%s21754_s1 + $0xfc0] ss:$16 sps:$4 sm:$0xff]   ;;  %v15091_v11 = vld [vmem:[%s21754_s1 + $0xfc8] ss:$16 sps:$4 sm:$0xff]  }
 0x1c5   : > { %10461 = vmatpush1.bf16.msra.mxu0 %v14995_v12  ;;  %11536 = vmatpush1.bf16.msra.mxu1 %v14998_v13  ;;  %v15096_v12 = vld [vmem:[%s21754_s1 + $0xfe4] ss:$16 sps:$4 sm:$0xff]   ;;  %v15099_v13 = vld [vmem:[%s21754_s1 + $0xfec] ss:$16 sps:$4 sm:$0xff]  }
 0x1c6   : > { %10473 = vmatprep.subr.bf16.mxu0 %v15006_v15  ;;  %11548 = vmatprep.subr.bf16.mxu1 %v15009_v16  ;;  %v15097_v15 = vld [vmem:[%s21754_s1 + $0xfe8] ss:$16 sps:$4 sm:$0xff]  }
 0x1c7   : > { %v15100_v16 = vld [vmem:[%s16986_s26 + $0x38] ss:$200 sps:$4 sm:$0xff]  }
 0x1c8   : > { %10463 = vmatmul.mubr.bf16.vlgmr.msra.gmra.mrb[0].mxu0 %v15001_v14  ;;  %11538 = vmatmul.mubr.bf16.vlgmr.msra.gmra.mrb[0].mxu1 %v15001_v14  ;;  %v15094_v14 = vld [vmem:[%s21754_s1 + $0xfe0] ss:$16 sps:$4 sm:$0xff]  }
 0x1c9   : > { %10474 = vmatpush1.bf16.msra.mxu0 %v15004_v17  ;;  %11549 = vmatpush1.bf16.msra.mxu1 %v15007_v18  ;;  %v15105_v17 = vld [vmem:[%s21754_s1 + $0x1004] ss:$16 sps:$4 sm:$0xff]   ;;  %v15108_v18 = vld [vmem:[%s21754_s1 + $0x100c] ss:$16 sps:$4 sm:$0xff]  }
 0x1ca   : > { %10475 = vmatprep.subr.bf16.mxu0 %v15012_v19  ;;  %11550 = vmatprep.subr.bf16.mxu1 %v15015_v20  ;;  %v15103_v19 = vld [vmem:[%s21754_s1 + $0x1000] ss:$16 sps:$4 sm:$0xff]   ;;  %v15106_v20 = vld [vmem:[%s21754_s1 + $0x1008] ss:$16 sps:$4 sm:$0xff]  }
 0x1cb   : > { %10505 = vmatprep.mubr.bf16.mxu0 %v15102_v21  ;;  %11580 = vmatprep.mubr.bf16.mxu1 %v15102_v21  ;;  %v15111_v21 = vld [vmem:[%s21754_s1 + $0x1024] ss:$16 sps:$4 sm:$0xff]  }
 0x1cd   : > { %10476 = vmatpush1.bf16.msra.mxu0 %v15010_v22  ;;  %11551 = vmatpush1.bf16.msra.mxu1 %v15013_v23  ;;  %v15114_v22 = vld [vmem:[%s21754_s1 + $0x102c] ss:$16 sps:$4 sm:$0xff]  }
 0x1ce   : > { %10477 = vmatprep.subr.bf16.mxu0 %v15018_v24  ;;  %11552 = vmatprep.subr.bf16.mxu1 %v15021_v25  ;;  %v15201_v23 = vld [vmem:[%s16986_s26 + $0x44] ss:$200 sps:$4 sm:$0xff]   ;;  %v15109_v24 = vld [vmem:[%s21754_s1 + $0x1020] ss:$16 sps:$4 sm:$0xff]   ;;  %v15112_v25 = vld [vmem:[%s21754_s1 + $0x1028] ss:$16 sps:$4 sm:$0xff]  }
 0x1d1   : > { %10478 = vmatpush1.bf16.msra.mxu0 %v15016_v26  ;;  %11553 = vmatpush1.bf16.msra.mxu1 %v15019_v27  ;;  %v15117_v26 = vld [vmem:[%s21754_s1 + $0x1044] ss:$16 sps:$4 sm:$0xff]   ;;  %v15120_v27 = vld [vmem:[%s21754_s1 + $0x104c] ss:$16 sps:$4 sm:$0xff]  }
 0x1d2   : > { %10479 = vmatprep.subr.bf16.mxu0 %v15024_v28  ;;  %11554 = vmatprep.subr.bf16.mxu1 %v15027_v29  ;;  %v15115_v28 = vld [vmem:[%s21754_s1 + $0x1040] ss:$16 sps:$4 sm:$0xff]   ;;  %v15118_v29 = vld [vmem:[%s21754_s1 + $0x1048] ss:$16 sps:$4 sm:$0xff]  }
 0x1d5   : > { %10480 = vmatpush1.bf16.msra.mxu0 %v15022_v30  ;;  %11555 = vmatpush1.bf16.msra.mxu1 %v15025_v31  ;;  %v15123_v30 = vld [vmem:[%s21754_s1 + $0x1064] ss:$16 sps:$4 sm:$0xff]   ;;  %v15126_v31 = vld [vmem:[%s21754_s1 + $0x106c] ss:$16 sps:$4 sm:$0xff]  }
 0x1d6   : > { %10481 = vmatprep.subr.bf16.mxu0 %v15030_v32  ;;  %11556 = vmatprep.subr.bf16.mxu1 %v15033_v33  ;;  %v15121_v32 = vld [vmem:[%s21754_s1 + $0x1060] ss:$16 sps:$4 sm:$0xff]   ;;  %v15124_v33 = vld [vmem:[%s21754_s1 + $0x1068] ss:$16 sps:$4 sm:$0xff]  }
 0x1d9   : > { %10482 = vmatpush1.bf16.msra.mxu0 %v15028_v34  ;;  %11557 = vmatpush1.bf16.msra.mxu1 %v15031_v35  ;;  %v15129_v34 = vld [vmem:[%s21754_s1 + $0x1084] ss:$16 sps:$4 sm:$0xff]   ;;  %v15132_v35 = vld [vmem:[%s21754_s1 + $0x108c] ss:$16 sps:$4 sm:$0xff]  }
 0x1da   : > { %10483 = vmatprep.subr.bf16.mxu0 %v15036_v36  ;;  %11558 = vmatprep.subr.bf16.mxu1 %v15039_v37  ;;  %v15127_v36 = vld [vmem:[%s21754_s1 + $0x1080] ss:$16 sps:$4 sm:$0xff]   ;;  %v15130_v37 = vld [vmem:[%s21754_s1 + $0x1088] ss:$16 sps:$4 sm:$0xff]  }
 0x1dd   : > { %10484 = vmatpush1.bf16.msra.mxu0 %v15034_v38  ;;  %11559 = vmatpush1.bf16.msra.mxu1 %v15037_v39  ;;  %v15135_v38 = vld [vmem:[%s21754_s1 + $0x10a4] ss:$16 sps:$4 sm:$0xff]   ;;  %v15138_v39 = vld [vmem:[%s21754_s1 + $0x10ac] ss:$16 sps:$4 sm:$0xff]  }
 0x1de   : > { %10485 = vmatprep.subr.bf16.mxu0 %v15042_v40  ;;  %11560 = vmatprep.subr.bf16.mxu1 %v15045_v41  ;;  %v15133_v40 = vld [vmem:[%s21754_s1 + $0x10a0] ss:$16 sps:$4 sm:$0xff]   ;;  %v15136_v41 = vld [vmem:[%s21754_s1 + $0x10a8] ss:$16 sps:$4 sm:$0xff]  }
 0x1e1   : > { %10486 = vmatpush1.bf16.msra.mxu0 %v15040_v42  ;;  %11561 = vmatpush1.bf16.msra.mxu1 %v15043_v43  ;;  %v15141_v42 = vld [vmem:[%s21754_s1 + $0x10c4] ss:$16 sps:$4 sm:$0xff]   ;;  %v15144_v43 = vld [vmem:[%s21754_s1 + $0x10cc] ss:$16 sps:$4 sm:$0xff]  }
 0x1e2   : > { %10487 = vmatprep.subr.bf16.mxu0 %v15048_v44  ;;  %11562 = vmatprep.subr.bf16.mxu1 %v15051_v45  ;;  %v15139_v44 = vld [vmem:[%s21754_s1 + $0x10c0] ss:$16 sps:$4 sm:$0xff]   ;;  %v15142_v45 = vld [vmem:[%s21754_s1 + $0x10c8] ss:$16 sps:$4 sm:$0xff]  }
 0x1e5   : > { %10488 = vmatpush1.bf16.msra.mxu0 %v15046_v46  ;;  %11563 = vmatpush1.bf16.msra.mxu1 %v15049_v47  ;;  %v15147_v46 = vld [vmem:[%s21754_s1 + $0x10e4] ss:$16 sps:$4 sm:$0xff]   ;;  %v15150_v47 = vld [vmem:[%s21754_s1 + $0x10ec] ss:$16 sps:$4 sm:$0xff]  }
 0x1e6   : > { %10489 = vmatprep.subr.bf16.mxu0 %v15054_v48  ;;  %11564 = vmatprep.subr.bf16.mxu1 %v15057_v49  ;;  %v15145_v48 = vld [vmem:[%s21754_s1 + $0x10e0] ss:$16 sps:$4 sm:$0xff]   ;;  %v15148_v49 = vld [vmem:[%s21754_s1 + $0x10e8] ss:$16 sps:$4 sm:$0xff]  }
 0x1e9   : > { %10490 = vmatpush1.bf16.msra.mxu0 %v15052_v50  ;;  %11565 = vmatpush1.bf16.msra.mxu1 %v15055_v51  ;;  %v15153_v50 = vld [vmem:[%s21754_s1 + $0x1104] ss:$16 sps:$4 sm:$0xff]   ;;  %v15156_v51 = vld [vmem:[%s21754_s1 + $0x110c] ss:$16 sps:$4 sm:$0xff]  }
 0x1ea   : > { %10491 = vmatprep.subr.bf16.mxu0 %v15060_v52  ;;  %11566 = vmatprep.subr.bf16.mxu1 %v15063_v53  ;;  %v15151_v52 = vld [vmem:[%s21754_s1 + $0x1100] ss:$16 sps:$4 sm:$0xff]   ;;  %v15154_v53 = vld [vmem:[%s21754_s1 + $0x1108] ss:$16 sps:$4 sm:$0xff]  }
 0x1ed   : > { %10492 = vmatpush1.bf16.msra.mxu0 %v15058_v54  ;;  %11567 = vmatpush1.bf16.msra.mxu1 %v15061_v55  ;;  %v15159_v54 = vld [vmem:[%s21754_s1 + $0x1124] ss:$16 sps:$4 sm:$0xff]   ;;  %v15162_v55 = vld [vmem:[%s21754_s1 + $0x112c] ss:$16 sps:$4 sm:$0xff]  }
 0x1ee   : > { %10493 = vmatprep.subr.bf16.mxu0 %v15066_v56  ;;  %11568 = vmatprep.subr.bf16.mxu1 %v15069_v57  ;;  %v15157_v56 = vld [vmem:[%s21754_s1 + $0x1120] ss:$16 sps:$4 sm:$0xff]   ;;  %v15160_v57 = vld [vmem:[%s21754_s1 + $0x1128] ss:$16 sps:$4 sm:$0xff]  }
 0x1f1   : > { %10494 = vmatpush1.bf16.msra.mxu0 %v15064_v58  ;;  %11569 = vmatpush1.bf16.msra.mxu1 %v15067_v59  ;;  %v15165_v58 = vld [vmem:[%s21754_s1 + $0x1144] ss:$16 sps:$4 sm:$0xff]   ;;  %v15168_v59 = vld [vmem:[%s21754_s1 + $0x114c] ss:$16 sps:$4 sm:$0xff]  }
 0x1f2   : > { %10495 = vmatprep.subr.bf16.mxu0 %v15072_v60  ;;  %11570 = vmatprep.subr.bf16.mxu1 %v15075_v61  ;;  %v15163_v60 = vld [vmem:[%s21754_s1 + $0x1140] ss:$16 sps:$4 sm:$0xff]   ;;  %v15166_v61 = vld [vmem:[%s21754_s1 + $0x1148] ss:$16 sps:$4 sm:$0xff]  }
 0x1f5   : > { %10496 = vmatpush1.bf16.msra.mxu0 %v15070_v62  ;;  %11571 = vmatpush1.bf16.msra.mxu1 %v15073_v63  ;;  %v15171_v62 = vld [vmem:[%s21754_s1 + $0x1164] ss:$16 sps:$4 sm:$0xff]   ;;  %v15174_v63 = vld [vmem:[%s21754_s1 + $0x116c] ss:$16 sps:$4 sm:$0xff]  }
 0x1f6   : > { %10497 = vmatprep.subr.bf16.mxu0 %v15078_v0  ;;  %11572 = vmatprep.subr.bf16.mxu1 %v15081_v1  ;;  %v15169_v0 = vld [vmem:[%s21754_s1 + $0x1160] ss:$16 sps:$4 sm:$0xff]   ;;  %v15172_v1 = vld [vmem:[%s21754_s1 + $0x1168] ss:$16 sps:$4 sm:$0xff]  }
 0x1f9   : > { %10498 = vmatpush1.bf16.msra.mxu0 %v15076_v2  ;;  %11573 = vmatpush1.bf16.msra.mxu1 %v15079_v3  ;;  %v15177_v2 = vld [vmem:[%s21754_s1 + $0x1184] ss:$16 sps:$4 sm:$0xff]   ;;  %v15180_v3 = vld [vmem:[%s21754_s1 + $0x118c] ss:$16 sps:$4 sm:$0xff]  }
 0x1fa   : > { %10499 = vmatprep.subr.bf16.mxu0 %v15084_v4  ;;  %11574 = vmatprep.subr.bf16.mxu1 %v15087_v5  ;;  %v15175_v4 = vld [vmem:[%s21754_s1 + $0x1180] ss:$16 sps:$4 sm:$0xff]   ;;  %v15178_v5 = vld [vmem:[%s21754_s1 + $0x1188] ss:$16 sps:$4 sm:$0xff]  }
 0x1fd   : > { %10500 = vmatpush1.bf16.msra.mxu0 %v15082_v6  ;;  %11575 = vmatpush1.bf16.msra.mxu1 %v15085_v7  ;;  %v15183_v6 = vld [vmem:[%s21754_s1 + $0x11a4] ss:$16 sps:$4 sm:$0xff]   ;;  %v15186_v7 = vld [vmem:[%s21754_s1 + $0x11ac] ss:$16 sps:$4 sm:$0xff]  }
 0x1fe   : > { %10501 = vmatprep.subr.bf16.mxu0 %v15090_v8  ;;  %11576 = vmatprep.subr.bf16.mxu1 %v15093_v9  ;;  %v15181_v8 = vld [vmem:[%s21754_s1 + $0x11a0] ss:$16 sps:$4 sm:$0xff]   ;;  %v15184_v9 = vld [vmem:[%s21754_s1 + $0x11a8] ss:$16 sps:$4 sm:$0xff]  }
 0x201   : > { %10502 = vmatpush1.bf16.msra.mxu0 %v15088_v10  ;;  %11577 = vmatpush1.bf16.msra.mxu1 %v15091_v11  ;;  %v15189_v10 = vld [vmem:[%s21754_s1 + $0x11c4] ss:$16 sps:$4 sm:$0xff]   ;;  %v15192_v11 = vld [vmem:[%s21754_s1 + $0x11cc] ss:$16 sps:$4 sm:$0xff]  }
 0x202   : > { %10503 = vmatprep.subr.bf16.mxu0 %v15096_v12  ;;  %11578 = vmatprep.subr.bf16.mxu1 %v15099_v13  ;;  %v15187_v12 = vld [vmem:[%s21754_s1 + $0x11c0] ss:$16 sps:$4 sm:$0xff]   ;;  %v15190_v13 = vld [vmem:[%s21754_s1 + $0x11c8] ss:$16 sps:$4 sm:$0xff]  }
 0x205   : > { %10504 = vmatpush1.bf16.msra.mxu0 %v15094_v14  ;;  %11579 = vmatpush1.bf16.msra.mxu1 %v15097_v15  ;;  %v15195_v14 = vld [vmem:[%s21754_s1 + $0x11e4] ss:$16 sps:$4 sm:$0xff]   ;;  %v15198_v15 = vld [vmem:[%s21754_s1 + $0x11ec] ss:$16 sps:$4 sm:$0xff]  }
 0x206   : > { %10516 = vmatprep.subr.bf16.mxu0 %v15105_v17  ;;  %11591 = vmatprep.subr.bf16.mxu1 %v15108_v18  ;;  %v15196_v17 = vld [vmem:[%s21754_s1 + $0x11e8] ss:$16 sps:$4 sm:$0xff]  }
 0x207   : > { %v15199_v18 = vld [vmem:[%s16986_s26 + $0x40] ss:$200 sps:$4 sm:$0xff]  }
 0x208   : > { %10506 = vmatmul.mubr.bf16.vlgmr.msra.gmra.mrb[0].mxu0 %v15100_v16  ;;  %11581 = vmatmul.mubr.bf16.vlgmr.msra.gmra.mrb[0].mxu1 %v15100_v16  ;;  %v15193_v16 = vld [vmem:[%s21754_s1 + $0x11e0] ss:$16 sps:$4 sm:$0xff]  }
 0x209   : > { %10517 = vmatpush1.bf16.msra.mxu0 %v15103_v19  ;;  %11592 = vmatpush1.bf16.msra.mxu1 %v15106_v20  ;;  %v15204_v19 = vld [vmem:[%s21754_s1 + $0x1204] ss:$16 sps:$4 sm:$0xff]   ;;  %v15207_v20 = vld [vmem:[%s21754_s1 + $0x120c] ss:$16 sps:$4 sm:$0xff]  }
 0x20a   : > { %10518 = vmatprep.subr.bf16.mxu0 %v15111_v21  ;;  %11593 = vmatprep.subr.bf16.mxu1 %v15114_v22  ;;  %v15202_v21 = vld [vmem:[%s21754_s1 + $0x1200] ss:$16 sps:$4 sm:$0xff]   ;;  %v15205_v22 = vld [vmem:[%s21754_s1 + $0x1208] ss:$16 sps:$4 sm:$0xff]  }
 0x20b   : > { %10548 = vmatprep.mubr.bf16.mxu0 %v15201_v23  ;;  %11623 = vmatprep.mubr.bf16.mxu1 %v15201_v23  ;;  %v15210_v23 = vld [vmem:[%s21754_s1 + $0x1224] ss:$16 sps:$4 sm:$0xff]  }
 0x20d   : > { %10519 = vmatpush1.bf16.msra.mxu0 %v15109_v24  ;;  %11594 = vmatpush1.bf16.msra.mxu1 %v15112_v25  ;;  %v15213_v24 = vld [vmem:[%s21754_s1 + $0x122c] ss:$16 sps:$4 sm:$0xff]  }
 0x20e   : > { %10520 = vmatprep.subr.bf16.mxu0 %v15117_v26  ;;  %11595 = vmatprep.subr.bf16.mxu1 %v15120_v27  ;;  %v15300_v25 = vld [vmem:[%s16986_s26 + $0x4c] ss:$200 sps:$4 sm:$0xff]   ;;  %v15208_v26 = vld [vmem:[%s21754_s1 + $0x1220] ss:$16 sps:$4 sm:$0xff]   ;;  %v15211_v27 = vld [vmem:[%s21754_s1 + $0x1228] ss:$16 sps:$4 sm:$0xff]  }
 0x211   : > { %10521 = vmatpush1.bf16.msra.mxu0 %v15115_v28  ;;  %11596 = vmatpush1.bf16.msra.mxu1 %v15118_v29  ;;  %v15216_v28 = vld [vmem:[%s21754_s1 + $0x1244] ss:$16 sps:$4 sm:$0xff]   ;;  %v15219_v29 = vld [vmem:[%s21754_s1 + $0x124c] ss:$16 sps:$4 sm:$0xff]  }
 0x212   : > { %10522 = vmatprep.subr.bf16.mxu0 %v15123_v30  ;;  %11597 = vmatprep.subr.bf16.mxu1 %v15126_v31  ;;  %v15214_v30 = vld [vmem:[%s21754_s1 + $0x1240] ss:$16 sps:$4 sm:$0xff]   ;;  %v15217_v31 = vld [vmem:[%s21754_s1 + $0x1248] ss:$16 sps:$4 sm:$0xff]  }
 0x215   : > { %10523 = vmatpush1.bf16.msra.mxu0 %v15121_v32  ;;  %11598 = vmatpush1.bf16.msra.mxu1 %v15124_v33  ;;  %v15222_v32 = vld [vmem:[%s21754_s1 + $0x1264] ss:$16 sps:$4 sm:$0xff]   ;;  %v15225_v33 = vld [vmem:[%s21754_s1 + $0x126c] ss:$16 sps:$4 sm:$0xff]  }
 0x216   : > { %10524 = vmatprep.subr.bf16.mxu0 %v15129_v34  ;;  %11599 = vmatprep.subr.bf16.mxu1 %v15132_v35  ;;  %v15220_v34 = vld [vmem:[%s21754_s1 + $0x1260] ss:$16 sps:$4 sm:$0xff]   ;;  %v15223_v35 = vld [vmem:[%s21754_s1 + $0x1268] ss:$16 sps:$4 sm:$0xff]  }
 0x219   : > { %10525 = vmatpush1.bf16.msra.mxu0 %v15127_v36  ;;  %11600 = vmatpush1.bf16.msra.mxu1 %v15130_v37  ;;  %v15228_v36 = vld [vmem:[%s21754_s1 + $0x1284] ss:$16 sps:$4 sm:$0xff]   ;;  %v15231_v37 = vld [vmem:[%s21754_s1 + $0x128c] ss:$16 sps:$4 sm:$0xff]  }
 0x21a   : > { %10526 = vmatprep.subr.bf16.mxu0 %v15135_v38  ;;  %11601 = vmatprep.subr.bf16.mxu1 %v15138_v39  ;;  %v15226_v38 = vld [vmem:[%s21754_s1 + $0x1280] ss:$16 sps:$4 sm:$0xff]   ;;  %v15229_v39 = vld [vmem:[%s21754_s1 + $0x1288] ss:$16 sps:$4 sm:$0xff]  }
 0x21d   : > { %10527 = vmatpush1.bf16.msra.mxu0 %v15133_v40  ;;  %11602 = vmatpush1.bf16.msra.mxu1 %v15136_v41  ;;  %v15234_v40 = vld [vmem:[%s21754_s1 + $0x12a4] ss:$16 sps:$4 sm:$0xff]   ;;  %v15237_v41 = vld [vmem:[%s21754_s1 + $0x12ac] ss:$16 sps:$4 sm:$0xff]  }
 0x21e   : > { %10528 = vmatprep.subr.bf16.mxu0 %v15141_v42  ;;  %11603 = vmatprep.subr.bf16.mxu1 %v15144_v43  ;;  %v15232_v42 = vld [vmem:[%s21754_s1 + $0x12a0] ss:$16 sps:$4 sm:$0xff]   ;;  %v15235_v43 = vld [vmem:[%s21754_s1 + $0x12a8] ss:$16 sps:$4 sm:$0xff]  }
 0x221   : > { %10529 = vmatpush1.bf16.msra.mxu0 %v15139_v44  ;;  %11604 = vmatpush1.bf16.msra.mxu1 %v15142_v45  ;;  %v15240_v44 = vld [vmem:[%s21754_s1 + $0x12c4] ss:$16 sps:$4 sm:$0xff]   ;;  %v15243_v45 = vld [vmem:[%s21754_s1 + $0x12cc] ss:$16 sps:$4 sm:$0xff]  }
 0x222   : > { %10530 = vmatprep.subr.bf16.mxu0 %v15147_v46  ;;  %11605 = vmatprep.subr.bf16.mxu1 %v15150_v47  ;;  %v15238_v46 = vld [vmem:[%s21754_s1 + $0x12c0] ss:$16 sps:$4 sm:$0xff]   ;;  %v15241_v47 = vld [vmem:[%s21754_s1 + $0x12c8] ss:$16 sps:$4 sm:$0xff]  }
 0x225   : > { %10531 = vmatpush1.bf16.msra.mxu0 %v15145_v48  ;;  %11606 = vmatpush1.bf16.msra.mxu1 %v15148_v49  ;;  %v15246_v48 = vld [vmem:[%s21754_s1 + $0x12e4] ss:$16 sps:$4 sm:$0xff]   ;;  %v15249_v49 = vld [vmem:[%s21754_s1 + $0x12ec] ss:$16 sps:$4 sm:$0xff]  }
 0x226   : > { %10532 = vmatprep.subr.bf16.mxu0 %v15153_v50  ;;  %11607 = vmatprep.subr.bf16.mxu1 %v15156_v51  ;;  %v15244_v50 = vld [vmem:[%s21754_s1 + $0x12e0] ss:$16 sps:$4 sm:$0xff]   ;;  %v15247_v51 = vld [vmem:[%s21754_s1 + $0x12e8] ss:$16 sps:$4 sm:$0xff]  }
 0x229   : > { %10533 = vmatpush1.bf16.msra.mxu0 %v15151_v52  ;;  %11608 = vmatpush1.bf16.msra.mxu1 %v15154_v53  ;;  %v15252_v52 = vld [vmem:[%s21754_s1 + $0x1304] ss:$16 sps:$4 sm:$0xff]   ;;  %v15255_v53 = vld [vmem:[%s21754_s1 + $0x130c] ss:$16 sps:$4 sm:$0xff]  }
 0x22a   : > { %10534 = vmatprep.subr.bf16.mxu0 %v15159_v54  ;;  %11609 = vmatprep.subr.bf16.mxu1 %v15162_v55  ;;  %v15250_v54 = vld [vmem:[%s21754_s1 + $0x1300] ss:$16 sps:$4 sm:$0xff]   ;;  %v15253_v55 = vld [vmem:[%s21754_s1 + $0x1308] ss:$16 sps:$4 sm:$0xff]  }
 0x22d   : > { %10535 = vmatpush1.bf16.msra.mxu0 %v15157_v56  ;;  %11610 = vmatpush1.bf16.msra.mxu1 %v15160_v57  ;;  %v15258_v56 = vld [vmem:[%s21754_s1 + $0x1324] ss:$16 sps:$4 sm:$0xff]   ;;  %v15261_v57 = vld [vmem:[%s21754_s1 + $0x132c] ss:$16 sps:$4 sm:$0xff]  }
 0x22e   : > { %10536 = vmatprep.subr.bf16.mxu0 %v15165_v58  ;;  %11611 = vmatprep.subr.bf16.mxu1 %v15168_v59  ;;  %v15256_v58 = vld [vmem:[%s21754_s1 + $0x1320] ss:$16 sps:$4 sm:$0xff]   ;;  %v15259_v59 = vld [vmem:[%s21754_s1 + $0x1328] ss:$16 sps:$4 sm:$0xff]  }
 0x231   : > { %10537 = vmatpush1.bf16.msra.mxu0 %v15163_v60  ;;  %11612 = vmatpush1.bf16.msra.mxu1 %v15166_v61  ;;  %v15264_v60 = vld [vmem:[%s21754_s1 + $0x1344] ss:$16 sps:$4 sm:$0xff]   ;;  %v15267_v61 = vld [vmem:[%s21754_s1 + $0x134c] ss:$16 sps:$4 sm:$0xff]  }
 0x232   : > { %10538 = vmatprep.subr.bf16.mxu0 %v15171_v62  ;;  %11613 = vmatprep.subr.bf16.mxu1 %v15174_v63  ;;  %v15262_v62 = vld [vmem:[%s21754_s1 + $0x1340] ss:$16 sps:$4 sm:$0xff]   ;;  %v15265_v63 = vld [vmem:[%s21754_s1 + $0x1348] ss:$16 sps:$4 sm:$0xff]  }
 0x235   : > { %10539 = vmatpush1.bf16.msra.mxu0 %v15169_v0  ;;  %11614 = vmatpush1.bf16.msra.mxu1 %v15172_v1  ;;  %v15270_v0 = vld [vmem:[%s21754_s1 + $0x1364] ss:$16 sps:$4 sm:$0xff]   ;;  %v15273_v1 = vld [vmem:[%s21754_s1 + $0x136c] ss:$16 sps:$4 sm:$0xff]  }
 0x236   : > { %10540 = vmatprep.subr.bf16.mxu0 %v15177_v2  ;;  %11615 = vmatprep.subr.bf16.mxu1 %v15180_v3  ;;  %v15268_v2 = vld [vmem:[%s21754_s1 + $0x1360] ss:$16 sps:$4 sm:$0xff]   ;;  %v15271_v3 = vld [vmem:[%s21754_s1 + $0x1368] ss:$16 sps:$4 sm:$0xff]  }
 0x239   : > { %10541 = vmatpush1.bf16.msra.mxu0 %v15175_v4  ;;  %11616 = vmatpush1.bf16.msra.mxu1 %v15178_v5  ;;  %v15276_v4 = vld [vmem:[%s21754_s1 + $0x1384] ss:$16 sps:$4 sm:$0xff]   ;;  %v15279_v5 = vld [vmem:[%s21754_s1 + $0x138c] ss:$16 sps:$4 sm:$0xff]  }
 0x23a   : > { %10542 = vmatprep.subr.bf16.mxu0 %v15183_v6  ;;  %11617 = vmatprep.subr.bf16.mxu1 %v15186_v7  ;;  %v15274_v6 = vld [vmem:[%s21754_s1 + $0x1380] ss:$16 sps:$4 sm:$0xff]   ;;  %v15277_v7 = vld [vmem:[%s21754_s1 + $0x1388] ss:$16 sps:$4 sm:$0xff]  }
 0x23d   : > { %10543 = vmatpush1.bf16.msra.mxu0 %v15181_v8  ;;  %11618 = vmatpush1.bf16.msra.mxu1 %v15184_v9  ;;  %v15282_v8 = vld [vmem:[%s21754_s1 + $0x13a4] ss:$16 sps:$4 sm:$0xff]   ;;  %v15285_v9 = vld [vmem:[%s21754_s1 + $0x13ac] ss:$16 sps:$4 sm:$0xff]  }
 0x23e   : > { %10544 = vmatprep.subr.bf16.mxu0 %v15189_v10  ;;  %11619 = vmatprep.subr.bf16.mxu1 %v15192_v11  ;;  %v15280_v10 = vld [vmem:[%s21754_s1 + $0x13a0] ss:$16 sps:$4 sm:$0xff]   ;;  %v15283_v11 = vld [vmem:[%s21754_s1 + $0x13a8] ss:$16 sps:$4 sm:$0xff]  }
 0x241   : > { %10545 = vmatpush1.bf16.msra.mxu0 %v15187_v12  ;;  %11620 = vmatpush1.bf16.msra.mxu1 %v15190_v13  ;;  %v15288_v12 = vld [vmem:[%s21754_s1 + $0x13c4] ss:$16 sps:$4 sm:$0xff]   ;;  %v15291_v13 = vld [vmem:[%s21754_s1 + $0x13cc] ss:$16 sps:$4 sm:$0xff]  }
 0x242   : > { %10546 = vmatprep.subr.bf16.mxu0 %v15195_v14  ;;  %11621 = vmatprep.subr.bf16.mxu1 %v15198_v15  ;;  %v15286_v14 = vld [vmem:[%s21754_s1 + $0x13c0] ss:$16 sps:$4 sm:$0xff]   ;;  %v15289_v15 = vld [vmem:[%s21754_s1 + $0x13c8] ss:$16 sps:$4 sm:$0xff]  }
 0x245   : > { %10547 = vmatpush1.bf16.msra.mxu0 %v15193_v16  ;;  %11622 = vmatpush1.bf16.msra.mxu1 %v15196_v17  ;;  %v15294_v16 = vld [vmem:[%s21754_s1 + $0x13e4] ss:$16 sps:$4 sm:$0xff]   ;;  %v15297_v17 = vld [vmem:[%s21754_s1 + $0x13ec] ss:$16 sps:$4 sm:$0xff]  }
 0x246   : > { %10559 = vmatprep.subr.bf16.mxu0 %v15204_v19  ;;  %11634 = vmatprep.subr.bf16.mxu1 %v15207_v20  ;;  %v15295_v19 = vld [vmem:[%s21754_s1 + $0x13e8] ss:$16 sps:$4 sm:$0xff]  }
 0x247   : > { %v15298_v20 = vld [vmem:[%s16986_s26 + $0x48] ss:$200 sps:$4 sm:$0xff]  }
 0x248   : > { %10549 = vmatmul.mubr.bf16.vlgmr.msra.gmra.mrb[0].mxu0 %v15199_v18  ;;  %11624 = vmatmul.mubr.bf16.vlgmr.msra.gmra.mrb[0].mxu1 %v15199_v18  ;;  %v15292_v18 = vld [vmem:[%s21754_s1 + $0x13e0] ss:$16 sps:$4 sm:$0xff]  }
 0x249   : > { %10560 = vmatpush1.bf16.msra.mxu0 %v15202_v21  ;;  %11635 = vmatpush1.bf16.msra.mxu1 %v15205_v22  ;;  %v15303_v21 = vld [vmem:[%s21754_s1 + $0x1404] ss:$16 sps:$4 sm:$0xff]   ;;  %v15306_v22 = vld [vmem:[%s21754_s1 + $0x140c] ss:$16 sps:$4 sm:$0xff]  }
 0x24a   : > { %10561 = vmatprep.subr.bf16.mxu0 %v15210_v23  ;;  %11636 = vmatprep.subr.bf16.mxu1 %v15213_v24  ;;  %v15301_v23 = vld [vmem:[%s21754_s1 + $0x1400] ss:$16 sps:$4 sm:$0xff]   ;;  %v15304_v24 = vld [vmem:[%s21754_s1 + $0x1408] ss:$16 sps:$4 sm:$0xff]  }
 0x24b   : > { %10591 = vmatprep.mubr.bf16.mxu0 %v15300_v25  ;;  %11666 = vmatprep.mubr.bf16.mxu1 %v15300_v25  ;;  %v15309_v25 = vld [vmem:[%s21754_s1 + $0x1424] ss:$16 sps:$4 sm:$0xff]  }
 0x24d   : > { %10562 = vmatpush1.bf16.msra.mxu0 %v15208_v26  ;;  %11637 = vmatpush1.bf16.msra.mxu1 %v15211_v27  ;;  %v15312_v26 = vld [vmem:[%s21754_s1 + $0x142c] ss:$16 sps:$4 sm:$0xff]  }
 0x24e   : > { %10563 = vmatprep.subr.bf16.mxu0 %v15216_v28  ;;  %11638 = vmatprep.subr.bf16.mxu1 %v15219_v29  ;;  %v15399_v27 = vld [vmem:[%s16986_s26 + $0x54] ss:$200 sps:$4 sm:$0xff]   ;;  %v15307_v28 = vld [vmem:[%s21754_s1 + $0x1420] ss:$16 sps:$4 sm:$0xff]   ;;  %v15310_v29 = vld [vmem:[%s21754_s1 + $0x1428] ss:$16 sps:$4 sm:$0xff]  }
 0x251   : > { %10564 = vmatpush1.bf16.msra.mxu0 %v15214_v30  ;;  %11639 = vmatpush1.bf16.msra.mxu1 %v15217_v31  ;;  %v15315_v30 = vld [vmem:[%s21754_s1 + $0x1444] ss:$16 sps:$4 sm:$0xff]   ;;  %v15318_v31 = vld [vmem:[%s21754_s1 + $0x144c] ss:$16 sps:$4 sm:$0xff]  }
 0x252   : > { %10565 = vmatprep.subr.bf16.mxu0 %v15222_v32  ;;  %11640 = vmatprep.subr.bf16.mxu1 %v15225_v33  ;;  %v15313_v32 = vld [vmem:[%s21754_s1 + $0x1440] ss:$16 sps:$4 sm:$0xff]   ;;  %v15316_v33 = vld [vmem:[%s21754_s1 + $0x1448] ss:$16 sps:$4 sm:$0xff]  }
 0x255   : > { %10566 = vmatpush1.bf16.msra.mxu0 %v15220_v34  ;;  %11641 = vmatpush1.bf16.msra.mxu1 %v15223_v35  ;;  %v15321_v34 = vld [vmem:[%s21754_s1 + $0x1464] ss:$16 sps:$4 sm:$0xff]   ;;  %v15324_v35 = vld [vmem:[%s21754_s1 + $0x146c] ss:$16 sps:$4 sm:$0xff]  }
 0x256   : > { %10567 = vmatprep.subr.bf16.mxu0 %v15228_v36  ;;  %11642 = vmatprep.subr.bf16.mxu1 %v15231_v37  ;;  %v15319_v36 = vld [vmem:[%s21754_s1 + $0x1460] ss:$16 sps:$4 sm:$0xff]   ;;  %v15322_v37 = vld [vmem:[%s21754_s1 + $0x1468] ss:$16 sps:$4 sm:$0xff]  }
 0x259   : > { %10568 = vmatpush1.bf16.msra.mxu0 %v15226_v38  ;;  %11643 = vmatpush1.bf16.msra.mxu1 %v15229_v39  ;;  %v15327_v38 = vld [vmem:[%s21754_s1 + $0x1484] ss:$16 sps:$4 sm:$0xff]   ;;  %v15330_v39 = vld [vmem:[%s21754_s1 + $0x148c] ss:$16 sps:$4 sm:$0xff]  }
 0x25a   : > { %10569 = vmatprep.subr.bf16.mxu0 %v15234_v40  ;;  %11644 = vmatprep.subr.bf16.mxu1 %v15237_v41  ;;  %v15325_v40 = vld [vmem:[%s21754_s1 + $0x1480] ss:$16 sps:$4 sm:$0xff]   ;;  %v15328_v41 = vld [vmem:[%s21754_s1 + $0x1488] ss:$16 sps:$4 sm:$0xff]  }
 0x25d   : > { %10570 = vmatpush1.bf16.msra.mxu0 %v15232_v42  ;;  %11645 = vmatpush1.bf16.msra.mxu1 %v15235_v43  ;;  %v15333_v42 = vld [vmem:[%s21754_s1 + $0x14a4] ss:$16 sps:$4 sm:$0xff]   ;;  %v15336_v43 = vld [vmem:[%s21754_s1 + $0x14ac] ss:$16 sps:$4 sm:$0xff]  }
 0x25e   : > { %10571 = vmatprep.subr.bf16.mxu0 %v15240_v44  ;;  %11646 = vmatprep.subr.bf16.mxu1 %v15243_v45  ;;  %v15331_v44 = vld [vmem:[%s21754_s1 + $0x14a0] ss:$16 sps:$4 sm:$0xff]   ;;  %v15334_v45 = vld [vmem:[%s21754_s1 + $0x14a8] ss:$16 sps:$4 sm:$0xff]  }
 0x261   : > { %10572 = vmatpush1.bf16.msra.mxu0 %v15238_v46  ;;  %11647 = vmatpush1.bf16.msra.mxu1 %v15241_v47  ;;  %v15339_v46 = vld [vmem:[%s21754_s1 + $0x14c4] ss:$16 sps:$4 sm:$0xff]   ;;  %v15342_v47 = vld [vmem:[%s21754_s1 + $0x14cc] ss:$16 sps:$4 sm:$0xff]  }
 0x262   : > { %10573 = vmatprep.subr.bf16.mxu0 %v15246_v48  ;;  %11648 = vmatprep.subr.bf16.mxu1 %v15249_v49  ;;  %v15337_v48 = vld [vmem:[%s21754_s1 + $0x14c0] ss:$16 sps:$4 sm:$0xff]   ;;  %v15340_v49 = vld [vmem:[%s21754_s1 + $0x14c8] ss:$16 sps:$4 sm:$0xff]  }
 0x265   : > { %10574 = vmatpush1.bf16.msra.mxu0 %v15244_v50  ;;  %11649 = vmatpush1.bf16.msra.mxu1 %v15247_v51  ;;  %v15345_v50 = vld [vmem:[%s21754_s1 + $0x14e4] ss:$16 sps:$4 sm:$0xff]   ;;  %v15348_v51 = vld [vmem:[%s21754_s1 + $0x14ec] ss:$16 sps:$4 sm:$0xff]  }
 0x266   : > { %10575 = vmatprep.subr.bf16.mxu0 %v15252_v52  ;;  %11650 = vmatprep.subr.bf16.mxu1 %v15255_v53  ;;  %v15343_v52 = vld [vmem:[%s21754_s1 + $0x14e0] ss:$16 sps:$4 sm:$0xff]   ;;  %v15346_v53 = vld [vmem:[%s21754_s1 + $0x14e8] ss:$16 sps:$4 sm:$0xff]  }
 0x269   : > { %10576 = vmatpush1.bf16.msra.mxu0 %v15250_v54  ;;  %11651 = vmatpush1.bf16.msra.mxu1 %v15253_v55  ;;  %v15351_v54 = vld [vmem:[%s21754_s1 + $0x1504] ss:$16 sps:$4 sm:$0xff]   ;;  %v15354_v55 = vld [vmem:[%s21754_s1 + $0x150c] ss:$16 sps:$4 sm:$0xff]  }
 0x26a   : > { %10577 = vmatprep.subr.bf16.mxu0 %v15258_v56  ;;  %11652 = vmatprep.subr.bf16.mxu1 %v15261_v57  ;;  %v15349_v56 = vld [vmem:[%s21754_s1 + $0x1500] ss:$16 sps:$4 sm:$0xff]   ;;  %v15352_v57 = vld [vmem:[%s21754_s1 + $0x1508] ss:$16 sps:$4 sm:$0xff]  }
 0x26d   : > { %10578 = vmatpush1.bf16.msra.mxu0 %v15256_v58  ;;  %11653 = vmatpush1.bf16.msra.mxu1 %v15259_v59  ;;  %v15357_v58 = vld [vmem:[%s21754_s1 + $0x1524] ss:$16 sps:$4 sm:$0xff]   ;;  %v15360_v59 = vld [vmem:[%s21754_s1 + $0x152c] ss:$16 sps:$4 sm:$0xff]  }
 0x26e   : > { %10579 = vmatprep.subr.bf16.mxu0 %v15264_v60  ;;  %11654 = vmatprep.subr.bf16.mxu1 %v15267_v61  ;;  %v15355_v60 = vld [vmem:[%s21754_s1 + $0x1520] ss:$16 sps:$4 sm:$0xff]   ;;  %v15358_v61 = vld [vmem:[%s21754_s1 + $0x1528] ss:$16 sps:$4 sm:$0xff]  }
 0x271   : > { %10580 = vmatpush1.bf16.msra.mxu0 %v15262_v62  ;;  %11655 = vmatpush1.bf16.msra.mxu1 %v15265_v63  ;;  %v15363_v62 = vld [vmem:[%s21754_s1 + $0x1544] ss:$16 sps:$4 sm:$0xff]   ;;  %v15366_v63 = vld [vmem:[%s21754_s1 + $0x154c] ss:$16 sps:$4 sm:$0xff]  }
 0x272   : > { %10581 = vmatprep.subr.bf16.mxu0 %v15270_v0  ;;  %11656 = vmatprep.subr.bf16.mxu1 %v15273_v1  ;;  %v15361_v0 = vld [vmem:[%s21754_s1 + $0x1540] ss:$16 sps:$4 sm:$0xff]   ;;  %v15364_v1 = vld [vmem:[%s21754_s1 + $0x1548] ss:$16 sps:$4 sm:$0xff]  }
 0x275   : > { %10582 = vmatpush1.bf16.msra.mxu0 %v15268_v2  ;;  %11657 = vmatpush1.bf16.msra.mxu1 %v15271_v3  ;;  %v15369_v2 = vld [vmem:[%s21754_s1 + $0x1564] ss:$16 sps:$4 sm:$0xff]   ;;  %v15372_v3 = vld [vmem:[%s21754_s1 + $0x156c] ss:$16 sps:$4 sm:$0xff]  }
 0x276   : > { %10583 = vmatprep.subr.bf16.mxu0 %v15276_v4  ;;  %11658 = vmatprep.subr.bf16.mxu1 %v15279_v5  ;;  %v15367_v4 = vld [vmem:[%s21754_s1 + $0x1560] ss:$16 sps:$4 sm:$0xff]   ;;  %v15370_v5 = vld [vmem:[%s21754_s1 + $0x1568] ss:$16 sps:$4 sm:$0xff]  }
 0x279   : > { %10584 = vmatpush1.bf16.msra.mxu0 %v15274_v6  ;;  %11659 = vmatpush1.bf16.msra.mxu1 %v15277_v7  ;;  %v15375_v6 = vld [vmem:[%s21754_s1 + $0x1584] ss:$16 sps:$4 sm:$0xff]   ;;  %v15378_v7 = vld [vmem:[%s21754_s1 + $0x158c] ss:$16 sps:$4 sm:$0xff]  }
 0x27a   : > { %10585 = vmatprep.subr.bf16.mxu0 %v15282_v8  ;;  %11660 = vmatprep.subr.bf16.mxu1 %v15285_v9  ;;  %v15373_v8 = vld [vmem:[%s21754_s1 + $0x1580] ss:$16 sps:$4 sm:$0xff]   ;;  %v15376_v9 = vld [vmem:[%s21754_s1 + $0x1588] ss:$16 sps:$4 sm:$0xff]  }
 0x27d   : > { %10586 = vmatpush1.bf16.msra.mxu0 %v15280_v10  ;;  %11661 = vmatpush1.bf16.msra.mxu1 %v15283_v11  ;;  %v15381_v10 = vld [vmem:[%s21754_s1 + $0x15a4] ss:$16 sps:$4 sm:$0xff]   ;;  %v15384_v11 = vld [vmem:[%s21754_s1 + $0x15ac] ss:$16 sps:$4 sm:$0xff]  }
 0x27e   : > { %10587 = vmatprep.subr.bf16.mxu0 %v15288_v12  ;;  %11662 = vmatprep.subr.bf16.mxu1 %v15291_v13  ;;  %v15379_v12 = vld [vmem:[%s21754_s1 + $0x15a0] ss:$16 sps:$4 sm:$0xff]   ;;  %v15382_v13 = vld [vmem:[%s21754_s1 + $0x15a8] ss:$16 sps:$4 sm:$0xff]  }
 0x281   : > { %10588 = vmatpush1.bf16.msra.mxu0 %v15286_v14  ;;  %11663 = vmatpush1.bf16.msra.mxu1 %v15289_v15  ;;  %v15387_v14 = vld [vmem:[%s21754_s1 + $0x15c4] ss:$16 sps:$4 sm:$0xff]   ;;  %v15390_v15 = vld [vmem:[%s21754_s1 + $0x15cc] ss:$16 sps:$4 sm:$0xff]  }
 0x282   : > { %10589 = vmatprep.subr.bf16.mxu0 %v15294_v16  ;;  %11664 = vmatprep.subr.bf16.mxu1 %v15297_v17  ;;  %v15385_v16 = vld [vmem:[%s21754_s1 + $0x15c0] ss:$16 sps:$4 sm:$0xff]   ;;  %v15388_v17 = vld [vmem:[%s21754_s1 + $0x15c8] ss:$16 sps:$4 sm:$0xff]  }
 0x285   : > { %10590 = vmatpush1.bf16.msra.mxu0 %v15292_v18  ;;  %11665 = vmatpush1.bf16.msra.mxu1 %v15295_v19  ;;  %v15393_v18 = vld [vmem:[%s21754_s1 + $0x15e4] ss:$16 sps:$4 sm:$0xff]   ;;  %v15396_v19 = vld [vmem:[%s21754_s1 + $0x15ec] ss:$16 sps:$4 sm:$0xff]  }
 0x286   : > { %10602 = vmatprep.subr.bf16.mxu0 %v15303_v21  ;;  %11677 = vmatprep.subr.bf16.mxu1 %v15306_v22  ;;  %v15394_v21 = vld [vmem:[%s21754_s1 + $0x15e8] ss:$16 sps:$4 sm:$0xff]  }
 0x287   : > { %v15397_v22 = vld [vmem:[%s16986_s26 + $0x50] ss:$200 sps:$4 sm:$0xff]  }
 0x288   : > { %10592 = vmatmul.mubr.bf16.vlgmr.msra.gmra.mrb[0].mxu0 %v15298_v20  ;;  %11667 = vmatmul.mubr.bf16.vlgmr.msra.gmra.mrb[0].mxu1 %v15298_v20  ;;  %v15391_v20 = vld [vmem:[%s21754_s1 + $0x15e0] ss:$16 sps:$4 sm:$0xff]  }
 0x289   : > { %10603 = vmatpush1.bf16.msra.mxu0 %v15301_v23  ;;  %11678 = vmatpush1.bf16.msra.mxu1 %v15304_v24  ;;  %v15402_v23 = vld [vmem:[%s21754_s1 + $0x1604] ss:$16 sps:$4 sm:$0xff]   ;;  %v15405_v24 = vld [vmem:[%s21754_s1 + $0x160c] ss:$16 sps:$4 sm:$0xff]  }
 0x28a   : > { %10604 = vmatprep.subr.bf16.mxu0 %v15309_v25  ;;  %11679 = vmatprep.subr.bf16.mxu1 %v15312_v26  ;;  %v15400_v25 = vld [vmem:[%s21754_s1 + $0x1600] ss:$16 sps:$4 sm:$0xff]   ;;  %v15403_v26 = vld [vmem:[%s21754_s1 + $0x1608] ss:$16 sps:$4 sm:$0xff]  }
 0x28b   : > { %10634 = vmatprep.mubr.bf16.mxu0 %v15399_v27  ;;  %11709 = vmatprep.mubr.bf16.mxu1 %v15399_v27  ;;  %v15408_v27 = vld [vmem:[%s21754_s1 + $0x1624] ss:$16 sps:$4 sm:$0xff]  }
 0x28d   : > { %10605 = vmatpush1.bf16.msra.mxu0 %v15307_v28  ;;  %11680 = vmatpush1.bf16.msra.mxu1 %v15310_v29  ;;  %v15411_v28 = vld [vmem:[%s21754_s1 + $0x162c] ss:$16 sps:$4 sm:$0xff]  }
 0x28e   : > { %10606 = vmatprep.subr.bf16.mxu0 %v15315_v30  ;;  %11681 = vmatprep.subr.bf16.mxu1 %v15318_v31  ;;  %v15498_v29 = vld [vmem:[%s16986_s26 + $0x5c] ss:$200 sps:$4 sm:$0xff]   ;;  %v15406_v30 = vld [vmem:[%s21754_s1 + $0x1620] ss:$16 sps:$4 sm:$0xff]   ;;  %v15409_v31 = vld [vmem:[%s21754_s1 + $0x1628] ss:$16 sps:$4 sm:$0xff]  }
 0x291   : > { %10607 = vmatpush1.bf16.msra.mxu0 %v15313_v32  ;;  %11682 = vmatpush1.bf16.msra.mxu1 %v15316_v33  ;;  %v15414_v32 = vld [vmem:[%s21754_s1 + $0x1644] ss:$16 sps:$4 sm:$0xff]   ;;  %v15417_v33 = vld [vmem:[%s21754_s1 + $0x164c] ss:$16 sps:$4 sm:$0xff]  }
 0x292   : > { %10608 = vmatprep.subr.bf16.mxu0 %v15321_v34  ;;  %11683 = vmatprep.subr.bf16.mxu1 %v15324_v35  ;;  %v15412_v34 = vld [vmem:[%s21754_s1 + $0x1640] ss:$16 sps:$4 sm:$0xff]   ;;  %v15415_v35 = vld [vmem:[%s21754_s1 + $0x1648] ss:$16 sps:$4 sm:$0xff]  }
 0x295   : > { %10609 = vmatpush1.bf16.msra.mxu0 %v15319_v36  ;;  %11684 = vmatpush1.bf16.msra.mxu1 %v15322_v37  ;;  %v15420_v36 = vld [vmem:[%s21754_s1 + $0x1664] ss:$16 sps:$4 sm:$0xff]   ;;  %v15423_v37 = vld [vmem:[%s21754_s1 + $0x166c] ss:$16 sps:$4 sm:$0xff]  }
 0x296   : > { %10610 = vmatprep.subr.bf16.mxu0 %v15327_v38  ;;  %11685 = vmatprep.subr.bf16.mxu1 %v15330_v39  ;;  %v15418_v38 = vld [vmem:[%s21754_s1 + $0x1660] ss:$16 sps:$4 sm:$0xff]   ;;  %v15421_v39 = vld [vmem:[%s21754_s1 + $0x1668] ss:$16 sps:$4 sm:$0xff]  }
 0x299   : > { %10611 = vmatpush1.bf16.msra.mxu0 %v15325_v40  ;;  %11686 = vmatpush1.bf16.msra.mxu1 %v15328_v41  ;;  %v15426_v40 = vld [vmem:[%s21754_s1 + $0x1684] ss:$16 sps:$4 sm:$0xff]   ;;  %v15429_v41 = vld [vmem:[%s21754_s1 + $0x168c] ss:$16 sps:$4 sm:$0xff]  }
 0x29a   : > { %10612 = vmatprep.subr.bf16.mxu0 %v15333_v42  ;;  %11687 = vmatprep.subr.bf16.mxu1 %v15336_v43  ;;  %v15424_v42 = vld [vmem:[%s21754_s1 + $0x1680] ss:$16 sps:$4 sm:$0xff]   ;;  %v15427_v43 = vld [vmem:[%s21754_s1 + $0x1688] ss:$16 sps:$4 sm:$0xff]  }
 0x29d   : > { %10613 = vmatpush1.bf16.msra.mxu0 %v15331_v44  ;;  %11688 = vmatpush1.bf16.msra.mxu1 %v15334_v45  ;;  %v15432_v44 = vld [vmem:[%s21754_s1 + $0x16a4] ss:$16 sps:$4 sm:$0xff]   ;;  %v15435_v45 = vld [vmem:[%s21754_s1 + $0x16ac] ss:$16 sps:$4 sm:$0xff]  }
 0x29e   : > { %10614 = vmatprep.subr.bf16.mxu0 %v15339_v46  ;;  %11689 = vmatprep.subr.bf16.mxu1 %v15342_v47  ;;  %v15430_v46 = vld [vmem:[%s21754_s1 + $0x16a0] ss:$16 sps:$4 sm:$0xff]   ;;  %v15433_v47 = vld [vmem:[%s21754_s1 + $0x16a8] ss:$16 sps:$4 sm:$0xff]  }
 0x2a1   : > { %10615 = vmatpush1.bf16.msra.mxu0 %v15337_v48  ;;  %11690 = vmatpush1.bf16.msra.mxu1 %v15340_v49  ;;  %v15438_v48 = vld [vmem:[%s21754_s1 + $0x16c4] ss:$16 sps:$4 sm:$0xff]   ;;  %v15441_v49 = vld [vmem:[%s21754_s1 + $0x16cc] ss:$16 sps:$4 sm:$0xff]  }
 0x2a2   : > { %10616 = vmatprep.subr.bf16.mxu0 %v15345_v50  ;;  %11691 = vmatprep.subr.bf16.mxu1 %v15348_v51  ;;  %v15436_v50 = vld [vmem:[%s21754_s1 + $0x16c0] ss:$16 sps:$4 sm:$0xff]   ;;  %v15439_v51 = vld [vmem:[%s21754_s1 + $0x16c8] ss:$16 sps:$4 sm:$0xff]  }
 0x2a5   : > { %10617 = vmatpush1.bf16.msra.mxu0 %v15343_v52  ;;  %11692 = vmatpush1.bf16.msra.mxu1 %v15346_v53  ;;  %v15444_v52 = vld [vmem:[%s21754_s1 + $0x16e4] ss:$16 sps:$4 sm:$0xff]   ;;  %v15447_v53 = vld [vmem:[%s21754_s1 + $0x16ec] ss:$16 sps:$4 sm:$0xff]  }
 0x2a6   : > { %10618 = vmatprep.subr.bf16.mxu0 %v15351_v54  ;;  %11693 = vmatprep.subr.bf16.mxu1 %v15354_v55  ;;  %v15442_v54 = vld [vmem:[%s21754_s1 + $0x16e0] ss:$16 sps:$4 sm:$0xff]   ;;  %v15445_v55 = vld [vmem:[%s21754_s1 + $0x16e8] ss:$16 sps:$4 sm:$0xff]  }
 0x2a9   : > { %10619 = vmatpush1.bf16.msra.mxu0 %v15349_v56  ;;  %11694 = vmatpush1.bf16.msra.mxu1 %v15352_v57  ;;  %v15450_v56 = vld [vmem:[%s21754_s1 + $0x1704] ss:$16 sps:$4 sm:$0xff]   ;;  %v15453_v57 = vld [vmem:[%s21754_s1 + $0x170c] ss:$16 sps:$4 sm:$0xff]  }
 0x2aa   : > { %10620 = vmatprep.subr.bf16.mxu0 %v15357_v58  ;;  %11695 = vmatprep.subr.bf16.mxu1 %v15360_v59  ;;  %v15448_v58 = vld [vmem:[%s21754_s1 + $0x1700] ss:$16 sps:$4 sm:$0xff]   ;;  %v15451_v59 = vld [vmem:[%s21754_s1 + $0x1708] ss:$16 sps:$4 sm:$0xff]  }
 0x2ad   : > { %10621 = vmatpush1.bf16.msra.mxu0 %v15355_v60  ;;  %11696 = vmatpush1.bf16.msra.mxu1 %v15358_v61  ;;  %v15456_v60 = vld [vmem:[%s21754_s1 + $0x1724] ss:$16 sps:$4 sm:$0xff]   ;;  %v15459_v61 = vld [vmem:[%s21754_s1 + $0x172c] ss:$16 sps:$4 sm:$0xff]  }
 0x2ae   : > { %10622 = vmatprep.subr.bf16.mxu0 %v15363_v62  ;;  %11697 = vmatprep.subr.bf16.mxu1 %v15366_v63  ;;  %v15454_v62 = vld [vmem:[%s21754_s1 + $0x1720] ss:$16 sps:$4 sm:$0xff]   ;;  %v15457_v63 = vld [vmem:[%s21754_s1 + $0x1728] ss:$16 sps:$4 sm:$0xff]  }
 0x2b1   : > { %10623 = vmatpush1.bf16.msra.mxu0 %v15361_v0  ;;  %11698 = vmatpush1.bf16.msra.mxu1 %v15364_v1  ;;  %v15462_v0 = vld [vmem:[%s21754_s1 + $0x1744] ss:$16 sps:$4 sm:$0xff]   ;;  %v15465_v1 = vld [vmem:[%s21754_s1 + $0x174c] ss:$16 sps:$4 sm:$0xff]  }
 0x2b2   : > { %10624 = vmatprep.subr.bf16.mxu0 %v15369_v2  ;;  %11699 = vmatprep.subr.bf16.mxu1 %v15372_v3  ;;  %v15460_v2 = vld [vmem:[%s21754_s1 + $0x1740] ss:$16 sps:$4 sm:$0xff]   ;;  %v15463_v3 = vld [vmem:[%s21754_s1 + $0x1748] ss:$16 sps:$4 sm:$0xff]  }
 0x2b5   : > { %10625 = vmatpush1.bf16.msra.mxu0 %v15367_v4  ;;  %11700 = vmatpush1.bf16.msra.mxu1 %v15370_v5  ;;  %v15468_v4 = vld [vmem:[%s21754_s1 + $0x1764] ss:$16 sps:$4 sm:$0xff]   ;;  %v15471_v5 = vld [vmem:[%s21754_s1 + $0x176c] ss:$16 sps:$4 sm:$0xff]  }
 0x2b6   : > { %10626 = vmatprep.subr.bf16.mxu0 %v15375_v6  ;;  %11701 = vmatprep.subr.bf16.mxu1 %v15378_v7  ;;  %v15466_v6 = vld [vmem:[%s21754_s1 + $0x1760] ss:$16 sps:$4 sm:$0xff]   ;;  %v15469_v7 = vld [vmem:[%s21754_s1 + $0x1768] ss:$16 sps:$4 sm:$0xff]  }
 0x2b9   : > { %10627 = vmatpush1.bf16.msra.mxu0 %v15373_v8  ;;  %11702 = vmatpush1.bf16.msra.mxu1 %v15376_v9  ;;  %v15474_v8 = vld [vmem:[%s21754_s1 + $0x1784] ss:$16 sps:$4 sm:$0xff]   ;;  %v15477_v9 = vld [vmem:[%s21754_s1 + $0x178c] ss:$16 sps:$4 sm:$0xff]  }
 0x2ba   : > { %10628 = vmatprep.subr.bf16.mxu0 %v15381_v10  ;;  %11703 = vmatprep.subr.bf16.mxu1 %v15384_v11  ;;  %v15472_v10 = vld [vmem:[%s21754_s1 + $0x1780] ss:$16 sps:$4 sm:$0xff]   ;;  %v15475_v11 = vld [vmem:[%s21754_s1 + $0x1788] ss:$16 sps:$4 sm:$0xff]  }
 0x2bd   : > { %10629 = vmatpush1.bf16.msra.mxu0 %v15379_v12  ;;  %11704 = vmatpush1.bf16.msra.mxu1 %v15382_v13  ;;  %v15480_v12 = vld [vmem:[%s21754_s1 + $0x17a4] ss:$16 sps:$4 sm:$0xff]   ;;  %v15483_v13 = vld [vmem:[%s21754_s1 + $0x17ac] ss:$16 sps:$4 sm:$0xff]  }
 0x2be   : > { %10630 = vmatprep.subr.bf16.mxu0 %v15387_v14  ;;  %11705 = vmatprep.subr.bf16.mxu1 %v15390_v15  ;;  %v15478_v14 = vld [vmem:[%s21754_s1 + $0x17a0] ss:$16 sps:$4 sm:$0xff]   ;;  %v15481_v15 = vld [vmem:[%s21754_s1 + $0x17a8] ss:$16 sps:$4 sm:$0xff]  }
 0x2c1   : > { %10631 = vmatpush1.bf16.msra.mxu0 %v15385_v16  ;;  %11706 = vmatpush1.bf16.msra.mxu1 %v15388_v17  ;;  %v15486_v16 = vld [vmem:[%s21754_s1 + $0x17c4] ss:$16 sps:$4 sm:$0xff]   ;;  %v15489_v17 = vld [vmem:[%s21754_s1 + $0x17cc] ss:$16 sps:$4 sm:$0xff]  }
 0x2c2   : > { %10632 = vmatprep.subr.bf16.mxu0 %v15393_v18  ;;  %11707 = vmatprep.subr.bf16.mxu1 %v15396_v19  ;;  %v15484_v18 = vld [vmem:[%s21754_s1 + $0x17c0] ss:$16 sps:$4 sm:$0xff]   ;;  %v15487_v19 = vld [vmem:[%s21754_s1 + $0x17c8] ss:$16 sps:$4 sm:$0xff]  }
 0x2c5   : > { %10633 = vmatpush1.bf16.msra.mxu0 %v15391_v20  ;;  %11708 = vmatpush1.bf16.msra.mxu1 %v15394_v21  ;;  %v15492_v20 = vld [vmem:[%s21754_s1 + $0x17e4] ss:$16 sps:$4 sm:$0xff]   ;;  %v15495_v21 = vld [vmem:[%s21754_s1 + $0x17ec] ss:$16 sps:$4 sm:$0xff]  }
 0x2c6   : > { %10645 = vmatprep.subr.bf16.mxu0 %v15402_v23  ;;  %11720 = vmatprep.subr.bf16.mxu1 %v15405_v24  ;;  %v15493_v23 = vld [vmem:[%s21754_s1 + $0x17e8] ss:$16 sps:$4 sm:$0xff]  }
 0x2c7   : > { %v15496_v24 = vld [vmem:[%s16986_s26 + $0x58] ss:$200 sps:$4 sm:$0xff]  }
 0x2c8   : > { %10635 = vmatmul.mubr.bf16.vlgmr.msra.gmra.mrb[0].mxu0 %v15397_v22  ;;  %11710 = vmatmul.mubr.bf16.vlgmr.msra.gmra.mrb[0].mxu1 %v15397_v22  ;;  %v15490_v22 = vld [vmem:[%s21754_s1 + $0x17e0] ss:$16 sps:$4 sm:$0xff]  }
 0x2c9   : > { %10646 = vmatpush1.bf16.msra.mxu0 %v15400_v25  ;;  %11721 = vmatpush1.bf16.msra.mxu1 %v15403_v26  ;;  %v15501_v25 = vld [vmem:[%s21754_s1 + $0x1804] ss:$16 sps:$4 sm:$0xff]   ;;  %v15504_v26 = vld [vmem:[%s21754_s1 + $0x180c] ss:$16 sps:$4 sm:$0xff]  }
 0x2ca   : > { %10647 = vmatprep.subr.bf16.mxu0 %v15408_v27  ;;  %11722 = vmatprep.subr.bf16.mxu1 %v15411_v28  ;;  %v15499_v27 = vld [vmem:[%s21754_s1 + $0x1800] ss:$16 sps:$4 sm:$0xff]   ;;  %v15502_v28 = vld [vmem:[%s21754_s1 + $0x1808] ss:$16 sps:$4 sm:$0xff]  }
 0x2cb   : > { %10677 = vmatprep.mubr.bf16.mxu0 %v15498_v29  ;;  %11752 = vmatprep.mubr.bf16.mxu1 %v15498_v29  ;;  %v15507_v29 = vld [vmem:[%s21754_s1 + $0x1824] ss:$16 sps:$4 sm:$0xff]  }
 0x2cd   : > { %10648 = vmatpush1.bf16.msra.mxu0 %v15406_v30  ;;  %11723 = vmatpush1.bf16.msra.mxu1 %v15409_v31  ;;  %v15510_v30 = vld [vmem:[%s21754_s1 + $0x182c] ss:$16 sps:$4 sm:$0xff]  }
 0x2ce   : > { %10649 = vmatprep.subr.bf16.mxu0 %v15414_v32  ;;  %11724 = vmatprep.subr.bf16.mxu1 %v15417_v33  ;;  %v15597_v31 = vld [vmem:[%s16986_s26 + $0x64] ss:$200 sps:$4 sm:$0xff]   ;;  %v15505_v32 = vld [vmem:[%s21754_s1 + $0x1820] ss:$16 sps:$4 sm:$0xff]   ;;  %v15508_v33 = vld [vmem:[%s21754_s1 + $0x1828] ss:$16 sps:$4 sm:$0xff]  }
 0x2d1   : > { %10650 = vmatpush1.bf16.msra.mxu0 %v15412_v34  ;;  %11725 = vmatpush1.bf16.msra.mxu1 %v15415_v35  ;;  %v15513_v34 = vld [vmem:[%s21754_s1 + $0x1844] ss:$16 sps:$4 sm:$0xff]   ;;  %v15516_v35 = vld [vmem:[%s21754_s1 + $0x184c] ss:$16 sps:$4 sm:$0xff]  }
 0x2d2   : > { %10651 = vmatprep.subr.bf16.mxu0 %v15420_v36  ;;  %11726 = vmatprep.subr.bf16.mxu1 %v15423_v37  ;;  %v15511_v36 = vld [vmem:[%s21754_s1 + $0x1840] ss:$16 sps:$4 sm:$0xff]   ;;  %v15514_v37 = vld [vmem:[%s21754_s1 + $0x1848] ss:$16 sps:$4 sm:$0xff]  }
 0x2d5   : > { %10652 = vmatpush1.bf16.msra.mxu0 %v15418_v38  ;;  %11727 = vmatpush1.bf16.msra.mxu1 %v15421_v39  ;;  %v15519_v38 = vld [vmem:[%s21754_s1 + $0x1864] ss:$16 sps:$4 sm:$0xff]   ;;  %v15522_v39 = vld [vmem:[%s21754_s1 + $0x186c] ss:$16 sps:$4 sm:$0xff]  }
 0x2d6   : > { %10653 = vmatprep.subr.bf16.mxu0 %v15426_v40  ;;  %11728 = vmatprep.subr.bf16.mxu1 %v15429_v41  ;;  %v15517_v40 = vld [vmem:[%s21754_s1 + $0x1860] ss:$16 sps:$4 sm:$0xff]   ;;  %v15520_v41 = vld [vmem:[%s21754_s1 + $0x1868] ss:$16 sps:$4 sm:$0xff]  }
 0x2d9   : > { %10654 = vmatpush1.bf16.msra.mxu0 %v15424_v42  ;;  %11729 = vmatpush1.bf16.msra.mxu1 %v15427_v43  ;;  %v15525_v42 = vld [vmem:[%s21754_s1 + $0x1884] ss:$16 sps:$4 sm:$0xff]   ;;  %v15528_v43 = vld [vmem:[%s21754_s1 + $0x188c] ss:$16 sps:$4 sm:$0xff]  }
 0x2da   : > { %10655 = vmatprep.subr.bf16.mxu0 %v15432_v44  ;;  %11730 = vmatprep.subr.bf16.mxu1 %v15435_v45  ;;  %v15523_v44 = vld [vmem:[%s21754_s1 + $0x1880] ss:$16 sps:$4 sm:$0xff]   ;;  %v15526_v45 = vld [vmem:[%s21754_s1 + $0x1888] ss:$16 sps:$4 sm:$0xff]  }
 0x2dd   : > { %10656 = vmatpush1.bf16.msra.mxu0 %v15430_v46  ;;  %11731 = vmatpush1.bf16.msra.mxu1 %v15433_v47  ;;  %v15531_v46 = vld [vmem:[%s21754_s1 + $0x18a4] ss:$16 sps:$4 sm:$0xff]   ;;  %v15534_v47 = vld [vmem:[%s21754_s1 + $0x18ac] ss:$16 sps:$4 sm:$0xff]  }
 0x2de   : > { %10657 = vmatprep.subr.bf16.mxu0 %v15438_v48  ;;  %11732 = vmatprep.subr.bf16.mxu1 %v15441_v49  ;;  %v15529_v48 = vld [vmem:[%s21754_s1 + $0x18a0] ss:$16 sps:$4 sm:$0xff]   ;;  %v15532_v49 = vld [vmem:[%s21754_s1 + $0x18a8] ss:$16 sps:$4 sm:$0xff]  }
 0x2e1   : > { %10658 = vmatpush1.bf16.msra.mxu0 %v15436_v50  ;;  %11733 = vmatpush1.bf16.msra.mxu1 %v15439_v51  ;;  %v15537_v50 = vld [vmem:[%s21754_s1 + $0x18c4] ss:$16 sps:$4 sm:$0xff]   ;;  %v15540_v51 = vld [vmem:[%s21754_s1 + $0x18cc] ss:$16 sps:$4 sm:$0xff]  }
 0x2e2   : > { %10659 = vmatprep.subr.bf16.mxu0 %v15444_v52  ;;  %11734 = vmatprep.subr.bf16.mxu1 %v15447_v53  ;;  %v15535_v52 = vld [vmem:[%s21754_s1 + $0x18c0] ss:$16 sps:$4 sm:$0xff]   ;;  %v15538_v53 = vld [vmem:[%s21754_s1 + $0x18c8] ss:$16 sps:$4 sm:$0xff]  }
 0x2e5   : > { %10660 = vmatpush1.bf16.msra.mxu0 %v15442_v54  ;;  %11735 = vmatpush1.bf16.msra.mxu1 %v15445_v55  ;;  %v15543_v54 = vld [vmem:[%s21754_s1 + $0x18e4] ss:$16 sps:$4 sm:$0xff]   ;;  %v15546_v55 = vld [vmem:[%s21754_s1 + $0x18ec] ss:$16 sps:$4 sm:$0xff]  }
 0x2e6   : > { %10661 = vmatprep.subr.bf16.mxu0 %v15450_v56  ;;  %11736 = vmatprep.subr.bf16.mxu1 %v15453_v57  ;;  %v15541_v56 = vld [vmem:[%s21754_s1 + $0x18e0] ss:$16 sps:$4 sm:$0xff]   ;;  %v15544_v57 = vld [vmem:[%s21754_s1 + $0x18e8] ss:$16 sps:$4 sm:$0xff]  }
 0x2e9   : > { %10662 = vmatpush1.bf16.msra.mxu0 %v15448_v58  ;;  %11737 = vmatpush1.bf16.msra.mxu1 %v15451_v59  ;;  %v15549_v58 = vld [vmem:[%s21754_s1 + $0x1904] ss:$16 sps:$4 sm:$0xff]   ;;  %v15552_v59 = vld [vmem:[%s21754_s1 + $0x190c] ss:$16 sps:$4 sm:$0xff]  }
 0x2ea   : > { %10663 = vmatprep.subr.bf16.mxu0 %v15456_v60  ;;  %11738 = vmatprep.subr.bf16.mxu1 %v15459_v61  ;;  %v15547_v60 = vld [vmem:[%s21754_s1 + $0x1900] ss:$16 sps:$4 sm:$0xff]   ;;  %v15550_v61 = vld [vmem:[%s21754_s1 + $0x1908] ss:$16 sps:$4 sm:$0xff]  }
 0x2ed   : > { %10664 = vmatpush1.bf16.msra.mxu0 %v15454_v62  ;;  %11739 = vmatpush1.bf16.msra.mxu1 %v15457_v63  ;;  %v15555_v62 = vld [vmem:[%s21754_s1 + $0x1924] ss:$16 sps:$4 sm:$0xff]   ;;  %v15558_v63 = vld [vmem:[%s21754_s1 + $0x192c] ss:$16 sps:$4 sm:$0xff]  }
 0x2ee   : > { %10665 = vmatprep.subr.bf16.mxu0 %v15462_v0  ;;  %11740 = vmatprep.subr.bf16.mxu1 %v15465_v1  ;;  %v15553_v0 = vld [vmem:[%s21754_s1 + $0x1920] ss:$16 sps:$4 sm:$0xff]   ;;  %v15556_v1 = vld [vmem:[%s21754_s1 + $0x1928] ss:$16 sps:$4 sm:$0xff]  }
 0x2f1   : > { %10666 = vmatpush1.bf16.msra.mxu0 %v15460_v2  ;;  %11741 = vmatpush1.bf16.msra.mxu1 %v15463_v3  ;;  %v15561_v2 = vld [vmem:[%s21754_s1 + $0x1944] ss:$16 sps:$4 sm:$0xff]   ;;  %v15564_v3 = vld [vmem:[%s21754_s1 + $0x194c] ss:$16 sps:$4 sm:$0xff]  }
 0x2f2   : > { %10667 = vmatprep.subr.bf16.mxu0 %v15468_v4  ;;  %11742 = vmatprep.subr.bf16.mxu1 %v15471_v5  ;;  %v15559_v4 = vld [vmem:[%s21754_s1 + $0x1940] ss:$16 sps:$4 sm:$0xff]   ;;  %v15562_v5 = vld [vmem:[%s21754_s1 + $0x1948] ss:$16 sps:$4 sm:$0xff]  }
 0x2f5   : > { %10668 = vmatpush1.bf16.msra.mxu0 %v15466_v6  ;;  %11743 = vmatpush1.bf16.msra.mxu1 %v15469_v7  ;;  %v15567_v6 = vld [vmem:[%s21754_s1 + $0x1964] ss:$16 sps:$4 sm:$0xff]   ;;  %v15570_v7 = vld [vmem:[%s21754_s1 + $0x196c] ss:$16 sps:$4 sm:$0xff]  }
 0x2f6   : > { %10669 = vmatprep.subr.bf16.mxu0 %v15474_v8  ;;  %11744 = vmatprep.subr.bf16.mxu1 %v15477_v9  ;;  %v15565_v8 = vld [vmem:[%s21754_s1 + $0x1960] ss:$16 sps:$4 sm:$0xff]   ;;  %v15568_v9 = vld [vmem:[%s21754_s1 + $0x1968] ss:$16 sps:$4 sm:$0xff]  }
 0x2f9   : > { %10670 = vmatpush1.bf16.msra.mxu0 %v15472_v10  ;;  %11745 = vmatpush1.bf16.msra.mxu1 %v15475_v11  ;;  %v15573_v10 = vld [vmem:[%s21754_s1 + $0x1984] ss:$16 sps:$4 sm:$0xff]   ;;  %v15576_v11 = vld [vmem:[%s21754_s1 + $0x198c] ss:$16 sps:$4 sm:$0xff]  }
 0x2fa   : > { %10671 = vmatprep.subr.bf16.mxu0 %v15480_v12  ;;  %11746 = vmatprep.subr.bf16.mxu1 %v15483_v13  ;;  %v15571_v12 = vld [vmem:[%s21754_s1 + $0x1980] ss:$16 sps:$4 sm:$0xff]   ;;  %v15574_v13 = vld [vmem:[%s21754_s1 + $0x1988] ss:$16 sps:$4 sm:$0xff]  }
 0x2fd   : > { %10672 = vmatpush1.bf16.msra.mxu0 %v15478_v14  ;;  %11747 = vmatpush1.bf16.msra.mxu1 %v15481_v15  ;;  %v15579_v14 = vld [vmem:[%s21754_s1 + $0x19a4] ss:$16 sps:$4 sm:$0xff]   ;;  %v15582_v15 = vld [vmem:[%s21754_s1 + $0x19ac] ss:$16 sps:$4 sm:$0xff]  }
 0x2fe   : > { %10673 = vmatprep.subr.bf16.mxu0 %v15486_v16  ;;  %11748 = vmatprep.subr.bf16.mxu1 %v15489_v17  ;;  %v15577_v16 = vld [vmem:[%s21754_s1 + $0x19a0] ss:$16 sps:$4 sm:$0xff]   ;;  %v15580_v17 = vld [vmem:[%s21754_s1 + $0x19a8] ss:$16 sps:$4 sm:$0xff]  }
 0x301   : > { %10674 = vmatpush1.bf16.msra.mxu0 %v15484_v18  ;;  %11749 = vmatpush1.bf16.msra.mxu1 %v15487_v19  ;;  %v15585_v18 = vld [vmem:[%s21754_s1 + $0x19c4] ss:$16 sps:$4 sm:$0xff]   ;;  %v15588_v19 = vld [vmem:[%s21754_s1 + $0x19cc] ss:$16 sps:$4 sm:$0xff]  }
 0x302   : > { %10675 = vmatprep.subr.bf16.mxu0 %v15492_v20  ;;  %11750 = vmatprep.subr.bf16.mxu1 %v15495_v21  ;;  %v15583_v20 = vld [vmem:[%s21754_s1 + $0x19c0] ss:$16 sps:$4 sm:$0xff]   ;;  %v15586_v21 = vld [vmem:[%s21754_s1 + $0x19c8] ss:$16 sps:$4 sm:$0xff]  }
 0x305   : > { %10676 = vmatpush1.bf16.msra.mxu0 %v15490_v22  ;;  %11751 = vmatpush1.bf16.msra.mxu1 %v15493_v23  ;;  %v15591_v22 = vld [vmem:[%s21754_s1 + $0x19e4] ss:$16 sps:$4 sm:$0xff]   ;;  %v15594_v23 = vld [vmem:[%s21754_s1 + $0x19ec] ss:$16 sps:$4 sm:$0xff]  }
 0x306   : > { %10688 = vmatprep.subr.bf16.mxu0 %v15501_v25  ;;  %11763 = vmatprep.subr.bf16.mxu1 %v15504_v26  ;;  %v15592_v25 = vld [vmem:[%s21754_s1 + $0x19e8] ss:$16 sps:$4 sm:$0xff]  }
 0x307   : > { %v15595_v26 = vld [vmem:[%s16986_s26 + $0x60] ss:$200 sps:$4 sm:$0xff]  }
 0x308   : > { %10678 = vmatmul.mubr.bf16.vlgmr.msra.gmra.mrb[0].mxu0 %v15496_v24  ;;  %11753 = vmatmul.mubr.bf16.vlgmr.msra.gmra.mrb[0].mxu1 %v15496_v24  ;;  %v15589_v24 = vld [vmem:[%s21754_s1 + $0x19e0] ss:$16 sps:$4 sm:$0xff]  }
 0x309   : > { %10689 = vmatpush1.bf16.msra.mxu0 %v15499_v27  ;;  %11764 = vmatpush1.bf16.msra.mxu1 %v15502_v28  ;;  %v15600_v27 = vld [vmem:[%s21754_s1 + $0x1a04] ss:$16 sps:$4 sm:$0xff]   ;;  %v15603_v28 = vld [vmem:[%s21754_s1 + $0x1a0c] ss:$16 sps:$4 sm:$0xff]  }
 0x30a   : > { %10690 = vmatprep.subr.bf16.mxu0 %v15507_v29  ;;  %11765 = vmatprep.subr.bf16.mxu1 %v15510_v30  ;;  %v15598_v29 = vld [vmem:[%s21754_s1 + $0x1a00] ss:$16 sps:$4 sm:$0xff]   ;;  %v15601_v30 = vld [vmem:[%s21754_s1 + $0x1a08] ss:$16 sps:$4 sm:$0xff]  }
 0x30b   : > { %10720 = vmatprep.mubr.bf16.mxu0 %v15597_v31  ;;  %11795 = vmatprep.mubr.bf16.mxu1 %v15597_v31  ;;  %v15606_v31 = vld [vmem:[%s21754_s1 + $0x1a24] ss:$16 sps:$4 sm:$0xff]  }
 0x30d   : > { %10691 = vmatpush1.bf16.msra.mxu0 %v15505_v32  ;;  %11766 = vmatpush1.bf16.msra.mxu1 %v15508_v33  ;;  %v15609_v32 = vld [vmem:[%s21754_s1 + $0x1a2c] ss:$16 sps:$4 sm:$0xff]  }
 0x30e   : > { %10692 = vmatprep.subr.bf16.mxu0 %v15513_v34  ;;  %11767 = vmatprep.subr.bf16.mxu1 %v15516_v35  ;;  %v15696_v33 = vld [vmem:[%s16986_s26 + $0x6c] ss:$200 sps:$4 sm:$0xff]   ;;  %v15604_v34 = vld [vmem:[%s21754_s1 + $0x1a20] ss:$16 sps:$4 sm:$0xff]   ;;  %v15607_v35 = vld [vmem:[%s21754_s1 + $0x1a28] ss:$16 sps:$4 sm:$0xff]  }
 0x311   : > { %10693 = vmatpush1.bf16.msra.mxu0 %v15511_v36  ;;  %11768 = vmatpush1.bf16.msra.mxu1 %v15514_v37  ;;  %v15612_v36 = vld [vmem:[%s21754_s1 + $0x1a44] ss:$16 sps:$4 sm:$0xff]   ;;  %v15615_v37 = vld [vmem:[%s21754_s1 + $0x1a4c] ss:$16 sps:$4 sm:$0xff]  }
 0x312   : > { %10694 = vmatprep.subr.bf16.mxu0 %v15519_v38  ;;  %11769 = vmatprep.subr.bf16.mxu1 %v15522_v39  ;;  %v15610_v38 = vld [vmem:[%s21754_s1 + $0x1a40] ss:$16 sps:$4 sm:$0xff]   ;;  %v15613_v39 = vld [vmem:[%s21754_s1 + $0x1a48] ss:$16 sps:$4 sm:$0xff]  }
 0x315   : > { %10695 = vmatpush1.bf16.msra.mxu0 %v15517_v40  ;;  %11770 = vmatpush1.bf16.msra.mxu1 %v15520_v41  ;;  %v15618_v40 = vld [vmem:[%s21754_s1 + $0x1a64] ss:$16 sps:$4 sm:$0xff]   ;;  %v15621_v41 = vld [vmem:[%s21754_s1 + $0x1a6c] ss:$16 sps:$4 sm:$0xff]  }
 0x316   : > { %10696 = vmatprep.subr.bf16.mxu0 %v15525_v42  ;;  %11771 = vmatprep.subr.bf16.mxu1 %v15528_v43  ;;  %v15616_v42 = vld [vmem:[%s21754_s1 + $0x1a60] ss:$16 sps:$4 sm:$0xff]   ;;  %v15619_v43 = vld [vmem:[%s21754_s1 + $0x1a68] ss:$16 sps:$4 sm:$0xff]  }
 0x319   : > { %10697 = vmatpush1.bf16.msra.mxu0 %v15523_v44  ;;  %11772 = vmatpush1.bf16.msra.mxu1 %v15526_v45  ;;  %v15624_v44 = vld [vmem:[%s21754_s1 + $0x1a84] ss:$16 sps:$4 sm:$0xff]   ;;  %v15627_v45 = vld [vmem:[%s21754_s1 + $0x1a8c] ss:$16 sps:$4 sm:$0xff]  }
 0x31a   : > { %10698 = vmatprep.subr.bf16.mxu0 %v15531_v46  ;;  %11773 = vmatprep.subr.bf16.mxu1 %v15534_v47  ;;  %v15622_v46 = vld [vmem:[%s21754_s1 + $0x1a80] ss:$16 sps:$4 sm:$0xff]   ;;  %v15625_v47 = vld [vmem:[%s21754_s1 + $0x1a88] ss:$16 sps:$4 sm:$0xff]  }
 0x31d   : > { %10699 = vmatpush1.bf16.msra.mxu0 %v15529_v48  ;;  %11774 = vmatpush1.bf16.msra.mxu1 %v15532_v49  ;;  %v15630_v48 = vld [vmem:[%s21754_s1 + $0x1aa4] ss:$16 sps:$4 sm:$0xff]   ;;  %v15633_v49 = vld [vmem:[%s21754_s1 + $0x1aac] ss:$16 sps:$4 sm:$0xff]  }
 0x31e   : > { %10700 = vmatprep.subr.bf16.mxu0 %v15537_v50  ;;  %11775 = vmatprep.subr.bf16.mxu1 %v15540_v51  ;;  %v15628_v50 = vld [vmem:[%s21754_s1 + $0x1aa0] ss:$16 sps:$4 sm:$0xff]   ;;  %v15631_v51 = vld [vmem:[%s21754_s1 + $0x1aa8] ss:$16 sps:$4 sm:$0xff]  }
 0x321   : > { %10701 = vmatpush1.bf16.msra.mxu0 %v15535_v52  ;;  %11776 = vmatpush1.bf16.msra.mxu1 %v15538_v53  ;;  %v15636_v52 = vld [vmem:[%s21754_s1 + $0x1ac4] ss:$16 sps:$4 sm:$0xff]   ;;  %v15639_v53 = vld [vmem:[%s21754_s1 + $0x1acc] ss:$16 sps:$4 sm:$0xff]  }
 0x322   : > { %10702 = vmatprep.subr.bf16.mxu0 %v15543_v54  ;;  %11777 = vmatprep.subr.bf16.mxu1 %v15546_v55  ;;  %v15634_v54 = vld [vmem:[%s21754_s1 + $0x1ac0] ss:$16 sps:$4 sm:$0xff]   ;;  %v15637_v55 = vld [vmem:[%s21754_s1 + $0x1ac8] ss:$16 sps:$4 sm:$0xff]  }
 0x325   : > { %10703 = vmatpush1.bf16.msra.mxu0 %v15541_v56  ;;  %11778 = vmatpush1.bf16.msra.mxu1 %v15544_v57  ;;  %v15642_v56 = vld [vmem:[%s21754_s1 + $0x1ae4] ss:$16 sps:$4 sm:$0xff]   ;;  %v15645_v57 = vld [vmem:[%s21754_s1 + $0x1aec] ss:$16 sps:$4 sm:$0xff]  }
 0x326   : > { %10704 = vmatprep.subr.bf16.mxu0 %v15549_v58  ;;  %11779 = vmatprep.subr.bf16.mxu1 %v15552_v59  ;;  %v15640_v58 = vld [vmem:[%s21754_s1 + $0x1ae0] ss:$16 sps:$4 sm:$0xff]   ;;  %v15643_v59 = vld [vmem:[%s21754_s1 + $0x1ae8] ss:$16 sps:$4 sm:$0xff]  }
 0x329   : > { %10705 = vmatpush1.bf16.msra.mxu0 %v15547_v60  ;;  %11780 = vmatpush1.bf16.msra.mxu1 %v15550_v61  ;;  %v15648_v60 = vld [vmem:[%s21754_s1 + $0x1b04] ss:$16 sps:$4 sm:$0xff]   ;;  %v15651_v61 = vld [vmem:[%s21754_s1 + $0x1b0c] ss:$16 sps:$4 sm:$0xff]  }
 0x32a   : > { %10706 = vmatprep.subr.bf16.mxu0 %v15555_v62  ;;  %11781 = vmatprep.subr.bf16.mxu1 %v15558_v63  ;;  %v15646_v62 = vld [vmem:[%s21754_s1 + $0x1b00] ss:$16 sps:$4 sm:$0xff]   ;;  %v15649_v63 = vld [vmem:[%s21754_s1 + $0x1b08] ss:$16 sps:$4 sm:$0xff]  }
 0x32d   : > { %10707 = vmatpush1.bf16.msra.mxu0 %v15553_v0  ;;  %11782 = vmatpush1.bf16.msra.mxu1 %v15556_v1  ;;  %v15654_v0 = vld [vmem:[%s21754_s1 + $0x1b24] ss:$16 sps:$4 sm:$0xff]   ;;  %v15657_v1 = vld [vmem:[%s21754_s1 + $0x1b2c] ss:$16 sps:$4 sm:$0xff]  }
 0x32e   : > { %10708 = vmatprep.subr.bf16.mxu0 %v15561_v2  ;;  %11783 = vmatprep.subr.bf16.mxu1 %v15564_v3  ;;  %v15652_v2 = vld [vmem:[%s21754_s1 + $0x1b20] ss:$16 sps:$4 sm:$0xff]   ;;  %v15655_v3 = vld [vmem:[%s21754_s1 + $0x1b28] ss:$16 sps:$4 sm:$0xff]  }
 0x331   : > { %10709 = vmatpush1.bf16.msra.mxu0 %v15559_v4  ;;  %11784 = vmatpush1.bf16.msra.mxu1 %v15562_v5  ;;  %v15660_v4 = vld [vmem:[%s21754_s1 + $0x1b44] ss:$16 sps:$4 sm:$0xff]   ;;  %v15663_v5 = vld [vmem:[%s21754_s1 + $0x1b4c] ss:$16 sps:$4 sm:$0xff]  }
 0x332   : > { %10710 = vmatprep.subr.bf16.mxu0 %v15567_v6  ;;  %11785 = vmatprep.subr.bf16.mxu1 %v15570_v7  ;;  %v15658_v6 = vld [vmem:[%s21754_s1 + $0x1b40] ss:$16 sps:$4 sm:$0xff]   ;;  %v15661_v7 = vld [vmem:[%s21754_s1 + $0x1b48] ss:$16 sps:$4 sm:$0xff]  }
 0x335   : > { %10711 = vmatpush1.bf16.msra.mxu0 %v15565_v8  ;;  %11786 = vmatpush1.bf16.msra.mxu1 %v15568_v9  ;;  %v15666_v8 = vld [vmem:[%s21754_s1 + $0x1b64] ss:$16 sps:$4 sm:$0xff]   ;;  %v15669_v9 = vld [vmem:[%s21754_s1 + $0x1b6c] ss:$16 sps:$4 sm:$0xff]  }
 0x336   : > { %10712 = vmatprep.subr.bf16.mxu0 %v15573_v10  ;;  %11787 = vmatprep.subr.bf16.mxu1 %v15576_v11  ;;  %v15664_v10 = vld [vmem:[%s21754_s1 + $0x1b60] ss:$16 sps:$4 sm:$0xff]   ;;  %v15667_v11 = vld [vmem:[%s21754_s1 + $0x1b68] ss:$16 sps:$4 sm:$0xff]  }
 0x339   : > { %10713 = vmatpush1.bf16.msra.mxu0 %v15571_v12  ;;  %11788 = vmatpush1.bf16.msra.mxu1 %v15574_v13  ;;  %v15672_v12 = vld [vmem:[%s21754_s1 + $0x1b84] ss:$16 sps:$4 sm:$0xff]   ;;  %v15675_v13 = vld [vmem:[%s21754_s1 + $0x1b8c] ss:$16 sps:$4 sm:$0xff]  }
 0x33a   : > { %10714 = vmatprep.subr.bf16.mxu0 %v15579_v14  ;;  %11789 = vmatprep.subr.bf16.mxu1 %v15582_v15  ;;  %v15670_v14 = vld [vmem:[%s21754_s1 + $0x1b80] ss:$16 sps:$4 sm:$0xff]   ;;  %v15673_v15 = vld [vmem:[%s21754_s1 + $0x1b88] ss:$16 sps:$4 sm:$0xff]  }
 0x33d   : > { %10715 = vmatpush1.bf16.msra.mxu0 %v15577_v16  ;;  %11790 = vmatpush1.bf16.msra.mxu1 %v15580_v17  ;;  %v15678_v16 = vld [vmem:[%s21754_s1 + $0x1ba4] ss:$16 sps:$4 sm:$0xff]   ;;  %v15681_v17 = vld [vmem:[%s21754_s1 + $0x1bac] ss:$16 sps:$4 sm:$0xff]  }
 0x33e   : > { %10716 = vmatprep.subr.bf16.mxu0 %v15585_v18  ;;  %11791 = vmatprep.subr.bf16.mxu1 %v15588_v19  ;;  %v15676_v18 = vld [vmem:[%s21754_s1 + $0x1ba0] ss:$16 sps:$4 sm:$0xff]   ;;  %v15679_v19 = vld [vmem:[%s21754_s1 + $0x1ba8] ss:$16 sps:$4 sm:$0xff]  }
 0x341   : > { %10717 = vmatpush1.bf16.msra.mxu0 %v15583_v20  ;;  %11792 = vmatpush1.bf16.msra.mxu1 %v15586_v21  ;;  %v15684_v20 = vld [vmem:[%s21754_s1 + $0x1bc4] ss:$16 sps:$4 sm:$0xff]   ;;  %v15687_v21 = vld [vmem:[%s21754_s1 + $0x1bcc] ss:$16 sps:$4 sm:$0xff]  }
 0x342   : > { %10718 = vmatprep.subr.bf16.mxu0 %v15591_v22  ;;  %11793 = vmatprep.subr.bf16.mxu1 %v15594_v23  ;;  %v15682_v22 = vld [vmem:[%s21754_s1 + $0x1bc0] ss:$16 sps:$4 sm:$0xff]   ;;  %v15685_v23 = vld [vmem:[%s21754_s1 + $0x1bc8] ss:$16 sps:$4 sm:$0xff]  }
 0x345   : > { %10719 = vmatpush1.bf16.msra.mxu0 %v15589_v24  ;;  %11794 = vmatpush1.bf16.msra.mxu1 %v15592_v25  ;;  %v15690_v24 = vld [vmem:[%s21754_s1 + $0x1be4] ss:$16 sps:$4 sm:$0xff]   ;;  %v15693_v25 = vld [vmem:[%s21754_s1 + $0x1bec] ss:$16 sps:$4 sm:$0xff]  }
 0x346   : > { %10731 = vmatprep.subr.bf16.mxu0 %v15600_v27  ;;  %11806 = vmatprep.subr.bf16.mxu1 %v15603_v28  ;;  %v15691_v27 = vld [vmem:[%s21754_s1 + $0x1be8] ss:$16 sps:$4 sm:$0xff]  }
 0x347   : > { %v15694_v28 = vld [vmem:[%s16986_s26 + $0x68] ss:$200 sps:$4 sm:$0xff]  }
 0x348   : > { %10721 = vmatmul.mubr.bf16.vlgmr.msra.gmra.mrb[0].mxu0 %v15595_v26  ;;  %11796 = vmatmul.mubr.bf16.vlgmr.msra.gmra.mrb[0].mxu1 %v15595_v26  ;;  %v15688_v26 = vld [vmem:[%s21754_s1 + $0x1be0] ss:$16 sps:$4 sm:$0xff]  }
 0x349   : > { %10732 = vmatpush1.bf16.msra.mxu0 %v15598_v29  ;;  %11807 = vmatpush1.bf16.msra.mxu1 %v15601_v30  ;;  %v15699_v29 = vld [vmem:[%s21754_s1 + $0x1c04] ss:$16 sps:$4 sm:$0xff]   ;;  %v15702_v30 = vld [vmem:[%s21754_s1 + $0x1c0c] ss:$16 sps:$4 sm:$0xff]  }
 0x34a   : > { %10733 = vmatprep.subr.bf16.mxu0 %v15606_v31  ;;  %11808 = vmatprep.subr.bf16.mxu1 %v15609_v32  ;;  %v15697_v31 = vld [vmem:[%s21754_s1 + $0x1c00] ss:$16 sps:$4 sm:$0xff]   ;;  %v15700_v32 = vld [vmem:[%s21754_s1 + $0x1c08] ss:$16 sps:$4 sm:$0xff]  }
 0x34b   : > { %10763 = vmatprep.mubr.bf16.mxu0 %v15696_v33  ;;  %11838 = vmatprep.mubr.bf16.mxu1 %v15696_v33  ;;  %v15705_v33 = vld [vmem:[%s21754_s1 + $0x1c24] ss:$16 sps:$4 sm:$0xff]  }
 0x34d   : > { %10734 = vmatpush1.bf16.msra.mxu0 %v15604_v34  ;;  %11809 = vmatpush1.bf16.msra.mxu1 %v15607_v35  ;;  %v15708_v34 = vld [vmem:[%s21754_s1 + $0x1c2c] ss:$16 sps:$4 sm:$0xff]  }
 0x34e   : > { %10735 = vmatprep.subr.bf16.mxu0 %v15612_v36  ;;  %11810 = vmatprep.subr.bf16.mxu1 %v15615_v37  ;;  %v15795_v35 = vld [vmem:[%s16986_s26 + $0x74] ss:$200 sps:$4 sm:$0xff]   ;;  %v15703_v36 = vld [vmem:[%s21754_s1 + $0x1c20] ss:$16 sps:$4 sm:$0xff]   ;;  %v15706_v37 = vld [vmem:[%s21754_s1 + $0x1c28] ss:$16 sps:$4 sm:$0xff]  }
 0x351   : > { %10736 = vmatpush1.bf16.msra.mxu0 %v15610_v38  ;;  %11811 = vmatpush1.bf16.msra.mxu1 %v15613_v39  ;;  %v15711_v38 = vld [vmem:[%s21754_s1 + $0x1c44] ss:$16 sps:$4 sm:$0xff]   ;;  %v15714_v39 = vld [vmem:[%s21754_s1 + $0x1c4c] ss:$16 sps:$4 sm:$0xff]  }
 0x352   : > { %10737 = vmatprep.subr.bf16.mxu0 %v15618_v40  ;;  %11812 = vmatprep.subr.bf16.mxu1 %v15621_v41  ;;  %v15709_v40 = vld [vmem:[%s21754_s1 + $0x1c40] ss:$16 sps:$4 sm:$0xff]   ;;  %v15712_v41 = vld [vmem:[%s21754_s1 + $0x1c48] ss:$16 sps:$4 sm:$0xff]  }
 0x355   : > { %10738 = vmatpush1.bf16.msra.mxu0 %v15616_v42  ;;  %11813 = vmatpush1.bf16.msra.mxu1 %v15619_v43  ;;  %v15717_v42 = vld [vmem:[%s21754_s1 + $0x1c64] ss:$16 sps:$4 sm:$0xff]   ;;  %v15720_v43 = vld [vmem:[%s21754_s1 + $0x1c6c] ss:$16 sps:$4 sm:$0xff]  }
 0x356   : > { %10739 = vmatprep.subr.bf16.mxu0 %v15624_v44  ;;  %11814 = vmatprep.subr.bf16.mxu1 %v15627_v45  ;;  %v15715_v44 = vld [vmem:[%s21754_s1 + $0x1c60] ss:$16 sps:$4 sm:$0xff]   ;;  %v15718_v45 = vld [vmem:[%s21754_s1 + $0x1c68] ss:$16 sps:$4 sm:$0xff]  }
 0x359   : > { %10740 = vmatpush1.bf16.msra.mxu0 %v15622_v46  ;;  %11815 = vmatpush1.bf16.msra.mxu1 %v15625_v47  ;;  %v15723_v46 = vld [vmem:[%s21754_s1 + $0x1c84] ss:$16 sps:$4 sm:$0xff]   ;;  %v15726_v47 = vld [vmem:[%s21754_s1 + $0x1c8c] ss:$16 sps:$4 sm:$0xff]  }
 0x35a   : > { %10741 = vmatprep.subr.bf16.mxu0 %v15630_v48  ;;  %11816 = vmatprep.subr.bf16.mxu1 %v15633_v49  ;;  %v15721_v48 = vld [vmem:[%s21754_s1 + $0x1c80] ss:$16 sps:$4 sm:$0xff]   ;;  %v15724_v49 = vld [vmem:[%s21754_s1 + $0x1c88] ss:$16 sps:$4 sm:$0xff]  }
 0x35d   : > { %10742 = vmatpush1.bf16.msra.mxu0 %v15628_v50  ;;  %11817 = vmatpush1.bf16.msra.mxu1 %v15631_v51  ;;  %v15729_v50 = vld [vmem:[%s21754_s1 + $0x1ca4] ss:$16 sps:$4 sm:$0xff]   ;;  %v15732_v51 = vld [vmem:[%s21754_s1 + $0x1cac] ss:$16 sps:$4 sm:$0xff]  }
 0x35e   : > { %10743 = vmatprep.subr.bf16.mxu0 %v15636_v52  ;;  %11818 = vmatprep.subr.bf16.mxu1 %v15639_v53  ;;  %v15727_v52 = vld [vmem:[%s21754_s1 + $0x1ca0] ss:$16 sps:$4 sm:$0xff]   ;;  %v15730_v53 = vld [vmem:[%s21754_s1 + $0x1ca8] ss:$16 sps:$4 sm:$0xff]  }
 0x361   : > { %10744 = vmatpush1.bf16.msra.mxu0 %v15634_v54  ;;  %11819 = vmatpush1.bf16.msra.mxu1 %v15637_v55  ;;  %v15735_v54 = vld [vmem:[%s21754_s1 + $0x1cc4] ss:$16 sps:$4 sm:$0xff]   ;;  %v15738_v55 = vld [vmem:[%s21754_s1 + $0x1ccc] ss:$16 sps:$4 sm:$0xff]  }
 0x362   : > { %10745 = vmatprep.subr.bf16.mxu0 %v15642_v56  ;;  %11820 = vmatprep.subr.bf16.mxu1 %v15645_v57  ;;  %v15733_v56 = vld [vmem:[%s21754_s1 + $0x1cc0] ss:$16 sps:$4 sm:$0xff]   ;;  %v15736_v57 = vld [vmem:[%s21754_s1 + $0x1cc8] ss:$16 sps:$4 sm:$0xff]  }
 0x365   : > { %10746 = vmatpush1.bf16.msra.mxu0 %v15640_v58  ;;  %11821 = vmatpush1.bf16.msra.mxu1 %v15643_v59  ;;  %v15741_v58 = vld [vmem:[%s21754_s1 + $0x1ce4] ss:$16 sps:$4 sm:$0xff]   ;;  %v15744_v59 = vld [vmem:[%s21754_s1 + $0x1cec] ss:$16 sps:$4 sm:$0xff]  }
 0x366   : > { %10747 = vmatprep.subr.bf16.mxu0 %v15648_v60  ;;  %11822 = vmatprep.subr.bf16.mxu1 %v15651_v61  ;;  %v15739_v60 = vld [vmem:[%s21754_s1 + $0x1ce0] ss:$16 sps:$4 sm:$0xff]   ;;  %v15742_v61 = vld [vmem:[%s21754_s1 + $0x1ce8] ss:$16 sps:$4 sm:$0xff]  }
 0x369   : > { %10748 = vmatpush1.bf16.msra.mxu0 %v15646_v62  ;;  %11823 = vmatpush1.bf16.msra.mxu1 %v15649_v63  ;;  %v15747_v62 = vld [vmem:[%s21754_s1 + $0x1d04] ss:$16 sps:$4 sm:$0xff]   ;;  %v15750_v63 = vld [vmem:[%s21754_s1 + $0x1d0c] ss:$16 sps:$4 sm:$0xff]  }
 0x36a   : > { %10749 = vmatprep.subr.bf16.mxu0 %v15654_v0  ;;  %11824 = vmatprep.subr.bf16.mxu1 %v15657_v1  ;;  %v15745_v0 = vld [vmem:[%s21754_s1 + $0x1d00] ss:$16 sps:$4 sm:$0xff]   ;;  %v15748_v1 = vld [vmem:[%s21754_s1 + $0x1d08] ss:$16 sps:$4 sm:$0xff]  }
 0x36d   : > { %10750 = vmatpush1.bf16.msra.mxu0 %v15652_v2  ;;  %11825 = vmatpush1.bf16.msra.mxu1 %v15655_v3  ;;  %v15753_v2 = vld [vmem:[%s21754_s1 + $0x1d24] ss:$16 sps:$4 sm:$0xff]   ;;  %v15756_v3 = vld [vmem:[%s21754_s1 + $0x1d2c] ss:$16 sps:$4 sm:$0xff]  }
 0x36e   : > { %10751 = vmatprep.subr.bf16.mxu0 %v15660_v4  ;;  %11826 = vmatprep.subr.bf16.mxu1 %v15663_v5  ;;  %v15751_v4 = vld [vmem:[%s21754_s1 + $0x1d20] ss:$16 sps:$4 sm:$0xff]   ;;  %v15754_v5 = vld [vmem:[%s21754_s1 + $0x1d28] ss:$16 sps:$4 sm:$0xff]  }
 0x371   : > { %10752 = vmatpush1.bf16.msra.mxu0 %v15658_v6  ;;  %11827 = vmatpush1.bf16.msra.mxu1 %v15661_v7  ;;  %v15759_v6 = vld [vmem:[%s21754_s1 + $0x1d44] ss:$16 sps:$4 sm:$0xff]   ;;  %v15762_v7 = vld [vmem:[%s21754_s1 + $0x1d4c] ss:$16 sps:$4 sm:$0xff]  }
 0x372   : > { %10753 = vmatprep.subr.bf16.mxu0 %v15666_v8  ;;  %11828 = vmatprep.subr.bf16.mxu1 %v15669_v9  ;;  %v15757_v8 = vld [vmem:[%s21754_s1 + $0x1d40] ss:$16 sps:$4 sm:$0xff]   ;;  %v15760_v9 = vld [vmem:[%s21754_s1 + $0x1d48] ss:$16 sps:$4 sm:$0xff]  }
 0x375   : > { %10754 = vmatpush1.bf16.msra.mxu0 %v15664_v10  ;;  %11829 = vmatpush1.bf16.msra.mxu1 %v15667_v11  ;;  %v15765_v10 = vld [vmem:[%s21754_s1 + $0x1d64] ss:$16 sps:$4 sm:$0xff]   ;;  %v15768_v11 = vld [vmem:[%s21754_s1 + $0x1d6c] ss:$16 sps:$4 sm:$0xff]  }
 0x376   : > { %10755 = vmatprep.subr.bf16.mxu0 %v15672_v12  ;;  %11830 = vmatprep.subr.bf16.mxu1 %v15675_v13  ;;  %v15763_v12 = vld [vmem:[%s21754_s1 + $0x1d60] ss:$16 sps:$4 sm:$0xff]   ;;  %v15766_v13 = vld [vmem:[%s21754_s1 + $0x1d68] ss:$16 sps:$4 sm:$0xff]  }
 0x379   : > { %10756 = vmatpush1.bf16.msra.mxu0 %v15670_v14  ;;  %11831 = vmatpush1.bf16.msra.mxu1 %v15673_v15  ;;  %v15771_v14 = vld [vmem:[%s21754_s1 + $0x1d84] ss:$16 sps:$4 sm:$0xff]   ;;  %v15774_v15 = vld [vmem:[%s21754_s1 + $0x1d8c] ss:$16 sps:$4 sm:$0xff]  }
 0x37a   : > { %10757 = vmatprep.subr.bf16.mxu0 %v15678_v16  ;;  %11832 = vmatprep.subr.bf16.mxu1 %v15681_v17  ;;  %v15769_v16 = vld [vmem:[%s21754_s1 + $0x1d80] ss:$16 sps:$4 sm:$0xff]   ;;  %v15772_v17 = vld [vmem:[%s21754_s1 + $0x1d88] ss:$16 sps:$4 sm:$0xff]  }
 0x37d   : > { %10758 = vmatpush1.bf16.msra.mxu0 %v15676_v18  ;;  %11833 = vmatpush1.bf16.msra.mxu1 %v15679_v19  ;;  %v15777_v18 = vld [vmem:[%s21754_s1 + $0x1da4] ss:$16 sps:$4 sm:$0xff]   ;;  %v15780_v19 = vld [vmem:[%s21754_s1 + $0x1dac] ss:$16 sps:$4 sm:$0xff]  }
 0x37e   : > { %10759 = vmatprep.subr.bf16.mxu0 %v15684_v20  ;;  %11834 = vmatprep.subr.bf16.mxu1 %v15687_v21  ;;  %v15775_v20 = vld [vmem:[%s21754_s1 + $0x1da0] ss:$16 sps:$4 sm:$0xff]   ;;  %v15778_v21 = vld [vmem:[%s21754_s1 + $0x1da8] ss:$16 sps:$4 sm:$0xff]  }
 0x381   : > { %10760 = vmatpush1.bf16.msra.mxu0 %v15682_v22  ;;  %11835 = vmatpush1.bf16.msra.mxu1 %v15685_v23  ;;  %v15783_v22 = vld [vmem:[%s21754_s1 + $0x1dc4] ss:$16 sps:$4 sm:$0xff]   ;;  %v15786_v23 = vld [vmem:[%s21754_s1 + $0x1dcc] ss:$16 sps:$4 sm:$0xff]  }
 0x382   : > { %10761 = vmatprep.subr.bf16.mxu0 %v15690_v24  ;;  %11836 = vmatprep.subr.bf16.mxu1 %v15693_v25  ;;  %v15781_v24 = vld [vmem:[%s21754_s1 + $0x1dc0] ss:$16 sps:$4 sm:$0xff]   ;;  %v15784_v25 = vld [vmem:[%s21754_s1 + $0x1dc8] ss:$16 sps:$4 sm:$0xff]  }
 0x385   : > { %10762 = vmatpush1.bf16.msra.mxu0 %v15688_v26  ;;  %11837 = vmatpush1.bf16.msra.mxu1 %v15691_v27  ;;  %v15789_v26 = vld [vmem:[%s21754_s1 + $0x1de4] ss:$16 sps:$4 sm:$0xff]   ;;  %v15792_v27 = vld [vmem:[%s21754_s1 + $0x1dec] ss:$16 sps:$4 sm:$0xff]  }
 0x386   : > { %10774 = vmatprep.subr.bf16.mxu0 %v15699_v29  ;;  %11849 = vmatprep.subr.bf16.mxu1 %v15702_v30  ;;  %v15790_v29 = vld [vmem:[%s21754_s1 + $0x1de8] ss:$16 sps:$4 sm:$0xff]   ;;  %v15798_v30 = vld [vmem:[%s21754_s1 + $0x1e04] ss:$16 sps:$4 sm:$0xff]  }
 0x388   : > { %10764 = vmatmul.mubr.bf16.vlgmr.msra.gmra.mrb[0].mxu0 %v15694_v28  ;;  %11839 = vmatmul.mubr.bf16.vlgmr.msra.gmra.mrb[0].mxu1 %v15694_v28  ;;  %v15787_v28 = vld [vmem:[%s21754_s1 + $0x1de0] ss:$16 sps:$4 sm:$0xff]  }
 0x389   : > { %10775 = vmatpush1.bf16.msra.mxu0 %v15697_v31  ;;  %11850 = vmatpush1.bf16.msra.mxu1 %v15700_v32  ;;  %v15801_v31 = vld [vmem:[%s21754_s1 + $0x1e0c] ss:$16 sps:$4 sm:$0xff]   ;;  %v15793_v32 = vld [vmem:[%s16986_s26 + $0x70] ss:$200 sps:$4 sm:$0xff]  }
 0x38a   : > { %10776 = vmatprep.subr.bf16.mxu0 %v15705_v33  ;;  %11851 = vmatprep.subr.bf16.mxu1 %v15708_v34  ;;  %v15796_v33 = vld [vmem:[%s21754_s1 + $0x1e00] ss:$16 sps:$4 sm:$0xff]   ;;  %v15799_v34 = vld [vmem:[%s21754_s1 + $0x1e08] ss:$16 sps:$4 sm:$0xff]  }
 0x38b   : > { %10806 = vmatprep.mubr.bf16.mxu0 %v15795_v35  ;;  %11881 = vmatprep.mubr.bf16.mxu1 %v15795_v35  ;;  %v15804_v35 = vld [vmem:[%s21754_s1 + $0x1e24] ss:$16 sps:$4 sm:$0xff]  }
 0x38d   : > { %10777 = vmatpush1.bf16.msra.mxu0 %v15703_v36  ;;  %11852 = vmatpush1.bf16.msra.mxu1 %v15706_v37  ;;  %v15807_v36 = vld [vmem:[%s21754_s1 + $0x1e2c] ss:$16 sps:$4 sm:$0xff]  }
 0x38e   : > { %10778 = vmatprep.subr.bf16.mxu0 %v15711_v38  ;;  %11853 = vmatprep.subr.bf16.mxu1 %v15714_v39  ;;  %v15894_v37 = vld [vmem:[%s16986_s26 + $0x7c] ss:$200 sps:$4 sm:$0xff]   ;;  %v15802_v38 = vld [vmem:[%s21754_s1 + $0x1e20] ss:$16 sps:$4 sm:$0xff]   ;;  %v15805_v39 = vld [vmem:[%s21754_s1 + $0x1e28] ss:$16 sps:$4 sm:$0xff]  }
 0x391   : > { %10779 = vmatpush1.bf16.msra.mxu0 %v15709_v40  ;;  %11854 = vmatpush1.bf16.msra.mxu1 %v15712_v41  ;;  %v15810_v40 = vld [vmem:[%s21754_s1 + $0x1e44] ss:$16 sps:$4 sm:$0xff]   ;;  %v15813_v41 = vld [vmem:[%s21754_s1 + $0x1e4c] ss:$16 sps:$4 sm:$0xff]  }
 0x392   : > { %10780 = vmatprep.subr.bf16.mxu0 %v15717_v42  ;;  %11855 = vmatprep.subr.bf16.mxu1 %v15720_v43  ;;  %v15808_v42 = vld [vmem:[%s21754_s1 + $0x1e40] ss:$16 sps:$4 sm:$0xff]   ;;  %v15811_v43 = vld [vmem:[%s21754_s1 + $0x1e48] ss:$16 sps:$4 sm:$0xff]  }
 0x395   : > { %10781 = vmatpush1.bf16.msra.mxu0 %v15715_v44  ;;  %11856 = vmatpush1.bf16.msra.mxu1 %v15718_v45  ;;  %v15816_v44 = vld [vmem:[%s21754_s1 + $0x1e64] ss:$16 sps:$4 sm:$0xff]   ;;  %v15819_v45 = vld [vmem:[%s21754_s1 + $0x1e6c] ss:$16 sps:$4 sm:$0xff]  }
 0x396   : > { %10782 = vmatprep.subr.bf16.mxu0 %v15723_v46  ;;  %11857 = vmatprep.subr.bf16.mxu1 %v15726_v47  ;;  %v15814_v46 = vld [vmem:[%s21754_s1 + $0x1e60] ss:$16 sps:$4 sm:$0xff]   ;;  %v15817_v47 = vld [vmem:[%s21754_s1 + $0x1e68] ss:$16 sps:$4 sm:$0xff]  }
 0x399   : > { %10783 = vmatpush1.bf16.msra.mxu0 %v15721_v48  ;;  %11858 = vmatpush1.bf16.msra.mxu1 %v15724_v49  ;;  %v15822_v48 = vld [vmem:[%s21754_s1 + $0x1e84] ss:$16 sps:$4 sm:$0xff]   ;;  %v15825_v49 = vld [vmem:[%s21754_s1 + $0x1e8c] ss:$16 sps:$4 sm:$0xff]  }
 0x39a   : > { %10784 = vmatprep.subr.bf16.mxu0 %v15729_v50  ;;  %11859 = vmatprep.subr.bf16.mxu1 %v15732_v51  ;;  %v15820_v50 = vld [vmem:[%s21754_s1 + $0x1e80] ss:$16 sps:$4 sm:$0xff]   ;;  %v15823_v51 = vld [vmem:[%s21754_s1 + $0x1e88] ss:$16 sps:$4 sm:$0xff]  }
 0x39d   : > { %10785 = vmatpush1.bf16.msra.mxu0 %v15727_v52  ;;  %11860 = vmatpush1.bf16.msra.mxu1 %v15730_v53  ;;  %v15828_v52 = vld [vmem:[%s21754_s1 + $0x1ea4] ss:$16 sps:$4 sm:$0xff]   ;;  %v15831_v53 = vld [vmem:[%s21754_s1 + $0x1eac] ss:$16 sps:$4 sm:$0xff]  }
 0x39e   : > { %10786 = vmatprep.subr.bf16.mxu0 %v15735_v54  ;;  %11861 = vmatprep.subr.bf16.mxu1 %v15738_v55  ;;  %v15826_v54 = vld [vmem:[%s21754_s1 + $0x1ea0] ss:$16 sps:$4 sm:$0xff]   ;;  %v15829_v55 = vld [vmem:[%s21754_s1 + $0x1ea8] ss:$16 sps:$4 sm:$0xff]  }
 0x3a1   : > { %10787 = vmatpush1.bf16.msra.mxu0 %v15733_v56  ;;  %11862 = vmatpush1.bf16.msra.mxu1 %v15736_v57  ;;  %v15834_v56 = vld [vmem:[%s21754_s1 + $0x1ec4] ss:$16 sps:$4 sm:$0xff]   ;;  %v15837_v57 = vld [vmem:[%s21754_s1 + $0x1ecc] ss:$16 sps:$4 sm:$0xff]  }
 0x3a2   : > { %10788 = vmatprep.subr.bf16.mxu0 %v15741_v58  ;;  %11863 = vmatprep.subr.bf16.mxu1 %v15744_v59  ;;  %v15832_v58 = vld [vmem:[%s21754_s1 + $0x1ec0] ss:$16 sps:$4 sm:$0xff]   ;;  %v15835_v59 = vld [vmem:[%s21754_s1 + $0x1ec8] ss:$16 sps:$4 sm:$0xff]  }
 0x3a5   : > { %10789 = vmatpush1.bf16.msra.mxu0 %v15739_v60  ;;  %11864 = vmatpush1.bf16.msra.mxu1 %v15742_v61  ;;  %v15840_v60 = vld [vmem:[%s21754_s1 + $0x1ee4] ss:$16 sps:$4 sm:$0xff]   ;;  %v15843_v61 = vld [vmem:[%s21754_s1 + $0x1eec] ss:$16 sps:$4 sm:$0xff]  }
 0x3a6   : > { %10790 = vmatprep.subr.bf16.mxu0 %v15747_v62  ;;  %11865 = vmatprep.subr.bf16.mxu1 %v15750_v63  ;;  %v15838_v62 = vld [vmem:[%s21754_s1 + $0x1ee0] ss:$16 sps:$4 sm:$0xff]   ;;  %v15841_v63 = vld [vmem:[%s21754_s1 + $0x1ee8] ss:$16 sps:$4 sm:$0xff]  }
 0x3a9   : > { %10791 = vmatpush1.bf16.msra.mxu0 %v15745_v0  ;;  %11866 = vmatpush1.bf16.msra.mxu1 %v15748_v1  ;;  %v15846_v0 = vld [vmem:[%s21754_s1 + $0x1f04] ss:$16 sps:$4 sm:$0xff]   ;;  %v15849_v1 = vld [vmem:[%s21754_s1 + $0x1f0c] ss:$16 sps:$4 sm:$0xff]  }
 0x3aa   : > { %10792 = vmatprep.subr.bf16.mxu0 %v15753_v2  ;;  %11867 = vmatprep.subr.bf16.mxu1 %v15756_v3  ;;  %v15844_v2 = vld [vmem:[%s21754_s1 + $0x1f00] ss:$16 sps:$4 sm:$0xff]   ;;  %v15847_v3 = vld [vmem:[%s21754_s1 + $0x1f08] ss:$16 sps:$4 sm:$0xff]  }
 0x3ad   : > { %10793 = vmatpush1.bf16.msra.mxu0 %v15751_v4  ;;  %11868 = vmatpush1.bf16.msra.mxu1 %v15754_v5  ;;  %v15852_v4 = vld [vmem:[%s21754_s1 + $0x1f24] ss:$16 sps:$4 sm:$0xff]   ;;  %v15855_v5 = vld [vmem:[%s21754_s1 + $0x1f2c] ss:$16 sps:$4 sm:$0xff]  }
 0x3ae   : > { %10794 = vmatprep.subr.bf16.mxu0 %v15759_v6  ;;  %11869 = vmatprep.subr.bf16.mxu1 %v15762_v7  ;;  %v15850_v6 = vld [vmem:[%s21754_s1 + $0x1f20] ss:$16 sps:$4 sm:$0xff]   ;;  %v15853_v7 = vld [vmem:[%s21754_s1 + $0x1f28] ss:$16 sps:$4 sm:$0xff]  }
 0x3b1   : > { %10795 = vmatpush1.bf16.msra.mxu0 %v15757_v8  ;;  %11870 = vmatpush1.bf16.msra.mxu1 %v15760_v9  ;;  %v15858_v8 = vld [vmem:[%s21754_s1 + $0x1f44] ss:$16 sps:$4 sm:$0xff]   ;;  %v15861_v9 = vld [vmem:[%s21754_s1 + $0x1f4c] ss:$16 sps:$4 sm:$0xff]  }
 0x3b2   : > { %10796 = vmatprep.subr.bf16.mxu0 %v15765_v10  ;;  %11871 = vmatprep.subr.bf16.mxu1 %v15768_v11  ;;  %v15856_v10 = vld [vmem:[%s21754_s1 + $0x1f40] ss:$16 sps:$4 sm:$0xff]   ;;  %v15859_v11 = vld [vmem:[%s21754_s1 + $0x1f48] ss:$16 sps:$4 sm:$0xff]  }
 0x3b5   : > { %10797 = vmatpush1.bf16.msra.mxu0 %v15763_v12  ;;  %11872 = vmatpush1.bf16.msra.mxu1 %v15766_v13  ;;  %v15864_v12 = vld [vmem:[%s21754_s1 + $0x1f64] ss:$16 sps:$4 sm:$0xff]   ;;  %v15867_v13 = vld [vmem:[%s21754_s1 + $0x1f6c] ss:$16 sps:$4 sm:$0xff]  }
 0x3b6   : > { %10798 = vmatprep.subr.bf16.mxu0 %v15771_v14  ;;  %11873 = vmatprep.subr.bf16.mxu1 %v15774_v15  ;;  %v15862_v14 = vld [vmem:[%s21754_s1 + $0x1f60] ss:$16 sps:$4 sm:$0xff]   ;;  %v15865_v15 = vld [vmem:[%s21754_s1 + $0x1f68] ss:$16 sps:$4 sm:$0xff]  }
 0x3b9   : > { %10799 = vmatpush1.bf16.msra.mxu0 %v15769_v16  ;;  %11874 = vmatpush1.bf16.msra.mxu1 %v15772_v17  ;;  %v15870_v16 = vld [vmem:[%s21754_s1 + $0x1f84] ss:$16 sps:$4 sm:$0xff]   ;;  %v15873_v17 = vld [vmem:[%s21754_s1 + $0x1f8c] ss:$16 sps:$4 sm:$0xff]  }
 0x3ba   : > { %10800 = vmatprep.subr.bf16.mxu0 %v15777_v18  ;;  %11875 = vmatprep.subr.bf16.mxu1 %v15780_v19  ;;  %v15868_v18 = vld [vmem:[%s21754_s1 + $0x1f80] ss:$16 sps:$4 sm:$0xff]   ;;  %v15871_v19 = vld [vmem:[%s21754_s1 + $0x1f88] ss:$16 sps:$4 sm:$0xff]  }
 0x3bd   : > { %10801 = vmatpush1.bf16.msra.mxu0 %v15775_v20  ;;  %11876 = vmatpush1.bf16.msra.mxu1 %v15778_v21  ;;  %v15876_v20 = vld [vmem:[%s21754_s1 + $0x1fa4] ss:$16 sps:$4 sm:$0xff]   ;;  %v15879_v21 = vld [vmem:[%s21754_s1 + $0x1fac] ss:$16 sps:$4 sm:$0xff]  }
 0x3be   : > { %10802 = vmatprep.subr.bf16.mxu0 %v15783_v22  ;;  %11877 = vmatprep.subr.bf16.mxu1 %v15786_v23  ;;  %v15874_v22 = vld [vmem:[%s21754_s1 + $0x1fa0] ss:$16 sps:$4 sm:$0xff]   ;;  %v15877_v23 = vld [vmem:[%s21754_s1 + $0x1fa8] ss:$16 sps:$4 sm:$0xff]  }
 0x3c1   : > { %10803 = vmatpush1.bf16.msra.mxu0 %v15781_v24  ;;  %11878 = vmatpush1.bf16.msra.mxu1 %v15784_v25  ;;  %v15882_v24 = vld [vmem:[%s21754_s1 + $0x1fc4] ss:$16 sps:$4 sm:$0xff]   ;;  %v15885_v25 = vld [vmem:[%s21754_s1 + $0x1fcc] ss:$16 sps:$4 sm:$0xff]  }
 0x3c2   : > { %10804 = vmatprep.subr.bf16.mxu0 %v15789_v26  ;;  %11879 = vmatprep.subr.bf16.mxu1 %v15792_v27  ;;  %v15880_v26 = vld [vmem:[%s21754_s1 + $0x1fc0] ss:$16 sps:$4 sm:$0xff]   ;;  %v15883_v27 = vld [vmem:[%s21754_s1 + $0x1fc8] ss:$16 sps:$4 sm:$0xff]  }
 0x3c5   : > { %10805 = vmatpush1.bf16.msra.mxu0 %v15787_v28  ;;  %11880 = vmatpush1.bf16.msra.mxu1 %v15790_v29  ;;  %v15888_v28 = vld [vmem:[%s21754_s1 + $0x1fe4] ss:$16 sps:$4 sm:$0xff]   ;;  %v15891_v29 = vld [vmem:[%s21754_s1 + $0x1fec] ss:$16 sps:$4 sm:$0xff]  }
 0x3c6   : > { %10817 = vmatprep.subr.bf16.mxu0 %v15798_v30  ;;  %11892 = vmatprep.subr.bf16.mxu1 %v15801_v31  ;;  %v15886_v30 = vld [vmem:[%s21754_s1 + $0x1fe0] ss:$16 sps:$4 sm:$0xff]   ;;  %v15889_v31 = vld [vmem:[%s21754_s1 + $0x1fe8] ss:$16 sps:$4 sm:$0xff]  }
 0x3c8   : > { %10807 = vmatmul.mubr.bf16.vlgmr.msra.gmra.mrb[0].mxu0 %v15793_v32  ;;  %11882 = vmatmul.mubr.bf16.vlgmr.msra.gmra.mrb[0].mxu1 %v15793_v32  ;;  %v15897_v32 = vld [vmem:[%s21754_s1 + $0x2004] ss:$16 sps:$4 sm:$0xff]  }
 0x3c9   : > { %10818 = vmatpush1.bf16.msra.mxu0 %v15796_v33  ;;  %11893 = vmatpush1.bf16.msra.mxu1 %v15799_v34  ;;  %v15900_v33 = vld [vmem:[%s21754_s1 + $0x200c] ss:$16 sps:$4 sm:$0xff]   ;;  %v15892_v34 = vld [vmem:[%s16986_s26 + $0x78] ss:$200 sps:$4 sm:$0xff]  }
 0x3ca   : > { %10819 = vmatprep.subr.bf16.mxu0 %v15804_v35  ;;  %11894 = vmatprep.subr.bf16.mxu1 %v15807_v36  ;;  %v15895_v35 = vld [vmem:[%s21754_s1 + $0x2000] ss:$16 sps:$4 sm:$0xff]   ;;  %v15898_v36 = vld [vmem:[%s21754_s1 + $0x2008] ss:$16 sps:$4 sm:$0xff]  }
 0x3cb   : > { %10849 = vmatprep.mubr.bf16.mxu0 %v15894_v37  ;;  %11924 = vmatprep.mubr.bf16.mxu1 %v15894_v37  ;;  %v15903_v37 = vld [vmem:[%s21754_s1 + $0x2024] ss:$16 sps:$4 sm:$0xff]  }
 0x3cd   : > { %10820 = vmatpush1.bf16.msra.mxu0 %v15802_v38  ;;  %11895 = vmatpush1.bf16.msra.mxu1 %v15805_v39  ;;  %v15906_v38 = vld [vmem:[%s21754_s1 + $0x202c] ss:$16 sps:$4 sm:$0xff]  }
 0x3ce   : > { %10821 = vmatprep.subr.bf16.mxu0 %v15810_v40  ;;  %11896 = vmatprep.subr.bf16.mxu1 %v15813_v41  ;;  %v15993_v39 = vld [vmem:[%s16986_s26 + $0x84] ss:$200 sps:$4 sm:$0xff]   ;;  %v15901_v40 = vld [vmem:[%s21754_s1 + $0x2020] ss:$16 sps:$4 sm:$0xff]   ;;  %v15904_v41 = vld [vmem:[%s21754_s1 + $0x2028] ss:$16 sps:$4 sm:$0xff]  }
 0x3d1   : > { %10822 = vmatpush1.bf16.msra.mxu0 %v15808_v42  ;;  %11897 = vmatpush1.bf16.msra.mxu1 %v15811_v43  ;;  %v15909_v42 = vld [vmem:[%s21754_s1 + $0x2044] ss:$16 sps:$4 sm:$0xff]   ;;  %v15912_v43 = vld [vmem:[%s21754_s1 + $0x204c] ss:$16 sps:$4 sm:$0xff]  }
 0x3d2   : > { %10823 = vmatprep.subr.bf16.mxu0 %v15816_v44  ;;  %11898 = vmatprep.subr.bf16.mxu1 %v15819_v45  ;;  %v15907_v44 = vld [vmem:[%s21754_s1 + $0x2040] ss:$16 sps:$4 sm:$0xff]   ;;  %v15910_v45 = vld [vmem:[%s21754_s1 + $0x2048] ss:$16 sps:$4 sm:$0xff]  }
 0x3d5   : > { %10824 = vmatpush1.bf16.msra.mxu0 %v15814_v46  ;;  %11899 = vmatpush1.bf16.msra.mxu1 %v15817_v47  ;;  %v15915_v46 = vld [vmem:[%s21754_s1 + $0x2064] ss:$16 sps:$4 sm:$0xff]   ;;  %v15918_v47 = vld [vmem:[%s21754_s1 + $0x206c] ss:$16 sps:$4 sm:$0xff]  }
 0x3d6   : > { %10825 = vmatprep.subr.bf16.mxu0 %v15822_v48  ;;  %11900 = vmatprep.subr.bf16.mxu1 %v15825_v49  ;;  %v15913_v48 = vld [vmem:[%s21754_s1 + $0x2060] ss:$16 sps:$4 sm:$0xff]   ;;  %v15916_v49 = vld [vmem:[%s21754_s1 + $0x2068] ss:$16 sps:$4 sm:$0xff]  }
 0x3d9   : > { %10826 = vmatpush1.bf16.msra.mxu0 %v15820_v50  ;;  %11901 = vmatpush1.bf16.msra.mxu1 %v15823_v51  ;;  %v15921_v50 = vld [vmem:[%s21754_s1 + $0x2084] ss:$16 sps:$4 sm:$0xff]   ;;  %v15924_v51 = vld [vmem:[%s21754_s1 + $0x208c] ss:$16 sps:$4 sm:$0xff]  }
 0x3da   : > { %10827 = vmatprep.subr.bf16.mxu0 %v15828_v52  ;;  %11902 = vmatprep.subr.bf16.mxu1 %v15831_v53  ;;  %v15919_v52 = vld [vmem:[%s21754_s1 + $0x2080] ss:$16 sps:$4 sm:$0xff]   ;;  %v15922_v53 = vld [vmem:[%s21754_s1 + $0x2088] ss:$16 sps:$4 sm:$0xff]  }
 0x3dd   : > { %10828 = vmatpush1.bf16.msra.mxu0 %v15826_v54  ;;  %11903 = vmatpush1.bf16.msra.mxu1 %v15829_v55  ;;  %v15927_v54 = vld [vmem:[%s21754_s1 + $0x20a4] ss:$16 sps:$4 sm:$0xff]   ;;  %v15930_v55 = vld [vmem:[%s21754_s1 + $0x20ac] ss:$16 sps:$4 sm:$0xff]  }
 0x3de   : > { %10829 = vmatprep.subr.bf16.mxu0 %v15834_v56  ;;  %11904 = vmatprep.subr.bf16.mxu1 %v15837_v57  ;;  %v15925_v56 = vld [vmem:[%s21754_s1 + $0x20a0] ss:$16 sps:$4 sm:$0xff]   ;;  %v15928_v57 = vld [vmem:[%s21754_s1 + $0x20a8] ss:$16 sps:$4 sm:$0xff]  }
 0x3e1   : > { %10830 = vmatpush1.bf16.msra.mxu0 %v15832_v58  ;;  %11905 = vmatpush1.bf16.msra.mxu1 %v15835_v59  ;;  %v15933_v58 = vld [vmem:[%s21754_s1 + $0x20c4] ss:$16 sps:$4 sm:$0xff]   ;;  %v15936_v59 = vld [vmem:[%s21754_s1 + $0x20cc] ss:$16 sps:$4 sm:$0xff]  }
 0x3e2   : > { %10831 = vmatprep.subr.bf16.mxu0 %v15840_v60  ;;  %11906 = vmatprep.subr.bf16.mxu1 %v15843_v61  ;;  %v15931_v60 = vld [vmem:[%s21754_s1 + $0x20c0] ss:$16 sps:$4 sm:$0xff]   ;;  %v15934_v61 = vld [vmem:[%s21754_s1 + $0x20c8] ss:$16 sps:$4 sm:$0xff]  }
 0x3e5   : > { %10832 = vmatpush1.bf16.msra.mxu0 %v15838_v62  ;;  %11907 = vmatpush1.bf16.msra.mxu1 %v15841_v63  ;;  %v15939_v62 = vld [vmem:[%s21754_s1 + $0x20e4] ss:$16 sps:$4 sm:$0xff]   ;;  %v15942_v63 = vld [vmem:[%s21754_s1 + $0x20ec] ss:$16 sps:$4 sm:$0xff]  }
 0x3e6   : > { %10833 = vmatprep.subr.bf16.mxu0 %v15846_v0  ;;  %11908 = vmatprep.subr.bf16.mxu1 %v15849_v1  ;;  %v15937_v0 = vld [vmem:[%s21754_s1 + $0x20e0] ss:$16 sps:$4 sm:$0xff]   ;;  %v15940_v1 = vld [vmem:[%s21754_s1 + $0x20e8] ss:$16 sps:$4 sm:$0xff]  }
 0x3e9   : > { %10834 = vmatpush1.bf16.msra.mxu0 %v15844_v2  ;;  %11909 = vmatpush1.bf16.msra.mxu1 %v15847_v3  ;;  %v15945_v2 = vld [vmem:[%s21754_s1 + $0x2104] ss:$16 sps:$4 sm:$0xff]   ;;  %v15948_v3 = vld [vmem:[%s21754_s1 + $0x210c] ss:$16 sps:$4 sm:$0xff]  }
 0x3ea   : > { %10835 = vmatprep.subr.bf16.mxu0 %v15852_v4  ;;  %11910 = vmatprep.subr.bf16.mxu1 %v15855_v5  ;;  %v15943_v4 = vld [vmem:[%s21754_s1 + $0x2100] ss:$16 sps:$4 sm:$0xff]   ;;  %v15946_v5 = vld [vmem:[%s21754_s1 + $0x2108] ss:$16 sps:$4 sm:$0xff]  }
 0x3ed   : > { %10836 = vmatpush1.bf16.msra.mxu0 %v15850_v6  ;;  %11911 = vmatpush1.bf16.msra.mxu1 %v15853_v7  ;;  %v15951_v6 = vld [vmem:[%s21754_s1 + $0x2124] ss:$16 sps:$4 sm:$0xff]   ;;  %v15954_v7 = vld [vmem:[%s21754_s1 + $0x212c] ss:$16 sps:$4 sm:$0xff]  }
 0x3ee   : > { %10837 = vmatprep.subr.bf16.mxu0 %v15858_v8  ;;  %11912 = vmatprep.subr.bf16.mxu1 %v15861_v9  ;;  %v15949_v8 = vld [vmem:[%s21754_s1 + $0x2120] ss:$16 sps:$4 sm:$0xff]   ;;  %v15952_v9 = vld [vmem:[%s21754_s1 + $0x2128] ss:$16 sps:$4 sm:$0xff]  }
 0x3f1   : > { %10838 = vmatpush1.bf16.msra.mxu0 %v15856_v10  ;;  %11913 = vmatpush1.bf16.msra.mxu1 %v15859_v11  ;;  %v15957_v10 = vld [vmem:[%s21754_s1 + $0x2144] ss:$16 sps:$4 sm:$0xff]   ;;  %v15960_v11 = vld [vmem:[%s21754_s1 + $0x214c] ss:$16 sps:$4 sm:$0xff]  }
 0x3f2   : > { %10839 = vmatprep.subr.bf16.mxu0 %v15864_v12  ;;  %11914 = vmatprep.subr.bf16.mxu1 %v15867_v13  ;;  %v15955_v12 = vld [vmem:[%s21754_s1 + $0x2140] ss:$16 sps:$4 sm:$0xff]   ;;  %v15958_v13 = vld [vmem:[%s21754_s1 + $0x2148] ss:$16 sps:$4 sm:$0xff]  }
 0x3f5   : > { %10840 = vmatpush1.bf16.msra.mxu0 %v15862_v14  ;;  %11915 = vmatpush1.bf16.msra.mxu1 %v15865_v15  ;;  %v15963_v14 = vld [vmem:[%s21754_s1 + $0x2164] ss:$16 sps:$4 sm:$0xff]   ;;  %v15966_v15 = vld [vmem:[%s21754_s1 + $0x216c] ss:$16 sps:$4 sm:$0xff]  }
 0x3f6   : > { %10841 = vmatprep.subr.bf16.mxu0 %v15870_v16  ;;  %11916 = vmatprep.subr.bf16.mxu1 %v15873_v17  ;;  %v15961_v16 = vld [vmem:[%s21754_s1 + $0x2160] ss:$16 sps:$4 sm:$0xff]   ;;  %v15964_v17 = vld [vmem:[%s21754_s1 + $0x2168] ss:$16 sps:$4 sm:$0xff]  }
 0x3f9   : > { %10842 = vmatpush1.bf16.msra.mxu0 %v15868_v18  ;;  %11917 = vmatpush1.bf16.msra.mxu1 %v15871_v19  ;;  %v15969_v18 = vld [vmem:[%s21754_s1 + $0x2184] ss:$16 sps:$4 sm:$0xff]   ;;  %v15972_v19 = vld [vmem:[%s21754_s1 + $0x218c] ss:$16 sps:$4 sm:$0xff]  }
 0x3fa   : > { %10843 = vmatprep.subr.bf16.mxu0 %v15876_v20  ;;  %11918 = vmatprep.subr.bf16.mxu1 %v15879_v21  ;;  %v15967_v20 = vld [vmem:[%s21754_s1 + $0x2180] ss:$16 sps:$4 sm:$0xff]   ;;  %v15970_v21 = vld [vmem:[%s21754_s1 + $0x2188] ss:$16 sps:$4 sm:$0xff]  }
 0x3fd   : > { %10844 = vmatpush1.bf16.msra.mxu0 %v15874_v22  ;;  %11919 = vmatpush1.bf16.msra.mxu1 %v15877_v23  ;;  %v15975_v22 = vld [vmem:[%s21754_s1 + $0x21a4] ss:$16 sps:$4 sm:$0xff]   ;;  %v15978_v23 = vld [vmem:[%s21754_s1 + $0x21ac] ss:$16 sps:$4 sm:$0xff]  }
 0x3fe   : > { %10845 = vmatprep.subr.bf16.mxu0 %v15882_v24  ;;  %11920 = vmatprep.subr.bf16.mxu1 %v15885_v25  ;;  %v15973_v24 = vld [vmem:[%s21754_s1 + $0x21a0] ss:$16 sps:$4 sm:$0xff]   ;;  %v15976_v25 = vld [vmem:[%s21754_s1 + $0x21a8] ss:$16 sps:$4 sm:$0xff]  }
 0x401   : > { %10846 = vmatpush1.bf16.msra.mxu0 %v15880_v26  ;;  %11921 = vmatpush1.bf16.msra.mxu1 %v15883_v27  ;;  %v15981_v26 = vld [vmem:[%s21754_s1 + $0x21c4] ss:$16 sps:$4 sm:$0xff]   ;;  %v15984_v27 = vld [vmem:[%s21754_s1 + $0x21cc] ss:$16 sps:$4 sm:$0xff]  }
 0x402   : > { %10847 = vmatprep.subr.bf16.mxu0 %v15888_v28  ;;  %11922 = vmatprep.subr.bf16.mxu1 %v15891_v29  ;;  %v15979_v28 = vld [vmem:[%s21754_s1 + $0x21c0] ss:$16 sps:$4 sm:$0xff]   ;;  %v15982_v29 = vld [vmem:[%s21754_s1 + $0x21c8] ss:$16 sps:$4 sm:$0xff]  }
 0x405   : > { %10848 = vmatpush1.bf16.msra.mxu0 %v15886_v30  ;;  %11923 = vmatpush1.bf16.msra.mxu1 %v15889_v31  ;;  %v15987_v30 = vld [vmem:[%s21754_s1 + $0x21e4] ss:$16 sps:$4 sm:$0xff]   ;;  %v15990_v31 = vld [vmem:[%s21754_s1 + $0x21ec] ss:$16 sps:$4 sm:$0xff]  }
 0x406   : > { %10860 = vmatprep.subr.bf16.mxu0 %v15897_v32  ;;  %11935 = vmatprep.subr.bf16.mxu1 %v15900_v33  ;;  %v15985_v32 = vld [vmem:[%s21754_s1 + $0x21e0] ss:$16 sps:$4 sm:$0xff]   ;;  %v15988_v33 = vld [vmem:[%s21754_s1 + $0x21e8] ss:$16 sps:$4 sm:$0xff]  }
 0x408   : > { %10850 = vmatmul.mubr.bf16.vlgmr.msra.gmra.mrb[0].mxu0 %v15892_v34  ;;  %11925 = vmatmul.mubr.bf16.vlgmr.msra.gmra.mrb[0].mxu1 %v15892_v34  ;;  %v15996_v34 = vld [vmem:[%s21754_s1 + $0x2204] ss:$16 sps:$4 sm:$0xff]  }
 0x409   : > { %10861 = vmatpush1.bf16.msra.mxu0 %v15895_v35  ;;  %11936 = vmatpush1.bf16.msra.mxu1 %v15898_v36  ;;  %v15999_v35 = vld [vmem:[%s21754_s1 + $0x220c] ss:$16 sps:$4 sm:$0xff]   ;;  %v15991_v36 = vld [vmem:[%s16986_s26 + $0x80] ss:$200 sps:$4 sm:$0xff]  }
 0x40a   : > { %10862 = vmatprep.subr.bf16.mxu0 %v15903_v37  ;;  %11937 = vmatprep.subr.bf16.mxu1 %v15906_v38  ;;  %v15994_v37 = vld [vmem:[%s21754_s1 + $0x2200] ss:$16 sps:$4 sm:$0xff]   ;;  %v15997_v38 = vld [vmem:[%s21754_s1 + $0x2208] ss:$16 sps:$4 sm:$0xff]  }
 0x40b   : > { %10892 = vmatprep.mubr.bf16.mxu0 %v15993_v39  ;;  %11967 = vmatprep.mubr.bf16.mxu1 %v15993_v39  ;;  %v16002_v39 = vld [vmem:[%s21754_s1 + $0x2224] ss:$16 sps:$4 sm:$0xff]  }
 0x40d   : > { %10863 = vmatpush1.bf16.msra.mxu0 %v15901_v40  ;;  %11938 = vmatpush1.bf16.msra.mxu1 %v15904_v41  ;;  %v16005_v40 = vld [vmem:[%s21754_s1 + $0x222c] ss:$16 sps:$4 sm:$0xff]  }
 0x40e   : > { %10864 = vmatprep.subr.bf16.mxu0 %v15909_v42  ;;  %11939 = vmatprep.subr.bf16.mxu1 %v15912_v43  ;;  %v16092_v41 = vld [vmem:[%s16986_s26 + $0x8c] ss:$200 sps:$4 sm:$0xff]   ;;  %v16000_v42 = vld [vmem:[%s21754_s1 + $0x2220] ss:$16 sps:$4 sm:$0xff]   ;;  %v16003_v43 = vld [vmem:[%s21754_s1 + $0x2228] ss:$16 sps:$4 sm:$0xff]  }
 0x411   : > { %10865 = vmatpush1.bf16.msra.mxu0 %v15907_v44  ;;  %11940 = vmatpush1.bf16.msra.mxu1 %v15910_v45  ;;  %v16008_v44 = vld [vmem:[%s21754_s1 + $0x2244] ss:$16 sps:$4 sm:$0xff]   ;;  %v16011_v45 = vld [vmem:[%s21754_s1 + $0x224c] ss:$16 sps:$4 sm:$0xff]  }
 0x412   : > { %10866 = vmatprep.subr.bf16.mxu0 %v15915_v46  ;;  %11941 = vmatprep.subr.bf16.mxu1 %v15918_v47  ;;  %v16006_v46 = vld [vmem:[%s21754_s1 + $0x2240] ss:$16 sps:$4 sm:$0xff]   ;;  %v16009_v47 = vld [vmem:[%s21754_s1 + $0x2248] ss:$16 sps:$4 sm:$0xff]  }
 0x415   : > { %10867 = vmatpush1.bf16.msra.mxu0 %v15913_v48  ;;  %11942 = vmatpush1.bf16.msra.mxu1 %v15916_v49  ;;  %v16014_v48 = vld [vmem:[%s21754_s1 + $0x2264] ss:$16 sps:$4 sm:$0xff]   ;;  %v16017_v49 = vld [vmem:[%s21754_s1 + $0x226c] ss:$16 sps:$4 sm:$0xff]  }
 0x416   : > { %10868 = vmatprep.subr.bf16.mxu0 %v15921_v50  ;;  %11943 = vmatprep.subr.bf16.mxu1 %v15924_v51  ;;  %v16012_v50 = vld [vmem:[%s21754_s1 + $0x2260] ss:$16 sps:$4 sm:$0xff]   ;;  %v16015_v51 = vld [vmem:[%s21754_s1 + $0x2268] ss:$16 sps:$4 sm:$0xff]  }
 0x419   : > { %10869 = vmatpush1.bf16.msra.mxu0 %v15919_v52  ;;  %11944 = vmatpush1.bf16.msra.mxu1 %v15922_v53  ;;  %v16020_v52 = vld [vmem:[%s21754_s1 + $0x2284] ss:$16 sps:$4 sm:$0xff]   ;;  %v16023_v53 = vld [vmem:[%s21754_s1 + $0x228c] ss:$16 sps:$4 sm:$0xff]  }
 0x41a   : > { %10870 = vmatprep.subr.bf16.mxu0 %v15927_v54  ;;  %11945 = vmatprep.subr.bf16.mxu1 %v15930_v55  ;;  %v16018_v54 = vld [vmem:[%s21754_s1 + $0x2280] ss:$16 sps:$4 sm:$0xff]   ;;  %v16021_v55 = vld [vmem:[%s21754_s1 + $0x2288] ss:$16 sps:$4 sm:$0xff]  }
 0x41d   : > { %10871 = vmatpush1.bf16.msra.mxu0 %v15925_v56  ;;  %11946 = vmatpush1.bf16.msra.mxu1 %v15928_v57  ;;  %v16026_v56 = vld [vmem:[%s21754_s1 + $0x22a4] ss:$16 sps:$4 sm:$0xff]   ;;  %v16029_v57 = vld [vmem:[%s21754_s1 + $0x22ac] ss:$16 sps:$4 sm:$0xff]  }
 0x41e   : > { %10872 = vmatprep.subr.bf16.mxu0 %v15933_v58  ;;  %11947 = vmatprep.subr.bf16.mxu1 %v15936_v59  ;;  %v16024_v58 = vld [vmem:[%s21754_s1 + $0x22a0] ss:$16 sps:$4 sm:$0xff]   ;;  %v16027_v59 = vld [vmem:[%s21754_s1 + $0x22a8] ss:$16 sps:$4 sm:$0xff]  }
 0x421   : > { %10873 = vmatpush1.bf16.msra.mxu0 %v15931_v60  ;;  %11948 = vmatpush1.bf16.msra.mxu1 %v15934_v61  ;;  %v16032_v60 = vld [vmem:[%s21754_s1 + $0x22c4] ss:$16 sps:$4 sm:$0xff]   ;;  %v16035_v61 = vld [vmem:[%s21754_s1 + $0x22cc] ss:$16 sps:$4 sm:$0xff]  }
 0x422   : > { %10874 = vmatprep.subr.bf16.mxu0 %v15939_v62  ;;  %11949 = vmatprep.subr.bf16.mxu1 %v15942_v63  ;;  %v16030_v62 = vld [vmem:[%s21754_s1 + $0x22c0] ss:$16 sps:$4 sm:$0xff]   ;;  %v16033_v63 = vld [vmem:[%s21754_s1 + $0x22c8] ss:$16 sps:$4 sm:$0xff]  }
 0x425   : > { %10875 = vmatpush1.bf16.msra.mxu0 %v15937_v0  ;;  %11950 = vmatpush1.bf16.msra.mxu1 %v15940_v1  ;;  %v16038_v0 = vld [vmem:[%s21754_s1 + $0x22e4] ss:$16 sps:$4 sm:$0xff]   ;;  %v16041_v1 = vld [vmem:[%s21754_s1 + $0x22ec] ss:$16 sps:$4 sm:$0xff]  }
 0x426   : > { %10876 = vmatprep.subr.bf16.mxu0 %v15945_v2  ;;  %11951 = vmatprep.subr.bf16.mxu1 %v15948_v3  ;;  %v16036_v2 = vld [vmem:[%s21754_s1 + $0x22e0] ss:$16 sps:$4 sm:$0xff]   ;;  %v16039_v3 = vld [vmem:[%s21754_s1 + $0x22e8] ss:$16 sps:$4 sm:$0xff]  }
 0x429   : > { %10877 = vmatpush1.bf16.msra.mxu0 %v15943_v4  ;;  %11952 = vmatpush1.bf16.msra.mxu1 %v15946_v5  ;;  %v16044_v4 = vld [vmem:[%s21754_s1 + $0x2304] ss:$16 sps:$4 sm:$0xff]   ;;  %v16047_v5 = vld [vmem:[%s21754_s1 + $0x230c] ss:$16 sps:$4 sm:$0xff]  }
 0x42a   : > { %10878 = vmatprep.subr.bf16.mxu0 %v15951_v6  ;;  %11953 = vmatprep.subr.bf16.mxu1 %v15954_v7  ;;  %v16042_v6 = vld [vmem:[%s21754_s1 + $0x2300] ss:$16 sps:$4 sm:$0xff]   ;;  %v16045_v7 = vld [vmem:[%s21754_s1 + $0x2308] ss:$16 sps:$4 sm:$0xff]  }
 0x42d   : > { %10879 = vmatpush1.bf16.msra.mxu0 %v15949_v8  ;;  %11954 = vmatpush1.bf16.msra.mxu1 %v15952_v9  ;;  %v16050_v8 = vld [vmem:[%s21754_s1 + $0x2324] ss:$16 sps:$4 sm:$0xff]   ;;  %v16053_v9 = vld [vmem:[%s21754_s1 + $0x232c] ss:$16 sps:$4 sm:$0xff]  }
 0x42e   : > { %10880 = vmatprep.subr.bf16.mxu0 %v15957_v10  ;;  %11955 = vmatprep.subr.bf16.mxu1 %v15960_v11  ;;  %v16048_v10 = vld [vmem:[%s21754_s1 + $0x2320] ss:$16 sps:$4 sm:$0xff]   ;;  %v16051_v11 = vld [vmem:[%s21754_s1 + $0x2328] ss:$16 sps:$4 sm:$0xff]  }
 0x431   : > { %10881 = vmatpush1.bf16.msra.mxu0 %v15955_v12  ;;  %11956 = vmatpush1.bf16.msra.mxu1 %v15958_v13  ;;  %v16056_v12 = vld [vmem:[%s21754_s1 + $0x2344] ss:$16 sps:$4 sm:$0xff]   ;;  %v16059_v13 = vld [vmem:[%s21754_s1 + $0x234c] ss:$16 sps:$4 sm:$0xff]  }
 0x432   : > { %10882 = vmatprep.subr.bf16.mxu0 %v15963_v14  ;;  %11957 = vmatprep.subr.bf16.mxu1 %v15966_v15  ;;  %v16054_v14 = vld [vmem:[%s21754_s1 + $0x2340] ss:$16 sps:$4 sm:$0xff]   ;;  %v16057_v15 = vld [vmem:[%s21754_s1 + $0x2348] ss:$16 sps:$4 sm:$0xff]  }
 0x435   : > { %10883 = vmatpush1.bf16.msra.mxu0 %v15961_v16  ;;  %11958 = vmatpush1.bf16.msra.mxu1 %v15964_v17  ;;  %v16062_v16 = vld [vmem:[%s21754_s1 + $0x2364] ss:$16 sps:$4 sm:$0xff]   ;;  %v16065_v17 = vld [vmem:[%s21754_s1 + $0x236c] ss:$16 sps:$4 sm:$0xff]  }
 0x436   : > { %10884 = vmatprep.subr.bf16.mxu0 %v15969_v18  ;;  %11959 = vmatprep.subr.bf16.mxu1 %v15972_v19  ;;  %v16060_v18 = vld [vmem:[%s21754_s1 + $0x2360] ss:$16 sps:$4 sm:$0xff]   ;;  %v16063_v19 = vld [vmem:[%s21754_s1 + $0x2368] ss:$16 sps:$4 sm:$0xff]  }
 0x439   : > { %10885 = vmatpush1.bf16.msra.mxu0 %v15967_v20  ;;  %11960 = vmatpush1.bf16.msra.mxu1 %v15970_v21  ;;  %v16068_v20 = vld [vmem:[%s21754_s1 + $0x2384] ss:$16 sps:$4 sm:$0xff]   ;;  %v16071_v21 = vld [vmem:[%s21754_s1 + $0x238c] ss:$16 sps:$4 sm:$0xff]  }
 0x43a   : > { %10886 = vmatprep.subr.bf16.mxu0 %v15975_v22  ;;  %11961 = vmatprep.subr.bf16.mxu1 %v15978_v23  ;;  %v16066_v22 = vld [vmem:[%s21754_s1 + $0x2380] ss:$16 sps:$4 sm:$0xff]   ;;  %v16069_v23 = vld [vmem:[%s21754_s1 + $0x2388] ss:$16 sps:$4 sm:$0xff]  }
 0x43d   : > { %10887 = vmatpush1.bf16.msra.mxu0 %v15973_v24  ;;  %11962 = vmatpush1.bf16.msra.mxu1 %v15976_v25  ;;  %v16074_v24 = vld [vmem:[%s21754_s1 + $0x23a4] ss:$16 sps:$4 sm:$0xff]   ;;  %v16077_v25 = vld [vmem:[%s21754_s1 + $0x23ac] ss:$16 sps:$4 sm:$0xff]  }
 0x43e   : > { %10888 = vmatprep.subr.bf16.mxu0 %v15981_v26  ;;  %11963 = vmatprep.subr.bf16.mxu1 %v15984_v27  ;;  %v16072_v26 = vld [vmem:[%s21754_s1 + $0x23a0] ss:$16 sps:$4 sm:$0xff]   ;;  %v16075_v27 = vld [vmem:[%s21754_s1 + $0x23a8] ss:$16 sps:$4 sm:$0xff]  }
 0x441   : > { %10889 = vmatpush1.bf16.msra.mxu0 %v15979_v28  ;;  %11964 = vmatpush1.bf16.msra.mxu1 %v15982_v29  ;;  %v16080_v28 = vld [vmem:[%s21754_s1 + $0x23c4] ss:$16 sps:$4 sm:$0xff]   ;;  %v16083_v29 = vld [vmem:[%s21754_s1 + $0x23cc] ss:$16 sps:$4 sm:$0xff]  }
 0x442   : > { %10890 = vmatprep.subr.bf16.mxu0 %v15987_v30  ;;  %11965 = vmatprep.subr.bf16.mxu1 %v15990_v31  ;;  %v16078_v30 = vld [vmem:[%s21754_s1 + $0x23c0] ss:$16 sps:$4 sm:$0xff]   ;;  %v16081_v31 = vld [vmem:[%s21754_s1 + $0x23c8] ss:$16 sps:$4 sm:$0xff]  }
 0x445   : > { %10891 = vmatpush1.bf16.msra.mxu0 %v15985_v32  ;;  %11966 = vmatpush1.bf16.msra.mxu1 %v15988_v33  ;;  %v16086_v32 = vld [vmem:[%s21754_s1 + $0x23e4] ss:$16 sps:$4 sm:$0xff]   ;;  %v16089_v33 = vld [vmem:[%s21754_s1 + $0x23ec] ss:$16 sps:$4 sm:$0xff]  }
 0x446   : > { %10903 = vmatprep.subr.bf16.mxu0 %v15996_v34  ;;  %11978 = vmatprep.subr.bf16.mxu1 %v15999_v35  ;;  %v16084_v34 = vld [vmem:[%s21754_s1 + $0x23e0] ss:$16 sps:$4 sm:$0xff]   ;;  %v16087_v35 = vld [vmem:[%s21754_s1 + $0x23e8] ss:$16 sps:$4 sm:$0xff]  }
 0x448   : > { %10893 = vmatmul.mubr.bf16.vlgmr.msra.gmra.mrb[0].mxu0 %v15991_v36  ;;  %11968 = vmatmul.mubr.bf16.vlgmr.msra.gmra.mrb[0].mxu1 %v15991_v36  ;;  %v16095_v36 = vld [vmem:[%s21754_s1 + $0x2404] ss:$16 sps:$4 sm:$0xff]  }
 0x449   : > { %10904 = vmatpush1.bf16.msra.mxu0 %v15994_v37  ;;  %11979 = vmatpush1.bf16.msra.mxu1 %v15997_v38  ;;  %v16098_v37 = vld [vmem:[%s21754_s1 + $0x240c] ss:$16 sps:$4 sm:$0xff]   ;;  %v16090_v38 = vld [vmem:[%s16986_s26 + $0x88] ss:$200 sps:$4 sm:$0xff]  }
 0x44a   : > { %10905 = vmatprep.subr.bf16.mxu0 %v16002_v39  ;;  %11980 = vmatprep.subr.bf16.mxu1 %v16005_v40  ;;  %v16093_v39 = vld [vmem:[%s21754_s1 + $0x2400] ss:$16 sps:$4 sm:$0xff]   ;;  %v16096_v40 = vld [vmem:[%s21754_s1 + $0x2408] ss:$16 sps:$4 sm:$0xff]  }
 0x44b   : > { %10935 = vmatprep.mubr.bf16.mxu0 %v16092_v41  ;;  %12010 = vmatprep.mubr.bf16.mxu1 %v16092_v41  ;;  %v16101_v41 = vld [vmem:[%s21754_s1 + $0x2424] ss:$16 sps:$4 sm:$0xff]  }
 0x44d   : > { %10906 = vmatpush1.bf16.msra.mxu0 %v16000_v42  ;;  %11981 = vmatpush1.bf16.msra.mxu1 %v16003_v43  ;;  %v16104_v42 = vld [vmem:[%s21754_s1 + $0x242c] ss:$16 sps:$4 sm:$0xff]  }
 0x44e   : > { %10907 = vmatprep.subr.bf16.mxu0 %v16008_v44  ;;  %11982 = vmatprep.subr.bf16.mxu1 %v16011_v45  ;;  %v16191_v43 = vld [vmem:[%s16986_s26 + $0x94] ss:$200 sps:$4 sm:$0xff]   ;;  %v16099_v44 = vld [vmem:[%s21754_s1 + $0x2420] ss:$16 sps:$4 sm:$0xff]   ;;  %v16102_v45 = vld [vmem:[%s21754_s1 + $0x2428] ss:$16 sps:$4 sm:$0xff]  }
 0x451   : > { %10908 = vmatpush1.bf16.msra.mxu0 %v16006_v46  ;;  %11983 = vmatpush1.bf16.msra.mxu1 %v16009_v47  ;;  %v16107_v46 = vld [vmem:[%s21754_s1 + $0x2444] ss:$16 sps:$4 sm:$0xff]   ;;  %v16110_v47 = vld [vmem:[%s21754_s1 + $0x244c] ss:$16 sps:$4 sm:$0xff]  }
 0x452   : > { %10909 = vmatprep.subr.bf16.mxu0 %v16014_v48  ;;  %11984 = vmatprep.subr.bf16.mxu1 %v16017_v49  ;;  %v16105_v48 = vld [vmem:[%s21754_s1 + $0x2440] ss:$16 sps:$4 sm:$0xff]   ;;  %v16108_v49 = vld [vmem:[%s21754_s1 + $0x2448] ss:$16 sps:$4 sm:$0xff]  }
 0x455   : > { %10910 = vmatpush1.bf16.msra.mxu0 %v16012_v50  ;;  %11985 = vmatpush1.bf16.msra.mxu1 %v16015_v51  ;;  %v16113_v50 = vld [vmem:[%s21754_s1 + $0x2464] ss:$16 sps:$4 sm:$0xff]   ;;  %v16116_v51 = vld [vmem:[%s21754_s1 + $0x246c] ss:$16 sps:$4 sm:$0xff]  }
 0x456   : > { %10911 = vmatprep.subr.bf16.mxu0 %v16020_v52  ;;  %11986 = vmatprep.subr.bf16.mxu1 %v16023_v53  ;;  %v16111_v52 = vld [vmem:[%s21754_s1 + $0x2460] ss:$16 sps:$4 sm:$0xff]   ;;  %v16114_v53 = vld [vmem:[%s21754_s1 + $0x2468] ss:$16 sps:$4 sm:$0xff]  }
 0x459   : > { %10912 = vmatpush1.bf16.msra.mxu0 %v16018_v54  ;;  %11987 = vmatpush1.bf16.msra.mxu1 %v16021_v55  ;;  %v16119_v54 = vld [vmem:[%s21754_s1 + $0x2484] ss:$16 sps:$4 sm:$0xff]   ;;  %v16122_v55 = vld [vmem:[%s21754_s1 + $0x248c] ss:$16 sps:$4 sm:$0xff]  }
 0x45a   : > { %10913 = vmatprep.subr.bf16.mxu0 %v16026_v56  ;;  %11988 = vmatprep.subr.bf16.mxu1 %v16029_v57  ;;  %v16117_v56 = vld [vmem:[%s21754_s1 + $0x2480] ss:$16 sps:$4 sm:$0xff]   ;;  %v16120_v57 = vld [vmem:[%s21754_s1 + $0x2488] ss:$16 sps:$4 sm:$0xff]  }
 0x45d   : > { %10914 = vmatpush1.bf16.msra.mxu0 %v16024_v58  ;;  %11989 = vmatpush1.bf16.msra.mxu1 %v16027_v59  ;;  %v16125_v58 = vld [vmem:[%s21754_s1 + $0x24a4] ss:$16 sps:$4 sm:$0xff]   ;;  %v16128_v59 = vld [vmem:[%s21754_s1 + $0x24ac] ss:$16 sps:$4 sm:$0xff]  }
 0x45e   : > { %10915 = vmatprep.subr.bf16.mxu0 %v16032_v60  ;;  %11990 = vmatprep.subr.bf16.mxu1 %v16035_v61  ;;  %v16123_v60 = vld [vmem:[%s21754_s1 + $0x24a0] ss:$16 sps:$4 sm:$0xff]   ;;  %v16126_v61 = vld [vmem:[%s21754_s1 + $0x24a8] ss:$16 sps:$4 sm:$0xff]  }
 0x461   : > { %10916 = vmatpush1.bf16.msra.mxu0 %v16030_v62  ;;  %11991 = vmatpush1.bf16.msra.mxu1 %v16033_v63  ;;  %v16131_v62 = vld [vmem:[%s21754_s1 + $0x24c4] ss:$16 sps:$4 sm:$0xff]   ;;  %v16134_v63 = vld [vmem:[%s21754_s1 + $0x24cc] ss:$16 sps:$4 sm:$0xff]  }
 0x462   : > { %10917 = vmatprep.subr.bf16.mxu0 %v16038_v0  ;;  %11992 = vmatprep.subr.bf16.mxu1 %v16041_v1  ;;  %v16129_v0 = vld [vmem:[%s21754_s1 + $0x24c0] ss:$16 sps:$4 sm:$0xff]   ;;  %v16132_v1 = vld [vmem:[%s21754_s1 + $0x24c8] ss:$16 sps:$4 sm:$0xff]  }
 0x465   : > { %10918 = vmatpush1.bf16.msra.mxu0 %v16036_v2  ;;  %11993 = vmatpush1.bf16.msra.mxu1 %v16039_v3  ;;  %v16137_v2 = vld [vmem:[%s21754_s1 + $0x24e4] ss:$16 sps:$4 sm:$0xff]   ;;  %v16140_v3 = vld [vmem:[%s21754_s1 + $0x24ec] ss:$16 sps:$4 sm:$0xff]  }
 0x466   : > { %10919 = vmatprep.subr.bf16.mxu0 %v16044_v4  ;;  %11994 = vmatprep.subr.bf16.mxu1 %v16047_v5  ;;  %v16135_v4 = vld [vmem:[%s21754_s1 + $0x24e0] ss:$16 sps:$4 sm:$0xff]   ;;  %v16138_v5 = vld [vmem:[%s21754_s1 + $0x24e8] ss:$16 sps:$4 sm:$0xff]  }
 0x469   : > { %10920 = vmatpush1.bf16.msra.mxu0 %v16042_v6  ;;  %11995 = vmatpush1.bf16.msra.mxu1 %v16045_v7  ;;  %v16143_v6 = vld [vmem:[%s21754_s1 + $0x2504] ss:$16 sps:$4 sm:$0xff]   ;;  %v16146_v7 = vld [vmem:[%s21754_s1 + $0x250c] ss:$16 sps:$4 sm:$0xff]  }
 0x46a   : > { %10921 = vmatprep.subr.bf16.mxu0 %v16050_v8  ;;  %11996 = vmatprep.subr.bf16.mxu1 %v16053_v9  ;;  %v16141_v8 = vld [vmem:[%s21754_s1 + $0x2500] ss:$16 sps:$4 sm:$0xff]   ;;  %v16144_v9 = vld [vmem:[%s21754_s1 + $0x2508] ss:$16 sps:$4 sm:$0xff]  }
 0x46d   : > { %10922 = vmatpush1.bf16.msra.mxu0 %v16048_v10  ;;  %11997 = vmatpush1.bf16.msra.mxu1 %v16051_v11  ;;  %v16149_v10 = vld [vmem:[%s21754_s1 + $0x2524] ss:$16 sps:$4 sm:$0xff]   ;;  %v16152_v11 = vld [vmem:[%s21754_s1 + $0x252c] ss:$16 sps:$4 sm:$0xff]  }
 0x46e   : > { %10923 = vmatprep.subr.bf16.mxu0 %v16056_v12  ;;  %11998 = vmatprep.subr.bf16.mxu1 %v16059_v13  ;;  %v16147_v12 = vld [vmem:[%s21754_s1 + $0x2520] ss:$16 sps:$4 sm:$0xff]   ;;  %v16150_v13 = vld [vmem:[%s21754_s1 + $0x2528] ss:$16 sps:$4 sm:$0xff]  }
 0x471   : > { %10924 = vmatpush1.bf16.msra.mxu0 %v16054_v14  ;;  %11999 = vmatpush1.bf16.msra.mxu1 %v16057_v15  ;;  %v16155_v14 = vld [vmem:[%s21754_s1 + $0x2544] ss:$16 sps:$4 sm:$0xff]   ;;  %v16158_v15 = vld [vmem:[%s21754_s1 + $0x254c] ss:$16 sps:$4 sm:$0xff]  }
 0x472   : > { %10925 = vmatprep.subr.bf16.mxu0 %v16062_v16  ;;  %12000 = vmatprep.subr.bf16.mxu1 %v16065_v17  ;;  %v16153_v16 = vld [vmem:[%s21754_s1 + $0x2540] ss:$16 sps:$4 sm:$0xff]   ;;  %v16156_v17 = vld [vmem:[%s21754_s1 + $0x2548] ss:$16 sps:$4 sm:$0xff]  }
 0x475   : > { %10926 = vmatpush1.bf16.msra.mxu0 %v16060_v18  ;;  %12001 = vmatpush1.bf16.msra.mxu1 %v16063_v19  ;;  %v16161_v18 = vld [vmem:[%s21754_s1 + $0x2564] ss:$16 sps:$4 sm:$0xff]   ;;  %v16164_v19 = vld [vmem:[%s21754_s1 + $0x256c] ss:$16 sps:$4 sm:$0xff]  }
 0x476   : > { %10927 = vmatprep.subr.bf16.mxu0 %v16068_v20  ;;  %12002 = vmatprep.subr.bf16.mxu1 %v16071_v21  ;;  %v16159_v20 = vld [vmem:[%s21754_s1 + $0x2560] ss:$16 sps:$4 sm:$0xff]   ;;  %v16162_v21 = vld [vmem:[%s21754_s1 + $0x2568] ss:$16 sps:$4 sm:$0xff]  }
 0x479   : > { %10928 = vmatpush1.bf16.msra.mxu0 %v16066_v22  ;;  %12003 = vmatpush1.bf16.msra.mxu1 %v16069_v23  ;;  %v16167_v22 = vld [vmem:[%s21754_s1 + $0x2584] ss:$16 sps:$4 sm:$0xff]   ;;  %v16170_v23 = vld [vmem:[%s21754_s1 + $0x258c] ss:$16 sps:$4 sm:$0xff]  }
 0x47a   : > { %10929 = vmatprep.subr.bf16.mxu0 %v16074_v24  ;;  %12004 = vmatprep.subr.bf16.mxu1 %v16077_v25  ;;  %v16165_v24 = vld [vmem:[%s21754_s1 + $0x2580] ss:$16 sps:$4 sm:$0xff]   ;;  %v16168_v25 = vld [vmem:[%s21754_s1 + $0x2588] ss:$16 sps:$4 sm:$0xff]  }
 0x47d   : > { %10930 = vmatpush1.bf16.msra.mxu0 %v16072_v26  ;;  %12005 = vmatpush1.bf16.msra.mxu1 %v16075_v27  ;;  %v16173_v26 = vld [vmem:[%s21754_s1 + $0x25a4] ss:$16 sps:$4 sm:$0xff]   ;;  %v16176_v27 = vld [vmem:[%s21754_s1 + $0x25ac] ss:$16 sps:$4 sm:$0xff]  }
 0x47e   : > { %10931 = vmatprep.subr.bf16.mxu0 %v16080_v28  ;;  %12006 = vmatprep.subr.bf16.mxu1 %v16083_v29  ;;  %v16171_v28 = vld [vmem:[%s21754_s1 + $0x25a0] ss:$16 sps:$4 sm:$0xff]   ;;  %v16174_v29 = vld [vmem:[%s21754_s1 + $0x25a8] ss:$16 sps:$4 sm:$0xff]  }
 0x481   : > { %10932 = vmatpush1.bf16.msra.mxu0 %v16078_v30  ;;  %12007 = vmatpush1.bf16.msra.mxu1 %v16081_v31  ;;  %v16179_v30 = vld [vmem:[%s21754_s1 + $0x25c4] ss:$16 sps:$4 sm:$0xff]   ;;  %v16182_v31 = vld [vmem:[%s21754_s1 + $0x25cc] ss:$16 sps:$4 sm:$0xff]  }
 0x482   : > { %10933 = vmatprep.subr.bf16.mxu0 %v16086_v32  ;;  %12008 = vmatprep.subr.bf16.mxu1 %v16089_v33  ;;  %v16177_v32 = vld [vmem:[%s21754_s1 + $0x25c0] ss:$16 sps:$4 sm:$0xff]   ;;  %v16180_v33 = vld [vmem:[%s21754_s1 + $0x25c8] ss:$16 sps:$4 sm:$0xff]  }
 0x485   : > { %10934 = vmatpush1.bf16.msra.mxu0 %v16084_v34  ;;  %12009 = vmatpush1.bf16.msra.mxu1 %v16087_v35  ;;  %v16185_v34 = vld [vmem:[%s21754_s1 + $0x25e4] ss:$16 sps:$4 sm:$0xff]   ;;  %v16188_v35 = vld [vmem:[%s21754_s1 + $0x25ec] ss:$16 sps:$4 sm:$0xff]  }
 0x486   : > { %10946 = vmatprep.subr.bf16.mxu0 %v16095_v36  ;;  %12021 = vmatprep.subr.bf16.mxu1 %v16098_v37  ;;  %v16183_v36 = vld [vmem:[%s21754_s1 + $0x25e0] ss:$16 sps:$4 sm:$0xff]   ;;  %v16186_v37 = vld [vmem:[%s21754_s1 + $0x25e8] ss:$16 sps:$4 sm:$0xff]  }
 0x488   : > { %10936 = vmatmul.mubr.bf16.vlgmr.msra.gmra.mrb[0].mxu0 %v16090_v38  ;;  %12011 = vmatmul.mubr.bf16.vlgmr.msra.gmra.mrb[0].mxu1 %v16090_v38  ;;  %v16194_v38 = vld [vmem:[%s21754_s1 + $0x2604] ss:$16 sps:$4 sm:$0xff]  }
 0x489   : > { %10947 = vmatpush1.bf16.msra.mxu0 %v16093_v39  ;;  %12022 = vmatpush1.bf16.msra.mxu1 %v16096_v40  ;;  %v16197_v39 = vld [vmem:[%s21754_s1 + $0x260c] ss:$16 sps:$4 sm:$0xff]   ;;  %v16189_v40 = vld [vmem:[%s16986_s26 + $0x90] ss:$200 sps:$4 sm:$0xff]  }
 0x48a   : > { %10948 = vmatprep.subr.bf16.mxu0 %v16101_v41  ;;  %12023 = vmatprep.subr.bf16.mxu1 %v16104_v42  ;;  %v16192_v41 = vld [vmem:[%s21754_s1 + $0x2600] ss:$16 sps:$4 sm:$0xff]   ;;  %v16195_v42 = vld [vmem:[%s21754_s1 + $0x2608] ss:$16 sps:$4 sm:$0xff]  }
 0x48b   : > { %10978 = vmatprep.mubr.bf16.mxu0 %v16191_v43  ;;  %12053 = vmatprep.mubr.bf16.mxu1 %v16191_v43  ;;  %v16200_v43 = vld [vmem:[%s21754_s1 + $0x2624] ss:$16 sps:$4 sm:$0xff]  }
 0x48d   : > { %10949 = vmatpush1.bf16.msra.mxu0 %v16099_v44  ;;  %12024 = vmatpush1.bf16.msra.mxu1 %v16102_v45  ;;  %v16203_v44 = vld [vmem:[%s21754_s1 + $0x262c] ss:$16 sps:$4 sm:$0xff]  }
 0x48e   : > { %10950 = vmatprep.subr.bf16.mxu0 %v16107_v46  ;;  %12025 = vmatprep.subr.bf16.mxu1 %v16110_v47  ;;  %v16290_v45 = vld [vmem:[%s16986_s26 + $0x9c] ss:$200 sps:$4 sm:$0xff]   ;;  %v16198_v46 = vld [vmem:[%s21754_s1 + $0x2620] ss:$16 sps:$4 sm:$0xff]   ;;  %v16201_v47 = vld [vmem:[%s21754_s1 + $0x2628] ss:$16 sps:$4 sm:$0xff]  }
 0x491   : > { %10951 = vmatpush1.bf16.msra.mxu0 %v16105_v48  ;;  %12026 = vmatpush1.bf16.msra.mxu1 %v16108_v49  ;;  %v16206_v48 = vld [vmem:[%s21754_s1 + $0x2644] ss:$16 sps:$4 sm:$0xff]   ;;  %v16209_v49 = vld [vmem:[%s21754_s1 + $0x264c] ss:$16 sps:$4 sm:$0xff]  }
 0x492   : > { %10952 = vmatprep.subr.bf16.mxu0 %v16113_v50  ;;  %12027 = vmatprep.subr.bf16.mxu1 %v16116_v51  ;;  %v16204_v50 = vld [vmem:[%s21754_s1 + $0x2640] ss:$16 sps:$4 sm:$0xff]   ;;  %v16207_v51 = vld [vmem:[%s21754_s1 + $0x2648] ss:$16 sps:$4 sm:$0xff]  }
 0x495   : > { %10953 = vmatpush1.bf16.msra.mxu0 %v16111_v52  ;;  %12028 = vmatpush1.bf16.msra.mxu1 %v16114_v53  ;;  %v16212_v52 = vld [vmem:[%s21754_s1 + $0x2664] ss:$16 sps:$4 sm:$0xff]   ;;  %v16215_v53 = vld [vmem:[%s21754_s1 + $0x266c] ss:$16 sps:$4 sm:$0xff]  }
 0x496   : > { %10954 = vmatprep.subr.bf16.mxu0 %v16119_v54  ;;  %12029 = vmatprep.subr.bf16.mxu1 %v16122_v55  ;;  %v16210_v54 = vld [vmem:[%s21754_s1 + $0x2660] ss:$16 sps:$4 sm:$0xff]   ;;  %v16213_v55 = vld [vmem:[%s21754_s1 + $0x2668] ss:$16 sps:$4 sm:$0xff]  }
 0x499   : > { %10955 = vmatpush1.bf16.msra.mxu0 %v16117_v56  ;;  %12030 = vmatpush1.bf16.msra.mxu1 %v16120_v57  ;;  %v16218_v56 = vld [vmem:[%s21754_s1 + $0x2684] ss:$16 sps:$4 sm:$0xff]   ;;  %v16221_v57 = vld [vmem:[%s21754_s1 + $0x268c] ss:$16 sps:$4 sm:$0xff]  }
 0x49a   : > { %10956 = vmatprep.subr.bf16.mxu0 %v16125_v58  ;;  %12031 = vmatprep.subr.bf16.mxu1 %v16128_v59  ;;  %v16216_v58 = vld [vmem:[%s21754_s1 + $0x2680] ss:$16 sps:$4 sm:$0xff]   ;;  %v16219_v59 = vld [vmem:[%s21754_s1 + $0x2688] ss:$16 sps:$4 sm:$0xff]  }
 0x49d   : > { %10957 = vmatpush1.bf16.msra.mxu0 %v16123_v60  ;;  %12032 = vmatpush1.bf16.msra.mxu1 %v16126_v61  ;;  %v16224_v60 = vld [vmem:[%s21754_s1 + $0x26a4] ss:$16 sps:$4 sm:$0xff]   ;;  %v16227_v61 = vld [vmem:[%s21754_s1 + $0x26ac] ss:$16 sps:$4 sm:$0xff]  }
 0x49e   : > { %10958 = vmatprep.subr.bf16.mxu0 %v16131_v62  ;;  %12033 = vmatprep.subr.bf16.mxu1 %v16134_v63  ;;  %v16222_v62 = vld [vmem:[%s21754_s1 + $0x26a0] ss:$16 sps:$4 sm:$0xff]   ;;  %v16225_v63 = vld [vmem:[%s21754_s1 + $0x26a8] ss:$16 sps:$4 sm:$0xff]  }
 0x4a1   : > { %10959 = vmatpush1.bf16.msra.mxu0 %v16129_v0  ;;  %12034 = vmatpush1.bf16.msra.mxu1 %v16132_v1  ;;  %v16230_v0 = vld [vmem:[%s21754_s1 + $0x26c4] ss:$16 sps:$4 sm:$0xff]   ;;  %v16233_v1 = vld [vmem:[%s21754_s1 + $0x26cc] ss:$16 sps:$4 sm:$0xff]  }
 0x4a2   : > { %10960 = vmatprep.subr.bf16.mxu0 %v16137_v2  ;;  %12035 = vmatprep.subr.bf16.mxu1 %v16140_v3  ;;  %v16228_v2 = vld [vmem:[%s21754_s1 + $0x26c0] ss:$16 sps:$4 sm:$0xff]   ;;  %v16231_v3 = vld [vmem:[%s21754_s1 + $0x26c8] ss:$16 sps:$4 sm:$0xff]  }
 0x4a5   : > { %10961 = vmatpush1.bf16.msra.mxu0 %v16135_v4  ;;  %12036 = vmatpush1.bf16.msra.mxu1 %v16138_v5  ;;  %v16236_v4 = vld [vmem:[%s21754_s1 + $0x26e4] ss:$16 sps:$4 sm:$0xff]   ;;  %v16239_v5 = vld [vmem:[%s21754_s1 + $0x26ec] ss:$16 sps:$4 sm:$0xff]  }
 0x4a6   : > { %10962 = vmatprep.subr.bf16.mxu0 %v16143_v6  ;;  %12037 = vmatprep.subr.bf16.mxu1 %v16146_v7  ;;  %v16234_v6 = vld [vmem:[%s21754_s1 + $0x26e0] ss:$16 sps:$4 sm:$0xff]   ;;  %v16237_v7 = vld [vmem:[%s21754_s1 + $0x26e8] ss:$16 sps:$4 sm:$0xff]  }
 0x4a9   : > { %10963 = vmatpush1.bf16.msra.mxu0 %v16141_v8  ;;  %12038 = vmatpush1.bf16.msra.mxu1 %v16144_v9  ;;  %v16242_v8 = vld [vmem:[%s21754_s1 + $0x2704] ss:$16 sps:$4 sm:$0xff]   ;;  %v16245_v9 = vld [vmem:[%s21754_s1 + $0x270c] ss:$16 sps:$4 sm:$0xff]  }
 0x4aa   : > { %10964 = vmatprep.subr.bf16.mxu0 %v16149_v10  ;;  %12039 = vmatprep.subr.bf16.mxu1 %v16152_v11  ;;  %v16240_v10 = vld [vmem:[%s21754_s1 + $0x2700] ss:$16 sps:$4 sm:$0xff]   ;;  %v16243_v11 = vld [vmem:[%s21754_s1 + $0x2708] ss:$16 sps:$4 sm:$0xff]  }
 0x4ad   : > { %10965 = vmatpush1.bf16.msra.mxu0 %v16147_v12  ;;  %12040 = vmatpush1.bf16.msra.mxu1 %v16150_v13  ;;  %v16248_v12 = vld [vmem:[%s21754_s1 + $0x2724] ss:$16 sps:$4 sm:$0xff]   ;;  %v16251_v13 = vld [vmem:[%s21754_s1 + $0x272c] ss:$16 sps:$4 sm:$0xff]  }
 0x4ae   : > { %10966 = vmatprep.subr.bf16.mxu0 %v16155_v14  ;;  %12041 = vmatprep.subr.bf16.mxu1 %v16158_v15  ;;  %v16246_v14 = vld [vmem:[%s21754_s1 + $0x2720] ss:$16 sps:$4 sm:$0xff]   ;;  %v16249_v15 = vld [vmem:[%s21754_s1 + $0x2728] ss:$16 sps:$4 sm:$0xff]  }
 0x4b1   : > { %10967 = vmatpush1.bf16.msra.mxu0 %v16153_v16  ;;  %12042 = vmatpush1.bf16.msra.mxu1 %v16156_v17  ;;  %v16254_v16 = vld [vmem:[%s21754_s1 + $0x2744] ss:$16 sps:$4 sm:$0xff]   ;;  %v16257_v17 = vld [vmem:[%s21754_s1 + $0x274c] ss:$16 sps:$4 sm:$0xff]  }
 0x4b2   : > { %10968 = vmatprep.subr.bf16.mxu0 %v16161_v18  ;;  %12043 = vmatprep.subr.bf16.mxu1 %v16164_v19  ;;  %v16252_v18 = vld [vmem:[%s21754_s1 + $0x2740] ss:$16 sps:$4 sm:$0xff]   ;;  %v16255_v19 = vld [vmem:[%s21754_s1 + $0x2748] ss:$16 sps:$4 sm:$0xff]  }
 0x4b5   : > { %10969 = vmatpush1.bf16.msra.mxu0 %v16159_v20  ;;  %12044 = vmatpush1.bf16.msra.mxu1 %v16162_v21  ;;  %v16260_v20 = vld [vmem:[%s21754_s1 + $0x2764] ss:$16 sps:$4 sm:$0xff]   ;;  %v16263_v21 = vld [vmem:[%s21754_s1 + $0x276c] ss:$16 sps:$4 sm:$0xff]  }
 0x4b6   : > { %10970 = vmatprep.subr.bf16.mxu0 %v16167_v22  ;;  %12045 = vmatprep.subr.bf16.mxu1 %v16170_v23  ;;  %v16258_v22 = vld [vmem:[%s21754_s1 + $0x2760] ss:$16 sps:$4 sm:$0xff]   ;;  %v16261_v23 = vld [vmem:[%s21754_s1 + $0x2768] ss:$16 sps:$4 sm:$0xff]  }
 0x4b9   : > { %10971 = vmatpush1.bf16.msra.mxu0 %v16165_v24  ;;  %12046 = vmatpush1.bf16.msra.mxu1 %v16168_v25  ;;  %v16266_v24 = vld [vmem:[%s21754_s1 + $0x2784] ss:$16 sps:$4 sm:$0xff]   ;;  %v16269_v25 = vld [vmem:[%s21754_s1 + $0x278c] ss:$16 sps:$4 sm:$0xff]  }
 0x4ba   : > { %10972 = vmatprep.subr.bf16.mxu0 %v16173_v26  ;;  %12047 = vmatprep.subr.bf16.mxu1 %v16176_v27  ;;  %v16264_v26 = vld [vmem:[%s21754_s1 + $0x2780] ss:$16 sps:$4 sm:$0xff]   ;;  %v16267_v27 = vld [vmem:[%s21754_s1 + $0x2788] ss:$16 sps:$4 sm:$0xff]  }
 0x4bd   : > { %10973 = vmatpush1.bf16.msra.mxu0 %v16171_v28  ;;  %12048 = vmatpush1.bf16.msra.mxu1 %v16174_v29  ;;  %v16272_v28 = vld [vmem:[%s21754_s1 + $0x27a4] ss:$16 sps:$4 sm:$0xff]   ;;  %v16275_v29 = vld [vmem:[%s21754_s1 + $0x27ac] ss:$16 sps:$4 sm:$0xff]  }
 0x4be   : > { %10974 = vmatprep.subr.bf16.mxu0 %v16179_v30  ;;  %12049 = vmatprep.subr.bf16.mxu1 %v16182_v31  ;;  %v16270_v30 = vld [vmem:[%s21754_s1 + $0x27a0] ss:$16 sps:$4 sm:$0xff]   ;;  %v16273_v31 = vld [vmem:[%s21754_s1 + $0x27a8] ss:$16 sps:$4 sm:$0xff]  }
 0x4c1   : > { %10975 = vmatpush1.bf16.msra.mxu0 %v16177_v32  ;;  %12050 = vmatpush1.bf16.msra.mxu1 %v16180_v33  ;;  %v16278_v32 = vld [vmem:[%s21754_s1 + $0x27c4] ss:$16 sps:$4 sm:$0xff]   ;;  %v16281_v33 = vld [vmem:[%s21754_s1 + $0x27cc] ss:$16 sps:$4 sm:$0xff]  }
 0x4c2   : > { %10976 = vmatprep.subr.bf16.mxu0 %v16185_v34  ;;  %12051 = vmatprep.subr.bf16.mxu1 %v16188_v35  ;;  %v16276_v34 = vld [vmem:[%s21754_s1 + $0x27c0] ss:$16 sps:$4 sm:$0xff]   ;;  %v16279_v35 = vld [vmem:[%s21754_s1 + $0x27c8] ss:$16 sps:$4 sm:$0xff]  }
 0x4c5   : > { %10977 = vmatpush1.bf16.msra.mxu0 %v16183_v36  ;;  %12052 = vmatpush1.bf16.msra.mxu1 %v16186_v37  ;;  %v16284_v36 = vld [vmem:[%s21754_s1 + $0x27e4] ss:$16 sps:$4 sm:$0xff]   ;;  %v16287_v37 = vld [vmem:[%s21754_s1 + $0x27ec] ss:$16 sps:$4 sm:$0xff]  }
 0x4c6   : > { %10989 = vmatprep.subr.bf16.mxu0 %v16194_v38  ;;  %12064 = vmatprep.subr.bf16.mxu1 %v16197_v39  ;;  %v16282_v38 = vld [vmem:[%s21754_s1 + $0x27e0] ss:$16 sps:$4 sm:$0xff]   ;;  %v16285_v39 = vld [vmem:[%s21754_s1 + $0x27e8] ss:$16 sps:$4 sm:$0xff]  }
 0x4c8   : > { %10979 = vmatmul.mubr.bf16.vlgmr.msra.gmra.mrb[0].mxu0 %v16189_v40  ;;  %12054 = vmatmul.mubr.bf16.vlgmr.msra.gmra.mrb[0].mxu1 %v16189_v40  ;;  %v16293_v40 = vld [vmem:[%s21754_s1 + $0x2804] ss:$16 sps:$4 sm:$0xff]  }
 0x4c9   : > { %10990 = vmatpush1.bf16.msra.mxu0 %v16192_v41  ;;  %12065 = vmatpush1.bf16.msra.mxu1 %v16195_v42  ;;  %v16296_v41 = vld [vmem:[%s21754_s1 + $0x280c] ss:$16 sps:$4 sm:$0xff]   ;;  %v16288_v42 = vld [vmem:[%s16986_s26 + $0x98] ss:$200 sps:$4 sm:$0xff]  }
 0x4ca   : > { %10991 = vmatprep.subr.bf16.mxu0 %v16200_v43  ;;  %12066 = vmatprep.subr.bf16.mxu1 %v16203_v44  ;;  %v16291_v43 = vld [vmem:[%s21754_s1 + $0x2800] ss:$16 sps:$4 sm:$0xff]   ;;  %v16294_v44 = vld [vmem:[%s21754_s1 + $0x2808] ss:$16 sps:$4 sm:$0xff]  }
 0x4cb   : > { %11021 = vmatprep.mubr.bf16.mxu0 %v16290_v45  ;;  %12096 = vmatprep.mubr.bf16.mxu1 %v16290_v45  ;;  %v16299_v45 = vld [vmem:[%s21754_s1 + $0x2824] ss:$16 sps:$4 sm:$0xff]  }
 0x4cd   : > { %10992 = vmatpush1.bf16.msra.mxu0 %v16198_v46  ;;  %12067 = vmatpush1.bf16.msra.mxu1 %v16201_v47  ;;  %v16302_v46 = vld [vmem:[%s21754_s1 + $0x282c] ss:$16 sps:$4 sm:$0xff]  }
 0x4ce   : > { %10993 = vmatprep.subr.bf16.mxu0 %v16206_v48  ;;  %12068 = vmatprep.subr.bf16.mxu1 %v16209_v49  ;;  %v16389_v47 = vld [vmem:[%s16986_s26 + $0xa4] ss:$200 sps:$4 sm:$0xff]   ;;  %v16297_v48 = vld [vmem:[%s21754_s1 + $0x2820] ss:$16 sps:$4 sm:$0xff]   ;;  %v16300_v49 = vld [vmem:[%s21754_s1 + $0x2828] ss:$16 sps:$4 sm:$0xff]  }
 0x4d1   : > { %10994 = vmatpush1.bf16.msra.mxu0 %v16204_v50  ;;  %12069 = vmatpush1.bf16.msra.mxu1 %v16207_v51  ;;  %v16305_v50 = vld [vmem:[%s21754_s1 + $0x2844] ss:$16 sps:$4 sm:$0xff]   ;;  %v16308_v51 = vld [vmem:[%s21754_s1 + $0x284c] ss:$16 sps:$4 sm:$0xff]  }
 0x4d2   : > { %10995 = vmatprep.subr.bf16.mxu0 %v16212_v52  ;;  %12070 = vmatprep.subr.bf16.mxu1 %v16215_v53  ;;  %v16303_v52 = vld [vmem:[%s21754_s1 + $0x2840] ss:$16 sps:$4 sm:$0xff]   ;;  %v16306_v53 = vld [vmem:[%s21754_s1 + $0x2848] ss:$16 sps:$4 sm:$0xff]  }
 0x4d5   : > { %10996 = vmatpush1.bf16.msra.mxu0 %v16210_v54  ;;  %12071 = vmatpush1.bf16.msra.mxu1 %v16213_v55  ;;  %v16311_v54 = vld [vmem:[%s21754_s1 + $0x2864] ss:$16 sps:$4 sm:$0xff]   ;;  %v16314_v55 = vld [vmem:[%s21754_s1 + $0x286c] ss:$16 sps:$4 sm:$0xff]  }
 0x4d6   : > { %10997 = vmatprep.subr.bf16.mxu0 %v16218_v56  ;;  %12072 = vmatprep.subr.bf16.mxu1 %v16221_v57  ;;  %v16309_v56 = vld [vmem:[%s21754_s1 + $0x2860] ss:$16 sps:$4 sm:$0xff]   ;;  %v16312_v57 = vld [vmem:[%s21754_s1 + $0x2868] ss:$16 sps:$4 sm:$0xff]  }
 0x4d9   : > { %10998 = vmatpush1.bf16.msra.mxu0 %v16216_v58  ;;  %12073 = vmatpush1.bf16.msra.mxu1 %v16219_v59  ;;  %v16317_v58 = vld [vmem:[%s21754_s1 + $0x2884] ss:$16 sps:$4 sm:$0xff]   ;;  %v16320_v59 = vld [vmem:[%s21754_s1 + $0x288c] ss:$16 sps:$4 sm:$0xff]  }
 0x4da   : > { %10999 = vmatprep.subr.bf16.mxu0 %v16224_v60  ;;  %12074 = vmatprep.subr.bf16.mxu1 %v16227_v61  ;;  %v16315_v60 = vld [vmem:[%s21754_s1 + $0x2880] ss:$16 sps:$4 sm:$0xff]   ;;  %v16318_v61 = vld [vmem:[%s21754_s1 + $0x2888] ss:$16 sps:$4 sm:$0xff]  }
 0x4dd   : > { %11000 = vmatpush1.bf16.msra.mxu0 %v16222_v62  ;;  %12075 = vmatpush1.bf16.msra.mxu1 %v16225_v63  ;;  %v16323_v62 = vld [vmem:[%s21754_s1 + $0x28a4] ss:$16 sps:$4 sm:$0xff]   ;;  %v16326_v63 = vld [vmem:[%s21754_s1 + $0x28ac] ss:$16 sps:$4 sm:$0xff]  }
 0x4de   : > { %11001 = vmatprep.subr.bf16.mxu0 %v16230_v0  ;;  %12076 = vmatprep.subr.bf16.mxu1 %v16233_v1  ;;  %v16321_v0 = vld [vmem:[%s21754_s1 + $0x28a0] ss:$16 sps:$4 sm:$0xff]   ;;  %v16324_v1 = vld [vmem:[%s21754_s1 + $0x28a8] ss:$16 sps:$4 sm:$0xff]  }
 0x4e1   : > { %11002 = vmatpush1.bf16.msra.mxu0 %v16228_v2  ;;  %12077 = vmatpush1.bf16.msra.mxu1 %v16231_v3  ;;  %v16329_v2 = vld [vmem:[%s21754_s1 + $0x28c4] ss:$16 sps:$4 sm:$0xff]   ;;  %v16332_v3 = vld [vmem:[%s21754_s1 + $0x28cc] ss:$16 sps:$4 sm:$0xff]  }
 0x4e2   : > { %11003 = vmatprep.subr.bf16.mxu0 %v16236_v4  ;;  %12078 = vmatprep.subr.bf16.mxu1 %v16239_v5  ;;  %v16327_v4 = vld [vmem:[%s21754_s1 + $0x28c0] ss:$16 sps:$4 sm:$0xff]   ;;  %v16330_v5 = vld [vmem:[%s21754_s1 + $0x28c8] ss:$16 sps:$4 sm:$0xff]  }
 0x4e5   : > { %11004 = vmatpush1.bf16.msra.mxu0 %v16234_v6  ;;  %12079 = vmatpush1.bf16.msra.mxu1 %v16237_v7  ;;  %v16335_v6 = vld [vmem:[%s21754_s1 + $0x28e4] ss:$16 sps:$4 sm:$0xff]   ;;  %v16338_v7 = vld [vmem:[%s21754_s1 + $0x28ec] ss:$16 sps:$4 sm:$0xff]  }
 0x4e6   : > { %11005 = vmatprep.subr.bf16.mxu0 %v16242_v8  ;;  %12080 = vmatprep.subr.bf16.mxu1 %v16245_v9  ;;  %v16333_v8 = vld [vmem:[%s21754_s1 + $0x28e0] ss:$16 sps:$4 sm:$0xff]   ;;  %v16336_v9 = vld [vmem:[%s21754_s1 + $0x28e8] ss:$16 sps:$4 sm:$0xff]  }
 0x4e9   : > { %11006 = vmatpush1.bf16.msra.mxu0 %v16240_v10  ;;  %12081 = vmatpush1.bf16.msra.mxu1 %v16243_v11  ;;  %v16341_v10 = vld [vmem:[%s21754_s1 + $0x2904] ss:$16 sps:$4 sm:$0xff]   ;;  %v16344_v11 = vld [vmem:[%s21754_s1 + $0x290c] ss:$16 sps:$4 sm:$0xff]  }
 0x4ea   : > { %11007 = vmatprep.subr.bf16.mxu0 %v16248_v12  ;;  %12082 = vmatprep.subr.bf16.mxu1 %v16251_v13  ;;  %v16339_v12 = vld [vmem:[%s21754_s1 + $0x2900] ss:$16 sps:$4 sm:$0xff]   ;;  %v16342_v13 = vld [vmem:[%s21754_s1 + $0x2908] ss:$16 sps:$4 sm:$0xff]  }
 0x4ed   : > { %11008 = vmatpush1.bf16.msra.mxu0 %v16246_v14  ;;  %12083 = vmatpush1.bf16.msra.mxu1 %v16249_v15  ;;  %v16347_v14 = vld [vmem:[%s21754_s1 + $0x2924] ss:$16 sps:$4 sm:$0xff]   ;;  %v16350_v15 = vld [vmem:[%s21754_s1 + $0x292c] ss:$16 sps:$4 sm:$0xff]  }
 0x4ee   : > { %11009 = vmatprep.subr.bf16.mxu0 %v16254_v16  ;;  %12084 = vmatprep.subr.bf16.mxu1 %v16257_v17  ;;  %v16345_v16 = vld [vmem:[%s21754_s1 + $0x2920] ss:$16 sps:$4 sm:$0xff]   ;;  %v16348_v17 = vld [vmem:[%s21754_s1 + $0x2928] ss:$16 sps:$4 sm:$0xff]  }
 0x4f1   : > { %11010 = vmatpush1.bf16.msra.mxu0 %v16252_v18  ;;  %12085 = vmatpush1.bf16.msra.mxu1 %v16255_v19  ;;  %v16353_v18 = vld [vmem:[%s21754_s1 + $0x2944] ss:$16 sps:$4 sm:$0xff]   ;;  %v16356_v19 = vld [vmem:[%s21754_s1 + $0x294c] ss:$16 sps:$4 sm:$0xff]  }
 0x4f2   : > { %11011 = vmatprep.subr.bf16.mxu0 %v16260_v20  ;;  %12086 = vmatprep.subr.bf16.mxu1 %v16263_v21  ;;  %v16351_v20 = vld [vmem:[%s21754_s1 + $0x2940] ss:$16 sps:$4 sm:$0xff]   ;;  %v16354_v21 = vld [vmem:[%s21754_s1 + $0x2948] ss:$16 sps:$4 sm:$0xff]  }
 0x4f5   : > { %11012 = vmatpush1.bf16.msra.mxu0 %v16258_v22  ;;  %12087 = vmatpush1.bf16.msra.mxu1 %v16261_v23  ;;  %v16359_v22 = vld [vmem:[%s21754_s1 + $0x2964] ss:$16 sps:$4 sm:$0xff]   ;;  %v16362_v23 = vld [vmem:[%s21754_s1 + $0x296c] ss:$16 sps:$4 sm:$0xff]  }
 0x4f6   : > { %11013 = vmatprep.subr.bf16.mxu0 %v16266_v24  ;;  %12088 = vmatprep.subr.bf16.mxu1 %v16269_v25  ;;  %v16357_v24 = vld [vmem:[%s21754_s1 + $0x2960] ss:$16 sps:$4 sm:$0xff]   ;;  %v16360_v25 = vld [vmem:[%s21754_s1 + $0x2968] ss:$16 sps:$4 sm:$0xff]  }
 0x4f9   : > { %11014 = vmatpush1.bf16.msra.mxu0 %v16264_v26  ;;  %12089 = vmatpush1.bf16.msra.mxu1 %v16267_v27  ;;  %v16365_v26 = vld [vmem:[%s21754_s1 + $0x2984] ss:$16 sps:$4 sm:$0xff]   ;;  %v16368_v27 = vld [vmem:[%s21754_s1 + $0x298c] ss:$16 sps:$4 sm:$0xff]  }
 0x4fa   : > { %11015 = vmatprep.subr.bf16.mxu0 %v16272_v28  ;;  %12090 = vmatprep.subr.bf16.mxu1 %v16275_v29  ;;  %v16363_v28 = vld [vmem:[%s21754_s1 + $0x2980] ss:$16 sps:$4 sm:$0xff]   ;;  %v16366_v29 = vld [vmem:[%s21754_s1 + $0x2988] ss:$16 sps:$4 sm:$0xff]  }
 0x4fd   : > { %11016 = vmatpush1.bf16.msra.mxu0 %v16270_v30  ;;  %12091 = vmatpush1.bf16.msra.mxu1 %v16273_v31  ;;  %v16371_v30 = vld [vmem:[%s21754_s1 + $0x29a4] ss:$16 sps:$4 sm:$0xff]   ;;  %v16374_v31 = vld [vmem:[%s21754_s1 + $0x29ac] ss:$16 sps:$4 sm:$0xff]  }
 0x4fe   : > { %11017 = vmatprep.subr.bf16.mxu0 %v16278_v32  ;;  %12092 = vmatprep.subr.bf16.mxu1 %v16281_v33  ;;  %v16369_v32 = vld [vmem:[%s21754_s1 + $0x29a0] ss:$16 sps:$4 sm:$0xff]   ;;  %v16372_v33 = vld [vmem:[%s21754_s1 + $0x29a8] ss:$16 sps:$4 sm:$0xff]  }
 0x501   : > { %11018 = vmatpush1.bf16.msra.mxu0 %v16276_v34  ;;  %12093 = vmatpush1.bf16.msra.mxu1 %v16279_v35  ;;  %v16377_v34 = vld [vmem:[%s21754_s1 + $0x29c4] ss:$16 sps:$4 sm:$0xff]   ;;  %v16380_v35 = vld [vmem:[%s21754_s1 + $0x29cc] ss:$16 sps:$4 sm:$0xff]  }
 0x502   : > { %11019 = vmatprep.subr.bf16.mxu0 %v16284_v36  ;;  %12094 = vmatprep.subr.bf16.mxu1 %v16287_v37  ;;  %v16375_v36 = vld [vmem:[%s21754_s1 + $0x29c0] ss:$16 sps:$4 sm:$0xff]   ;;  %v16378_v37 = vld [vmem:[%s21754_s1 + $0x29c8] ss:$16 sps:$4 sm:$0xff]  }
 0x505   : > { %11020 = vmatpush1.bf16.msra.mxu0 %v16282_v38  ;;  %12095 = vmatpush1.bf16.msra.mxu1 %v16285_v39  ;;  %v16383_v38 = vld [vmem:[%s21754_s1 + $0x29e4] ss:$16 sps:$4 sm:$0xff]   ;;  %v16386_v39 = vld [vmem:[%s21754_s1 + $0x29ec] ss:$16 sps:$4 sm:$0xff]  }
 0x506   : > { %11032 = vmatprep.subr.bf16.mxu0 %v16293_v40  ;;  %12107 = vmatprep.subr.bf16.mxu1 %v16296_v41  ;;  %v16381_v40 = vld [vmem:[%s21754_s1 + $0x29e0] ss:$16 sps:$4 sm:$0xff]   ;;  %v16384_v41 = vld [vmem:[%s21754_s1 + $0x29e8] ss:$16 sps:$4 sm:$0xff]  }
 0x508   : > { %11022 = vmatmul.mubr.bf16.vlgmr.msra.gmra.mrb[0].mxu0 %v16288_v42  ;;  %12097 = vmatmul.mubr.bf16.vlgmr.msra.gmra.mrb[0].mxu1 %v16288_v42  ;;  %v16392_v42 = vld [vmem:[%s21754_s1 + $0x2a04] ss:$16 sps:$4 sm:$0xff]  }
 0x509   : > { %11033 = vmatpush1.bf16.msra.mxu0 %v16291_v43  ;;  %12108 = vmatpush1.bf16.msra.mxu1 %v16294_v44  ;;  %v16395_v43 = vld [vmem:[%s21754_s1 + $0x2a0c] ss:$16 sps:$4 sm:$0xff]   ;;  %v16387_v44 = vld [vmem:[%s16986_s26 + $0xa0] ss:$200 sps:$4 sm:$0xff]  }
 0x50a   : > { %11034 = vmatprep.subr.bf16.mxu0 %v16299_v45  ;;  %12109 = vmatprep.subr.bf16.mxu1 %v16302_v46  ;;  %v16390_v45 = vld [vmem:[%s21754_s1 + $0x2a00] ss:$16 sps:$4 sm:$0xff]   ;;  %v16393_v46 = vld [vmem:[%s21754_s1 + $0x2a08] ss:$16 sps:$4 sm:$0xff]  }
 0x50b   : > { %11064 = vmatprep.mubr.bf16.mxu0 %v16389_v47  ;;  %12139 = vmatprep.mubr.bf16.mxu1 %v16389_v47  ;;  %v16398_v47 = vld [vmem:[%s21754_s1 + $0x2a24] ss:$16 sps:$4 sm:$0xff]  }
 0x50d   : > { %11035 = vmatpush1.bf16.msra.mxu0 %v16297_v48  ;;  %12110 = vmatpush1.bf16.msra.mxu1 %v16300_v49  ;;  %v16401_v48 = vld [vmem:[%s21754_s1 + $0x2a2c] ss:$16 sps:$4 sm:$0xff]  }
 0x50e   : > { %11036 = vmatprep.subr.bf16.mxu0 %v16305_v50  ;;  %12111 = vmatprep.subr.bf16.mxu1 %v16308_v51  ;;  %v16488_v49 = vld [vmem:[%s16986_s26 + $0xac] ss:$200 sps:$4 sm:$0xff]   ;;  %v16396_v50 = vld [vmem:[%s21754_s1 + $0x2a20] ss:$16 sps:$4 sm:$0xff]   ;;  %v16399_v51 = vld [vmem:[%s21754_s1 + $0x2a28] ss:$16 sps:$4 sm:$0xff]  }
 0x511   : > { %11037 = vmatpush1.bf16.msra.mxu0 %v16303_v52  ;;  %12112 = vmatpush1.bf16.msra.mxu1 %v16306_v53  ;;  %v16404_v52 = vld [vmem:[%s21754_s1 + $0x2a44] ss:$16 sps:$4 sm:$0xff]   ;;  %v16407_v53 = vld [vmem:[%s21754_s1 + $0x2a4c] ss:$16 sps:$4 sm:$0xff]  }
 0x512   : > { %11038 = vmatprep.subr.bf16.mxu0 %v16311_v54  ;;  %12113 = vmatprep.subr.bf16.mxu1 %v16314_v55  ;;  %v16402_v54 = vld [vmem:[%s21754_s1 + $0x2a40] ss:$16 sps:$4 sm:$0xff]   ;;  %v16405_v55 = vld [vmem:[%s21754_s1 + $0x2a48] ss:$16 sps:$4 sm:$0xff]  }
 0x515   : > { %11039 = vmatpush1.bf16.msra.mxu0 %v16309_v56  ;;  %12114 = vmatpush1.bf16.msra.mxu1 %v16312_v57  ;;  %v16410_v56 = vld [vmem:[%s21754_s1 + $0x2a64] ss:$16 sps:$4 sm:$0xff]   ;;  %v16413_v57 = vld [vmem:[%s21754_s1 + $0x2a6c] ss:$16 sps:$4 sm:$0xff]  }
 0x516   : > { %11040 = vmatprep.subr.bf16.mxu0 %v16317_v58  ;;  %12115 = vmatprep.subr.bf16.mxu1 %v16320_v59  ;;  %v16408_v58 = vld [vmem:[%s21754_s1 + $0x2a60] ss:$16 sps:$4 sm:$0xff]   ;;  %v16411_v59 = vld [vmem:[%s21754_s1 + $0x2a68] ss:$16 sps:$4 sm:$0xff]  }
 0x519   : > { %11041 = vmatpush1.bf16.msra.mxu0 %v16315_v60  ;;  %12116 = vmatpush1.bf16.msra.mxu1 %v16318_v61  ;;  %v16416_v60 = vld [vmem:[%s21754_s1 + $0x2a84] ss:$16 sps:$4 sm:$0xff]   ;;  %v16419_v61 = vld [vmem:[%s21754_s1 + $0x2a8c] ss:$16 sps:$4 sm:$0xff]  }
 0x51a   : > { %11042 = vmatprep.subr.bf16.mxu0 %v16323_v62  ;;  %12117 = vmatprep.subr.bf16.mxu1 %v16326_v63  ;;  %v16414_v62 = vld [vmem:[%s21754_s1 + $0x2a80] ss:$16 sps:$4 sm:$0xff]   ;;  %v16417_v63 = vld [vmem:[%s21754_s1 + $0x2a88] ss:$16 sps:$4 sm:$0xff]  }
 0x51d   : > { %11043 = vmatpush1.bf16.msra.mxu0 %v16321_v0  ;;  %12118 = vmatpush1.bf16.msra.mxu1 %v16324_v1  ;;  %v16422_v0 = vld [vmem:[%s21754_s1 + $0x2aa4] ss:$16 sps:$4 sm:$0xff]   ;;  %v16425_v1 = vld [vmem:[%s21754_s1 + $0x2aac] ss:$16 sps:$4 sm:$0xff]  }
 0x51e   : > { %11044 = vmatprep.subr.bf16.mxu0 %v16329_v2  ;;  %12119 = vmatprep.subr.bf16.mxu1 %v16332_v3  ;;  %v16420_v2 = vld [vmem:[%s21754_s1 + $0x2aa0] ss:$16 sps:$4 sm:$0xff]   ;;  %v16423_v3 = vld [vmem:[%s21754_s1 + $0x2aa8] ss:$16 sps:$4 sm:$0xff]  }
 0x521   : > { %11045 = vmatpush1.bf16.msra.mxu0 %v16327_v4  ;;  %12120 = vmatpush1.bf16.msra.mxu1 %v16330_v5  ;;  %v16428_v4 = vld [vmem:[%s21754_s1 + $0x2ac4] ss:$16 sps:$4 sm:$0xff]   ;;  %v16431_v5 = vld [vmem:[%s21754_s1 + $0x2acc] ss:$16 sps:$4 sm:$0xff]  }
 0x522   : > { %11046 = vmatprep.subr.bf16.mxu0 %v16335_v6  ;;  %12121 = vmatprep.subr.bf16.mxu1 %v16338_v7  ;;  %v16426_v6 = vld [vmem:[%s21754_s1 + $0x2ac0] ss:$16 sps:$4 sm:$0xff]   ;;  %v16429_v7 = vld [vmem:[%s21754_s1 + $0x2ac8] ss:$16 sps:$4 sm:$0xff]  }
 0x525   : > { %11047 = vmatpush1.bf16.msra.mxu0 %v16333_v8  ;;  %12122 = vmatpush1.bf16.msra.mxu1 %v16336_v9  ;;  %v16434_v8 = vld [vmem:[%s21754_s1 + $0x2ae4] ss:$16 sps:$4 sm:$0xff]   ;;  %v16437_v9 = vld [vmem:[%s21754_s1 + $0x2aec] ss:$16 sps:$4 sm:$0xff]  }
 0x526   : > { %11048 = vmatprep.subr.bf16.mxu0 %v16341_v10  ;;  %12123 = vmatprep.subr.bf16.mxu1 %v16344_v11  ;;  %v16432_v10 = vld [vmem:[%s21754_s1 + $0x2ae0] ss:$16 sps:$4 sm:$0xff]   ;;  %v16435_v11 = vld [vmem:[%s21754_s1 + $0x2ae8] ss:$16 sps:$4 sm:$0xff]  }
 0x529   : > { %11049 = vmatpush1.bf16.msra.mxu0 %v16339_v12  ;;  %12124 = vmatpush1.bf16.msra.mxu1 %v16342_v13  ;;  %v16440_v12 = vld [vmem:[%s21754_s1 + $0x2b04] ss:$16 sps:$4 sm:$0xff]   ;;  %v16443_v13 = vld [vmem:[%s21754_s1 + $0x2b0c] ss:$16 sps:$4 sm:$0xff]  }
 0x52a   : > { %11050 = vmatprep.subr.bf16.mxu0 %v16347_v14  ;;  %12125 = vmatprep.subr.bf16.mxu1 %v16350_v15  ;;  %v16438_v14 = vld [vmem:[%s21754_s1 + $0x2b00] ss:$16 sps:$4 sm:$0xff]   ;;  %v16441_v15 = vld [vmem:[%s21754_s1 + $0x2b08] ss:$16 sps:$4 sm:$0xff]  }
 0x52d   : > { %11051 = vmatpush1.bf16.msra.mxu0 %v16345_v16  ;;  %12126 = vmatpush1.bf16.msra.mxu1 %v16348_v17  ;;  %v16446_v16 = vld [vmem:[%s21754_s1 + $0x2b24] ss:$16 sps:$4 sm:$0xff]   ;;  %v16449_v17 = vld [vmem:[%s21754_s1 + $0x2b2c] ss:$16 sps:$4 sm:$0xff]  }
 0x52e   : > { %11052 = vmatprep.subr.bf16.mxu0 %v16353_v18  ;;  %12127 = vmatprep.subr.bf16.mxu1 %v16356_v19  ;;  %v16444_v18 = vld [vmem:[%s21754_s1 + $0x2b20] ss:$16 sps:$4 sm:$0xff]   ;;  %v16447_v19 = vld [vmem:[%s21754_s1 + $0x2b28] ss:$16 sps:$4 sm:$0xff]  }
 0x531   : > { %11053 = vmatpush1.bf16.msra.mxu0 %v16351_v20  ;;  %12128 = vmatpush1.bf16.msra.mxu1 %v16354_v21  ;;  %v16452_v20 = vld [vmem:[%s21754_s1 + $0x2b44] ss:$16 sps:$4 sm:$0xff]   ;;  %v16455_v21 = vld [vmem:[%s21754_s1 + $0x2b4c] ss:$16 sps:$4 sm:$0xff]  }
 0x532   : > { %11054 = vmatprep.subr.bf16.mxu0 %v16359_v22  ;;  %12129 = vmatprep.subr.bf16.mxu1 %v16362_v23  ;;  %v16450_v22 = vld [vmem:[%s21754_s1 + $0x2b40] ss:$16 sps:$4 sm:$0xff]   ;;  %v16453_v23 = vld [vmem:[%s21754_s1 + $0x2b48] ss:$16 sps:$4 sm:$0xff]  }
 0x535   : > { %11055 = vmatpush1.bf16.msra.mxu0 %v16357_v24  ;;  %12130 = vmatpush1.bf16.msra.mxu1 %v16360_v25  ;;  %v16458_v24 = vld [vmem:[%s21754_s1 + $0x2b64] ss:$16 sps:$4 sm:$0xff]   ;;  %v16461_v25 = vld [vmem:[%s21754_s1 + $0x2b6c] ss:$16 sps:$4 sm:$0xff]  }
 0x536   : > { %11056 = vmatprep.subr.bf16.mxu0 %v16365_v26  ;;  %12131 = vmatprep.subr.bf16.mxu1 %v16368_v27  ;;  %v16456_v26 = vld [vmem:[%s21754_s1 + $0x2b60] ss:$16 sps:$4 sm:$0xff]   ;;  %v16459_v27 = vld [vmem:[%s21754_s1 + $0x2b68] ss:$16 sps:$4 sm:$0xff]  }
 0x539   : > { %11057 = vmatpush1.bf16.msra.mxu0 %v16363_v28  ;;  %12132 = vmatpush1.bf16.msra.mxu1 %v16366_v29  ;;  %v16464_v28 = vld [vmem:[%s21754_s1 + $0x2b84] ss:$16 sps:$4 sm:$0xff]   ;;  %v16467_v29 = vld [vmem:[%s21754_s1 + $0x2b8c] ss:$16 sps:$4 sm:$0xff]  }
 0x53a   : > { %11058 = vmatprep.subr.bf16.mxu0 %v16371_v30  ;;  %12133 = vmatprep.subr.bf16.mxu1 %v16374_v31  ;;  %v16462_v30 = vld [vmem:[%s21754_s1 + $0x2b80] ss:$16 sps:$4 sm:$0xff]   ;;  %v16465_v31 = vld [vmem:[%s21754_s1 + $0x2b88] ss:$16 sps:$4 sm:$0xff]  }
 0x53d   : > { %11059 = vmatpush1.bf16.msra.mxu0 %v16369_v32  ;;  %12134 = vmatpush1.bf16.msra.mxu1 %v16372_v33  ;;  %v16470_v32 = vld [vmem:[%s21754_s1 + $0x2ba4] ss:$16 sps:$4 sm:$0xff]   ;;  %v16473_v33 = vld [vmem:[%s21754_s1 + $0x2bac] ss:$16 sps:$4 sm:$0xff]  }
 0x53e   : > { %11060 = vmatprep.subr.bf16.mxu0 %v16377_v34  ;;  %12135 = vmatprep.subr.bf16.mxu1 %v16380_v35  ;;  %v16468_v34 = vld [vmem:[%s21754_s1 + $0x2ba0] ss:$16 sps:$4 sm:$0xff]   ;;  %v16471_v35 = vld [vmem:[%s21754_s1 + $0x2ba8] ss:$16 sps:$4 sm:$0xff]  }
 0x541   : > { %11061 = vmatpush1.bf16.msra.mxu0 %v16375_v36  ;;  %12136 = vmatpush1.bf16.msra.mxu1 %v16378_v37  ;;  %v16476_v36 = vld [vmem:[%s21754_s1 + $0x2bc4] ss:$16 sps:$4 sm:$0xff]   ;;  %v16479_v37 = vld [vmem:[%s21754_s1 + $0x2bcc] ss:$16 sps:$4 sm:$0xff]  }
 0x542   : > { %11062 = vmatprep.subr.bf16.mxu0 %v16383_v38  ;;  %12137 = vmatprep.subr.bf16.mxu1 %v16386_v39  ;;  %v16474_v38 = vld [vmem:[%s21754_s1 + $0x2bc0] ss:$16 sps:$4 sm:$0xff]   ;;  %v16477_v39 = vld [vmem:[%s21754_s1 + $0x2bc8] ss:$16 sps:$4 sm:$0xff]  }
 0x545   : > { %11063 = vmatpush1.bf16.msra.mxu0 %v16381_v40  ;;  %12138 = vmatpush1.bf16.msra.mxu1 %v16384_v41  ;;  %v16482_v40 = vld [vmem:[%s21754_s1 + $0x2be4] ss:$16 sps:$4 sm:$0xff]   ;;  %v16485_v41 = vld [vmem:[%s21754_s1 + $0x2bec] ss:$16 sps:$4 sm:$0xff]  }
 0x546   : > { %11075 = vmatprep.subr.bf16.mxu0 %v16392_v42  ;;  %12150 = vmatprep.subr.bf16.mxu1 %v16395_v43  ;;  %v16480_v42 = vld [vmem:[%s21754_s1 + $0x2be0] ss:$16 sps:$4 sm:$0xff]   ;;  %v16483_v43 = vld [vmem:[%s21754_s1 + $0x2be8] ss:$16 sps:$4 sm:$0xff]  }
 0x548   : > { %11065 = vmatmul.mubr.bf16.vlgmr.msra.gmra.mrb[0].mxu0 %v16387_v44  ;;  %12140 = vmatmul.mubr.bf16.vlgmr.msra.gmra.mrb[0].mxu1 %v16387_v44  ;;  %v16491_v44 = vld [vmem:[%s21754_s1 + $0x2c04] ss:$16 sps:$4 sm:$0xff]  }
 0x549   : > { %11076 = vmatpush1.bf16.msra.mxu0 %v16390_v45  ;;  %12151 = vmatpush1.bf16.msra.mxu1 %v16393_v46  ;;  %v16494_v45 = vld [vmem:[%s21754_s1 + $0x2c0c] ss:$16 sps:$4 sm:$0xff]   ;;  %v16486_v46 = vld [vmem:[%s16986_s26 + $0xa8] ss:$200 sps:$4 sm:$0xff]  }
 0x54a   : > { %11077 = vmatprep.subr.bf16.mxu0 %v16398_v47  ;;  %12152 = vmatprep.subr.bf16.mxu1 %v16401_v48  ;;  %v16489_v47 = vld [vmem:[%s21754_s1 + $0x2c00] ss:$16 sps:$4 sm:$0xff]   ;;  %v16492_v48 = vld [vmem:[%s21754_s1 + $0x2c08] ss:$16 sps:$4 sm:$0xff]  }
 0x54b   : > { %11107 = vmatprep.mubr.bf16.mxu0 %v16488_v49  ;;  %12182 = vmatprep.mubr.bf16.mxu1 %v16488_v49  ;;  %v16497_v49 = vld [vmem:[%s21754_s1 + $0x2c24] ss:$16 sps:$4 sm:$0xff]  }
 0x54d   : > { %11078 = vmatpush1.bf16.msra.mxu0 %v16396_v50  ;;  %12153 = vmatpush1.bf16.msra.mxu1 %v16399_v51  ;;  %v16500_v50 = vld [vmem:[%s21754_s1 + $0x2c2c] ss:$16 sps:$4 sm:$0xff]  }
 0x54e   : > { %11079 = vmatprep.subr.bf16.mxu0 %v16404_v52  ;;  %12154 = vmatprep.subr.bf16.mxu1 %v16407_v53  ;;  %v16587_v51 = vld [vmem:[%s16986_s26 + $0xb4] ss:$200 sps:$4 sm:$0xff]   ;;  %v16495_v52 = vld [vmem:[%s21754_s1 + $0x2c20] ss:$16 sps:$4 sm:$0xff]   ;;  %v16498_v53 = vld [vmem:[%s21754_s1 + $0x2c28] ss:$16 sps:$4 sm:$0xff]  }
 0x551   : > { %11080 = vmatpush1.bf16.msra.mxu0 %v16402_v54  ;;  %12155 = vmatpush1.bf16.msra.mxu1 %v16405_v55  ;;  %v16503_v54 = vld [vmem:[%s21754_s1 + $0x2c44] ss:$16 sps:$4 sm:$0xff]   ;;  %v16506_v55 = vld [vmem:[%s21754_s1 + $0x2c4c] ss:$16 sps:$4 sm:$0xff]  }
 0x552   : > { %11081 = vmatprep.subr.bf16.mxu0 %v16410_v56  ;;  %12156 = vmatprep.subr.bf16.mxu1 %v16413_v57  ;;  %v16501_v56 = vld [vmem:[%s21754_s1 + $0x2c40] ss:$16 sps:$4 sm:$0xff]   ;;  %v16504_v57 = vld [vmem:[%s21754_s1 + $0x2c48] ss:$16 sps:$4 sm:$0xff]  }
 0x555   : > { %11082 = vmatpush1.bf16.msra.mxu0 %v16408_v58  ;;  %12157 = vmatpush1.bf16.msra.mxu1 %v16411_v59  ;;  %v16509_v58 = vld [vmem:[%s21754_s1 + $0x2c64] ss:$16 sps:$4 sm:$0xff]   ;;  %v16512_v59 = vld [vmem:[%s21754_s1 + $0x2c6c] ss:$16 sps:$4 sm:$0xff]  }
 0x556   : > { %11083 = vmatprep.subr.bf16.mxu0 %v16416_v60  ;;  %12158 = vmatprep.subr.bf16.mxu1 %v16419_v61  ;;  %v16507_v60 = vld [vmem:[%s21754_s1 + $0x2c60] ss:$16 sps:$4 sm:$0xff]   ;;  %v16510_v61 = vld [vmem:[%s21754_s1 + $0x2c68] ss:$16 sps:$4 sm:$0xff]  }
 0x559   : > { %11084 = vmatpush1.bf16.msra.mxu0 %v16414_v62  ;;  %12159 = vmatpush1.bf16.msra.mxu1 %v16417_v63  ;;  %v16515_v62 = vld [vmem:[%s21754_s1 + $0x2c84] ss:$16 sps:$4 sm:$0xff]   ;;  %v16518_v63 = vld [vmem:[%s21754_s1 + $0x2c8c] ss:$16 sps:$4 sm:$0xff]  }
 0x55a   : > { %11085 = vmatprep.subr.bf16.mxu0 %v16422_v0  ;;  %12160 = vmatprep.subr.bf16.mxu1 %v16425_v1  ;;  %v16513_v0 = vld [vmem:[%s21754_s1 + $0x2c80] ss:$16 sps:$4 sm:$0xff]   ;;  %v16516_v1 = vld [vmem:[%s21754_s1 + $0x2c88] ss:$16 sps:$4 sm:$0xff]  }
 0x55d   : > { %11086 = vmatpush1.bf16.msra.mxu0 %v16420_v2  ;;  %12161 = vmatpush1.bf16.msra.mxu1 %v16423_v3  ;;  %v16521_v2 = vld [vmem:[%s21754_s1 + $0x2ca4] ss:$16 sps:$4 sm:$0xff]   ;;  %v16524_v3 = vld [vmem:[%s21754_s1 + $0x2cac] ss:$16 sps:$4 sm:$0xff]  }
 0x55e   : > { %11087 = vmatprep.subr.bf16.mxu0 %v16428_v4  ;;  %12162 = vmatprep.subr.bf16.mxu1 %v16431_v5  ;;  %v16519_v4 = vld [vmem:[%s21754_s1 + $0x2ca0] ss:$16 sps:$4 sm:$0xff]   ;;  %v16522_v5 = vld [vmem:[%s21754_s1 + $0x2ca8] ss:$16 sps:$4 sm:$0xff]  }
 0x561   : > { %11088 = vmatpush1.bf16.msra.mxu0 %v16426_v6  ;;  %12163 = vmatpush1.bf16.msra.mxu1 %v16429_v7  ;;  %v16527_v6 = vld [vmem:[%s21754_s1 + $0x2cc4] ss:$16 sps:$4 sm:$0xff]   ;;  %v16530_v7 = vld [vmem:[%s21754_s1 + $0x2ccc] ss:$16 sps:$4 sm:$0xff]  }
 0x562   : > { %11089 = vmatprep.subr.bf16.mxu0 %v16434_v8  ;;  %12164 = vmatprep.subr.bf16.mxu1 %v16437_v9  ;;  %v16525_v8 = vld [vmem:[%s21754_s1 + $0x2cc0] ss:$16 sps:$4 sm:$0xff]   ;;  %v16528_v9 = vld [vmem:[%s21754_s1 + $0x2cc8] ss:$16 sps:$4 sm:$0xff]  }
 0x565   : > { %11090 = vmatpush1.bf16.msra.mxu0 %v16432_v10  ;;  %12165 = vmatpush1.bf16.msra.mxu1 %v16435_v11  ;;  %v16533_v10 = vld [vmem:[%s21754_s1 + $0x2ce4] ss:$16 sps:$4 sm:$0xff]   ;;  %v16536_v11 = vld [vmem:[%s21754_s1 + $0x2cec] ss:$16 sps:$4 sm:$0xff]  }
 0x566   : > { %11091 = vmatprep.subr.bf16.mxu0 %v16440_v12  ;;  %12166 = vmatprep.subr.bf16.mxu1 %v16443_v13  ;;  %v16531_v12 = vld [vmem:[%s21754_s1 + $0x2ce0] ss:$16 sps:$4 sm:$0xff]   ;;  %v16534_v13 = vld [vmem:[%s21754_s1 + $0x2ce8] ss:$16 sps:$4 sm:$0xff]  }
 0x569   : > { %11092 = vmatpush1.bf16.msra.mxu0 %v16438_v14  ;;  %12167 = vmatpush1.bf16.msra.mxu1 %v16441_v15  ;;  %v16539_v14 = vld [vmem:[%s21754_s1 + $0x2d04] ss:$16 sps:$4 sm:$0xff]   ;;  %v16542_v15 = vld [vmem:[%s21754_s1 + $0x2d0c] ss:$16 sps:$4 sm:$0xff]  }
 0x56a   : > { %11093 = vmatprep.subr.bf16.mxu0 %v16446_v16  ;;  %12168 = vmatprep.subr.bf16.mxu1 %v16449_v17  ;;  %v16537_v16 = vld [vmem:[%s21754_s1 + $0x2d00] ss:$16 sps:$4 sm:$0xff]   ;;  %v16540_v17 = vld [vmem:[%s21754_s1 + $0x2d08] ss:$16 sps:$4 sm:$0xff]  }
 0x56d   : > { %11094 = vmatpush1.bf16.msra.mxu0 %v16444_v18  ;;  %12169 = vmatpush1.bf16.msra.mxu1 %v16447_v19  ;;  %v16545_v18 = vld [vmem:[%s21754_s1 + $0x2d24] ss:$16 sps:$4 sm:$0xff]   ;;  %v16548_v19 = vld [vmem:[%s21754_s1 + $0x2d2c] ss:$16 sps:$4 sm:$0xff]  }
 0x56e   : > { %11095 = vmatprep.subr.bf16.mxu0 %v16452_v20  ;;  %12170 = vmatprep.subr.bf16.mxu1 %v16455_v21  ;;  %v16543_v20 = vld [vmem:[%s21754_s1 + $0x2d20] ss:$16 sps:$4 sm:$0xff]   ;;  %v16546_v21 = vld [vmem:[%s21754_s1 + $0x2d28] ss:$16 sps:$4 sm:$0xff]  }
 0x571   : > { %11096 = vmatpush1.bf16.msra.mxu0 %v16450_v22  ;;  %12171 = vmatpush1.bf16.msra.mxu1 %v16453_v23  ;;  %v16551_v22 = vld [vmem:[%s21754_s1 + $0x2d44] ss:$16 sps:$4 sm:$0xff]   ;;  %v16554_v23 = vld [vmem:[%s21754_s1 + $0x2d4c] ss:$16 sps:$4 sm:$0xff]  }
 0x572   : > { %11097 = vmatprep.subr.bf16.mxu0 %v16458_v24  ;;  %12172 = vmatprep.subr.bf16.mxu1 %v16461_v25  ;;  %v16549_v24 = vld [vmem:[%s21754_s1 + $0x2d40] ss:$16 sps:$4 sm:$0xff]   ;;  %v16552_v25 = vld [vmem:[%s21754_s1 + $0x2d48] ss:$16 sps:$4 sm:$0xff]  }
 0x575   : > { %11098 = vmatpush1.bf16.msra.mxu0 %v16456_v26  ;;  %12173 = vmatpush1.bf16.msra.mxu1 %v16459_v27  ;;  %v16557_v26 = vld [vmem:[%s21754_s1 + $0x2d64] ss:$16 sps:$4 sm:$0xff]   ;;  %v16560_v27 = vld [vmem:[%s21754_s1 + $0x2d6c] ss:$16 sps:$4 sm:$0xff]  }
 0x576   : > { %11099 = vmatprep.subr.bf16.mxu0 %v16464_v28  ;;  %12174 = vmatprep.subr.bf16.mxu1 %v16467_v29  ;;  %v16555_v28 = vld [vmem:[%s21754_s1 + $0x2d60] ss:$16 sps:$4 sm:$0xff]   ;;  %v16558_v29 = vld [vmem:[%s21754_s1 + $0x2d68] ss:$16 sps:$4 sm:$0xff]  }
 0x579   : > { %11100 = vmatpush1.bf16.msra.mxu0 %v16462_v30  ;;  %12175 = vmatpush1.bf16.msra.mxu1 %v16465_v31  ;;  %v16563_v30 = vld [vmem:[%s21754_s1 + $0x2d84] ss:$16 sps:$4 sm:$0xff]   ;;  %v16566_v31 = vld [vmem:[%s21754_s1 + $0x2d8c] ss:$16 sps:$4 sm:$0xff]  }
 0x57a   : > { %11101 = vmatprep.subr.bf16.mxu0 %v16470_v32  ;;  %12176 = vmatprep.subr.bf16.mxu1 %v16473_v33  ;;  %v16561_v32 = vld [vmem:[%s21754_s1 + $0x2d80] ss:$16 sps:$4 sm:$0xff]   ;;  %v16564_v33 = vld [vmem:[%s21754_s1 + $0x2d88] ss:$16 sps:$4 sm:$0xff]  }
 0x57d   : > { %11102 = vmatpush1.bf16.msra.mxu0 %v16468_v34  ;;  %12177 = vmatpush1.bf16.msra.mxu1 %v16471_v35  ;;  %v16569_v34 = vld [vmem:[%s21754_s1 + $0x2da4] ss:$16 sps:$4 sm:$0xff]   ;;  %v16572_v35 = vld [vmem:[%s21754_s1 + $0x2dac] ss:$16 sps:$4 sm:$0xff]  }
 0x57e   : > { %11103 = vmatprep.subr.bf16.mxu0 %v16476_v36  ;;  %12178 = vmatprep.subr.bf16.mxu1 %v16479_v37  ;;  %v16567_v36 = vld [vmem:[%s21754_s1 + $0x2da0] ss:$16 sps:$4 sm:$0xff]   ;;  %v16570_v37 = vld [vmem:[%s21754_s1 + $0x2da8] ss:$16 sps:$4 sm:$0xff]  }
 0x581   : > { %11104 = vmatpush1.bf16.msra.mxu0 %v16474_v38  ;;  %12179 = vmatpush1.bf16.msra.mxu1 %v16477_v39  ;;  %v16575_v38 = vld [vmem:[%s21754_s1 + $0x2dc4] ss:$16 sps:$4 sm:$0xff]   ;;  %v16578_v39 = vld [vmem:[%s21754_s1 + $0x2dcc] ss:$16 sps:$4 sm:$0xff]  }
 0x582   : > { %11105 = vmatprep.subr.bf16.mxu0 %v16482_v40  ;;  %12180 = vmatprep.subr.bf16.mxu1 %v16485_v41  ;;  %v16573_v40 = vld [vmem:[%s21754_s1 + $0x2dc0] ss:$16 sps:$4 sm:$0xff]   ;;  %v16576_v41 = vld [vmem:[%s21754_s1 + $0x2dc8] ss:$16 sps:$4 sm:$0xff]  }
 0x585   : > { %11106 = vmatpush1.bf16.msra.mxu0 %v16480_v42  ;;  %12181 = vmatpush1.bf16.msra.mxu1 %v16483_v43  ;;  %v16581_v42 = vld [vmem:[%s21754_s1 + $0x2de4] ss:$16 sps:$4 sm:$0xff]   ;;  %v16584_v43 = vld [vmem:[%s21754_s1 + $0x2dec] ss:$16 sps:$4 sm:$0xff]  }
 0x586   : > { %11118 = vmatprep.subr.bf16.mxu0 %v16491_v44  ;;  %12193 = vmatprep.subr.bf16.mxu1 %v16494_v45  ;;  %v16579_v44 = vld [vmem:[%s21754_s1 + $0x2de0] ss:$16 sps:$4 sm:$0xff]   ;;  %v16582_v45 = vld [vmem:[%s21754_s1 + $0x2de8] ss:$16 sps:$4 sm:$0xff]  }
 0x588   : > { %11108 = vmatmul.mubr.bf16.vlgmr.msra.gmra.mrb[0].mxu0 %v16486_v46  ;;  %12183 = vmatmul.mubr.bf16.vlgmr.msra.gmra.mrb[0].mxu1 %v16486_v46  ;;  %v16590_v46 = vld [vmem:[%s21754_s1 + $0x2e04] ss:$16 sps:$4 sm:$0xff]  }
 0x589   : > { %11119 = vmatpush1.bf16.msra.mxu0 %v16489_v47  ;;  %12194 = vmatpush1.bf16.msra.mxu1 %v16492_v48  ;;  %v16593_v47 = vld [vmem:[%s21754_s1 + $0x2e0c] ss:$16 sps:$4 sm:$0xff]   ;;  %v16585_v48 = vld [vmem:[%s16986_s26 + $0xb0] ss:$200 sps:$4 sm:$0xff]  }
 0x58a   : > { %11120 = vmatprep.subr.bf16.mxu0 %v16497_v49  ;;  %12195 = vmatprep.subr.bf16.mxu1 %v16500_v50  ;;  %v16588_v49 = vld [vmem:[%s21754_s1 + $0x2e00] ss:$16 sps:$4 sm:$0xff]   ;;  %v16591_v50 = vld [vmem:[%s21754_s1 + $0x2e08] ss:$16 sps:$4 sm:$0xff]  }
 0x58b   : > { %11150 = vmatprep.mubr.bf16.mxu0 %v16587_v51  ;;  %12225 = vmatprep.mubr.bf16.mxu1 %v16587_v51  ;;  %v16596_v51 = vld [vmem:[%s21754_s1 + $0x2e24] ss:$16 sps:$4 sm:$0xff]  }
 0x58d   : > { %11121 = vmatpush1.bf16.msra.mxu0 %v16495_v52  ;;  %12196 = vmatpush1.bf16.msra.mxu1 %v16498_v53  ;;  %v16599_v52 = vld [vmem:[%s21754_s1 + $0x2e2c] ss:$16 sps:$4 sm:$0xff]  }
 0x58e   : > { %11122 = vmatprep.subr.bf16.mxu0 %v16503_v54  ;;  %12197 = vmatprep.subr.bf16.mxu1 %v16506_v55  ;;  %v16686_v53 = vld [vmem:[%s16986_s26 + $0xbc] ss:$200 sps:$4 sm:$0xff]   ;;  %v16594_v54 = vld [vmem:[%s21754_s1 + $0x2e20] ss:$16 sps:$4 sm:$0xff]   ;;  %v16597_v55 = vld [vmem:[%s21754_s1 + $0x2e28] ss:$16 sps:$4 sm:$0xff]  }
 0x591   : > { %11123 = vmatpush1.bf16.msra.mxu0 %v16501_v56  ;;  %12198 = vmatpush1.bf16.msra.mxu1 %v16504_v57  ;;  %v16602_v56 = vld [vmem:[%s21754_s1 + $0x2e44] ss:$16 sps:$4 sm:$0xff]   ;;  %v16605_v57 = vld [vmem:[%s21754_s1 + $0x2e4c] ss:$16 sps:$4 sm:$0xff]  }
 0x592   : > { %11124 = vmatprep.subr.bf16.mxu0 %v16509_v58  ;;  %12199 = vmatprep.subr.bf16.mxu1 %v16512_v59  ;;  %v16794_v58 = vmov 0   ;;  %v12322_v59 = vld [vmem:[%s21756_s3] sm:$0xff] }
 0x593   : > { %14310 = vset.pattern.permute.xlu0 %v16794_v58  ;;  %v16785_v58 = vld [vmem:[%s16986_s26 + $0xc4] ss:$200 sps:$4 sm:$0xff]  }
 0x594   : > { %12326 = vperm.xlu0 %14310, %v12322_v59   ;;  %v16693_v59 = vld [vmem:[%s21754_s1 + $0x3020] ss:$16 sps:$4 sm:$0xff]  }
 0x595   : > { %11125 = vmatpush1.bf16.msra.mxu0 %v16507_v60  ;;  %12200 = vmatpush1.bf16.msra.mxu1 %v16510_v61  ;;  %v16600_v60 = vld [vmem:[%s21754_s1 + $0x2e40] ss:$16 sps:$4 sm:$0xff]   ;;  %v16603_v61 = vld [vmem:[%s21754_s1 + $0x2e48] ss:$16 sps:$4 sm:$0xff]  }
 0x596   : > { %11126 = vmatprep.subr.bf16.mxu0 %v16515_v62  ;;  %12201 = vmatprep.subr.bf16.mxu1 %v16518_v63  ;;  %v16608_v62 = vld [vmem:[%s21754_s1 + $0x2e64] ss:$16 sps:$4 sm:$0xff]   ;;  %v16611_v63 = vld [vmem:[%s21754_s1 + $0x2e6c] ss:$16 sps:$4 sm:$0xff]  }
 0x599   : > { %11127 = vmatpush1.bf16.msra.mxu0 %v16513_v0  ;;  %12202 = vmatpush1.bf16.msra.mxu1 %v16516_v1  ;;  %v12323_v0 = vld [vmem:[%s21756_s3 + $0x8] sm:$0xff]  ;;  %v16606_v1 = vld [vmem:[%s21754_s1 + $0x2e60] ss:$16 sps:$4 sm:$0xff]  }
 0x59a   : > { %11128 = vmatprep.subr.bf16.mxu0 %v16521_v2  ;;  %12203 = vmatprep.subr.bf16.mxu1 %v16524_v3  ;;  %v16609_v2 = vld [vmem:[%s21754_s1 + $0x2e68] ss:$16 sps:$4 sm:$0xff]   ;;  %v16614_v3 = vld [vmem:[%s21754_s1 + $0x2e84] ss:$16 sps:$4 sm:$0xff]  }
 0x59b   : > { %12331 = vperm.xlu0 %14310, %v12323_v0   ;;  %v16702_v0 = vld [vmem:[%s21754_s1 + $0x3048] ss:$16 sps:$4 sm:$0xff]  }
 0x59d   : > { %11129 = vmatpush1.bf16.msra.mxu0 %v16519_v4  ;;  %12204 = vmatpush1.bf16.msra.mxu1 %v16522_v5  ;;  %v16617_v4 = vld [vmem:[%s21754_s1 + $0x2e8c] ss:$16 sps:$4 sm:$0xff]   ;;  %v16612_v5 = vld [vmem:[%s21754_s1 + $0x2e80] ss:$16 sps:$4 sm:$0xff]  }
 0x59e   : > { %11130 = vmatprep.subr.bf16.mxu0 %v16527_v6  ;;  %12205 = vmatprep.subr.bf16.mxu1 %v16530_v7  ;;  %v16615_v6 = vld [vmem:[%s21754_s1 + $0x2e88] ss:$16 sps:$4 sm:$0xff]   ;;  %v16620_v7 = vld [vmem:[%s21754_s1 + $0x2ea4] ss:$16 sps:$4 sm:$0xff]  }
 0x5a1   : > { %11131 = vmatpush1.bf16.msra.mxu0 %v16525_v8  ;;  %12206 = vmatpush1.bf16.msra.mxu1 %v16528_v9  ;;  %v16623_v8 = vld [vmem:[%s21754_s1 + $0x2eac] ss:$16 sps:$4 sm:$0xff]   ;;  %v16618_v9 = vld [vmem:[%s21754_s1 + $0x2ea0] ss:$16 sps:$4 sm:$0xff]  }
 0x5a2   : > { %11132 = vmatprep.subr.bf16.mxu0 %v16533_v10  ;;  %12207 = vmatprep.subr.bf16.mxu1 %v16536_v11  ;;  %v16621_v10 = vld [vmem:[%s21754_s1 + $0x2ea8] ss:$16 sps:$4 sm:$0xff]   ;;  %v16626_v11 = vld [vmem:[%s21754_s1 + $0x2ec4] ss:$16 sps:$4 sm:$0xff]  }
 0x5a5   : > { %11133 = vmatpush1.bf16.msra.mxu0 %v16531_v12  ;;  %12208 = vmatpush1.bf16.msra.mxu1 %v16534_v13  ;;  %v16629_v12 = vld [vmem:[%s21754_s1 + $0x2ecc] ss:$16 sps:$4 sm:$0xff]   ;;  %v16624_v13 = vld [vmem:[%s21754_s1 + $0x2ec0] ss:$16 sps:$4 sm:$0xff]  }
 0x5a6   : > { %11134 = vmatprep.subr.bf16.mxu0 %v16539_v14  ;;  %12209 = vmatprep.subr.bf16.mxu1 %v16542_v15  ;;  %v16627_v14 = vld [vmem:[%s21754_s1 + $0x2ec8] ss:$16 sps:$4 sm:$0xff]   ;;  %v16632_v15 = vld [vmem:[%s21754_s1 + $0x2ee4] ss:$16 sps:$4 sm:$0xff]  }
 0x5a9   : > { %11135 = vmatpush1.bf16.msra.mxu0 %v16537_v16  ;;  %12210 = vmatpush1.bf16.msra.mxu1 %v16540_v17  ;;  %v16635_v16 = vld [vmem:[%s21754_s1 + $0x2eec] ss:$16 sps:$4 sm:$0xff]   ;;  %v16630_v17 = vld [vmem:[%s21754_s1 + $0x2ee0] ss:$16 sps:$4 sm:$0xff]  }
 0x5aa   : > { %11136 = vmatprep.subr.bf16.mxu0 %v16545_v18  ;;  %12211 = vmatprep.subr.bf16.mxu1 %v16548_v19  ;;  %v16633_v18 = vld [vmem:[%s21754_s1 + $0x2ee8] ss:$16 sps:$4 sm:$0xff]   ;;  %v16638_v19 = vld [vmem:[%s21754_s1 + $0x2f04] ss:$16 sps:$4 sm:$0xff]  }
 0x5ad   : > { %11137 = vmatpush1.bf16.msra.mxu0 %v16543_v20  ;;  %12212 = vmatpush1.bf16.msra.mxu1 %v16546_v21  ;;  %v16641_v20 = vld [vmem:[%s21754_s1 + $0x2f0c] ss:$16 sps:$4 sm:$0xff]   ;;  %v16636_v21 = vld [vmem:[%s21754_s1 + $0x2f00] ss:$16 sps:$4 sm:$0xff]  }
 0x5ae   : > { %11138 = vmatprep.subr.bf16.mxu0 %v16551_v22  ;;  %12213 = vmatprep.subr.bf16.mxu1 %v16554_v23  ;;  %v16639_v22 = vld [vmem:[%s21754_s1 + $0x2f08] ss:$16 sps:$4 sm:$0xff]   ;;  %v16644_v23 = vld [vmem:[%s21754_s1 + $0x2f24] ss:$16 sps:$4 sm:$0xff]  }
 0x5b1   : > { %11139 = vmatpush1.bf16.msra.mxu0 %v16549_v24  ;;  %12214 = vmatpush1.bf16.msra.mxu1 %v16552_v25  ;;  %v16647_v24 = vld [vmem:[%s21754_s1 + $0x2f2c] ss:$16 sps:$4 sm:$0xff]   ;;  %v16642_v25 = vld [vmem:[%s21754_s1 + $0x2f20] ss:$16 sps:$4 sm:$0xff]  }
 0x5b2   : > { %11140 = vmatprep.subr.bf16.mxu0 %v16557_v26  ;;  %12215 = vmatprep.subr.bf16.mxu1 %v16560_v27  ;;  %v16645_v26 = vld [vmem:[%s21754_s1 + $0x2f28] ss:$16 sps:$4 sm:$0xff]   ;;  %v16650_v27 = vld [vmem:[%s21754_s1 + $0x2f44] ss:$16 sps:$4 sm:$0xff]  }
 0x5b5   : > { %11141 = vmatpush1.bf16.msra.mxu0 %v16555_v28  ;;  %12216 = vmatpush1.bf16.msra.mxu1 %v16558_v29  ;;  %v16653_v28 = vld [vmem:[%s21754_s1 + $0x2f4c] ss:$16 sps:$4 sm:$0xff]   ;;  %v16648_v29 = vld [vmem:[%s21754_s1 + $0x2f40] ss:$16 sps:$4 sm:$0xff]  }
 0x5b6   : > { %11142 = vmatprep.subr.bf16.mxu0 %v16563_v30  ;;  %12217 = vmatprep.subr.bf16.mxu1 %v16566_v31  ;;  %v16651_v30 = vld [vmem:[%s21754_s1 + $0x2f48] ss:$16 sps:$4 sm:$0xff]   ;;  %v16656_v31 = vld [vmem:[%s21754_s1 + $0x2f64] ss:$16 sps:$4 sm:$0xff]  }
 0x5b9   : > { %11143 = vmatpush1.bf16.msra.mxu0 %v16561_v32  ;;  %12218 = vmatpush1.bf16.msra.mxu1 %v16564_v33  ;;  %v16659_v32 = vld [vmem:[%s21754_s1 + $0x2f6c] ss:$16 sps:$4 sm:$0xff]   ;;  %v16654_v33 = vld [vmem:[%s21754_s1 + $0x2f60] ss:$16 sps:$4 sm:$0xff]  }
 0x5ba   : > { %11144 = vmatprep.subr.bf16.mxu0 %v16569_v34  ;;  %12219 = vmatprep.subr.bf16.mxu1 %v16572_v35  ;;  %v16657_v34 = vld [vmem:[%s21754_s1 + $0x2f68] ss:$16 sps:$4 sm:$0xff]   ;;  %v16662_v35 = vld [vmem:[%s21754_s1 + $0x2f84] ss:$16 sps:$4 sm:$0xff]  }
 0x5bd   : > { %11145 = vmatpush1.bf16.msra.mxu0 %v16567_v36  ;;  %12220 = vmatpush1.bf16.msra.mxu1 %v16570_v37  ;;  %v16665_v36 = vld [vmem:[%s21754_s1 + $0x2f8c] ss:$16 sps:$4 sm:$0xff]   ;;  %v16660_v37 = vld [vmem:[%s21754_s1 + $0x2f80] ss:$16 sps:$4 sm:$0xff]  }
 0x5be   : > { %11146 = vmatprep.subr.bf16.mxu0 %v16575_v38  ;;  %12221 = vmatprep.subr.bf16.mxu1 %v16578_v39  ;;  %v16663_v38 = vld [vmem:[%s21754_s1 + $0x2f88] ss:$16 sps:$4 sm:$0xff]   ;;  %v16668_v39 = vld [vmem:[%s21754_s1 + $0x2fa4] ss:$16 sps:$4 sm:$0xff]  }
 0x5c1   : > { %11147 = vmatpush1.bf16.msra.mxu0 %v16573_v40  ;;  %12222 = vmatpush1.bf16.msra.mxu1 %v16576_v41  ;;  %v16671_v40 = vld [vmem:[%s21754_s1 + $0x2fac] ss:$16 sps:$4 sm:$0xff]   ;;  %v16666_v41 = vld [vmem:[%s21754_s1 + $0x2fa0] ss:$16 sps:$4 sm:$0xff]  }
 0x5c2   : > { %11148 = vmatprep.subr.bf16.mxu0 %v16581_v42  ;;  %12223 = vmatprep.subr.bf16.mxu1 %v16584_v43  ;;  %v16669_v42 = vld [vmem:[%s21754_s1 + $0x2fa8] ss:$16 sps:$4 sm:$0xff]   ;;  %v16674_v43 = vld [vmem:[%s21754_s1 + $0x2fc4] ss:$16 sps:$4 sm:$0xff]  }
 0x5c5   : > { %11149 = vmatpush1.bf16.msra.mxu0 %v16579_v44  ;;  %12224 = vmatpush1.bf16.msra.mxu1 %v16582_v45  ;;  %v16677_v44 = vld [vmem:[%s21754_s1 + $0x2fcc] ss:$16 sps:$4 sm:$0xff]   ;;  %v16672_v45 = vld [vmem:[%s21754_s1 + $0x2fc0] ss:$16 sps:$4 sm:$0xff]  }
 0x5c6   : > { %11161 = vmatprep.subr.bf16.mxu0 %v16590_v46  ;;  %12236 = vmatprep.subr.bf16.mxu1 %v16593_v47  ;;  %v16675_v46 = vld [vmem:[%s21754_s1 + $0x2fc8] ss:$16 sps:$4 sm:$0xff]   ;;  %v16680_v47 = vld [vmem:[%s21754_s1 + $0x2fe4] ss:$16 sps:$4 sm:$0xff]  }
 0x5c8   : > { %11151 = vmatmul.mubr.bf16.vlgmr.msra.gmra.mrb[0].mxu0 %v16585_v48  ;;  %12226 = vmatmul.mubr.bf16.vlgmr.msra.gmra.mrb[0].mxu1 %v16585_v48  ;;  %v16683_v48 = vld [vmem:[%s21754_s1 + $0x2fec] ss:$16 sps:$4 sm:$0xff]  }
 0x5c9   : > { %11162 = vmatpush1.bf16.msra.mxu0 %v16588_v49  ;;  %12237 = vmatpush1.bf16.msra.mxu1 %v16591_v50  ;;  %v16678_v49 = vld [vmem:[%s21754_s1 + $0x2fe0] ss:$16 sps:$4 sm:$0xff]   ;;  %v16681_v50 = vld [vmem:[%s21754_s1 + $0x2fe8] ss:$16 sps:$4 sm:$0xff]  }
 0x5ca   : > { %11163 = vmatprep.subr.bf16.mxu0 %v16596_v51  ;;  %12238 = vmatprep.subr.bf16.mxu1 %v16599_v52  ;;  %v16689_v51 = vld [vmem:[%s21754_s1 + $0x3004] ss:$16 sps:$4 sm:$0xff]   ;;  %v16692_v52 = vld [vmem:[%s21754_s1 + $0x300c] ss:$16 sps:$4 sm:$0xff]  }
 0x5cb   : > { %11193 = vmatprep.mubr.bf16.mxu0 %v16686_v53  ;;  %12268 = vmatprep.mubr.bf16.mxu1 %v16686_v53  ;;  %v16684_v53 = vld [vmem:[%s16986_s26 + $0xb8] ss:$200 sps:$4 sm:$0xff]  }
 0x5cd   : > { %11164 = vmatpush1.bf16.msra.mxu0 %v16594_v54  ;;  %12239 = vmatpush1.bf16.msra.mxu1 %v16597_v55  ;;  %v16687_v54 = vld [vmem:[%s21754_s1 + $0x3000] ss:$16 sps:$4 sm:$0xff]   ;;  %v16690_v55 = vld [vmem:[%s21754_s1 + $0x3008] ss:$16 sps:$4 sm:$0xff]  }
 0x5ce   : > { %11165 = vmatprep.subr.bf16.mxu0 %v16602_v56  ;;  %12240 = vmatprep.subr.bf16.mxu1 %v16605_v57  ;;  %v16695_v56 = vld [vmem:[%s21754_s1 + $0x3024] ss:$16 sps:$4 sm:$0xff]   ;;  %v16698_v57 = vld [vmem:[%s21754_s1 + $0x302c] ss:$16 sps:$4 sm:$0xff]  }
 0x5d1   : > { %11166 = vmatpush1.bf16.msra.mxu0 %v16600_v60  ;;  %12241 = vmatpush1.bf16.msra.mxu1 %v16603_v61  ;;  %v16696_v60 = vld [vmem:[%s21754_s1 + $0x3028] ss:$16 sps:$4 sm:$0xff]   ;;  %v16701_v61 = vld [vmem:[%s21754_s1 + $0x3044] ss:$16 sps:$4 sm:$0xff]  }
 0x5d2   : > { %11167 = vmatprep.subr.bf16.mxu0 %v16608_v62  ;;  %12242 = vmatprep.subr.bf16.mxu1 %v16611_v63  ;;  %v16704_v62 = vld [vmem:[%s21754_s1 + $0x304c] ss:$16 sps:$4 sm:$0xff]   ;;  %v16699_v63 = vld [vmem:[%s21754_s1 + $0x3040] ss:$16 sps:$4 sm:$0xff]  }
 0x5d5   : > { %11168 = vmatpush1.bf16.msra.mxu0 %v16606_v1  ;;  %12243 = vmatpush1.bf16.msra.mxu1 %v16609_v2  ;;  %v16707_v1 = vld [vmem:[%s21754_s1 + $0x3064] ss:$16 sps:$4 sm:$0xff]   ;;  %v16710_v2 = vld [vmem:[%s21754_s1 + $0x306c] ss:$16 sps:$4 sm:$0xff]  }
 0x5d6   : > { %11169 = vmatprep.subr.bf16.mxu0 %v16614_v3  ;;  %12244 = vmatprep.subr.bf16.mxu1 %v16617_v4  ;;  %v16705_v3 = vld [vmem:[%s21754_s1 + $0x3060] ss:$16 sps:$4 sm:$0xff]   ;;  %v16708_v4 = vld [vmem:[%s21754_s1 + $0x3068] ss:$16 sps:$4 sm:$0xff]  }
 0x5d9   : > { %11170 = vmatpush1.bf16.msra.mxu0 %v16612_v5  ;;  %12245 = vmatpush1.bf16.msra.mxu1 %v16615_v6  ;;  %v16713_v5 = vld [vmem:[%s21754_s1 + $0x3084] ss:$16 sps:$4 sm:$0xff]   ;;  %v16716_v6 = vld [vmem:[%s21754_s1 + $0x308c] ss:$16 sps:$4 sm:$0xff]  }
 0x5da   : > { %11171 = vmatprep.subr.bf16.mxu0 %v16620_v7  ;;  %12246 = vmatprep.subr.bf16.mxu1 %v16623_v8  ;;  %v16711_v7 = vld [vmem:[%s21754_s1 + $0x3080] ss:$16 sps:$4 sm:$0xff]   ;;  %v16714_v8 = vld [vmem:[%s21754_s1 + $0x3088] ss:$16 sps:$4 sm:$0xff]  }
 0x5dd   : > { %11172 = vmatpush1.bf16.msra.mxu0 %v16618_v9  ;;  %12247 = vmatpush1.bf16.msra.mxu1 %v16621_v10  ;;  %v16719_v9 = vld [vmem:[%s21754_s1 + $0x30a4] ss:$16 sps:$4 sm:$0xff]   ;;  %v16722_v10 = vld [vmem:[%s21754_s1 + $0x30ac] ss:$16 sps:$4 sm:$0xff]  }
 0x5de   : > { %11173 = vmatprep.subr.bf16.mxu0 %v16626_v11  ;;  %12248 = vmatprep.subr.bf16.mxu1 %v16629_v12  ;;  %v16717_v11 = vld [vmem:[%s21754_s1 + $0x30a0] ss:$16 sps:$4 sm:$0xff]   ;;  %v16720_v12 = vld [vmem:[%s21754_s1 + $0x30a8] ss:$16 sps:$4 sm:$0xff]  }
 0x5e1   : > { %11174 = vmatpush1.bf16.msra.mxu0 %v16624_v13  ;;  %12249 = vmatpush1.bf16.msra.mxu1 %v16627_v14  ;;  %v16725_v13 = vld [vmem:[%s21754_s1 + $0x30c4] ss:$16 sps:$4 sm:$0xff]   ;;  %v16728_v14 = vld [vmem:[%s21754_s1 + $0x30cc] ss:$16 sps:$4 sm:$0xff]  }
 0x5e2   : > { %11175 = vmatprep.subr.bf16.mxu0 %v16632_v15  ;;  %12250 = vmatprep.subr.bf16.mxu1 %v16635_v16  ;;  %v16723_v15 = vld [vmem:[%s21754_s1 + $0x30c0] ss:$16 sps:$4 sm:$0xff]   ;;  %v16726_v16 = vld [vmem:[%s21754_s1 + $0x30c8] ss:$16 sps:$4 sm:$0xff]  }
 0x5e5   : > { %11176 = vmatpush1.bf16.msra.mxu0 %v16630_v17  ;;  %12251 = vmatpush1.bf16.msra.mxu1 %v16633_v18  ;;  %v16731_v17 = vld [vmem:[%s21754_s1 + $0x30e4] ss:$16 sps:$4 sm:$0xff]   ;;  %v16734_v18 = vld [vmem:[%s21754_s1 + $0x30ec] ss:$16 sps:$4 sm:$0xff]  }
 0x5e6   : > { %11177 = vmatprep.subr.bf16.mxu0 %v16638_v19  ;;  %12252 = vmatprep.subr.bf16.mxu1 %v16641_v20  ;;  %v16729_v19 = vld [vmem:[%s21754_s1 + $0x30e0] ss:$16 sps:$4 sm:$0xff]   ;;  %v16732_v20 = vld [vmem:[%s21754_s1 + $0x30e8] ss:$16 sps:$4 sm:$0xff]  }
 0x5e9   : > { %11178 = vmatpush1.bf16.msra.mxu0 %v16636_v21  ;;  %12253 = vmatpush1.bf16.msra.mxu1 %v16639_v22  ;;  %v16737_v21 = vld [vmem:[%s21754_s1 + $0x3104] ss:$16 sps:$4 sm:$0xff]   ;;  %v16740_v22 = vld [vmem:[%s21754_s1 + $0x310c] ss:$16 sps:$4 sm:$0xff]  }
 0x5ea   : > { %11179 = vmatprep.subr.bf16.mxu0 %v16644_v23  ;;  %12254 = vmatprep.subr.bf16.mxu1 %v16647_v24  ;;  %v16735_v23 = vld [vmem:[%s21754_s1 + $0x3100] ss:$16 sps:$4 sm:$0xff]   ;;  %v16738_v24 = vld [vmem:[%s21754_s1 + $0x3108] ss:$16 sps:$4 sm:$0xff]  }
 0x5ed   : > { %11180 = vmatpush1.bf16.msra.mxu0 %v16642_v25  ;;  %12255 = vmatpush1.bf16.msra.mxu1 %v16645_v26  ;;  %v16743_v25 = vld [vmem:[%s21754_s1 + $0x3124] ss:$16 sps:$4 sm:$0xff]   ;;  %v16746_v26 = vld [vmem:[%s21754_s1 + $0x312c] ss:$16 sps:$4 sm:$0xff]  }
 0x5ee   : > { %11181 = vmatprep.subr.bf16.mxu0 %v16650_v27  ;;  %12256 = vmatprep.subr.bf16.mxu1 %v16653_v28  ;;  %v16741_v27 = vld [vmem:[%s21754_s1 + $0x3120] ss:$16 sps:$4 sm:$0xff]   ;;  %v16744_v28 = vld [vmem:[%s21754_s1 + $0x3128] ss:$16 sps:$4 sm:$0xff]  }
 0x5f1   : > { %11182 = vmatpush1.bf16.msra.mxu0 %v16648_v29  ;;  %12257 = vmatpush1.bf16.msra.mxu1 %v16651_v30  ;;  %v16749_v29 = vld [vmem:[%s21754_s1 + $0x3144] ss:$16 sps:$4 sm:$0xff]   ;;  %v16752_v30 = vld [vmem:[%s21754_s1 + $0x314c] ss:$16 sps:$4 sm:$0xff]  }
 0x5f2   : > { %11183 = vmatprep.subr.bf16.mxu0 %v16656_v31  ;;  %12258 = vmatprep.subr.bf16.mxu1 %v16659_v32  ;;  %v16747_v31 = vld [vmem:[%s21754_s1 + $0x3140] ss:$16 sps:$4 sm:$0xff]   ;;  %v16750_v32 = vld [vmem:[%s21754_s1 + $0x3148] ss:$16 sps:$4 sm:$0xff]  }
 0x5f5   : > { %11184 = vmatpush1.bf16.msra.mxu0 %v16654_v33  ;;  %12259 = vmatpush1.bf16.msra.mxu1 %v16657_v34  ;;  %v16755_v33 = vld [vmem:[%s21754_s1 + $0x3164] ss:$16 sps:$4 sm:$0xff]   ;;  %v16758_v34 = vld [vmem:[%s21754_s1 + $0x316c] ss:$16 sps:$4 sm:$0xff]  }
 0x5f6   : > { %11185 = vmatprep.subr.bf16.mxu0 %v16662_v35  ;;  %12260 = vmatprep.subr.bf16.mxu1 %v16665_v36  ;;  %v16753_v35 = vld [vmem:[%s21754_s1 + $0x3160] ss:$16 sps:$4 sm:$0xff]   ;;  %v16756_v36 = vld [vmem:[%s21754_s1 + $0x3168] ss:$16 sps:$4 sm:$0xff]  }
 0x5f9   : > { %11186 = vmatpush1.bf16.msra.mxu0 %v16660_v37  ;;  %12261 = vmatpush1.bf16.msra.mxu1 %v16663_v38  ;;  %v16761_v37 = vld [vmem:[%s21754_s1 + $0x3184] ss:$16 sps:$4 sm:$0xff]   ;;  %v16764_v38 = vld [vmem:[%s21754_s1 + $0x318c] ss:$16 sps:$4 sm:$0xff]  }
 0x5fa   : > { %11187 = vmatprep.subr.bf16.mxu0 %v16668_v39  ;;  %12262 = vmatprep.subr.bf16.mxu1 %v16671_v40  ;;  %v16759_v39 = vld [vmem:[%s21754_s1 + $0x3180] ss:$16 sps:$4 sm:$0xff]   ;;  %v16762_v40 = vld [vmem:[%s21754_s1 + $0x3188] ss:$16 sps:$4 sm:$0xff]  }
 0x5fd   : > { %11188 = vmatpush1.bf16.msra.mxu0 %v16666_v41  ;;  %12263 = vmatpush1.bf16.msra.mxu1 %v16669_v42  ;;  %v16767_v41 = vld [vmem:[%s21754_s1 + $0x31a4] ss:$16 sps:$4 sm:$0xff]   ;;  %v16770_v42 = vld [vmem:[%s21754_s1 + $0x31ac] ss:$16 sps:$4 sm:$0xff]  }
 0x5fe   : > { %11189 = vmatprep.subr.bf16.mxu0 %v16674_v43  ;;  %12264 = vmatprep.subr.bf16.mxu1 %v16677_v44  ;;  %v16765_v43 = vld [vmem:[%s21754_s1 + $0x31a0] ss:$16 sps:$4 sm:$0xff]   ;;  %v16768_v44 = vld [vmem:[%s21754_s1 + $0x31a8] ss:$16 sps:$4 sm:$0xff]  }
 0x601   : > { %11190 = vmatpush1.bf16.msra.mxu0 %v16672_v45  ;;  %12265 = vmatpush1.bf16.msra.mxu1 %v16675_v46  ;;  %v16773_v45 = vld [vmem:[%s21754_s1 + $0x31c4] ss:$16 sps:$4 sm:$0xff]   ;;  %v16776_v46 = vld [vmem:[%s21754_s1 + $0x31cc] ss:$16 sps:$4 sm:$0xff]  }
 0x602   : > { %11191 = vmatprep.subr.bf16.mxu0 %v16680_v47  ;;  %12266 = vmatprep.subr.bf16.mxu1 %v16683_v48  ;;  %v16771_v47 = vld [vmem:[%s21754_s1 + $0x31c0] ss:$16 sps:$4 sm:$0xff]   ;;  %v16774_v48 = vld [vmem:[%s21754_s1 + $0x31c8] ss:$16 sps:$4 sm:$0xff]  }
 0x605   : > { %11192 = vmatpush1.bf16.msra.mxu0 %v16678_v49  ;;  %12267 = vmatpush1.bf16.msra.mxu1 %v16681_v50  ;;  %v16779_v49 = vld [vmem:[%s21754_s1 + $0x31e4] ss:$16 sps:$4 sm:$0xff]   ;;  %v16782_v50 = vld [vmem:[%s21754_s1 + $0x31ec] ss:$16 sps:$4 sm:$0xff]  }
 0x606   : > { %11204 = vmatprep.subr.bf16.mxu0 %v16689_v51  ;;  %12279 = vmatprep.subr.bf16.mxu1 %v16692_v52  ;;  %v16777_v51 = vld [vmem:[%s21754_s1 + $0x31e0] ss:$16 sps:$4 sm:$0xff]   ;;  %v16780_v52 = vld [vmem:[%s21754_s1 + $0x31e8] ss:$16 sps:$4 sm:$0xff]  }
 0x608   : > { %11194 = vmatmul.mubr.bf16.vlgmr.msra.gmra.mrb[0].mxu0 %v16684_v53  ;;  %12269 = vmatmul.mubr.bf16.vlgmr.msra.gmra.mrb[0].mxu1 %v16684_v53  ;;  %v16783_v53 = vld [vmem:[%s16986_s26 + $0xc0] ss:$200 sps:$4 sm:$0xff]  }
 0x609   : > { %11205 = vmatpush1.bf16.msra.mxu0 %v16687_v54  ;;  %12280 = vmatpush1.bf16.msra.mxu1 %v16690_v55  ;;  %v1902_v54 = vlaneseq }
 0x60a   : > { %11206 = vmatprep.subr.bf16.mxu0 %v16695_v56  ;;  %12281 = vmatprep.subr.bf16.mxu1 %v16698_v57 }
 0x60b   : > { %11236 = vmatprep.mubr.bf16.mxu0 %v16785_v58  ;;  %12311 = vmatprep.mubr.bf16.mxu1 %v16785_v58  ;;  %v21709_v55 = vshrl.u32 %v1902_v54, 7 }
 0x60d   : > { %11207 = vmatpush1.bf16.msra.mxu0 %v16693_v59  ;;  %12282 = vmatpush1.bf16.msra.mxu1 %v16696_v60  ;;  %v1904_v57 = vsub.s32 0, %v21709_v55  ;;  %v1912_v58 = vsub.s32 2, %v21709_v55  ;;  %v1900_v59 = vld [vmem:[%s21755_s2] sm:$0xf]  ;;  %v1908_v60 = vsub.s32 1, %v21709_v55 }
 0x60e   : > { %11208 = vmatprep.subr.bf16.mxu0 %v16701_v61  ;;  %12283 = vmatprep.subr.bf16.mxu1 %v16704_v62  ;;  %v1916_v61 = vsub.s32 3, %v21709_v55 }
 0x60f   : > { %v1905_v62 = vrot.slane %v1900_v59, %v1904_v57 }
 0x611   : > { %11209 = vmatpush1.bf16.msra.mxu0 %v16699_v63  ;;  %12284 = vmatpush1.bf16.msra.mxu1 %v16702_v0  ;;  %v1913_v63 = vrot.slane %v1900_v59, %v1912_v58  ;;  %v1909_v0 = vrot.slane %v1900_v59, %v1908_v60 }
 0x612   : > { %11210 = vmatprep.subr.bf16.mxu0 %v16707_v1  ;;  %12285 = vmatprep.subr.bf16.mxu1 %v16710_v2  ;;  %v1917_v1 = vrot.slane %v1900_v59, %v1916_v61 }
 0x613   : > { %v12327_v56 = vpop.permute.xlu0 %12326 }
 0x615   : > { %11211 = vmatpush1.bf16.msra.mxu0 %v16705_v3  ;;  %12286 = vmatpush1.bf16.msra.mxu1 %v16708_v4 }
 0x616   : > { %11212 = vmatprep.subr.bf16.mxu0 %v16713_v5  ;;  %12287 = vmatprep.subr.bf16.mxu1 %v16716_v6 }
 0x619   : > { %11213 = vmatpush1.bf16.msra.mxu0 %v16711_v7  ;;  %12288 = vmatpush1.bf16.msra.mxu1 %v16714_v8 }
 0x61a   : > { %11214 = vmatprep.subr.bf16.mxu0 %v16719_v9  ;;  %12289 = vmatprep.subr.bf16.mxu1 %v16722_v10  ;;  %v12332_v2 = vpop.permute.xlu0 %12331 }
 0x61d   : > { %11215 = vmatpush1.bf16.msra.mxu0 %v16717_v11  ;;  %12290 = vmatpush1.bf16.msra.mxu1 %v16720_v12 }
 0x61e   : > { %11216 = vmatprep.subr.bf16.mxu0 %v16725_v13  ;;  %12291 = vmatprep.subr.bf16.mxu1 %v16728_v14 }
 0x621   : > { %11217 = vmatpush1.bf16.msra.mxu0 %v16723_v15  ;;  %12292 = vmatpush1.bf16.msra.mxu1 %v16726_v16 }
 0x622   : > { %11218 = vmatprep.subr.bf16.mxu0 %v16731_v17  ;;  %12293 = vmatprep.subr.bf16.mxu1 %v16734_v18 }
 0x625   : > { %11219 = vmatpush1.bf16.msra.mxu0 %v16729_v19  ;;  %12294 = vmatpush1.bf16.msra.mxu1 %v16732_v20  ;;  %v12350_v19 = vld [vmem:[%s21757_s4] sm:$0xff] }
 0x626   : > { %11220 = vmatprep.subr.bf16.mxu0 %v16737_v21  ;;  %12295 = vmatprep.subr.bf16.mxu1 %v16740_v22 }
 0x629   : > { %11221 = vmatpush1.bf16.msra.mxu0 %v16735_v23  ;;  %12296 = vmatpush1.bf16.msra.mxu1 %v16738_v24 }
 0x62a   : > { %11222 = vmatprep.subr.bf16.mxu0 %v16743_v25  ;;  %12297 = vmatprep.subr.bf16.mxu1 %v16746_v26  ;;  %v12351_v25 = vld [vmem:[%s21757_s4 + $0x8] sm:$0xff] }
 0x62d   : > { %11223 = vmatpush1.bf16.msra.mxu0 %v16741_v27  ;;  %12298 = vmatpush1.bf16.msra.mxu1 %v16744_v28 }
 0x62e   : > { %11224 = vmatprep.subr.bf16.mxu0 %v16749_v29  ;;  %12299 = vmatprep.subr.bf16.mxu1 %v16752_v30 }
 0x631   : > { %11225 = vmatpush1.bf16.msra.mxu0 %v16747_v31  ;;  %12300 = vmatpush1.bf16.msra.mxu1 %v16750_v32  ;;  %v12354_v32 = vld [vmem:[%s21757_s4 + $0x20] sm:$0xff] }
 0x632   : > { %11226 = vmatprep.subr.bf16.mxu0 %v16755_v33  ;;  %12301 = vmatprep.subr.bf16.mxu1 %v16758_v34 }
 0x635   : > { %11227 = vmatpush1.bf16.msra.mxu0 %v16753_v35  ;;  %12302 = vmatpush1.bf16.msra.mxu1 %v16756_v36  ;;  %v12355_v35 = vld [vmem:[%s21757_s4 + $0x28] sm:$0xff]  ;;  %v12352_v36 = vld [vmem:[%s21757_s4 + $0x10] sm:$0xff] }
 0x636   : > { %11228 = vmatprep.subr.bf16.mxu0 %v16761_v37  ;;  %12303 = vmatprep.subr.bf16.mxu1 %v16764_v38 }
 0x639   : > { %11229 = vmatpush1.bf16.msra.mxu0 %v16759_v39  ;;  %12304 = vmatpush1.bf16.msra.mxu1 %v16762_v40 }
 0x63a   : > { %11230 = vmatprep.subr.bf16.mxu0 %v16767_v41  ;;  %12305 = vmatprep.subr.bf16.mxu1 %v16770_v42  ;;  %v12353_v41 = vld [vmem:[%s21757_s4 + $0x18] sm:$0xff]  ;;  %v12356_v42 = vld [vmem:[%s21757_s4 + $0x30] sm:$0xff] }
 0x63d   : > { %11231 = vmatpush1.bf16.msra.mxu0 %v16765_v43  ;;  %12306 = vmatpush1.bf16.msra.mxu1 %v16768_v44 }
 0x63e   : > { %11232 = vmatprep.subr.bf16.mxu0 %v16773_v45  ;;  %12307 = vmatprep.subr.bf16.mxu1 %v16776_v46 }
 0x641   : > { %11233 = vmatpush1.bf16.msra.mxu0 %v16771_v47  ;;  %12308 = vmatpush1.bf16.msra.mxu1 %v16774_v48  ;;  %v12357_v48 = vld [vmem:[%s21757_s4 + $0x38] sm:$0xff] }
 0x642   : > { %11234 = vmatprep.subr.bf16.mxu0 %v16779_v49  ;;  %12309 = vmatprep.subr.bf16.mxu1 %v16782_v50 }
 0x645   : > { %11235 = vmatpush1.bf16.msra.mxu0 %v16777_v51  ;;  %12310 = vmatpush1.bf16.msra.mxu1 %v16780_v52 }
 0x648   : > { %11237 = vmatmul.mubr.bf16.vlgmr.msra.gmra.mrb[0].mxu0 %v16783_v53  ;;  %12312 = vmatmul.mubr.bf16.vlgmr.msra.gmra.mrb[0].mxu1 %v16783_v53 }
 0x71b   : > { %v11238_v3 = vpop.f32.mrb[0].mxu0  ;;  %v12313_v4 = vpop.f32.mrb[0].mxu1 }
 0x71c   : > { %v14100_v5 = vadd.f32 %v11238_v3, %v1905_v62  ;;  %v14104_v6 = vadd.f32 %v12313_v4, %v1913_v63  ;;  %v11240_v7 = vpop.f32.mrb[1].mxu0  ;;  %v12315_v8 = vpop.f32.mrb[1].mxu1  ;;  %v12383_v3 = vld [vmem:[#allocation2] sm:$0x1] }
 0x71d   : > { %v14101_v9 = vadd.f32 %v11240_v7, %v1909_v0  ;;  %v14105_v10 = vadd.f32 %v12315_v8, %v1917_v1  ;;  %v11242_v11 = vpop.f32.mrb[2].mxu0  ;;  %v12317_v12 = vpop.f32.mrb[2].mxu1 }
 0x71e   : > { %v12334_v13 = vmul.f32 %v14100_v5, %v12327_v56  ;;  %v12336_v14 = vmul.f32 %v14104_v6, %v12327_v56  ;;  %v14102_v15 = vadd.f32 %v11242_v11, %v1905_v62  ;;  %v14106_v16 = vadd.f32 %v12317_v12, %v1913_v63  ;;  %v11244_v17 = vpop.f32.mrb[3].mxu0  ;;  %v12319_v18 = vpop.f32.mrb[3].mxu1 }
 0x71f   : > { %v12335_v20 = vmul.f32 %v14101_v9, %v12327_v56  ;;  %v12337_v21 = vmul.f32 %v14105_v10, %v12327_v56  ;;  %v14103_v22 = vadd.f32 %v11244_v17, %v1909_v0  ;;  %v14107_v23 = vadd.f32 %v12319_v18, %v1917_v1 }
 0x720   : > { %v12342_v24 = vmax.f32 %v12334_v13, 0.0  ;;  %v12338_v26 = vmul.f32 %v14102_v15, %v12332_v2  ;;  %v12340_v27 = vmul.f32 %v14106_v16, %v12332_v2  ;;  %v12344_v28 = vmax.f32 %v12336_v14, 0.0 }
 0x721   : > { %v12343_v29 = vmax.f32 %v12335_v20, 0.0  ;;  %v12339_v30 = vmul.f32 %v14103_v22, %v12332_v2  ;;  %v12341_v31 = vmul.f32 %v14107_v23, %v12332_v2  ;;  %v12345_v38 = vmax.f32 %v12337_v21, 0.0 }
 0x722   : > { %v12358_v33 = vmul.f32 %v12350_v19, %v12342_v24  ;;  %v12346_v34 = vmax.f32 %v12338_v26, 0.0  ;;  %v12348_v39 = vmax.f32 %v12340_v27, 0.0  ;;  %v12360_v46 = vmul.f32 %v12352_v36, %v12344_v28 }
 0x723   : > { %v12359_v37 = vmul.f32 %v12351_v25, %v12343_v29  ;;  %v12347_v40 = vmax.f32 %v12339_v30, 0.0  ;;  %v12349_v45 = vmax.f32 %v12341_v31, 0.0  ;;  %v12361_v49 = vmul.f32 %v12353_v41, %v12345_v38 }
 0x724   : > { %v12362_v43 = vmul.f32 %v12354_v32, %v12346_v34  ;;  %v12364_v51 = vmul.f32 %v12356_v42, %v12348_v39 }
 0x725   : > { %v12363_v44 = vmul.f32 %v12355_v35, %v12347_v40  ;;  %v12366_v47 = vadd.f32 %v12359_v37, %v12358_v33  ;;  %v12365_v54 = vmul.f32 %v12357_v48, %v12349_v45 }
 0x727   : > { %v12367_v50 = vadd.f32 %v12366_v47, %v12360_v46  ;;  %v12371_v52 = vadd.f32 %v12363_v44, %v12362_v43 }
 0x729   : > { %v12368_v53 = vadd.f32 %v12367_v50, %v12361_v49  ;;  %v12372_v56 = vadd.f32 %v12371_v52, %v12364_v51 }
 0x72b   : > { %12369 = vadd.xlane.f32.xlu1 %v12368_v53  ;;  %v12373_v58 = vadd.f32 %v12372_v56, %v12365_v54 }
 0x72f   : > { %12374 = vadd.xlane.f32.xlu1 %v12373_v58 }
 0x7b8   : > { %v12370_v59 = vpop.xlane.xlu1 %12369 }
 0x7bc   : > { %v12375_v60 = vpop.xlane.xlu1 %12374 }
 0x7bd   : > { %v12376_v61 = vadd.f32 %v12375_v60, %v12370_v59 }
 0x7bf   : > { %v12377_v62 = vrot.slane %v12376_v61, 4 }
 0x7c1   : > { %v12378_v63 = vadd.f32 %v12377_v62, %v12376_v61 }
 0x7c3   : > { %v12379_v0 = vrot.slane %v12378_v63, 2 }
 0x7c5   : > { %v12380_v1 = vadd.f32 %v12379_v0, %v12378_v63 }
 0x7c7   : > { %v12381_v2 = vrot.slane %v12380_v1, 1 }
 0x7c9   : > { %v12382_v4 = vadd.f32 %v12381_v2, %v12380_v1 }
 0x7cb   : > { %v12384_v5 = vadd.f32 %v12383_v3, %v12382_v4 }
 0x7cd   : > { %12387 = vperm.xlu0 %14310, %v12384_v5  }
 0x84c   : > { %v12388_v6 = vpop.permute.xlu0 %12387 }
 0x84d   : > { %v12393_v7 = vrot.slane %v12388_v6, %v1904_v57 }
 0x84f   : > { %12394 = vst [vmem:[%s249_s11] sm:$0x1] %v12393_v7 }
 0x850 PF: > { %s18_s23 = sadd.s32 1, %s16792_s23  }
 0x851   : > { %p15_p4 = scmp.ge.s32.totalorder %s18_s23, 4  }
 0x853   :  { %17 = sbr.rel (!%p15_p4) target bundleno = 3 (0x3), region = 74 }

</bundles_post_ra>
